<compile_context>
chip_gen: v6e
topology: v6e:2x2x1
jax: 0.10.0
libtpu: 0.0.40
codegen_flags: <defaults>
</compile_context>

<pallas_src>
import jax
import jax.numpy as jnp
from jax import lax
from jax.experimental import pallas as pl
from jax.experimental.pallas import tpu as pltpu

# ----------------------------- config (small, synthetic) -----------------------------
VOCAB = 256          # vocab.voc_size
EMB = 32             # config.emb_size
HID = 32             # config.decoder_hidden_size
HEADS = 4            # config.head_num
HEAD_DIM = EMB // HEADS
LAYERS = 2           # config.num_layers (BERT layers and stacked-LSTM layers)
FFN = 4 * EMB
MAX_LEN = 16         # config.max_sentence_len
NEG_INF = -1e9
W_DTYPE = jnp.bfloat16   # weight storage; MXU-native, f32 accumulation


def _bf(x):
    return x.astype(jnp.bfloat16)


def _mm(x, w):
    """bf16 x bf16 matmul, f32 accumulation."""
    return jnp.dot(_bf(x), w, preferred_element_type=jnp.float32)


def _layer_norm(y, g, b):
    mu = jnp.mean(y, axis=-1, keepdims=True)
    var = jnp.mean(jnp.square(y - mu), axis=-1, keepdims=True)
    return (y - mu) * lax.rsqrt(var + 1e-5) * g + b


def _full_spec(shape):
    zeros = (0,) * len(shape)
    return pl.BlockSpec(shape, lambda i, _z=zeros: _z)


# ----------------------------- single fused forward kernel -----------------------------
def _fused_forward_kernel(
    xs_ref, mask_ref, xt_ref,
    # BERT weights, stacked along a leading LAYERS dim
    wqkv_ref, bqkv_ref, wo_ref, bo_ref, ln1g_ref, ln1b_ref,
    w1_ref, b1_ref, w2_ref, b2_ref, ln2g_ref, ln2b_ref,
    # encoder head: proj + state_wc / state_wh
    wp_ref, bp_ref, wc_ref, bcs_ref, wh_ref, bhs_ref,
    # decoder: stacked LSTM + Luong attention + vocab projection
    wih0_ref, bih0_ref, wihr_ref, whh_ref, brest_ref,
    wat_ref, wc1_ref, wc2_ref, bca_ref, wout_ref, bout_ref,
    # output + scratch
    o_ref, attn_ref,
):
    B, S, E = xs_ref.shape
    TB = xt_ref.shape[0]                      # (T-1) * B, flat time-major
    T = TB // B
    H = wp_ref.shape[1]
    L = whh_ref.shape[0]
    scale = 1.0 / float(HEAD_DIM) ** 0.5

    mask = mask_ref[...]                      # (B, 1, S) key mask

    # --------------------- BERT encoder: both layers fused ---------------------
    x = xs_ref[...].reshape(B * S, E)         # (B*S, E) f32

    for l in range(LAYERS):
        # fused QKV projection over the whole batch: one (B*S, E) x (E, 3E) matmul
        qkv = (_mm(x, wqkv_ref[l]) + bqkv_ref[l]).reshape(B, S, 3 * E)
        q = qkv[..., 0:E]
        k = qkv[..., E:2 * E]
        v = qkv[..., 2 * E:3 * E]
        heads = []
        for h in range(HEADS):                # static unroll; batched over B per head
            sl = slice(h * HEAD_DIM, (h + 1) * HEAD_DIM)
            qh, kh, vh = q[..., sl], k[..., sl], v[..., sl]        # (B, S, Dh)
            s = jnp.einsum('bid,bjd->bij', qh, kh,
                           preferred_element_type=jnp.float32) * scale
            s = jnp.where(mask > 0.0, s, NEG_INF)
            s = s - jnp.max(s, axis=-1, keepdims=True)
            pr = jnp.exp(s)
            pr = pr / jnp.sum(pr, axis=-1, keepdims=True)          # exact softmax
            heads.append(jnp.einsum('bij,bjd->bid', pr, vh,
                                    preferred_element_type=jnp.float32))
        a = jnp.concatenate(heads, axis=-1).reshape(B * S, E)
        a = _mm(a, wo_ref[l]) + bo_ref[l]
        x = _layer_norm(x + a, ln1g_ref[l], ln1b_ref[l])
        f = jnp.maximum(_mm(x, w1_ref[l]) + b1_ref[l], 0.0)
        f = _mm(f, w2_ref[l]) + b2_ref[l]
        x = _layer_norm(x + f, ln2g_ref[l], ln2b_ref[l])

    # --------------------- encoder head: proj + build_init_state ---------------------
    ctx_f = _mm(x, wp_ref[...]) + bp_ref[...]                  # self.proj -> (B*S, H)
    ctx = ctx_f.reshape(B, S, H)                               # contexts (stays in VMEM)
    state = ctx[:, 0, :]                                       # contexts[:, 0]
    cflat = jnp.tanh(_mm(state, wc_ref[...]) + bcs_ref[...])   # state_wc -> (B, L*H)
    hflat = jnp.tanh(_mm(state, wh_ref[...]) + bhs_ref[...])   # state_wh
    hs = [hflat[:, l * H:(l + 1) * H] for l in range(L)]       # view(-1,L,H).transpose(1,0)
    cs = [cflat[:, l * H:(l + 1) * H] for l in range(L)]

    # --------------------- decoder (fully unrolled recurrence) ---------------------
    # hoist layer-0 input-path gates for ALL timesteps into one matmul (flat layout)
    xg = _mm(xt_ref[...], wih0_ref[...]) + bih0_ref[...]       # (T*B, 4H)
    # hoist the Luong 'general' key projection: score = h_t . (ctx @ W_a^T)
    ctx_k = _mm(ctx_f, wat_ref[...]).reshape(B, S, H)          # wat = W_a^T (from wrapper)

    whh = [whh_ref[l].astype(jnp.float32) for l in range(L)]   # f32 recurrent path,
    wih = [wihr_ref[l].astype(jnp.float32) for l in range(L - 1)]  # up-cast once
    brest = [brest_ref[l] for l in range(L - 1)]
    wc1, wc2, bca = wc1_ref[...], wc2_ref[...], bca_ref[...]

    def lstm_cell(g, c_prev):                                  # PyTorch gate order i,f,g,o
        i = jax.nn.sigmoid(g[:, 0:H])
        f = jax.nn.sigmoid(g[:, H:2 * H])
        gg = jnp.tanh(g[:, 2 * H:3 * H])
        o = jax.nn.sigmoid(g[:, 3 * H:4 * H])
        c_new = f * c_prev + i * gg
        return o * jnp.tanh(c_new), c_new

    for t in range(T):                                         # static unroll, T-1 = 7 steps
        g0 = xg[t * B:(t + 1) * B, :] + jnp.dot(
            hs[0], whh[0], preferred_element_type=jnp.float32)
        hs[0], cs[0] = lstm_cell(g0, cs[0])
        inp = hs[0]
        for l in range(1, L):
            g = (jnp.dot(inp, wih[l - 1], preferred_element_type=jnp.float32)
                 + jnp.dot(hs[l], whh[l], preferred_element_type=jnp.float32)
                 + brest[l - 1])
            hs[l], cs[l] = lstm_cell(g, cs[l])
            inp = hs[l]

        # Luong attention: batched dot_general contractions (MXU), keys pre-projected.
        # TODO(synk): reference rnn_decoder attends over all context positions (no src mask).
        s = jnp.einsum('bih,bsh->bis', inp[:, None, :], ctx_k,
                       preferred_element_type=jnp.float32)[:, 0, :]       # (B, S)
        s = s - jnp.max(s, axis=-1, keepdims=True)
        pr = jnp.exp(s)
        pr = pr / jnp.sum(pr, axis=-1, keepdims=True)
        cvec = jnp.einsum('bis,bsh->bih', pr[:, None, :], ctx,
                          preferred_element_type=jnp.float32)[:, 0, :]    # (B, H)
        attn_h = jnp.tanh(_mm(cvec, wc1) + _mm(inp, wc2) + bca)           # W_c split, no concat
        attn_ref[t * B:(t + 1) * B, :] = attn_h                           # small VMEM scratch

    # batched vocab projection + softmax, single lane-dense (T*B, 256) store
    logits = _mm(attn_ref[...], wout_ref[...]) + bout_ref[...]
    logits = logits - jnp.max(logits, axis=-1, keepdims=True)
    pe = jnp.exp(logits)
    o_ref[...] = pe / jnp.sum(pe, axis=-1, keepdims=True)


def fused_forward(x_src, mask, x_tgt, p):
    TB = x_tgt.shape[0]
    b = p["bert"]
    # W_a is passed pre-transposed so the in-kernel hoisted key projection matches
    # the reference score h_t @ W_a @ ctx^T.
    args = (
        x_src, mask, x_tgt,
        b["wqkv"], b["bqkv"], b["wo"], b["bo"], b["ln1_g"], b["ln1_b"],
        b["w1"], b["b1"], b["w2"], b["b2"], b["ln2_g"], b["ln2_b"],
        p["w_proj"], p["b_proj"], p["wc"], p["bc_s"], p["wh"], p["bh_s"],
        p["w_ih0"], p["b_ih0"], p["w_ih_rest"], p["w_hh"], p["b_rest"],
        jnp.transpose(p["w_a"]), p["w_c1"], p["w_c2"], p["b_cattn"],
        p["w_out"], p["b_out"],
    )
    return pl.pallas_call(
        _fused_forward_kernel,
        out_shape=jax.ShapeDtypeStruct((TB, VOCAB), jnp.float32),
        grid=(1,),
        in_specs=[_full_spec(a.shape) for a in args],
        out_specs=_full_spec((TB, VOCAB)),
        scratch_shapes=[pltpu.VMEM((TB, HID), jnp.float32)],
    )(*args)


# ----------------------------- parameters -----------------------------
def init_params(key):
    kit = iter(jax.random.split(key, 64))

    def nrm(shape, dtype=W_DTYPE):
        return (0.02 * jax.random.normal(next(kit), shape)).astype(dtype)

    def zeros(shape):
        return jnp.zeros(shape, jnp.float32)

    def ones(shape):
        return jnp.ones(shape, jnp.float32)

    def stack(fn, shape):
        return jnp.stack([fn(shape) for _ in range(LAYERS)])

    p = {
        "emb": nrm((VOCAB, EMB), jnp.float32),   # shared embedding (encoder + decoder)
        "pos": nrm((MAX_LEN, EMB), jnp.float32), # BERT positional embedding
        "bert": {                                # weights stacked over the layer dim
            "wqkv": stack(nrm, (EMB, 3 * EMB)), "bqkv": stack(zeros, (1, 3 * EMB)),
            "wo": stack(nrm, (EMB, EMB)), "bo": stack(zeros, (1, EMB)),
            "ln1_g": stack(ones, (1, EMB)), "ln1_b": stack(zeros, (1, EMB)),
            "w1": stack(nrm, (EMB, FFN)), "b1": stack(zeros, (1, FFN)),
            "w2": stack(nrm, (FFN, EMB)), "b2": stack(zeros, (1, EMB)),
            "ln2_g": stack(ones, (1, EMB)), "ln2_b": stack(zeros, (1, EMB)),
        },
    }
    p["w_proj"] = nrm((EMB, HID)); p["b_proj"] = zeros((1, HID))                 # self.proj
    p["wc"] = nrm((HID, HID * LAYERS)); p["bc_s"] = zeros((1, HID * LAYERS))     # state_wc
    p["wh"] = nrm((HID, HID * LAYERS)); p["bh_s"] = zeros((1, HID * LAYERS))     # state_wh
    # stacked-LSTM decoder (layer 0 input dim EMB, layers >= 1 input dim HID)
    p["w_ih0"] = nrm((EMB, 4 * HID)); p["b_ih0"] = zeros((1, 4 * HID))
    p["w_ih_rest"] = nrm((LAYERS - 1, HID, 4 * HID))
    p["b_rest"] = jnp.zeros((LAYERS - 1, 1, 4 * HID), jnp.float32)
    p["w_hh"] = nrm((LAYERS, HID, 4 * HID))
    p["w_a"] = nrm((HID, HID))                                                   # Luong attention
    p["w_c1"] = nrm((HID, HID)); p["w_c2"] = nrm((HID, HID))                     # W_c split halves
    p["b_cattn"] = zeros((1, HID))
    p["w_out"] = nrm((HID, VOCAB)); p["b_out"] = zeros((1, VOCAB))               # vocab linear
    return p


# ----------------------------- model -----------------------------
def bow2seq_forward(src, src_mask, tgt, p):
    """Mirrors bow2seq.forward: BERT -> proj -> init state -> decoder -> softmax."""
    B, S = src.shape
    # TODO(synk): embedding lookups (token gathers) kept in plain JAX glue.
    x_src = jnp.take(p["emb"], src, axis=0) + p["pos"][:S][None, :, :]   # (B, S, E)
    mask = src_mask.astype(jnp.float32).reshape(B, 1, S)
    tgt_in = tgt[:, :-1]                                                 # (B, T-1)
    T = tgt_in.shape[1]
    x_tgt = jnp.take(p["emb"], tgt_in.T.reshape(T * B), axis=0)          # time-major flat (T*B, E)
    probs_flat = fused_forward(x_src, mask, x_tgt, p)                    # ((T-1)*B, VOCAB)
    return probs_flat.reshape(T, B, VOCAB).transpose(1, 0, 2)            # (B, T-1, VOCAB)


# ----------------------------- main -----------------------------
if __name__ == "__main__":
    key = jax.random.PRNGKey(0)
    kp, k1, k2 = jax.random.split(key, 3)
    params = init_params(kp)

    B, S, T = 2, 8, 8
    src = jax.random.randint(k1, (B, S), 0, VOCAB, dtype=jnp.int32)        # batch.bow
    src_mask = jnp.array([[1, 1, 1, 1, 1, 1, 0, 0],
                          [1, 1, 1, 1, 1, 1, 1, 1]], dtype=jnp.float32)    # batch.bow_mask
    tgt = jax.random.randint(k2, (B, T), 0, VOCAB, dtype=jnp.int32)        # batch.tgt

    fwd = jax.jit(bow2seq_forward)
    out = fwd(src, src_mask, tgt, params)
    jax.block_until_ready(out)

    assert out.shape == (B, T - 1, VOCAB), out.shape
    # rows are probability distributions (softmax output)
    row_sums = jnp.sum(out, axis=-1)
    assert bool(jnp.all(jnp.abs(row_sums - 1.0) < 1e-3))
    print("KERNEL_OK")
</pallas_src>

<mosaic_0001>
module attributes {stable_mosaic.version = 11 : i64} {
  func.func @_fused_forward_kernel(%arg0: i32, %arg1: memref<2x8x32xf32, #tpu.memory_space<vmem>>, %arg2: memref<2x1x8xf32, #tpu.memory_space<vmem>>, %arg3: memref<14x32xf32, #tpu.memory_space<vmem>>, %arg4: memref<2x32x96xbf16, #tpu.memory_space<vmem>>, %arg5: memref<2x1x96xf32, #tpu.memory_space<vmem>>, %arg6: memref<2x32x32xbf16, #tpu.memory_space<vmem>>, %arg7: memref<2x1x32xf32, #tpu.memory_space<vmem>>, %arg8: memref<2x1x32xf32, #tpu.memory_space<vmem>>, %arg9: memref<2x1x32xf32, #tpu.memory_space<vmem>>, %arg10: memref<2x32x128xbf16, #tpu.memory_space<vmem>>, %arg11: memref<2x1x128xf32, #tpu.memory_space<vmem>>, %arg12: memref<2x128x32xbf16, #tpu.memory_space<vmem>>, %arg13: memref<2x1x32xf32, #tpu.memory_space<vmem>>, %arg14: memref<2x1x32xf32, #tpu.memory_space<vmem>>, %arg15: memref<2x1x32xf32, #tpu.memory_space<vmem>>, %arg16: memref<32x32xbf16, #tpu.memory_space<vmem>>, %arg17: memref<1x32xf32, #tpu.memory_space<vmem>>, %arg18: memref<32x64xbf16, #tpu.memory_space<vmem>>, %arg19: memref<1x64xf32, #tpu.memory_space<vmem>>, %arg20: memref<32x64xbf16, #tpu.memory_space<vmem>>, %arg21: memref<1x64xf32, #tpu.memory_space<vmem>>, %arg22: memref<32x128xbf16, #tpu.memory_space<vmem>>, %arg23: memref<1x128xf32, #tpu.memory_space<vmem>>, %arg24: memref<1x32x128xbf16, #tpu.memory_space<vmem>>, %arg25: memref<2x32x128xbf16, #tpu.memory_space<vmem>>, %arg26: memref<1x1x128xf32, #tpu.memory_space<vmem>>, %arg27: memref<32x32xbf16, #tpu.memory_space<vmem>>, %arg28: memref<32x32xbf16, #tpu.memory_space<vmem>>, %arg29: memref<32x32xbf16, #tpu.memory_space<vmem>>, %arg30: memref<1x32xf32, #tpu.memory_space<vmem>>, %arg31: memref<32x256xbf16, #tpu.memory_space<vmem>>, %arg32: memref<1x256xf32, #tpu.memory_space<vmem>>, %arg33: memref<14x256xf32, #tpu.memory_space<vmem>>, %arg34: memref<14x32xf32, #tpu.memory_space<vmem>>) attributes {dimension_semantics = [#tpu.dimension_semantics<arbitrary>], iteration_bounds = array<i64: 1>, scalar_prefetch = 0 : i64, scratch_operands = 1 : i64, tpu.core_type = #tpu.core_type<tc>, window_params = [{pipeline_mode = #tpu.pipeline_mode<synchronous>, transform_indices = @transform_0, window_bounds = array<i64: 2, 8, 32>}, {pipeline_mode = #tpu.pipeline_mode<synchronous>, transform_indices = @transform_1, window_bounds = array<i64: 2, 1, 8>}, {pipeline_mode = #tpu.pipeline_mode<synchronous>, transform_indices = @transform_2, window_bounds = array<i64: 14, 32>}, {pipeline_mode = #tpu.pipeline_mode<synchronous>, transform_indices = @transform_3, window_bounds = array<i64: 2, 32, 96>}, {pipeline_mode = #tpu.pipeline_mode<synchronous>, transform_indices = @transform_4, window_bounds = array<i64: 2, 1, 96>}, {pipeline_mode = #tpu.pipeline_mode<synchronous>, transform_indices = @transform_5, window_bounds = array<i64: 2, 32, 32>}, {pipeline_mode = #tpu.pipeline_mode<synchronous>, transform_indices = @transform_6, window_bounds = array<i64: 2, 1, 32>}, {pipeline_mode = #tpu.pipeline_mode<synchronous>, transform_indices = @transform_7, window_bounds = array<i64: 2, 1, 32>}, {pipeline_mode = #tpu.pipeline_mode<synchronous>, transform_indices = @transform_8, window_bounds = array<i64: 2, 1, 32>}, {pipeline_mode = #tpu.pipeline_mode<synchronous>, transform_indices = @transform_9, window_bounds = array<i64: 2, 32, 128>}, {pipeline_mode = #tpu.pipeline_mode<synchronous>, transform_indices = @transform_10, window_bounds = array<i64: 2, 1, 128>}, {pipeline_mode = #tpu.pipeline_mode<synchronous>, transform_indices = @transform_11, window_bounds = array<i64: 2, 128, 32>}, {pipeline_mode = #tpu.pipeline_mode<synchronous>, transform_indices = @transform_12, window_bounds = array<i64: 2, 1, 32>}, {pipeline_mode = #tpu.pipeline_mode<synchronous>, transform_indices = @transform_13, window_bounds = array<i64: 2, 1, 32>}, {pipeline_mode = #tpu.pipeline_mode<synchronous>, transform_indices = @transform_14, window_bounds = array<i64: 2, 1, 32>}, {pipeline_mode = #tpu.pipeline_mode<synchronous>, transform_indices = @transform_15, window_bounds = array<i64: 32, 32>}, {pipeline_mode = #tpu.pipeline_mode<synchronous>, transform_indices = @transform_16, window_bounds = array<i64: 1, 32>}, {pipeline_mode = #tpu.pipeline_mode<synchronous>, transform_indices = @transform_17, window_bounds = array<i64: 32, 64>}, {pipeline_mode = #tpu.pipeline_mode<synchronous>, transform_indices = @transform_18, window_bounds = array<i64: 1, 64>}, {pipeline_mode = #tpu.pipeline_mode<synchronous>, transform_indices = @transform_19, window_bounds = array<i64: 32, 64>}, {pipeline_mode = #tpu.pipeline_mode<synchronous>, transform_indices = @transform_20, window_bounds = array<i64: 1, 64>}, {pipeline_mode = #tpu.pipeline_mode<synchronous>, transform_indices = @transform_21, window_bounds = array<i64: 32, 128>}, {pipeline_mode = #tpu.pipeline_mode<synchronous>, transform_indices = @transform_22, window_bounds = array<i64: 1, 128>}, {pipeline_mode = #tpu.pipeline_mode<synchronous>, transform_indices = @transform_23, window_bounds = array<i64: 1, 32, 128>}, {pipeline_mode = #tpu.pipeline_mode<synchronous>, transform_indices = @transform_24, window_bounds = array<i64: 2, 32, 128>}, {pipeline_mode = #tpu.pipeline_mode<synchronous>, transform_indices = @transform_25, window_bounds = array<i64: 1, 1, 128>}, {pipeline_mode = #tpu.pipeline_mode<synchronous>, transform_indices = @transform_26, window_bounds = array<i64: 32, 32>}, {pipeline_mode = #tpu.pipeline_mode<synchronous>, transform_indices = @transform_27, window_bounds = array<i64: 32, 32>}, {pipeline_mode = #tpu.pipeline_mode<synchronous>, transform_indices = @transform_28, window_bounds = array<i64: 32, 32>}, {pipeline_mode = #tpu.pipeline_mode<synchronous>, transform_indices = @transform_29, window_bounds = array<i64: 1, 32>}, {pipeline_mode = #tpu.pipeline_mode<synchronous>, transform_indices = @transform_30, window_bounds = array<i64: 32, 256>}, {pipeline_mode = #tpu.pipeline_mode<synchronous>, transform_indices = @transform_31, window_bounds = array<i64: 1, 256>}, {pipeline_mode = #tpu.pipeline_mode<synchronous>, transform_indices = @transform_32, window_bounds = array<i64: 14, 256>}]} {
    %c0 = arith.constant 0 : index
    %c0_0 = arith.constant 0 : index
    %c0_1 = arith.constant 0 : index
    %0 = vector.load %arg2[%c0, %c0_0, %c0_1] : memref<2x1x8xf32, #tpu.memory_space<vmem>>, vector<2x1x8xf32>
    %c0_2 = arith.constant 0 : index
    %c0_3 = arith.constant 0 : index
    %c0_4 = arith.constant 0 : index
    %1 = vector.load %arg1[%c0_2, %c0_3, %c0_4] : memref<2x8x32xf32, #tpu.memory_space<vmem>>, vector<2x8x32xf32>
    %2 = vector.shape_cast %1 : vector<2x8x32xf32> to vector<16x32xf32>
    %c0_5 = arith.constant 0 : index
    %c0_6 = arith.constant 0 : index
    %c0_7 = arith.constant 0 : index
    %3 = vector.load %arg4[%c0_5, %c0_6, %c0_7] : memref<2x32x96xbf16, #tpu.memory_space<vmem>>, vector<1x32x96xbf16>
    %4 = vector.shape_cast %3 : vector<1x32x96xbf16> to vector<32x96xbf16>
    %5 = arith.truncf %2 : vector<16x32xf32> to vector<16x32xbf16>
    %cst = arith.constant dense<0.000000e+00> : vector<16x96xf32>
    %6 = tpu.matmul %5, %4, %cst {dimension_numbers = #tpu.dot_dimension_numbers<[1], [0], [0], [1], [0, 0, 1, 1], [], []>} : vector<16x32xbf16>, vector<32x96xbf16>, vector<16x96xf32> -> vector<16x96xf32>
    %c0_8 = arith.constant 0 : index
    %c0_9 = arith.constant 0 : index
    %c0_10 = arith.constant 0 : index
    %7 = vector.load %arg5[%c0_8, %c0_9, %c0_10] : memref<2x1x96xf32, #tpu.memory_space<vmem>>, vector<1x1x96xf32>
    %8 = vector.shape_cast %7 : vector<1x1x96xf32> to vector<1x96xf32>
    %9 = vector.broadcast %8 : vector<1x96xf32> to vector<16x96xf32>
    %10 = arith.addf %6, %9 : vector<16x96xf32>
    %11 = vector.shape_cast %10 : vector<16x96xf32> to vector<2x8x96xf32>
    %12 = vector.extract_strided_slice %11 {offsets = [0, 0, 0], sizes = [2, 8, 32], strides = [1, 1, 1]} : vector<2x8x96xf32> to vector<2x8x32xf32>
    %13 = vector.extract_strided_slice %11 {offsets = [0, 0, 32], sizes = [2, 8, 32], strides = [1, 1, 1]} : vector<2x8x96xf32> to vector<2x8x32xf32>
    %14 = vector.extract_strided_slice %11 {offsets = [0, 0, 64], sizes = [2, 8, 32], strides = [1, 1, 1]} : vector<2x8x96xf32> to vector<2x8x32xf32>
    %15 = vector.extract_strided_slice %12 {offsets = [0, 0, 0], sizes = [2, 8, 8], strides = [1, 1, 1]} : vector<2x8x32xf32> to vector<2x8x8xf32>
    %16 = vector.extract_strided_slice %13 {offsets = [0, 0, 0], sizes = [2, 8, 8], strides = [1, 1, 1]} : vector<2x8x32xf32> to vector<2x8x8xf32>
    %17 = vector.extract_strided_slice %14 {offsets = [0, 0, 0], sizes = [2, 8, 8], strides = [1, 1, 1]} : vector<2x8x32xf32> to vector<2x8x8xf32>
    "tpu.trace_start"() <{level = 10 : i32, message = "bid,bjd->bij"}> : () -> ()
    %cst_11 = arith.constant dense<0.000000e+00> : vector<2x8x8xf32>
    %18 = tpu.matmul %15, %16, %cst_11 {dimension_numbers = #tpu.dot_dimension_numbers<[2], [2], [1], [1], [0, 0, 0, 1, 1, 1], [0], [0]>} : vector<2x8x8xf32>, vector<2x8x8xf32>, vector<2x8x8xf32> -> vector<2x8x8xf32>
    "tpu.trace_stop"() : () -> ()
    %cst_12 = arith.constant 0.353553385 : f32
    %19 = vector.broadcast %cst_12 : f32 to vector<2x8x8xf32>
    %20 = arith.mulf %18, %19 : vector<2x8x8xf32>
    %cst_13 = arith.constant 0.000000e+00 : f32
    %21 = vector.broadcast %cst_13 : f32 to vector<2x1x8xf32>
    %22 = arith.cmpf ogt, %0, %21 : vector<2x1x8xf32>
    %cst_14 = arith.constant -1.000000e+09 : f32
    %23 = vector.shape_cast %22 : vector<2x1x8xi1> to vector<2x1x8xi1>
    %24 = vector.broadcast %23 : vector<2x1x8xi1> to vector<2x8x8xi1>
    %25 = vector.broadcast %cst_14 : f32 to vector<2x8x8xf32>
    %26 = arith.select %24, %20, %25 : vector<2x8x8xi1>, vector<2x8x8xf32>
    %cst_15 = arith.constant dense<0xFF800000> : vector<2x8xf32>
    %27 = vector.multi_reduction <maximumf>, %26, %cst_15 [2] : vector<2x8x8xf32> to vector<2x8xf32>
    %28 = vector.shape_cast %27 : vector<2x8xf32> to vector<2x8x1xf32>
    %29 = vector.broadcast %28 : vector<2x8x1xf32> to vector<2x8x8xf32>
    %30 = arith.subf %26, %29 : vector<2x8x8xf32>
    %31 = math.exp %30 : vector<2x8x8xf32>
    %cst_16 = arith.constant dense<0.000000e+00> : vector<2x8xf32>
    %32 = vector.multi_reduction <add>, %31, %cst_16 [2] : vector<2x8x8xf32> to vector<2x8xf32>
    %33 = vector.shape_cast %32 : vector<2x8xf32> to vector<2x8x1xf32>
    %34 = vector.broadcast %33 : vector<2x8x1xf32> to vector<2x8x8xf32>
    %35 = arith.divf %31, %34 : vector<2x8x8xf32>
    "tpu.trace_start"() <{level = 10 : i32, message = "bij,bjd->bid"}> : () -> ()
    %cst_17 = arith.constant dense<0.000000e+00> : vector<2x8x8xf32>
    %36 = tpu.matmul %35, %17, %cst_17 {dimension_numbers = #tpu.dot_dimension_numbers<[2], [1], [1], [2], [0, 0, 0, 1, 1, 2], [0], [0]>} : vector<2x8x8xf32>, vector<2x8x8xf32>, vector<2x8x8xf32> -> vector<2x8x8xf32>
    "tpu.trace_stop"() : () -> ()
    %37 = vector.extract_strided_slice %12 {offsets = [0, 0, 8], sizes = [2, 8, 8], strides = [1, 1, 1]} : vector<2x8x32xf32> to vector<2x8x8xf32>
    %38 = vector.extract_strided_slice %13 {offsets = [0, 0, 8], sizes = [2, 8, 8], strides = [1, 1, 1]} : vector<2x8x32xf32> to vector<2x8x8xf32>
    %39 = vector.extract_strided_slice %14 {offsets = [0, 0, 8], sizes = [2, 8, 8], strides = [1, 1, 1]} : vector<2x8x32xf32> to vector<2x8x8xf32>
    "tpu.trace_start"() <{level = 10 : i32, message = "bid,bjd->bij"}> : () -> ()
    %cst_18 = arith.constant dense<0.000000e+00> : vector<2x8x8xf32>
    %40 = tpu.matmul %37, %38, %cst_18 {dimension_numbers = #tpu.dot_dimension_numbers<[2], [2], [1], [1], [0, 0, 0, 1, 1, 1], [0], [0]>} : vector<2x8x8xf32>, vector<2x8x8xf32>, vector<2x8x8xf32> -> vector<2x8x8xf32>
    "tpu.trace_stop"() : () -> ()
    %cst_19 = arith.constant 0.353553385 : f32
    %41 = vector.broadcast %cst_19 : f32 to vector<2x8x8xf32>
    %42 = arith.mulf %40, %41 : vector<2x8x8xf32>
    %cst_20 = arith.constant 0.000000e+00 : f32
    %43 = vector.broadcast %cst_20 : f32 to vector<2x1x8xf32>
    %44 = arith.cmpf ogt, %0, %43 : vector<2x1x8xf32>
    %cst_21 = arith.constant -1.000000e+09 : f32
    %45 = vector.shape_cast %44 : vector<2x1x8xi1> to vector<2x1x8xi1>
    %46 = vector.broadcast %45 : vector<2x1x8xi1> to vector<2x8x8xi1>
    %47 = vector.broadcast %cst_21 : f32 to vector<2x8x8xf32>
    %48 = arith.select %46, %42, %47 : vector<2x8x8xi1>, vector<2x8x8xf32>
    %cst_22 = arith.constant dense<0xFF800000> : vector<2x8xf32>
    %49 = vector.multi_reduction <maximumf>, %48, %cst_22 [2] : vector<2x8x8xf32> to vector<2x8xf32>
    %50 = vector.shape_cast %49 : vector<2x8xf32> to vector<2x8x1xf32>
    %51 = vector.broadcast %50 : vector<2x8x1xf32> to vector<2x8x8xf32>
    %52 = arith.subf %48, %51 : vector<2x8x8xf32>
    %53 = math.exp %52 : vector<2x8x8xf32>
    %cst_23 = arith.constant dense<0.000000e+00> : vector<2x8xf32>
    %54 = vector.multi_reduction <add>, %53, %cst_23 [2] : vector<2x8x8xf32> to vector<2x8xf32>
    %55 = vector.shape_cast %54 : vector<2x8xf32> to vector<2x8x1xf32>
    %56 = vector.broadcast %55 : vector<2x8x1xf32> to vector<2x8x8xf32>
    %57 = arith.divf %53, %56 : vector<2x8x8xf32>
    "tpu.trace_start"() <{level = 10 : i32, message = "bij,bjd->bid"}> : () -> ()
    %cst_24 = arith.constant dense<0.000000e+00> : vector<2x8x8xf32>
    %58 = tpu.matmul %57, %39, %cst_24 {dimension_numbers = #tpu.dot_dimension_numbers<[2], [1], [1], [2], [0, 0, 0, 1, 1, 2], [0], [0]>} : vector<2x8x8xf32>, vector<2x8x8xf32>, vector<2x8x8xf32> -> vector<2x8x8xf32>
    "tpu.trace_stop"() : () -> ()
    %59 = vector.extract_strided_slice %12 {offsets = [0, 0, 16], sizes = [2, 8, 8], strides = [1, 1, 1]} : vector<2x8x32xf32> to vector<2x8x8xf32>
    %60 = vector.extract_strided_slice %13 {offsets = [0, 0, 16], sizes = [2, 8, 8], strides = [1, 1, 1]} : vector<2x8x32xf32> to vector<2x8x8xf32>
    %61 = vector.extract_strided_slice %14 {offsets = [0, 0, 16], sizes = [2, 8, 8], strides = [1, 1, 1]} : vector<2x8x32xf32> to vector<2x8x8xf32>
    "tpu.trace_start"() <{level = 10 : i32, message = "bid,bjd->bij"}> : () -> ()
    %cst_25 = arith.constant dense<0.000000e+00> : vector<2x8x8xf32>
    %62 = tpu.matmul %59, %60, %cst_25 {dimension_numbers = #tpu.dot_dimension_numbers<[2], [2], [1], [1], [0, 0, 0, 1, 1, 1], [0], [0]>} : vector<2x8x8xf32>, vector<2x8x8xf32>, vector<2x8x8xf32> -> vector<2x8x8xf32>
    "tpu.trace_stop"() : () -> ()
    %cst_26 = arith.constant 0.353553385 : f32
    %63 = vector.broadcast %cst_26 : f32 to vector<2x8x8xf32>
    %64 = arith.mulf %62, %63 : vector<2x8x8xf32>
    %cst_27 = arith.constant 0.000000e+00 : f32
    %65 = vector.broadcast %cst_27 : f32 to vector<2x1x8xf32>
    %66 = arith.cmpf ogt, %0, %65 : vector<2x1x8xf32>
    %cst_28 = arith.constant -1.000000e+09 : f32
    %67 = vector.shape_cast %66 : vector<2x1x8xi1> to vector<2x1x8xi1>
    %68 = vector.broadcast %67 : vector<2x1x8xi1> to vector<2x8x8xi1>
    %69 = vector.broadcast %cst_28 : f32 to vector<2x8x8xf32>
    %70 = arith.select %68, %64, %69 : vector<2x8x8xi1>, vector<2x8x8xf32>
    %cst_29 = arith.constant dense<0xFF800000> : vector<2x8xf32>
    %71 = vector.multi_reduction <maximumf>, %70, %cst_29 [2] : vector<2x8x8xf32> to vector<2x8xf32>
    %72 = vector.shape_cast %71 : vector<2x8xf32> to vector<2x8x1xf32>
    %73 = vector.broadcast %72 : vector<2x8x1xf32> to vector<2x8x8xf32>
    %74 = arith.subf %70, %73 : vector<2x8x8xf32>
    %75 = math.exp %74 : vector<2x8x8xf32>
    %cst_30 = arith.constant dense<0.000000e+00> : vector<2x8xf32>
    %76 = vector.multi_reduction <add>, %75, %cst_30 [2] : vector<2x8x8xf32> to vector<2x8xf32>
    %77 = vector.shape_cast %76 : vector<2x8xf32> to vector<2x8x1xf32>
    %78 = vector.broadcast %77 : vector<2x8x1xf32> to vector<2x8x8xf32>
    %79 = arith.divf %75, %78 : vector<2x8x8xf32>
    "tpu.trace_start"() <{level = 10 : i32, message = "bij,bjd->bid"}> : () -> ()
    %cst_31 = arith.constant dense<0.000000e+00> : vector<2x8x8xf32>
    %80 = tpu.matmul %79, %61, %cst_31 {dimension_numbers = #tpu.dot_dimension_numbers<[2], [1], [1], [2], [0, 0, 0, 1, 1, 2], [0], [0]>} : vector<2x8x8xf32>, vector<2x8x8xf32>, vector<2x8x8xf32> -> vector<2x8x8xf32>
    "tpu.trace_stop"() : () -> ()
    %81 = vector.extract_strided_slice %12 {offsets = [0, 0, 24], sizes = [2, 8, 8], strides = [1, 1, 1]} : vector<2x8x32xf32> to vector<2x8x8xf32>
    %82 = vector.extract_strided_slice %13 {offsets = [0, 0, 24], sizes = [2, 8, 8], strides = [1, 1, 1]} : vector<2x8x32xf32> to vector<2x8x8xf32>
    %83 = vector.extract_strided_slice %14 {offsets = [0, 0, 24], sizes = [2, 8, 8], strides = [1, 1, 1]} : vector<2x8x32xf32> to vector<2x8x8xf32>
    "tpu.trace_start"() <{level = 10 : i32, message = "bid,bjd->bij"}> : () -> ()
    %cst_32 = arith.constant dense<0.000000e+00> : vector<2x8x8xf32>
    %84 = tpu.matmul %81, %82, %cst_32 {dimension_numbers = #tpu.dot_dimension_numbers<[2], [2], [1], [1], [0, 0, 0, 1, 1, 1], [0], [0]>} : vector<2x8x8xf32>, vector<2x8x8xf32>, vector<2x8x8xf32> -> vector<2x8x8xf32>
    "tpu.trace_stop"() : () -> ()
    %cst_33 = arith.constant 0.353553385 : f32
    %85 = vector.broadcast %cst_33 : f32 to vector<2x8x8xf32>
    %86 = arith.mulf %84, %85 : vector<2x8x8xf32>
    %cst_34 = arith.constant 0.000000e+00 : f32
    %87 = vector.broadcast %cst_34 : f32 to vector<2x1x8xf32>
    %88 = arith.cmpf ogt, %0, %87 : vector<2x1x8xf32>
    %cst_35 = arith.constant -1.000000e+09 : f32
    %89 = vector.shape_cast %88 : vector<2x1x8xi1> to vector<2x1x8xi1>
    %90 = vector.broadcast %89 : vector<2x1x8xi1> to vector<2x8x8xi1>
    %91 = vector.broadcast %cst_35 : f32 to vector<2x8x8xf32>
    %92 = arith.select %90, %86, %91 : vector<2x8x8xi1>, vector<2x8x8xf32>
    %cst_36 = arith.constant dense<0xFF800000> : vector<2x8xf32>
    %93 = vector.multi_reduction <maximumf>, %92, %cst_36 [2] : vector<2x8x8xf32> to vector<2x8xf32>
    %94 = vector.shape_cast %93 : vector<2x8xf32> to vector<2x8x1xf32>
    %95 = vector.broadcast %94 : vector<2x8x1xf32> to vector<2x8x8xf32>
    %96 = arith.subf %92, %95 : vector<2x8x8xf32>
    %97 = math.exp %96 : vector<2x8x8xf32>
    %cst_37 = arith.constant dense<0.000000e+00> : vector<2x8xf32>
    %98 = vector.multi_reduction <add>, %97, %cst_37 [2] : vector<2x8x8xf32> to vector<2x8xf32>
    %99 = vector.shape_cast %98 : vector<2x8xf32> to vector<2x8x1xf32>
    %100 = vector.broadcast %99 : vector<2x8x1xf32> to vector<2x8x8xf32>
    %101 = arith.divf %97, %100 : vector<2x8x8xf32>
    "tpu.trace_start"() <{level = 10 : i32, message = "bij,bjd->bid"}> : () -> ()
    %cst_38 = arith.constant dense<0.000000e+00> : vector<2x8x8xf32>
    %102 = tpu.matmul %101, %83, %cst_38 {dimension_numbers = #tpu.dot_dimension_numbers<[2], [1], [1], [2], [0, 0, 0, 1, 1, 2], [0], [0]>} : vector<2x8x8xf32>, vector<2x8x8xf32>, vector<2x8x8xf32> -> vector<2x8x8xf32>
    "tpu.trace_stop"() : () -> ()
    %103 = tpu.concatenate %36, %58, %80, %102 in 2 : vector<2x8x8xf32>, vector<2x8x8xf32>, vector<2x8x8xf32>, vector<2x8x8xf32> -> vector<2x8x32xf32>
    %104 = vector.shape_cast %103 : vector<2x8x32xf32> to vector<16x32xf32>
    %c0_39 = arith.constant 0 : index
    %c0_40 = arith.constant 0 : index
    %c0_41 = arith.constant 0 : index
    %105 = vector.load %arg6[%c0_39, %c0_40, %c0_41] : memref<2x32x32xbf16, #tpu.memory_space<vmem>>, vector<1x32x32xbf16>
    %106 = vector.shape_cast %105 : vector<1x32x32xbf16> to vector<32x32xbf16>
    %107 = arith.truncf %104 : vector<16x32xf32> to vector<16x32xbf16>
    %cst_42 = arith.constant dense<0.000000e+00> : vector<16x32xf32>
    %108 = tpu.matmul %107, %106, %cst_42 {dimension_numbers = #tpu.dot_dimension_numbers<[1], [0], [0], [1], [0, 0, 1, 1], [], []>} : vector<16x32xbf16>, vector<32x32xbf16>, vector<16x32xf32> -> vector<16x32xf32>
    %c0_43 = arith.constant 0 : index
    %c0_44 = arith.constant 0 : index
    %c0_45 = arith.constant 0 : index
    %109 = vector.load %arg7[%c0_43, %c0_44, %c0_45] : memref<2x1x32xf32, #tpu.memory_space<vmem>>, vector<1x1x32xf32>
    %110 = vector.shape_cast %109 : vector<1x1x32xf32> to vector<1x32xf32>
    %111 = vector.broadcast %110 : vector<1x32xf32> to vector<16x32xf32>
    %112 = arith.addf %108, %111 : vector<16x32xf32>
    %113 = arith.addf %2, %112 : vector<16x32xf32>
    %c0_46 = arith.constant 0 : index
    %c0_47 = arith.constant 0 : index
    %c0_48 = arith.constant 0 : index
    %114 = vector.load %arg8[%c0_46, %c0_47, %c0_48] : memref<2x1x32xf32, #tpu.memory_space<vmem>>, vector<1x1x32xf32>
    %115 = vector.shape_cast %114 : vector<1x1x32xf32> to vector<1x32xf32>
    %c0_49 = arith.constant 0 : index
    %c0_50 = arith.constant 0 : index
    %c0_51 = arith.constant 0 : index
    %116 = vector.load %arg9[%c0_49, %c0_50, %c0_51] : memref<2x1x32xf32, #tpu.memory_space<vmem>>, vector<1x1x32xf32>
    %117 = vector.shape_cast %116 : vector<1x1x32xf32> to vector<1x32xf32>
    %cst_52 = arith.constant dense<0.000000e+00> : vector<16xf32>
    %118 = vector.multi_reduction <add>, %113, %cst_52 [1] : vector<16x32xf32> to vector<16xf32>
    %119 = vector.shape_cast %118 : vector<16xf32> to vector<16x1xf32>
    %cst_53 = arith.constant 3.200000e+01 : f32
    %120 = vector.broadcast %cst_53 : f32 to vector<16x1xf32>
    %121 = arith.divf %119, %120 : vector<16x1xf32>
    %122 = vector.broadcast %121 : vector<16x1xf32> to vector<16x32xf32>
    %123 = arith.subf %113, %122 : vector<16x32xf32>
    %124 = arith.mulf %123, %123 : vector<16x32xf32>
    %cst_54 = arith.constant dense<0.000000e+00> : vector<16xf32>
    %125 = vector.multi_reduction <add>, %124, %cst_54 [1] : vector<16x32xf32> to vector<16xf32>
    %126 = vector.shape_cast %125 : vector<16xf32> to vector<16x1xf32>
    %cst_55 = arith.constant 3.200000e+01 : f32
    %127 = vector.broadcast %cst_55 : f32 to vector<16x1xf32>
    %128 = arith.divf %126, %127 : vector<16x1xf32>
    %129 = vector.broadcast %121 : vector<16x1xf32> to vector<16x32xf32>
    %130 = arith.subf %113, %129 : vector<16x32xf32>
    %cst_56 = arith.constant 9.99999974E-6 : f32
    %131 = vector.broadcast %cst_56 : f32 to vector<16x1xf32>
    %132 = arith.addf %128, %131 : vector<16x1xf32>
    %133 = math.rsqrt %132 : vector<16x1xf32>
    %134 = vector.broadcast %133 : vector<16x1xf32> to vector<16x32xf32>
    %135 = arith.mulf %130, %134 : vector<16x32xf32>
    %136 = vector.broadcast %115 : vector<1x32xf32> to vector<16x32xf32>
    %137 = arith.mulf %135, %136 : vector<16x32xf32>
    %138 = vector.broadcast %117 : vector<1x32xf32> to vector<16x32xf32>
    %139 = arith.addf %137, %138 : vector<16x32xf32>
    %c0_57 = arith.constant 0 : index
    %c0_58 = arith.constant 0 : index
    %c0_59 = arith.constant 0 : index
    %140 = vector.load %arg10[%c0_57, %c0_58, %c0_59] : memref<2x32x128xbf16, #tpu.memory_space<vmem>>, vector<1x32x128xbf16>
    %141 = vector.shape_cast %140 : vector<1x32x128xbf16> to vector<32x128xbf16>
    %142 = arith.truncf %139 : vector<16x32xf32> to vector<16x32xbf16>
    %cst_60 = arith.constant dense<0.000000e+00> : vector<16x128xf32>
    %143 = tpu.matmul %142, %141, %cst_60 {dimension_numbers = #tpu.dot_dimension_numbers<[1], [0], [0], [1], [0, 0, 1, 1], [], []>} : vector<16x32xbf16>, vector<32x128xbf16>, vector<16x128xf32> -> vector<16x128xf32>
    %c0_61 = arith.constant 0 : index
    %c0_62 = arith.constant 0 : index
    %c0_63 = arith.constant 0 : index
    %144 = vector.load %arg11[%c0_61, %c0_62, %c0_63] : memref<2x1x128xf32, #tpu.memory_space<vmem>>, vector<1x1x128xf32>
    %145 = vector.shape_cast %144 : vector<1x1x128xf32> to vector<1x128xf32>
    %146 = vector.broadcast %145 : vector<1x128xf32> to vector<16x128xf32>
    %147 = arith.addf %143, %146 : vector<16x128xf32>
    %cst_64 = arith.constant 0.000000e+00 : f32
    %148 = vector.broadcast %cst_64 : f32 to vector<16x128xf32>
    %149 = arith.maximumf %147, %148 : vector<16x128xf32>
    %c0_65 = arith.constant 0 : index
    %c0_66 = arith.constant 0 : index
    %c0_67 = arith.constant 0 : index
    %150 = vector.load %arg12[%c0_65, %c0_66, %c0_67] : memref<2x128x32xbf16, #tpu.memory_space<vmem>>, vector<1x128x32xbf16>
    %151 = vector.shape_cast %150 : vector<1x128x32xbf16> to vector<128x32xbf16>
    %152 = arith.truncf %149 : vector<16x128xf32> to vector<16x128xbf16>
    %cst_68 = arith.constant dense<0.000000e+00> : vector<16x32xf32>
    %153 = tpu.matmul %152, %151, %cst_68 {dimension_numbers = #tpu.dot_dimension_numbers<[1], [0], [0], [1], [0, 0, 1, 1], [], []>} : vector<16x128xbf16>, vector<128x32xbf16>, vector<16x32xf32> -> vector<16x32xf32>
    %c0_69 = arith.constant 0 : index
    %c0_70 = arith.constant 0 : index
    %c0_71 = arith.constant 0 : index
    %154 = vector.load %arg13[%c0_69, %c0_70, %c0_71] : memref<2x1x32xf32, #tpu.memory_space<vmem>>, vector<1x1x32xf32>
    %155 = vector.shape_cast %154 : vector<1x1x32xf32> to vector<1x32xf32>
    %156 = vector.broadcast %155 : vector<1x32xf32> to vector<16x32xf32>
    %157 = arith.addf %153, %156 : vector<16x32xf32>
    %158 = arith.addf %139, %157 : vector<16x32xf32>
    %c0_72 = arith.constant 0 : index
    %c0_73 = arith.constant 0 : index
    %c0_74 = arith.constant 0 : index
    %159 = vector.load %arg14[%c0_72, %c0_73, %c0_74] : memref<2x1x32xf32, #tpu.memory_space<vmem>>, vector<1x1x32xf32>
    %160 = vector.shape_cast %159 : vector<1x1x32xf32> to vector<1x32xf32>
    %c0_75 = arith.constant 0 : index
    %c0_76 = arith.constant 0 : index
    %c0_77 = arith.constant 0 : index
    %161 = vector.load %arg15[%c0_75, %c0_76, %c0_77] : memref<2x1x32xf32, #tpu.memory_space<vmem>>, vector<1x1x32xf32>
    %162 = vector.shape_cast %161 : vector<1x1x32xf32> to vector<1x32xf32>
    %cst_78 = arith.constant dense<0.000000e+00> : vector<16xf32>
    %163 = vector.multi_reduction <add>, %158, %cst_78 [1] : vector<16x32xf32> to vector<16xf32>
    %164 = vector.shape_cast %163 : vector<16xf32> to vector<16x1xf32>
    %cst_79 = arith.constant 3.200000e+01 : f32
    %165 = vector.broadcast %cst_79 : f32 to vector<16x1xf32>
    %166 = arith.divf %164, %165 : vector<16x1xf32>
    %167 = vector.broadcast %166 : vector<16x1xf32> to vector<16x32xf32>
    %168 = arith.subf %158, %167 : vector<16x32xf32>
    %169 = arith.mulf %168, %168 : vector<16x32xf32>
    %cst_80 = arith.constant dense<0.000000e+00> : vector<16xf32>
    %170 = vector.multi_reduction <add>, %169, %cst_80 [1] : vector<16x32xf32> to vector<16xf32>
    %171 = vector.shape_cast %170 : vector<16xf32> to vector<16x1xf32>
    %cst_81 = arith.constant 3.200000e+01 : f32
    %172 = vector.broadcast %cst_81 : f32 to vector<16x1xf32>
    %173 = arith.divf %171, %172 : vector<16x1xf32>
    %174 = vector.broadcast %166 : vector<16x1xf32> to vector<16x32xf32>
    %175 = arith.subf %158, %174 : vector<16x32xf32>
    %cst_82 = arith.constant 9.99999974E-6 : f32
    %176 = vector.broadcast %cst_82 : f32 to vector<16x1xf32>
    %177 = arith.addf %173, %176 : vector<16x1xf32>
    %178 = math.rsqrt %177 : vector<16x1xf32>
    %179 = vector.broadcast %178 : vector<16x1xf32> to vector<16x32xf32>
    %180 = arith.mulf %175, %179 : vector<16x32xf32>
    %181 = vector.broadcast %160 : vector<1x32xf32> to vector<16x32xf32>
    %182 = arith.mulf %180, %181 : vector<16x32xf32>
    %183 = vector.broadcast %162 : vector<1x32xf32> to vector<16x32xf32>
    %184 = arith.addf %182, %183 : vector<16x32xf32>
    %c1 = arith.constant 1 : index
    %c0_83 = arith.constant 0 : index
    %c0_84 = arith.constant 0 : index
    %185 = vector.load %arg4[%c1, %c0_83, %c0_84] : memref<2x32x96xbf16, #tpu.memory_space<vmem>>, vector<1x32x96xbf16>
    %186 = vector.shape_cast %185 : vector<1x32x96xbf16> to vector<32x96xbf16>
    %187 = arith.truncf %184 : vector<16x32xf32> to vector<16x32xbf16>
    %cst_85 = arith.constant dense<0.000000e+00> : vector<16x96xf32>
    %188 = tpu.matmul %187, %186, %cst_85 {dimension_numbers = #tpu.dot_dimension_numbers<[1], [0], [0], [1], [0, 0, 1, 1], [], []>} : vector<16x32xbf16>, vector<32x96xbf16>, vector<16x96xf32> -> vector<16x96xf32>
    %c1_86 = arith.constant 1 : index
    %c0_87 = arith.constant 0 : index
    %c0_88 = arith.constant 0 : index
    %189 = vector.load %arg5[%c1_86, %c0_87, %c0_88] : memref<2x1x96xf32, #tpu.memory_space<vmem>>, vector<1x1x96xf32>
    %190 = vector.shape_cast %189 : vector<1x1x96xf32> to vector<1x96xf32>
    %191 = vector.broadcast %190 : vector<1x96xf32> to vector<16x96xf32>
    %192 = arith.addf %188, %191 : vector<16x96xf32>
    %193 = vector.shape_cast %192 : vector<16x96xf32> to vector<2x8x96xf32>
    %194 = vector.extract_strided_slice %193 {offsets = [0, 0, 0], sizes = [2, 8, 32], strides = [1, 1, 1]} : vector<2x8x96xf32> to vector<2x8x32xf32>
    %195 = vector.extract_strided_slice %193 {offsets = [0, 0, 32], sizes = [2, 8, 32], strides = [1, 1, 1]} : vector<2x8x96xf32> to vector<2x8x32xf32>
    %196 = vector.extract_strided_slice %193 {offsets = [0, 0, 64], sizes = [2, 8, 32], strides = [1, 1, 1]} : vector<2x8x96xf32> to vector<2x8x32xf32>
    %197 = vector.extract_strided_slice %194 {offsets = [0, 0, 0], sizes = [2, 8, 8], strides = [1, 1, 1]} : vector<2x8x32xf32> to vector<2x8x8xf32>
    %198 = vector.extract_strided_slice %195 {offsets = [0, 0, 0], sizes = [2, 8, 8], strides = [1, 1, 1]} : vector<2x8x32xf32> to vector<2x8x8xf32>
    %199 = vector.extract_strided_slice %196 {offsets = [0, 0, 0], sizes = [2, 8, 8], strides = [1, 1, 1]} : vector<2x8x32xf32> to vector<2x8x8xf32>
    "tpu.trace_start"() <{level = 10 : i32, message = "bid,bjd->bij"}> : () -> ()
    %cst_89 = arith.constant dense<0.000000e+00> : vector<2x8x8xf32>
    %200 = tpu.matmul %197, %198, %cst_89 {dimension_numbers = #tpu.dot_dimension_numbers<[2], [2], [1], [1], [0, 0, 0, 1, 1, 1], [0], [0]>} : vector<2x8x8xf32>, vector<2x8x8xf32>, vector<2x8x8xf32> -> vector<2x8x8xf32>
    "tpu.trace_stop"() : () -> ()
    %cst_90 = arith.constant 0.353553385 : f32
    %201 = vector.broadcast %cst_90 : f32 to vector<2x8x8xf32>
    %202 = arith.mulf %200, %201 : vector<2x8x8xf32>
    %cst_91 = arith.constant 0.000000e+00 : f32
    %203 = vector.broadcast %cst_91 : f32 to vector<2x1x8xf32>
    %204 = arith.cmpf ogt, %0, %203 : vector<2x1x8xf32>
    %cst_92 = arith.constant -1.000000e+09 : f32
    %205 = vector.shape_cast %204 : vector<2x1x8xi1> to vector<2x1x8xi1>
    %206 = vector.broadcast %205 : vector<2x1x8xi1> to vector<2x8x8xi1>
    %207 = vector.broadcast %cst_92 : f32 to vector<2x8x8xf32>
    %208 = arith.select %206, %202, %207 : vector<2x8x8xi1>, vector<2x8x8xf32>
    %cst_93 = arith.constant dense<0xFF800000> : vector<2x8xf32>
    %209 = vector.multi_reduction <maximumf>, %208, %cst_93 [2] : vector<2x8x8xf32> to vector<2x8xf32>
    %210 = vector.shape_cast %209 : vector<2x8xf32> to vector<2x8x1xf32>
    %211 = vector.broadcast %210 : vector<2x8x1xf32> to vector<2x8x8xf32>
    %212 = arith.subf %208, %211 : vector<2x8x8xf32>
    %213 = math.exp %212 : vector<2x8x8xf32>
    %cst_94 = arith.constant dense<0.000000e+00> : vector<2x8xf32>
    %214 = vector.multi_reduction <add>, %213, %cst_94 [2] : vector<2x8x8xf32> to vector<2x8xf32>
    %215 = vector.shape_cast %214 : vector<2x8xf32> to vector<2x8x1xf32>
    %216 = vector.broadcast %215 : vector<2x8x1xf32> to vector<2x8x8xf32>
    %217 = arith.divf %213, %216 : vector<2x8x8xf32>
    "tpu.trace_start"() <{level = 10 : i32, message = "bij,bjd->bid"}> : () -> ()
    %cst_95 = arith.constant dense<0.000000e+00> : vector<2x8x8xf32>
    %218 = tpu.matmul %217, %199, %cst_95 {dimension_numbers = #tpu.dot_dimension_numbers<[2], [1], [1], [2], [0, 0, 0, 1, 1, 2], [0], [0]>} : vector<2x8x8xf32>, vector<2x8x8xf32>, vector<2x8x8xf32> -> vector<2x8x8xf32>
    "tpu.trace_stop"() : () -> ()
    %219 = vector.extract_strided_slice %194 {offsets = [0, 0, 8], sizes = [2, 8, 8], strides = [1, 1, 1]} : vector<2x8x32xf32> to vector<2x8x8xf32>
    %220 = vector.extract_strided_slice %195 {offsets = [0, 0, 8], sizes = [2, 8, 8], strides = [1, 1, 1]} : vector<2x8x32xf32> to vector<2x8x8xf32>
    %221 = vector.extract_strided_slice %196 {offsets = [0, 0, 8], sizes = [2, 8, 8], strides = [1, 1, 1]} : vector<2x8x32xf32> to vector<2x8x8xf32>
    "tpu.trace_start"() <{level = 10 : i32, message = "bid,bjd->bij"}> : () -> ()
    %cst_96 = arith.constant dense<0.000000e+00> : vector<2x8x8xf32>
    %222 = tpu.matmul %219, %220, %cst_96 {dimension_numbers = #tpu.dot_dimension_numbers<[2], [2], [1], [1], [0, 0, 0, 1, 1, 1], [0], [0]>} : vector<2x8x8xf32>, vector<2x8x8xf32>, vector<2x8x8xf32> -> vector<2x8x8xf32>
    "tpu.trace_stop"() : () -> ()
    %cst_97 = arith.constant 0.353553385 : f32
    %223 = vector.broadcast %cst_97 : f32 to vector<2x8x8xf32>
    %224 = arith.mulf %222, %223 : vector<2x8x8xf32>
    %cst_98 = arith.constant 0.000000e+00 : f32
    %225 = vector.broadcast %cst_98 : f32 to vector<2x1x8xf32>
    %226 = arith.cmpf ogt, %0, %225 : vector<2x1x8xf32>
    %cst_99 = arith.constant -1.000000e+09 : f32
    %227 = vector.shape_cast %226 : vector<2x1x8xi1> to vector<2x1x8xi1>
    %228 = vector.broadcast %227 : vector<2x1x8xi1> to vector<2x8x8xi1>
    %229 = vector.broadcast %cst_99 : f32 to vector<2x8x8xf32>
    %230 = arith.select %228, %224, %229 : vector<2x8x8xi1>, vector<2x8x8xf32>
    %cst_100 = arith.constant dense<0xFF800000> : vector<2x8xf32>
    %231 = vector.multi_reduction <maximumf>, %230, %cst_100 [2] : vector<2x8x8xf32> to vector<2x8xf32>
    %232 = vector.shape_cast %231 : vector<2x8xf32> to vector<2x8x1xf32>
    %233 = vector.broadcast %232 : vector<2x8x1xf32> to vector<2x8x8xf32>
    %234 = arith.subf %230, %233 : vector<2x8x8xf32>
    %235 = math.exp %234 : vector<2x8x8xf32>
    %cst_101 = arith.constant dense<0.000000e+00> : vector<2x8xf32>
    %236 = vector.multi_reduction <add>, %235, %cst_101 [2] : vector<2x8x8xf32> to vector<2x8xf32>
    %237 = vector.shape_cast %236 : vector<2x8xf32> to vector<2x8x1xf32>
    %238 = vector.broadcast %237 : vector<2x8x1xf32> to vector<2x8x8xf32>
    %239 = arith.divf %235, %238 : vector<2x8x8xf32>
    "tpu.trace_start"() <{level = 10 : i32, message = "bij,bjd->bid"}> : () -> ()
    %cst_102 = arith.constant dense<0.000000e+00> : vector<2x8x8xf32>
    %240 = tpu.matmul %239, %221, %cst_102 {dimension_numbers = #tpu.dot_dimension_numbers<[2], [1], [1], [2], [0, 0, 0, 1, 1, 2], [0], [0]>} : vector<2x8x8xf32>, vector<2x8x8xf32>, vector<2x8x8xf32> -> vector<2x8x8xf32>
    "tpu.trace_stop"() : () -> ()
    %241 = vector.extract_strided_slice %194 {offsets = [0, 0, 16], sizes = [2, 8, 8], strides = [1, 1, 1]} : vector<2x8x32xf32> to vector<2x8x8xf32>
    %242 = vector.extract_strided_slice %195 {offsets = [0, 0, 16], sizes = [2, 8, 8], strides = [1, 1, 1]} : vector<2x8x32xf32> to vector<2x8x8xf32>
    %243 = vector.extract_strided_slice %196 {offsets = [0, 0, 16], sizes = [2, 8, 8], strides = [1, 1, 1]} : vector<2x8x32xf32> to vector<2x8x8xf32>
    "tpu.trace_start"() <{level = 10 : i32, message = "bid,bjd->bij"}> : () -> ()
    %cst_103 = arith.constant dense<0.000000e+00> : vector<2x8x8xf32>
    %244 = tpu.matmul %241, %242, %cst_103 {dimension_numbers = #tpu.dot_dimension_numbers<[2], [2], [1], [1], [0, 0, 0, 1, 1, 1], [0], [0]>} : vector<2x8x8xf32>, vector<2x8x8xf32>, vector<2x8x8xf32> -> vector<2x8x8xf32>
    "tpu.trace_stop"() : () -> ()
    %cst_104 = arith.constant 0.353553385 : f32
    %245 = vector.broadcast %cst_104 : f32 to vector<2x8x8xf32>
    %246 = arith.mulf %244, %245 : vector<2x8x8xf32>
    %cst_105 = arith.constant 0.000000e+00 : f32
    %247 = vector.broadcast %cst_105 : f32 to vector<2x1x8xf32>
    %248 = arith.cmpf ogt, %0, %247 : vector<2x1x8xf32>
    %cst_106 = arith.constant -1.000000e+09 : f32
    %249 = vector.shape_cast %248 : vector<2x1x8xi1> to vector<2x1x8xi1>
    %250 = vector.broadcast %249 : vector<2x1x8xi1> to vector<2x8x8xi1>
    %251 = vector.broadcast %cst_106 : f32 to vector<2x8x8xf32>
    %252 = arith.select %250, %246, %251 : vector<2x8x8xi1>, vector<2x8x8xf32>
    %cst_107 = arith.constant dense<0xFF800000> : vector<2x8xf32>
    %253 = vector.multi_reduction <maximumf>, %252, %cst_107 [2] : vector<2x8x8xf32> to vector<2x8xf32>
    %254 = vector.shape_cast %253 : vector<2x8xf32> to vector<2x8x1xf32>
    %255 = vector.broadcast %254 : vector<2x8x1xf32> to vector<2x8x8xf32>
    %256 = arith.subf %252, %255 : vector<2x8x8xf32>
    %257 = math.exp %256 : vector<2x8x8xf32>
    %cst_108 = arith.constant dense<0.000000e+00> : vector<2x8xf32>
    %258 = vector.multi_reduction <add>, %257, %cst_108 [2] : vector<2x8x8xf32> to vector<2x8xf32>
    %259 = vector.shape_cast %258 : vector<2x8xf32> to vector<2x8x1xf32>
    %260 = vector.broadcast %259 : vector<2x8x1xf32> to vector<2x8x8xf32>
    %261 = arith.divf %257, %260 : vector<2x8x8xf32>
    "tpu.trace_start"() <{level = 10 : i32, message = "bij,bjd->bid"}> : () -> ()
    %cst_109 = arith.constant dense<0.000000e+00> : vector<2x8x8xf32>
    %262 = tpu.matmul %261, %243, %cst_109 {dimension_numbers = #tpu.dot_dimension_numbers<[2], [1], [1], [2], [0, 0, 0, 1, 1, 2], [0], [0]>} : vector<2x8x8xf32>, vector<2x8x8xf32>, vector<2x8x8xf32> -> vector<2x8x8xf32>
    "tpu.trace_stop"() : () -> ()
    %263 = vector.extract_strided_slice %194 {offsets = [0, 0, 24], sizes = [2, 8, 8], strides = [1, 1, 1]} : vector<2x8x32xf32> to vector<2x8x8xf32>
    %264 = vector.extract_strided_slice %195 {offsets = [0, 0, 24], sizes = [2, 8, 8], strides = [1, 1, 1]} : vector<2x8x32xf32> to vector<2x8x8xf32>
    %265 = vector.extract_strided_slice %196 {offsets = [0, 0, 24], sizes = [2, 8, 8], strides = [1, 1, 1]} : vector<2x8x32xf32> to vector<2x8x8xf32>
    "tpu.trace_start"() <{level = 10 : i32, message = "bid,bjd->bij"}> : () -> ()
    %cst_110 = arith.constant dense<0.000000e+00> : vector<2x8x8xf32>
    %266 = tpu.matmul %263, %264, %cst_110 {dimension_numbers = #tpu.dot_dimension_numbers<[2], [2], [1], [1], [0, 0, 0, 1, 1, 1], [0], [0]>} : vector<2x8x8xf32>, vector<2x8x8xf32>, vector<2x8x8xf32> -> vector<2x8x8xf32>
    "tpu.trace_stop"() : () -> ()
    %cst_111 = arith.constant 0.353553385 : f32
    %267 = vector.broadcast %cst_111 : f32 to vector<2x8x8xf32>
    %268 = arith.mulf %266, %267 : vector<2x8x8xf32>
    %cst_112 = arith.constant 0.000000e+00 : f32
    %269 = vector.broadcast %cst_112 : f32 to vector<2x1x8xf32>
    %270 = arith.cmpf ogt, %0, %269 : vector<2x1x8xf32>
    %cst_113 = arith.constant -1.000000e+09 : f32
    %271 = vector.shape_cast %270 : vector<2x1x8xi1> to vector<2x1x8xi1>
    %272 = vector.broadcast %271 : vector<2x1x8xi1> to vector<2x8x8xi1>
    %273 = vector.broadcast %cst_113 : f32 to vector<2x8x8xf32>
    %274 = arith.select %272, %268, %273 : vector<2x8x8xi1>, vector<2x8x8xf32>
    %cst_114 = arith.constant dense<0xFF800000> : vector<2x8xf32>
    %275 = vector.multi_reduction <maximumf>, %274, %cst_114 [2] : vector<2x8x8xf32> to vector<2x8xf32>
    %276 = vector.shape_cast %275 : vector<2x8xf32> to vector<2x8x1xf32>
    %277 = vector.broadcast %276 : vector<2x8x1xf32> to vector<2x8x8xf32>
    %278 = arith.subf %274, %277 : vector<2x8x8xf32>
    %279 = math.exp %278 : vector<2x8x8xf32>
    %cst_115 = arith.constant dense<0.000000e+00> : vector<2x8xf32>
    %280 = vector.multi_reduction <add>, %279, %cst_115 [2] : vector<2x8x8xf32> to vector<2x8xf32>
    %281 = vector.shape_cast %280 : vector<2x8xf32> to vector<2x8x1xf32>
    %282 = vector.broadcast %281 : vector<2x8x1xf32> to vector<2x8x8xf32>
    %283 = arith.divf %279, %282 : vector<2x8x8xf32>
    "tpu.trace_start"() <{level = 10 : i32, message = "bij,bjd->bid"}> : () -> ()
    %cst_116 = arith.constant dense<0.000000e+00> : vector<2x8x8xf32>
    %284 = tpu.matmul %283, %265, %cst_116 {dimension_numbers = #tpu.dot_dimension_numbers<[2], [1], [1], [2], [0, 0, 0, 1, 1, 2], [0], [0]>} : vector<2x8x8xf32>, vector<2x8x8xf32>, vector<2x8x8xf32> -> vector<2x8x8xf32>
    "tpu.trace_stop"() : () -> ()
    %285 = tpu.concatenate %218, %240, %262, %284 in 2 : vector<2x8x8xf32>, vector<2x8x8xf32>, vector<2x8x8xf32>, vector<2x8x8xf32> -> vector<2x8x32xf32>
    %286 = vector.shape_cast %285 : vector<2x8x32xf32> to vector<16x32xf32>
    %c1_117 = arith.constant 1 : index
    %c0_118 = arith.constant 0 : index
    %c0_119 = arith.constant 0 : index
    %287 = vector.load %arg6[%c1_117, %c0_118, %c0_119] : memref<2x32x32xbf16, #tpu.memory_space<vmem>>, vector<1x32x32xbf16>
    %288 = vector.shape_cast %287 : vector<1x32x32xbf16> to vector<32x32xbf16>
    %289 = arith.truncf %286 : vector<16x32xf32> to vector<16x32xbf16>
    %cst_120 = arith.constant dense<0.000000e+00> : vector<16x32xf32>
    %290 = tpu.matmul %289, %288, %cst_120 {dimension_numbers = #tpu.dot_dimension_numbers<[1], [0], [0], [1], [0, 0, 1, 1], [], []>} : vector<16x32xbf16>, vector<32x32xbf16>, vector<16x32xf32> -> vector<16x32xf32>
    %c1_121 = arith.constant 1 : index
    %c0_122 = arith.constant 0 : index
    %c0_123 = arith.constant 0 : index
    %291 = vector.load %arg7[%c1_121, %c0_122, %c0_123] : memref<2x1x32xf32, #tpu.memory_space<vmem>>, vector<1x1x32xf32>
    %292 = vector.shape_cast %291 : vector<1x1x32xf32> to vector<1x32xf32>
    %293 = vector.broadcast %292 : vector<1x32xf32> to vector<16x32xf32>
    %294 = arith.addf %290, %293 : vector<16x32xf32>
    %295 = arith.addf %184, %294 : vector<16x32xf32>
    %c1_124 = arith.constant 1 : index
    %c0_125 = arith.constant 0 : index
    %c0_126 = arith.constant 0 : index
    %296 = vector.load %arg8[%c1_124, %c0_125, %c0_126] : memref<2x1x32xf32, #tpu.memory_space<vmem>>, vector<1x1x32xf32>
    %297 = vector.shape_cast %296 : vector<1x1x32xf32> to vector<1x32xf32>
    %c1_127 = arith.constant 1 : index
    %c0_128 = arith.constant 0 : index
    %c0_129 = arith.constant 0 : index
    %298 = vector.load %arg9[%c1_127, %c0_128, %c0_129] : memref<2x1x32xf32, #tpu.memory_space<vmem>>, vector<1x1x32xf32>
    %299 = vector.shape_cast %298 : vector<1x1x32xf32> to vector<1x32xf32>
    %cst_130 = arith.constant dense<0.000000e+00> : vector<16xf32>
    %300 = vector.multi_reduction <add>, %295, %cst_130 [1] : vector<16x32xf32> to vector<16xf32>
    %301 = vector.shape_cast %300 : vector<16xf32> to vector<16x1xf32>
    %cst_131 = arith.constant 3.200000e+01 : f32
    %302 = vector.broadcast %cst_131 : f32 to vector<16x1xf32>
    %303 = arith.divf %301, %302 : vector<16x1xf32>
    %304 = vector.broadcast %303 : vector<16x1xf32> to vector<16x32xf32>
    %305 = arith.subf %295, %304 : vector<16x32xf32>
    %306 = arith.mulf %305, %305 : vector<16x32xf32>
    %cst_132 = arith.constant dense<0.000000e+00> : vector<16xf32>
    %307 = vector.multi_reduction <add>, %306, %cst_132 [1] : vector<16x32xf32> to vector<16xf32>
    %308 = vector.shape_cast %307 : vector<16xf32> to vector<16x1xf32>
    %cst_133 = arith.constant 3.200000e+01 : f32
    %309 = vector.broadcast %cst_133 : f32 to vector<16x1xf32>
    %310 = arith.divf %308, %309 : vector<16x1xf32>
    %311 = vector.broadcast %303 : vector<16x1xf32> to vector<16x32xf32>
    %312 = arith.subf %295, %311 : vector<16x32xf32>
    %cst_134 = arith.constant 9.99999974E-6 : f32
    %313 = vector.broadcast %cst_134 : f32 to vector<16x1xf32>
    %314 = arith.addf %310, %313 : vector<16x1xf32>
    %315 = math.rsqrt %314 : vector<16x1xf32>
    %316 = vector.broadcast %315 : vector<16x1xf32> to vector<16x32xf32>
    %317 = arith.mulf %312, %316 : vector<16x32xf32>
    %318 = vector.broadcast %297 : vector<1x32xf32> to vector<16x32xf32>
    %319 = arith.mulf %317, %318 : vector<16x32xf32>
    %320 = vector.broadcast %299 : vector<1x32xf32> to vector<16x32xf32>
    %321 = arith.addf %319, %320 : vector<16x32xf32>
    %c1_135 = arith.constant 1 : index
    %c0_136 = arith.constant 0 : index
    %c0_137 = arith.constant 0 : index
    %322 = vector.load %arg10[%c1_135, %c0_136, %c0_137] : memref<2x32x128xbf16, #tpu.memory_space<vmem>>, vector<1x32x128xbf16>
    %323 = vector.shape_cast %322 : vector<1x32x128xbf16> to vector<32x128xbf16>
    %324 = arith.truncf %321 : vector<16x32xf32> to vector<16x32xbf16>
    %cst_138 = arith.constant dense<0.000000e+00> : vector<16x128xf32>
    %325 = tpu.matmul %324, %323, %cst_138 {dimension_numbers = #tpu.dot_dimension_numbers<[1], [0], [0], [1], [0, 0, 1, 1], [], []>} : vector<16x32xbf16>, vector<32x128xbf16>, vector<16x128xf32> -> vector<16x128xf32>
    %c1_139 = arith.constant 1 : index
    %c0_140 = arith.constant 0 : index
    %c0_141 = arith.constant 0 : index
    %326 = vector.load %arg11[%c1_139, %c0_140, %c0_141] : memref<2x1x128xf32, #tpu.memory_space<vmem>>, vector<1x1x128xf32>
    %327 = vector.shape_cast %326 : vector<1x1x128xf32> to vector<1x128xf32>
    %328 = vector.broadcast %327 : vector<1x128xf32> to vector<16x128xf32>
    %329 = arith.addf %325, %328 : vector<16x128xf32>
    %cst_142 = arith.constant 0.000000e+00 : f32
    %330 = vector.broadcast %cst_142 : f32 to vector<16x128xf32>
    %331 = arith.maximumf %329, %330 : vector<16x128xf32>
    %c1_143 = arith.constant 1 : index
    %c0_144 = arith.constant 0 : index
    %c0_145 = arith.constant 0 : index
    %332 = vector.load %arg12[%c1_143, %c0_144, %c0_145] : memref<2x128x32xbf16, #tpu.memory_space<vmem>>, vector<1x128x32xbf16>
    %333 = vector.shape_cast %332 : vector<1x128x32xbf16> to vector<128x32xbf16>
    %334 = arith.truncf %331 : vector<16x128xf32> to vector<16x128xbf16>
    %cst_146 = arith.constant dense<0.000000e+00> : vector<16x32xf32>
    %335 = tpu.matmul %334, %333, %cst_146 {dimension_numbers = #tpu.dot_dimension_numbers<[1], [0], [0], [1], [0, 0, 1, 1], [], []>} : vector<16x128xbf16>, vector<128x32xbf16>, vector<16x32xf32> -> vector<16x32xf32>
    %c1_147 = arith.constant 1 : index
    %c0_148 = arith.constant 0 : index
    %c0_149 = arith.constant 0 : index
    %336 = vector.load %arg13[%c1_147, %c0_148, %c0_149] : memref<2x1x32xf32, #tpu.memory_space<vmem>>, vector<1x1x32xf32>
    %337 = vector.shape_cast %336 : vector<1x1x32xf32> to vector<1x32xf32>
    %338 = vector.broadcast %337 : vector<1x32xf32> to vector<16x32xf32>
    %339 = arith.addf %335, %338 : vector<16x32xf32>
    %340 = arith.addf %321, %339 : vector<16x32xf32>
    %c1_150 = arith.constant 1 : index
    %c0_151 = arith.constant 0 : index
    %c0_152 = arith.constant 0 : index
    %341 = vector.load %arg14[%c1_150, %c0_151, %c0_152] : memref<2x1x32xf32, #tpu.memory_space<vmem>>, vector<1x1x32xf32>
    %342 = vector.shape_cast %341 : vector<1x1x32xf32> to vector<1x32xf32>
    %c1_153 = arith.constant 1 : index
    %c0_154 = arith.constant 0 : index
    %c0_155 = arith.constant 0 : index
    %343 = vector.load %arg15[%c1_153, %c0_154, %c0_155] : memref<2x1x32xf32, #tpu.memory_space<vmem>>, vector<1x1x32xf32>
    %344 = vector.shape_cast %343 : vector<1x1x32xf32> to vector<1x32xf32>
    %cst_156 = arith.constant dense<0.000000e+00> : vector<16xf32>
    %345 = vector.multi_reduction <add>, %340, %cst_156 [1] : vector<16x32xf32> to vector<16xf32>
    %346 = vector.shape_cast %345 : vector<16xf32> to vector<16x1xf32>
    %cst_157 = arith.constant 3.200000e+01 : f32
    %347 = vector.broadcast %cst_157 : f32 to vector<16x1xf32>
    %348 = arith.divf %346, %347 : vector<16x1xf32>
    %349 = vector.broadcast %348 : vector<16x1xf32> to vector<16x32xf32>
    %350 = arith.subf %340, %349 : vector<16x32xf32>
    %351 = arith.mulf %350, %350 : vector<16x32xf32>
    %cst_158 = arith.constant dense<0.000000e+00> : vector<16xf32>
    %352 = vector.multi_reduction <add>, %351, %cst_158 [1] : vector<16x32xf32> to vector<16xf32>
    %353 = vector.shape_cast %352 : vector<16xf32> to vector<16x1xf32>
    %cst_159 = arith.constant 3.200000e+01 : f32
    %354 = vector.broadcast %cst_159 : f32 to vector<16x1xf32>
    %355 = arith.divf %353, %354 : vector<16x1xf32>
    %356 = vector.broadcast %348 : vector<16x1xf32> to vector<16x32xf32>
    %357 = arith.subf %340, %356 : vector<16x32xf32>
    %cst_160 = arith.constant 9.99999974E-6 : f32
    %358 = vector.broadcast %cst_160 : f32 to vector<16x1xf32>
    %359 = arith.addf %355, %358 : vector<16x1xf32>
    %360 = math.rsqrt %359 : vector<16x1xf32>
    %361 = vector.broadcast %360 : vector<16x1xf32> to vector<16x32xf32>
    %362 = arith.mulf %357, %361 : vector<16x32xf32>
    %363 = vector.broadcast %342 : vector<1x32xf32> to vector<16x32xf32>
    %364 = arith.mulf %362, %363 : vector<16x32xf32>
    %365 = vector.broadcast %344 : vector<1x32xf32> to vector<16x32xf32>
    %366 = arith.addf %364, %365 : vector<16x32xf32>
    %c0_161 = arith.constant 0 : index
    %c0_162 = arith.constant 0 : index
    %367 = vector.load %arg16[%c0_161, %c0_162] : memref<32x32xbf16, #tpu.memory_space<vmem>>, vector<32x32xbf16>
    %368 = arith.truncf %366 : vector<16x32xf32> to vector<16x32xbf16>
    %cst_163 = arith.constant dense<0.000000e+00> : vector<16x32xf32>
    %369 = tpu.matmul %368, %367, %cst_163 {dimension_numbers = #tpu.dot_dimension_numbers<[1], [0], [0], [1], [0, 0, 1, 1], [], []>} : vector<16x32xbf16>, vector<32x32xbf16>, vector<16x32xf32> -> vector<16x32xf32>
    %c0_164 = arith.constant 0 : index
    %c0_165 = arith.constant 0 : index
    %370 = vector.load %arg17[%c0_164, %c0_165] : memref<1x32xf32, #tpu.memory_space<vmem>>, vector<1x32xf32>
    %371 = vector.broadcast %370 : vector<1x32xf32> to vector<16x32xf32>
    %372 = arith.addf %369, %371 : vector<16x32xf32>
    %373 = vector.shape_cast %372 : vector<16x32xf32> to vector<2x8x32xf32>
    %374 = vector.extract_strided_slice %373 {offsets = [0, 0, 0], sizes = [2, 1, 32], strides = [1, 1, 1]} : vector<2x8x32xf32> to vector<2x1x32xf32>
    %375 = vector.shape_cast %374 : vector<2x1x32xf32> to vector<2x32xf32>
    %c0_166 = arith.constant 0 : index
    %c0_167 = arith.constant 0 : index
    %376 = vector.load %arg18[%c0_166, %c0_167] : memref<32x64xbf16, #tpu.memory_space<vmem>>, vector<32x64xbf16>
    %377 = arith.truncf %375 : vector<2x32xf32> to vector<2x32xbf16>
    %cst_168 = arith.constant dense<0.000000e+00> : vector<2x64xf32>
    %378 = tpu.matmul %377, %376, %cst_168 {dimension_numbers = #tpu.dot_dimension_numbers<[1], [0], [0], [1], [0, 0, 1, 1], [], []>} : vector<2x32xbf16>, vector<32x64xbf16>, vector<2x64xf32> -> vector<2x64xf32>
    %c0_169 = arith.constant 0 : index
    %c0_170 = arith.constant 0 : index
    %379 = vector.load %arg19[%c0_169, %c0_170] : memref<1x64xf32, #tpu.memory_space<vmem>>, vector<1x64xf32>
    %380 = vector.broadcast %379 : vector<1x64xf32> to vector<2x64xf32>
    %381 = arith.addf %378, %380 : vector<2x64xf32>
    %382 = math.tanh %381 : vector<2x64xf32>
    %c0_171 = arith.constant 0 : index
    %c0_172 = arith.constant 0 : index
    %383 = vector.load %arg20[%c0_171, %c0_172] : memref<32x64xbf16, #tpu.memory_space<vmem>>, vector<32x64xbf16>
    %384 = arith.truncf %375 : vector<2x32xf32> to vector<2x32xbf16>
    %cst_173 = arith.constant dense<0.000000e+00> : vector<2x64xf32>
    %385 = tpu.matmul %384, %383, %cst_173 {dimension_numbers = #tpu.dot_dimension_numbers<[1], [0], [0], [1], [0, 0, 1, 1], [], []>} : vector<2x32xbf16>, vector<32x64xbf16>, vector<2x64xf32> -> vector<2x64xf32>
    %c0_174 = arith.constant 0 : index
    %c0_175 = arith.constant 0 : index
    %386 = vector.load %arg21[%c0_174, %c0_175] : memref<1x64xf32, #tpu.memory_space<vmem>>, vector<1x64xf32>
    %387 = vector.broadcast %386 : vector<1x64xf32> to vector<2x64xf32>
    %388 = arith.addf %385, %387 : vector<2x64xf32>
    %389 = math.tanh %388 : vector<2x64xf32>
    %390 = vector.extract_strided_slice %389 {offsets = [0, 0], sizes = [2, 32], strides = [1, 1]} : vector<2x64xf32> to vector<2x32xf32>
    %391 = vector.extract_strided_slice %389 {offsets = [0, 32], sizes = [2, 32], strides = [1, 1]} : vector<2x64xf32> to vector<2x32xf32>
    %392 = vector.extract_strided_slice %382 {offsets = [0, 0], sizes = [2, 32], strides = [1, 1]} : vector<2x64xf32> to vector<2x32xf32>
    %393 = vector.extract_strided_slice %382 {offsets = [0, 32], sizes = [2, 32], strides = [1, 1]} : vector<2x64xf32> to vector<2x32xf32>
    %c0_176 = arith.constant 0 : index
    %c0_177 = arith.constant 0 : index
    %394 = vector.load %arg3[%c0_176, %c0_177] : memref<14x32xf32, #tpu.memory_space<vmem>>, vector<14x32xf32>
    %c0_178 = arith.constant 0 : index
    %c0_179 = arith.constant 0 : index
    %395 = vector.load %arg22[%c0_178, %c0_179] : memref<32x128xbf16, #tpu.memory_space<vmem>>, vector<32x128xbf16>
    %396 = arith.truncf %394 : vector<14x32xf32> to vector<14x32xbf16>
    %cst_180 = arith.constant dense<0.000000e+00> : vector<14x128xf32>
    %397 = tpu.matmul %396, %395, %cst_180 {dimension_numbers = #tpu.dot_dimension_numbers<[1], [0], [0], [1], [0, 0, 1, 1], [], []>} : vector<14x32xbf16>, vector<32x128xbf16>, vector<14x128xf32> -> vector<14x128xf32>
    %c0_181 = arith.constant 0 : index
    %c0_182 = arith.constant 0 : index
    %398 = vector.load %arg23[%c0_181, %c0_182] : memref<1x128xf32, #tpu.memory_space<vmem>>, vector<1x128xf32>
    %399 = vector.broadcast %398 : vector<1x128xf32> to vector<14x128xf32>
    %400 = arith.addf %397, %399 : vector<14x128xf32>
    %c0_183 = arith.constant 0 : index
    %c0_184 = arith.constant 0 : index
    %401 = vector.load %arg27[%c0_183, %c0_184] : memref<32x32xbf16, #tpu.memory_space<vmem>>, vector<32x32xbf16>
    %402 = arith.truncf %372 : vector<16x32xf32> to vector<16x32xbf16>
    %cst_185 = arith.constant dense<0.000000e+00> : vector<16x32xf32>
    %403 = tpu.matmul %402, %401, %cst_185 {dimension_numbers = #tpu.dot_dimension_numbers<[1], [0], [0], [1], [0, 0, 1, 1], [], []>} : vector<16x32xbf16>, vector<32x32xbf16>, vector<16x32xf32> -> vector<16x32xf32>
    %404 = vector.shape_cast %403 : vector<16x32xf32> to vector<2x8x32xf32>
    %c0_186 = arith.constant 0 : index
    %c0_187 = arith.constant 0 : index
    %c0_188 = arith.constant 0 : index
    %405 = vector.load %arg25[%c0_186, %c0_187, %c0_188] : memref<2x32x128xbf16, #tpu.memory_space<vmem>>, vector<1x32x128xbf16>
    %406 = vector.shape_cast %405 : vector<1x32x128xbf16> to vector<32x128xbf16>
    %407 = arith.extf %406 : vector<32x128xbf16> to vector<32x128xf32>
    %c1_189 = arith.constant 1 : index
    %c0_190 = arith.constant 0 : index
    %c0_191 = arith.constant 0 : index
    %408 = vector.load %arg25[%c1_189, %c0_190, %c0_191] : memref<2x32x128xbf16, #tpu.memory_space<vmem>>, vector<1x32x128xbf16>
    %409 = vector.shape_cast %408 : vector<1x32x128xbf16> to vector<32x128xbf16>
    %410 = arith.extf %409 : vector<32x128xbf16> to vector<32x128xf32>
    %c0_192 = arith.constant 0 : index
    %c0_193 = arith.constant 0 : index
    %c0_194 = arith.constant 0 : index
    %411 = vector.load %arg24[%c0_192, %c0_193, %c0_194] : memref<1x32x128xbf16, #tpu.memory_space<vmem>>, vector<1x32x128xbf16>
    %412 = vector.shape_cast %411 : vector<1x32x128xbf16> to vector<32x128xbf16>
    %413 = arith.extf %412 : vector<32x128xbf16> to vector<32x128xf32>
    %c0_195 = arith.constant 0 : index
    %c0_196 = arith.constant 0 : index
    %c0_197 = arith.constant 0 : index
    %414 = vector.load %arg26[%c0_195, %c0_196, %c0_197] : memref<1x1x128xf32, #tpu.memory_space<vmem>>, vector<1x1x128xf32>
    %415 = vector.shape_cast %414 : vector<1x1x128xf32> to vector<1x128xf32>
    %c0_198 = arith.constant 0 : index
    %c0_199 = arith.constant 0 : index
    %416 = vector.load %arg28[%c0_198, %c0_199] : memref<32x32xbf16, #tpu.memory_space<vmem>>, vector<32x32xbf16>
    %c0_200 = arith.constant 0 : index
    %c0_201 = arith.constant 0 : index
    %417 = vector.load %arg29[%c0_200, %c0_201] : memref<32x32xbf16, #tpu.memory_space<vmem>>, vector<32x32xbf16>
    %c0_202 = arith.constant 0 : index
    %c0_203 = arith.constant 0 : index
    %418 = vector.load %arg30[%c0_202, %c0_203] : memref<1x32xf32, #tpu.memory_space<vmem>>, vector<1x32xf32>
    %419 = vector.extract_strided_slice %400 {offsets = [0, 0], sizes = [2, 128], strides = [1, 1]} : vector<14x128xf32> to vector<2x128xf32>
    %cst_204 = arith.constant dense<0.000000e+00> : vector<2x128xf32>
    %420 = tpu.matmul %390, %407, %cst_204 {dimension_numbers = #tpu.dot_dimension_numbers<[1], [0], [0], [1], [0, 0, 1, 1], [], []>} : vector<2x32xf32>, vector<32x128xf32>, vector<2x128xf32> -> vector<2x128xf32>
    %421 = arith.addf %419, %420 : vector<2x128xf32>
    %422 = vector.extract_strided_slice %421 {offsets = [0, 0], sizes = [2, 32], strides = [1, 1]} : vector<2x128xf32> to vector<2x32xf32>
    %423 = arith.negf %422 : vector<2x32xf32>
    %424 = math.exp %423 : vector<2x32xf32>
    %cst_205 = arith.constant 1.000000e+00 : f32
    %425 = vector.broadcast %cst_205 : f32 to vector<2x32xf32>
    %426 = arith.addf %425, %424 : vector<2x32xf32>
    %427 = arith.divf %425, %426 : vector<2x32xf32>
    %428 = vector.extract_strided_slice %421 {offsets = [0, 32], sizes = [2, 32], strides = [1, 1]} : vector<2x128xf32> to vector<2x32xf32>
    %429 = arith.negf %428 : vector<2x32xf32>
    %430 = math.exp %429 : vector<2x32xf32>
    %cst_206 = arith.constant 1.000000e+00 : f32
    %431 = vector.broadcast %cst_206 : f32 to vector<2x32xf32>
    %432 = arith.addf %431, %430 : vector<2x32xf32>
    %433 = arith.divf %431, %432 : vector<2x32xf32>
    %434 = vector.extract_strided_slice %421 {offsets = [0, 64], sizes = [2, 32], strides = [1, 1]} : vector<2x128xf32> to vector<2x32xf32>
    %435 = math.tanh %434 : vector<2x32xf32>
    %436 = vector.extract_strided_slice %421 {offsets = [0, 96], sizes = [2, 32], strides = [1, 1]} : vector<2x128xf32> to vector<2x32xf32>
    %437 = arith.negf %436 : vector<2x32xf32>
    %438 = math.exp %437 : vector<2x32xf32>
    %cst_207 = arith.constant 1.000000e+00 : f32
    %439 = vector.broadcast %cst_207 : f32 to vector<2x32xf32>
    %440 = arith.addf %439, %438 : vector<2x32xf32>
    %441 = arith.divf %439, %440 : vector<2x32xf32>
    %442 = arith.mulf %433, %392 : vector<2x32xf32>
    %443 = arith.mulf %427, %435 : vector<2x32xf32>
    %444 = arith.addf %442, %443 : vector<2x32xf32>
    %445 = math.tanh %444 : vector<2x32xf32>
    %446 = arith.mulf %441, %445 : vector<2x32xf32>
    %cst_208 = arith.constant dense<0.000000e+00> : vector<2x128xf32>
    %447 = tpu.matmul %446, %413, %cst_208 {dimension_numbers = #tpu.dot_dimension_numbers<[1], [0], [0], [1], [0, 0, 1, 1], [], []>} : vector<2x32xf32>, vector<32x128xf32>, vector<2x128xf32> -> vector<2x128xf32>
    %cst_209 = arith.constant dense<0.000000e+00> : vector<2x128xf32>
    %448 = tpu.matmul %391, %410, %cst_209 {dimension_numbers = #tpu.dot_dimension_numbers<[1], [0], [0], [1], [0, 0, 1, 1], [], []>} : vector<2x32xf32>, vector<32x128xf32>, vector<2x128xf32> -> vector<2x128xf32>
    %449 = arith.addf %447, %448 : vector<2x128xf32>
    %450 = vector.broadcast %415 : vector<1x128xf32> to vector<2x128xf32>
    %451 = arith.addf %449, %450 : vector<2x128xf32>
    %452 = vector.extract_strided_slice %451 {offsets = [0, 0], sizes = [2, 32], strides = [1, 1]} : vector<2x128xf32> to vector<2x32xf32>
    %453 = arith.negf %452 : vector<2x32xf32>
    %454 = math.exp %453 : vector<2x32xf32>
    %cst_210 = arith.constant 1.000000e+00 : f32
    %455 = vector.broadcast %cst_210 : f32 to vector<2x32xf32>
    %456 = arith.addf %455, %454 : vector<2x32xf32>
    %457 = arith.divf %455, %456 : vector<2x32xf32>
    %458 = vector.extract_strided_slice %451 {offsets = [0, 32], sizes = [2, 32], strides = [1, 1]} : vector<2x128xf32> to vector<2x32xf32>
    %459 = arith.negf %458 : vector<2x32xf32>
    %460 = math.exp %459 : vector<2x32xf32>
    %cst_211 = arith.constant 1.000000e+00 : f32
    %461 = vector.broadcast %cst_211 : f32 to vector<2x32xf32>
    %462 = arith.addf %461, %460 : vector<2x32xf32>
    %463 = arith.divf %461, %462 : vector<2x32xf32>
    %464 = vector.extract_strided_slice %451 {offsets = [0, 64], sizes = [2, 32], strides = [1, 1]} : vector<2x128xf32> to vector<2x32xf32>
    %465 = math.tanh %464 : vector<2x32xf32>
    %466 = vector.extract_strided_slice %451 {offsets = [0, 96], sizes = [2, 32], strides = [1, 1]} : vector<2x128xf32> to vector<2x32xf32>
    %467 = arith.negf %466 : vector<2x32xf32>
    %468 = math.exp %467 : vector<2x32xf32>
    %cst_212 = arith.constant 1.000000e+00 : f32
    %469 = vector.broadcast %cst_212 : f32 to vector<2x32xf32>
    %470 = arith.addf %469, %468 : vector<2x32xf32>
    %471 = arith.divf %469, %470 : vector<2x32xf32>
    %472 = arith.mulf %463, %393 : vector<2x32xf32>
    %473 = arith.mulf %457, %465 : vector<2x32xf32>
    %474 = arith.addf %472, %473 : vector<2x32xf32>
    %475 = math.tanh %474 : vector<2x32xf32>
    %476 = arith.mulf %471, %475 : vector<2x32xf32>
    %477 = vector.shape_cast %476 : vector<2x32xf32> to vector<2x1x32xf32>
    "tpu.trace_start"() <{level = 10 : i32, message = "bih,bsh->bis"}> : () -> ()
    %cst_213 = arith.constant dense<0.000000e+00> : vector<2x1x8xf32>
    %478 = tpu.matmul %477, %404, %cst_213 {dimension_numbers = #tpu.dot_dimension_numbers<[2], [2], [1], [1], [0, 0, 0, 1, 1, 1], [0], [0]>} : vector<2x1x32xf32>, vector<2x8x32xf32>, vector<2x1x8xf32> -> vector<2x1x8xf32>
    "tpu.trace_stop"() : () -> ()
    %479 = vector.shape_cast %478 : vector<2x1x8xf32> to vector<2x8xf32>
    %cst_214 = arith.constant dense<0xFF800000> : vector<2xf32>
    %480 = vector.multi_reduction <maximumf>, %479, %cst_214 [1] : vector<2x8xf32> to vector<2xf32>
    %481 = vector.shape_cast %480 : vector<2xf32> to vector<2x1xf32>
    %482 = vector.broadcast %481 : vector<2x1xf32> to vector<2x8xf32>
    %483 = arith.subf %479, %482 : vector<2x8xf32>
    %484 = math.exp %483 : vector<2x8xf32>
    %cst_215 = arith.constant dense<0.000000e+00> : vector<2xf32>
    %485 = vector.multi_reduction <add>, %484, %cst_215 [1] : vector<2x8xf32> to vector<2xf32>
    %486 = vector.shape_cast %485 : vector<2xf32> to vector<2x1xf32>
    %487 = vector.broadcast %486 : vector<2x1xf32> to vector<2x8xf32>
    %488 = arith.divf %484, %487 : vector<2x8xf32>
    %489 = vector.shape_cast %488 : vector<2x8xf32> to vector<2x1x8xf32>
    "tpu.trace_start"() <{level = 10 : i32, message = "bis,bsh->bih"}> : () -> ()
    %cst_216 = arith.constant dense<0.000000e+00> : vector<2x1x32xf32>
    %490 = tpu.matmul %489, %373, %cst_216 {dimension_numbers = #tpu.dot_dimension_numbers<[2], [1], [1], [2], [0, 0, 0, 1, 1, 2], [0], [0]>} : vector<2x1x8xf32>, vector<2x8x32xf32>, vector<2x1x32xf32> -> vector<2x1x32xf32>
    "tpu.trace_stop"() : () -> ()
    %491 = vector.shape_cast %490 : vector<2x1x32xf32> to vector<2x32xf32>
    %492 = arith.truncf %491 : vector<2x32xf32> to vector<2x32xbf16>
    %cst_217 = arith.constant dense<0.000000e+00> : vector<2x32xf32>
    %493 = tpu.matmul %492, %416, %cst_217 {dimension_numbers = #tpu.dot_dimension_numbers<[1], [0], [0], [1], [0, 0, 1, 1], [], []>} : vector<2x32xbf16>, vector<32x32xbf16>, vector<2x32xf32> -> vector<2x32xf32>
    %494 = arith.truncf %476 : vector<2x32xf32> to vector<2x32xbf16>
    %cst_218 = arith.constant dense<0.000000e+00> : vector<2x32xf32>
    %495 = tpu.matmul %494, %417, %cst_218 {dimension_numbers = #tpu.dot_dimension_numbers<[1], [0], [0], [1], [0, 0, 1, 1], [], []>} : vector<2x32xbf16>, vector<32x32xbf16>, vector<2x32xf32> -> vector<2x32xf32>
    %496 = arith.addf %493, %495 : vector<2x32xf32>
    %497 = vector.broadcast %418 : vector<1x32xf32> to vector<2x32xf32>
    %498 = arith.addf %496, %497 : vector<2x32xf32>
    %499 = math.tanh %498 : vector<2x32xf32>
    %c0_219 = arith.constant 0 : index
    %c0_220 = arith.constant 0 : index
    %500 = vector.load %arg34[%c0_219, %c0_220] : memref<14x32xf32, #tpu.memory_space<vmem>>, vector<2x32xf32>
    tpu.vector_store %arg34[%c0_219, %c0_220], %499 {strides = array<i32>} : memref<14x32xf32, #tpu.memory_space<vmem>>, vector<2x32xf32>,
    %501 = vector.extract_strided_slice %400 {offsets = [2, 0], sizes = [2, 128], strides = [1, 1]} : vector<14x128xf32> to vector<2x128xf32>
    %cst_221 = arith.constant dense<0.000000e+00> : vector<2x128xf32>
    %502 = tpu.matmul %446, %407, %cst_221 {dimension_numbers = #tpu.dot_dimension_numbers<[1], [0], [0], [1], [0, 0, 1, 1], [], []>} : vector<2x32xf32>, vector<32x128xf32>, vector<2x128xf32> -> vector<2x128xf32>
    %503 = arith.addf %501, %502 : vector<2x128xf32>
    %504 = vector.extract_strided_slice %503 {offsets = [0, 0], sizes = [2, 32], strides = [1, 1]} : vector<2x128xf32> to vector<2x32xf32>
    %505 = arith.negf %504 : vector<2x32xf32>
    %506 = math.exp %505 : vector<2x32xf32>
    %cst_222 = arith.constant 1.000000e+00 : f32
    %507 = vector.broadcast %cst_222 : f32 to vector<2x32xf32>
    %508 = arith.addf %507, %506 : vector<2x32xf32>
    %509 = arith.divf %507, %508 : vector<2x32xf32>
    %510 = vector.extract_strided_slice %503 {offsets = [0, 32], sizes = [2, 32], strides = [1, 1]} : vector<2x128xf32> to vector<2x32xf32>
    %511 = arith.negf %510 : vector<2x32xf32>
    %512 = math.exp %511 : vector<2x32xf32>
    %cst_223 = arith.constant 1.000000e+00 : f32
    %513 = vector.broadcast %cst_223 : f32 to vector<2x32xf32>
    %514 = arith.addf %513, %512 : vector<2x32xf32>
    %515 = arith.divf %513, %514 : vector<2x32xf32>
    %516 = vector.extract_strided_slice %503 {offsets = [0, 64], sizes = [2, 32], strides = [1, 1]} : vector<2x128xf32> to vector<2x32xf32>
    %517 = math.tanh %516 : vector<2x32xf32>
    %518 = vector.extract_strided_slice %503 {offsets = [0, 96], sizes = [2, 32], strides = [1, 1]} : vector<2x128xf32> to vector<2x32xf32>
    %519 = arith.negf %518 : vector<2x32xf32>
    %520 = math.exp %519 : vector<2x32xf32>
    %cst_224 = arith.constant 1.000000e+00 : f32
    %521 = vector.broadcast %cst_224 : f32 to vector<2x32xf32>
    %522 = arith.addf %521, %520 : vector<2x32xf32>
    %523 = arith.divf %521, %522 : vector<2x32xf32>
    %524 = arith.mulf %515, %444 : vector<2x32xf32>
    %525 = arith.mulf %509, %517 : vector<2x32xf32>
    %526 = arith.addf %524, %525 : vector<2x32xf32>
    %527 = math.tanh %526 : vector<2x32xf32>
    %528 = arith.mulf %523, %527 : vector<2x32xf32>
    %cst_225 = arith.constant dense<0.000000e+00> : vector<2x128xf32>
    %529 = tpu.matmul %528, %413, %cst_225 {dimension_numbers = #tpu.dot_dimension_numbers<[1], [0], [0], [1], [0, 0, 1, 1], [], []>} : vector<2x32xf32>, vector<32x128xf32>, vector<2x128xf32> -> vector<2x128xf32>
    %cst_226 = arith.constant dense<0.000000e+00> : vector<2x128xf32>
    %530 = tpu.matmul %476, %410, %cst_226 {dimension_numbers = #tpu.dot_dimension_numbers<[1], [0], [0], [1], [0, 0, 1, 1], [], []>} : vector<2x32xf32>, vector<32x128xf32>, vector<2x128xf32> -> vector<2x128xf32>
    %531 = arith.addf %529, %530 : vector<2x128xf32>
    %532 = vector.broadcast %415 : vector<1x128xf32> to vector<2x128xf32>
    %533 = arith.addf %531, %532 : vector<2x128xf32>
    %534 = vector.extract_strided_slice %533 {offsets = [0, 0], sizes = [2, 32], strides = [1, 1]} : vector<2x128xf32> to vector<2x32xf32>
    %535 = arith.negf %534 : vector<2x32xf32>
    %536 = math.exp %535 : vector<2x32xf32>
    %cst_227 = arith.constant 1.000000e+00 : f32
    %537 = vector.broadcast %cst_227 : f32 to vector<2x32xf32>
    %538 = arith.addf %537, %536 : vector<2x32xf32>
    %539 = arith.divf %537, %538 : vector<2x32xf32>
    %540 = vector.extract_strided_slice %533 {offsets = [0, 32], sizes = [2, 32], strides = [1, 1]} : vector<2x128xf32> to vector<2x32xf32>
    %541 = arith.negf %540 : vector<2x32xf32>
    %542 = math.exp %541 : vector<2x32xf32>
    %cst_228 = arith.constant 1.000000e+00 : f32
    %543 = vector.broadcast %cst_228 : f32 to vector<2x32xf32>
    %544 = arith.addf %543, %542 : vector<2x32xf32>
    %545 = arith.divf %543, %544 : vector<2x32xf32>
    %546 = vector.extract_strided_slice %533 {offsets = [0, 64], sizes = [2, 32], strides = [1, 1]} : vector<2x128xf32> to vector<2x32xf32>
    %547 = math.tanh %546 : vector<2x32xf32>
    %548 = vector.extract_strided_slice %533 {offsets = [0, 96], sizes = [2, 32], strides = [1, 1]} : vector<2x128xf32> to vector<2x32xf32>
    %549 = arith.negf %548 : vector<2x32xf32>
    %550 = math.exp %549 : vector<2x32xf32>
    %cst_229 = arith.constant 1.000000e+00 : f32
    %551 = vector.broadcast %cst_229 : f32 to vector<2x32xf32>
    %552 = arith.addf %551, %550 : vector<2x32xf32>
    %553 = arith.divf %551, %552 : vector<2x32xf32>
    %554 = arith.mulf %545, %474 : vector<2x32xf32>
    %555 = arith.mulf %539, %547 : vector<2x32xf32>
    %556 = arith.addf %554, %555 : vector<2x32xf32>
    %557 = math.tanh %556 : vector<2x32xf32>
    %558 = arith.mulf %553, %557 : vector<2x32xf32>
    %559 = vector.shape_cast %558 : vector<2x32xf32> to vector<2x1x32xf32>
    "tpu.trace_start"() <{level = 10 : i32, message = "bih,bsh->bis"}> : () -> ()
    %cst_230 = arith.constant dense<0.000000e+00> : vector<2x1x8xf32>
    %560 = tpu.matmul %559, %404, %cst_230 {dimension_numbers = #tpu.dot_dimension_numbers<[2], [2], [1], [1], [0, 0, 0, 1, 1, 1], [0], [0]>} : vector<2x1x32xf32>, vector<2x8x32xf32>, vector<2x1x8xf32> -> vector<2x1x8xf32>
    "tpu.trace_stop"() : () -> ()
    %561 = vector.shape_cast %560 : vector<2x1x8xf32> to vector<2x8xf32>
    %cst_231 = arith.constant dense<0xFF800000> : vector<2xf32>
    %562 = vector.multi_reduction <maximumf>, %561, %cst_231 [1] : vector<2x8xf32> to vector<2xf32>
    %563 = vector.shape_cast %562 : vector<2xf32> to vector<2x1xf32>
    %564 = vector.broadcast %563 : vector<2x1xf32> to vector<2x8xf32>
    %565 = arith.subf %561, %564 : vector<2x8xf32>
    %566 = math.exp %565 : vector<2x8xf32>
    %cst_232 = arith.constant dense<0.000000e+00> : vector<2xf32>
    %567 = vector.multi_reduction <add>, %566, %cst_232 [1] : vector<2x8xf32> to vector<2xf32>
    %568 = vector.shape_cast %567 : vector<2xf32> to vector<2x1xf32>
    %569 = vector.broadcast %568 : vector<2x1xf32> to vector<2x8xf32>
    %570 = arith.divf %566, %569 : vector<2x8xf32>
    %571 = vector.shape_cast %570 : vector<2x8xf32> to vector<2x1x8xf32>
    "tpu.trace_start"() <{level = 10 : i32, message = "bis,bsh->bih"}> : () -> ()
    %cst_233 = arith.constant dense<0.000000e+00> : vector<2x1x32xf32>
    %572 = tpu.matmul %571, %373, %cst_233 {dimension_numbers = #tpu.dot_dimension_numbers<[2], [1], [1], [2], [0, 0, 0, 1, 1, 2], [0], [0]>} : vector<2x1x8xf32>, vector<2x8x32xf32>, vector<2x1x32xf32> -> vector<2x1x32xf32>
    "tpu.trace_stop"() : () -> ()
    %573 = vector.shape_cast %572 : vector<2x1x32xf32> to vector<2x32xf32>
    %574 = arith.truncf %573 : vector<2x32xf32> to vector<2x32xbf16>
    %cst_234 = arith.constant dense<0.000000e+00> : vector<2x32xf32>
    %575 = tpu.matmul %574, %416, %cst_234 {dimension_numbers = #tpu.dot_dimension_numbers<[1], [0], [0], [1], [0, 0, 1, 1], [], []>} : vector<2x32xbf16>, vector<32x32xbf16>, vector<2x32xf32> -> vector<2x32xf32>
    %576 = arith.truncf %558 : vector<2x32xf32> to vector<2x32xbf16>
    %cst_235 = arith.constant dense<0.000000e+00> : vector<2x32xf32>
    %577 = tpu.matmul %576, %417, %cst_235 {dimension_numbers = #tpu.dot_dimension_numbers<[1], [0], [0], [1], [0, 0, 1, 1], [], []>} : vector<2x32xbf16>, vector<32x32xbf16>, vector<2x32xf32> -> vector<2x32xf32>
    %578 = arith.addf %575, %577 : vector<2x32xf32>
    %579 = vector.broadcast %418 : vector<1x32xf32> to vector<2x32xf32>
    %580 = arith.addf %578, %579 : vector<2x32xf32>
    %581 = math.tanh %580 : vector<2x32xf32>
    %c2 = arith.constant 2 : index
    %c0_236 = arith.constant 0 : index
    %582 = vector.load %arg34[%c2, %c0_236] : memref<14x32xf32, #tpu.memory_space<vmem>>, vector<2x32xf32>
    tpu.vector_store %arg34[%c2, %c0_236], %581 {strides = array<i32>} : memref<14x32xf32, #tpu.memory_space<vmem>>, vector<2x32xf32>,
    %583 = vector.extract_strided_slice %400 {offsets = [4, 0], sizes = [2, 128], strides = [1, 1]} : vector<14x128xf32> to vector<2x128xf32>
    %cst_237 = arith.constant dense<0.000000e+00> : vector<2x128xf32>
    %584 = tpu.matmul %528, %407, %cst_237 {dimension_numbers = #tpu.dot_dimension_numbers<[1], [0], [0], [1], [0, 0, 1, 1], [], []>} : vector<2x32xf32>, vector<32x128xf32>, vector<2x128xf32> -> vector<2x128xf32>
    %585 = arith.addf %583, %584 : vector<2x128xf32>
    %586 = vector.extract_strided_slice %585 {offsets = [0, 0], sizes = [2, 32], strides = [1, 1]} : vector<2x128xf32> to vector<2x32xf32>
    %587 = arith.negf %586 : vector<2x32xf32>
    %588 = math.exp %587 : vector<2x32xf32>
    %cst_238 = arith.constant 1.000000e+00 : f32
    %589 = vector.broadcast %cst_238 : f32 to vector<2x32xf32>
    %590 = arith.addf %589, %588 : vector<2x32xf32>
    %591 = arith.divf %589, %590 : vector<2x32xf32>
    %592 = vector.extract_strided_slice %585 {offsets = [0, 32], sizes = [2, 32], strides = [1, 1]} : vector<2x128xf32> to vector<2x32xf32>
    %593 = arith.negf %592 : vector<2x32xf32>
    %594 = math.exp %593 : vector<2x32xf32>
    %cst_239 = arith.constant 1.000000e+00 : f32
    %595 = vector.broadcast %cst_239 : f32 to vector<2x32xf32>
    %596 = arith.addf %595, %594 : vector<2x32xf32>
    %597 = arith.divf %595, %596 : vector<2x32xf32>
    %598 = vector.extract_strided_slice %585 {offsets = [0, 64], sizes = [2, 32], strides = [1, 1]} : vector<2x128xf32> to vector<2x32xf32>
    %599 = math.tanh %598 : vector<2x32xf32>
    %600 = vector.extract_strided_slice %585 {offsets = [0, 96], sizes = [2, 32], strides = [1, 1]} : vector<2x128xf32> to vector<2x32xf32>
    %601 = arith.negf %600 : vector<2x32xf32>
    %602 = math.exp %601 : vector<2x32xf32>
    %cst_240 = arith.constant 1.000000e+00 : f32
    %603 = vector.broadcast %cst_240 : f32 to vector<2x32xf32>
    %604 = arith.addf %603, %602 : vector<2x32xf32>
    %605 = arith.divf %603, %604 : vector<2x32xf32>
    %606 = arith.mulf %597, %526 : vector<2x32xf32>
    %607 = arith.mulf %591, %599 : vector<2x32xf32>
    %608 = arith.addf %606, %607 : vector<2x32xf32>
    %609 = math.tanh %608 : vector<2x32xf32>
    %610 = arith.mulf %605, %609 : vector<2x32xf32>
    %cst_241 = arith.constant dense<0.000000e+00> : vector<2x128xf32>
    %611 = tpu.matmul %610, %413, %cst_241 {dimension_numbers = #tpu.dot_dimension_numbers<[1], [0], [0], [1], [0, 0, 1, 1], [], []>} : vector<2x32xf32>, vector<32x128xf32>, vector<2x128xf32> -> vector<2x128xf32>
    %cst_242 = arith.constant dense<0.000000e+00> : vector<2x128xf32>
    %612 = tpu.matmul %558, %410, %cst_242 {dimension_numbers = #tpu.dot_dimension_numbers<[1], [0], [0], [1], [0, 0, 1, 1], [], []>} : vector<2x32xf32>, vector<32x128xf32>, vector<2x128xf32> -> vector<2x128xf32>
    %613 = arith.addf %611, %612 : vector<2x128xf32>
    %614 = vector.broadcast %415 : vector<1x128xf32> to vector<2x128xf32>
    %615 = arith.addf %613, %614 : vector<2x128xf32>
    %616 = vector.extract_strided_slice %615 {offsets = [0, 0], sizes = [2, 32], strides = [1, 1]} : vector<2x128xf32> to vector<2x32xf32>
    %617 = arith.negf %616 : vector<2x32xf32>
    %618 = math.exp %617 : vector<2x32xf32>
    %cst_243 = arith.constant 1.000000e+00 : f32
    %619 = vector.broadcast %cst_243 : f32 to vector<2x32xf32>
    %620 = arith.addf %619, %618 : vector<2x32xf32>
    %621 = arith.divf %619, %620 : vector<2x32xf32>
    %622 = vector.extract_strided_slice %615 {offsets = [0, 32], sizes = [2, 32], strides = [1, 1]} : vector<2x128xf32> to vector<2x32xf32>
    %623 = arith.negf %622 : vector<2x32xf32>
    %624 = math.exp %623 : vector<2x32xf32>
    %cst_244 = arith.constant 1.000000e+00 : f32
    %625 = vector.broadcast %cst_244 : f32 to vector<2x32xf32>
    %626 = arith.addf %625, %624 : vector<2x32xf32>
    %627 = arith.divf %625, %626 : vector<2x32xf32>
    %628 = vector.extract_strided_slice %615 {offsets = [0, 64], sizes = [2, 32], strides = [1, 1]} : vector<2x128xf32> to vector<2x32xf32>
    %629 = math.tanh %628 : vector<2x32xf32>
    %630 = vector.extract_strided_slice %615 {offsets = [0, 96], sizes = [2, 32], strides = [1, 1]} : vector<2x128xf32> to vector<2x32xf32>
    %631 = arith.negf %630 : vector<2x32xf32>
    %632 = math.exp %631 : vector<2x32xf32>
    %cst_245 = arith.constant 1.000000e+00 : f32
    %633 = vector.broadcast %cst_245 : f32 to vector<2x32xf32>
    %634 = arith.addf %633, %632 : vector<2x32xf32>
    %635 = arith.divf %633, %634 : vector<2x32xf32>
    %636 = arith.mulf %627, %556 : vector<2x32xf32>
    %637 = arith.mulf %621, %629 : vector<2x32xf32>
    %638 = arith.addf %636, %637 : vector<2x32xf32>
    %639 = math.tanh %638 : vector<2x32xf32>
    %640 = arith.mulf %635, %639 : vector<2x32xf32>
    %641 = vector.shape_cast %640 : vector<2x32xf32> to vector<2x1x32xf32>
    "tpu.trace_start"() <{level = 10 : i32, message = "bih,bsh->bis"}> : () -> ()
    %cst_246 = arith.constant dense<0.000000e+00> : vector<2x1x8xf32>
    %642 = tpu.matmul %641, %404, %cst_246 {dimension_numbers = #tpu.dot_dimension_numbers<[2], [2], [1], [1], [0, 0, 0, 1, 1, 1], [0], [0]>} : vector<2x1x32xf32>, vector<2x8x32xf32>, vector<2x1x8xf32> -> vector<2x1x8xf32>
    "tpu.trace_stop"() : () -> ()
    %643 = vector.shape_cast %642 : vector<2x1x8xf32> to vector<2x8xf32>
    %cst_247 = arith.constant dense<0xFF800000> : vector<2xf32>
    %644 = vector.multi_reduction <maximumf>, %643, %cst_247 [1] : vector<2x8xf32> to vector<2xf32>
    %645 = vector.shape_cast %644 : vector<2xf32> to vector<2x1xf32>
    %646 = vector.broadcast %645 : vector<2x1xf32> to vector<2x8xf32>
    %647 = arith.subf %643, %646 : vector<2x8xf32>
    %648 = math.exp %647 : vector<2x8xf32>
    %cst_248 = arith.constant dense<0.000000e+00> : vector<2xf32>
    %649 = vector.multi_reduction <add>, %648, %cst_248 [1] : vector<2x8xf32> to vector<2xf32>
    %650 = vector.shape_cast %649 : vector<2xf32> to vector<2x1xf32>
    %651 = vector.broadcast %650 : vector<2x1xf32> to vector<2x8xf32>
    %652 = arith.divf %648, %651 : vector<2x8xf32>
    %653 = vector.shape_cast %652 : vector<2x8xf32> to vector<2x1x8xf32>
    "tpu.trace_start"() <{level = 10 : i32, message = "bis,bsh->bih"}> : () -> ()
    %cst_249 = arith.constant dense<0.000000e+00> : vector<2x1x32xf32>
    %654 = tpu.matmul %653, %373, %cst_249 {dimension_numbers = #tpu.dot_dimension_numbers<[2], [1], [1], [2], [0, 0, 0, 1, 1, 2], [0], [0]>} : vector<2x1x8xf32>, vector<2x8x32xf32>, vector<2x1x32xf32> -> vector<2x1x32xf32>
    "tpu.trace_stop"() : () -> ()
    %655 = vector.shape_cast %654 : vector<2x1x32xf32> to vector<2x32xf32>
    %656 = arith.truncf %655 : vector<2x32xf32> to vector<2x32xbf16>
    %cst_250 = arith.constant dense<0.000000e+00> : vector<2x32xf32>
    %657 = tpu.matmul %656, %416, %cst_250 {dimension_numbers = #tpu.dot_dimension_numbers<[1], [0], [0], [1], [0, 0, 1, 1], [], []>} : vector<2x32xbf16>, vector<32x32xbf16>, vector<2x32xf32> -> vector<2x32xf32>
    %658 = arith.truncf %640 : vector<2x32xf32> to vector<2x32xbf16>
    %cst_251 = arith.constant dense<0.000000e+00> : vector<2x32xf32>
    %659 = tpu.matmul %658, %417, %cst_251 {dimension_numbers = #tpu.dot_dimension_numbers<[1], [0], [0], [1], [0, 0, 1, 1], [], []>} : vector<2x32xbf16>, vector<32x32xbf16>, vector<2x32xf32> -> vector<2x32xf32>
    %660 = arith.addf %657, %659 : vector<2x32xf32>
    %661 = vector.broadcast %418 : vector<1x32xf32> to vector<2x32xf32>
    %662 = arith.addf %660, %661 : vector<2x32xf32>
    %663 = math.tanh %662 : vector<2x32xf32>
    %c4 = arith.constant 4 : index
    %c0_252 = arith.constant 0 : index
    %664 = vector.load %arg34[%c4, %c0_252] : memref<14x32xf32, #tpu.memory_space<vmem>>, vector<2x32xf32>
    tpu.vector_store %arg34[%c4, %c0_252], %663 {strides = array<i32>} : memref<14x32xf32, #tpu.memory_space<vmem>>, vector<2x32xf32>,
    %665 = vector.extract_strided_slice %400 {offsets = [6, 0], sizes = [2, 128], strides = [1, 1]} : vector<14x128xf32> to vector<2x128xf32>
    %cst_253 = arith.constant dense<0.000000e+00> : vector<2x128xf32>
    %666 = tpu.matmul %610, %407, %cst_253 {dimension_numbers = #tpu.dot_dimension_numbers<[1], [0], [0], [1], [0, 0, 1, 1], [], []>} : vector<2x32xf32>, vector<32x128xf32>, vector<2x128xf32> -> vector<2x128xf32>
    %667 = arith.addf %665, %666 : vector<2x128xf32>
    %668 = vector.extract_strided_slice %667 {offsets = [0, 0], sizes = [2, 32], strides = [1, 1]} : vector<2x128xf32> to vector<2x32xf32>
    %669 = arith.negf %668 : vector<2x32xf32>
    %670 = math.exp %669 : vector<2x32xf32>
    %cst_254 = arith.constant 1.000000e+00 : f32
    %671 = vector.broadcast %cst_254 : f32 to vector<2x32xf32>
    %672 = arith.addf %671, %670 : vector<2x32xf32>
    %673 = arith.divf %671, %672 : vector<2x32xf32>
    %674 = vector.extract_strided_slice %667 {offsets = [0, 32], sizes = [2, 32], strides = [1, 1]} : vector<2x128xf32> to vector<2x32xf32>
    %675 = arith.negf %674 : vector<2x32xf32>
    %676 = math.exp %675 : vector<2x32xf32>
    %cst_255 = arith.constant 1.000000e+00 : f32
    %677 = vector.broadcast %cst_255 : f32 to vector<2x32xf32>
    %678 = arith.addf %677, %676 : vector<2x32xf32>
    %679 = arith.divf %677, %678 : vector<2x32xf32>
    %680 = vector.extract_strided_slice %667 {offsets = [0, 64], sizes = [2, 32], strides = [1, 1]} : vector<2x128xf32> to vector<2x32xf32>
    %681 = math.tanh %680 : vector<2x32xf32>
    %682 = vector.extract_strided_slice %667 {offsets = [0, 96], sizes = [2, 32], strides = [1, 1]} : vector<2x128xf32> to vector<2x32xf32>
    %683 = arith.negf %682 : vector<2x32xf32>
    %684 = math.exp %683 : vector<2x32xf32>
    %cst_256 = arith.constant 1.000000e+00 : f32
    %685 = vector.broadcast %cst_256 : f32 to vector<2x32xf32>
    %686 = arith.addf %685, %684 : vector<2x32xf32>
    %687 = arith.divf %685, %686 : vector<2x32xf32>
    %688 = arith.mulf %679, %608 : vector<2x32xf32>
    %689 = arith.mulf %673, %681 : vector<2x32xf32>
    %690 = arith.addf %688, %689 : vector<2x32xf32>
    %691 = math.tanh %690 : vector<2x32xf32>
    %692 = arith.mulf %687, %691 : vector<2x32xf32>
    %cst_257 = arith.constant dense<0.000000e+00> : vector<2x128xf32>
    %693 = tpu.matmul %692, %413, %cst_257 {dimension_numbers = #tpu.dot_dimension_numbers<[1], [0], [0], [1], [0, 0, 1, 1], [], []>} : vector<2x32xf32>, vector<32x128xf32>, vector<2x128xf32> -> vector<2x128xf32>
    %cst_258 = arith.constant dense<0.000000e+00> : vector<2x128xf32>
    %694 = tpu.matmul %640, %410, %cst_258 {dimension_numbers = #tpu.dot_dimension_numbers<[1], [0], [0], [1], [0, 0, 1, 1], [], []>} : vector<2x32xf32>, vector<32x128xf32>, vector<2x128xf32> -> vector<2x128xf32>
    %695 = arith.addf %693, %694 : vector<2x128xf32>
    %696 = vector.broadcast %415 : vector<1x128xf32> to vector<2x128xf32>
    %697 = arith.addf %695, %696 : vector<2x128xf32>
    %698 = vector.extract_strided_slice %697 {offsets = [0, 0], sizes = [2, 32], strides = [1, 1]} : vector<2x128xf32> to vector<2x32xf32>
    %699 = arith.negf %698 : vector<2x32xf32>
    %700 = math.exp %699 : vector<2x32xf32>
    %cst_259 = arith.constant 1.000000e+00 : f32
    %701 = vector.broadcast %cst_259 : f32 to vector<2x32xf32>
    %702 = arith.addf %701, %700 : vector<2x32xf32>
    %703 = arith.divf %701, %702 : vector<2x32xf32>
    %704 = vector.extract_strided_slice %697 {offsets = [0, 32], sizes = [2, 32], strides = [1, 1]} : vector<2x128xf32> to vector<2x32xf32>
    %705 = arith.negf %704 : vector<2x32xf32>
    %706 = math.exp %705 : vector<2x32xf32>
    %cst_260 = arith.constant 1.000000e+00 : f32
    %707 = vector.broadcast %cst_260 : f32 to vector<2x32xf32>
    %708 = arith.addf %707, %706 : vector<2x32xf32>
    %709 = arith.divf %707, %708 : vector<2x32xf32>
    %710 = vector.extract_strided_slice %697 {offsets = [0, 64], sizes = [2, 32], strides = [1, 1]} : vector<2x128xf32> to vector<2x32xf32>
    %711 = math.tanh %710 : vector<2x32xf32>
    %712 = vector.extract_strided_slice %697 {offsets = [0, 96], sizes = [2, 32], strides = [1, 1]} : vector<2x128xf32> to vector<2x32xf32>
    %713 = arith.negf %712 : vector<2x32xf32>
    %714 = math.exp %713 : vector<2x32xf32>
    %cst_261 = arith.constant 1.000000e+00 : f32
    %715 = vector.broadcast %cst_261 : f32 to vector<2x32xf32>
    %716 = arith.addf %715, %714 : vector<2x32xf32>
    %717 = arith.divf %715, %716 : vector<2x32xf32>
    %718 = arith.mulf %709, %638 : vector<2x32xf32>
    %719 = arith.mulf %703, %711 : vector<2x32xf32>
    %720 = arith.addf %718, %719 : vector<2x32xf32>
    %721 = math.tanh %720 : vector<2x32xf32>
    %722 = arith.mulf %717, %721 : vector<2x32xf32>
    %723 = vector.shape_cast %722 : vector<2x32xf32> to vector<2x1x32xf32>
    "tpu.trace_start"() <{level = 10 : i32, message = "bih,bsh->bis"}> : () -> ()
    %cst_262 = arith.constant dense<0.000000e+00> : vector<2x1x8xf32>
    %724 = tpu.matmul %723, %404, %cst_262 {dimension_numbers = #tpu.dot_dimension_numbers<[2], [2], [1], [1], [0, 0, 0, 1, 1, 1], [0], [0]>} : vector<2x1x32xf32>, vector<2x8x32xf32>, vector<2x1x8xf32> -> vector<2x1x8xf32>
    "tpu.trace_stop"() : () -> ()
    %725 = vector.shape_cast %724 : vector<2x1x8xf32> to vector<2x8xf32>
    %cst_263 = arith.constant dense<0xFF800000> : vector<2xf32>
    %726 = vector.multi_reduction <maximumf>, %725, %cst_263 [1] : vector<2x8xf32> to vector<2xf32>
    %727 = vector.shape_cast %726 : vector<2xf32> to vector<2x1xf32>
    %728 = vector.broadcast %727 : vector<2x1xf32> to vector<2x8xf32>
    %729 = arith.subf %725, %728 : vector<2x8xf32>
    %730 = math.exp %729 : vector<2x8xf32>
    %cst_264 = arith.constant dense<0.000000e+00> : vector<2xf32>
    %731 = vector.multi_reduction <add>, %730, %cst_264 [1] : vector<2x8xf32> to vector<2xf32>
    %732 = vector.shape_cast %731 : vector<2xf32> to vector<2x1xf32>
    %733 = vector.broadcast %732 : vector<2x1xf32> to vector<2x8xf32>
    %734 = arith.divf %730, %733 : vector<2x8xf32>
    %735 = vector.shape_cast %734 : vector<2x8xf32> to vector<2x1x8xf32>
    "tpu.trace_start"() <{level = 10 : i32, message = "bis,bsh->bih"}> : () -> ()
    %cst_265 = arith.constant dense<0.000000e+00> : vector<2x1x32xf32>
    %736 = tpu.matmul %735, %373, %cst_265 {dimension_numbers = #tpu.dot_dimension_numbers<[2], [1], [1], [2], [0, 0, 0, 1, 1, 2], [0], [0]>} : vector<2x1x8xf32>, vector<2x8x32xf32>, vector<2x1x32xf32> -> vector<2x1x32xf32>
    "tpu.trace_stop"() : () -> ()
    %737 = vector.shape_cast %736 : vector<2x1x32xf32> to vector<2x32xf32>
    %738 = arith.truncf %737 : vector<2x32xf32> to vector<2x32xbf16>
    %cst_266 = arith.constant dense<0.000000e+00> : vector<2x32xf32>
    %739 = tpu.matmul %738, %416, %cst_266 {dimension_numbers = #tpu.dot_dimension_numbers<[1], [0], [0], [1], [0, 0, 1, 1], [], []>} : vector<2x32xbf16>, vector<32x32xbf16>, vector<2x32xf32> -> vector<2x32xf32>
    %740 = arith.truncf %722 : vector<2x32xf32> to vector<2x32xbf16>
    %cst_267 = arith.constant dense<0.000000e+00> : vector<2x32xf32>
    %741 = tpu.matmul %740, %417, %cst_267 {dimension_numbers = #tpu.dot_dimension_numbers<[1], [0], [0], [1], [0, 0, 1, 1], [], []>} : vector<2x32xbf16>, vector<32x32xbf16>, vector<2x32xf32> -> vector<2x32xf32>
    %742 = arith.addf %739, %741 : vector<2x32xf32>
    %743 = vector.broadcast %418 : vector<1x32xf32> to vector<2x32xf32>
    %744 = arith.addf %742, %743 : vector<2x32xf32>
    %745 = math.tanh %744 : vector<2x32xf32>
    %c6 = arith.constant 6 : index
    %c0_268 = arith.constant 0 : index
    %746 = vector.load %arg34[%c6, %c0_268] : memref<14x32xf32, #tpu.memory_space<vmem>>, vector<2x32xf32>
    tpu.vector_store %arg34[%c6, %c0_268], %745 {strides = array<i32>} : memref<14x32xf32, #tpu.memory_space<vmem>>, vector<2x32xf32>,
    %747 = vector.extract_strided_slice %400 {offsets = [8, 0], sizes = [2, 128], strides = [1, 1]} : vector<14x128xf32> to vector<2x128xf32>
    %cst_269 = arith.constant dense<0.000000e+00> : vector<2x128xf32>
    %748 = tpu.matmul %692, %407, %cst_269 {dimension_numbers = #tpu.dot_dimension_numbers<[1], [0], [0], [1], [0, 0, 1, 1], [], []>} : vector<2x32xf32>, vector<32x128xf32>, vector<2x128xf32> -> vector<2x128xf32>
    %749 = arith.addf %747, %748 : vector<2x128xf32>
    %750 = vector.extract_strided_slice %749 {offsets = [0, 0], sizes = [2, 32], strides = [1, 1]} : vector<2x128xf32> to vector<2x32xf32>
    %751 = arith.negf %750 : vector<2x32xf32>
    %752 = math.exp %751 : vector<2x32xf32>
    %cst_270 = arith.constant 1.000000e+00 : f32
    %753 = vector.broadcast %cst_270 : f32 to vector<2x32xf32>
    %754 = arith.addf %753, %752 : vector<2x32xf32>
    %755 = arith.divf %753, %754 : vector<2x32xf32>
    %756 = vector.extract_strided_slice %749 {offsets = [0, 32], sizes = [2, 32], strides = [1, 1]} : vector<2x128xf32> to vector<2x32xf32>
    %757 = arith.negf %756 : vector<2x32xf32>
    %758 = math.exp %757 : vector<2x32xf32>
    %cst_271 = arith.constant 1.000000e+00 : f32
    %759 = vector.broadcast %cst_271 : f32 to vector<2x32xf32>
    %760 = arith.addf %759, %758 : vector<2x32xf32>
    %761 = arith.divf %759, %760 : vector<2x32xf32>
    %762 = vector.extract_strided_slice %749 {offsets = [0, 64], sizes = [2, 32], strides = [1, 1]} : vector<2x128xf32> to vector<2x32xf32>
    %763 = math.tanh %762 : vector<2x32xf32>
    %764 = vector.extract_strided_slice %749 {offsets = [0, 96], sizes = [2, 32], strides = [1, 1]} : vector<2x128xf32> to vector<2x32xf32>
    %765 = arith.negf %764 : vector<2x32xf32>
    %766 = math.exp %765 : vector<2x32xf32>
    %cst_272 = arith.constant 1.000000e+00 : f32
    %767 = vector.broadcast %cst_272 : f32 to vector<2x32xf32>
    %768 = arith.addf %767, %766 : vector<2x32xf32>
    %769 = arith.divf %767, %768 : vector<2x32xf32>
    %770 = arith.mulf %761, %690 : vector<2x32xf32>
    %771 = arith.mulf %755, %763 : vector<2x32xf32>
    %772 = arith.addf %770, %771 : vector<2x32xf32>
    %773 = math.tanh %772 : vector<2x32xf32>
    %774 = arith.mulf %769, %773 : vector<2x32xf32>
    %cst_273 = arith.constant dense<0.000000e+00> : vector<2x128xf32>
    %775 = tpu.matmul %774, %413, %cst_273 {dimension_numbers = #tpu.dot_dimension_numbers<[1], [0], [0], [1], [0, 0, 1, 1], [], []>} : vector<2x32xf32>, vector<32x128xf32>, vector<2x128xf32> -> vector<2x128xf32>
    %cst_274 = arith.constant dense<0.000000e+00> : vector<2x128xf32>
    %776 = tpu.matmul %722, %410, %cst_274 {dimension_numbers = #tpu.dot_dimension_numbers<[1], [0], [0], [1], [0, 0, 1, 1], [], []>} : vector<2x32xf32>, vector<32x128xf32>, vector<2x128xf32> -> vector<2x128xf32>
    %777 = arith.addf %775, %776 : vector<2x128xf32>
    %778 = vector.broadcast %415 : vector<1x128xf32> to vector<2x128xf32>
    %779 = arith.addf %777, %778 : vector<2x128xf32>
    %780 = vector.extract_strided_slice %779 {offsets = [0, 0], sizes = [2, 32], strides = [1, 1]} : vector<2x128xf32> to vector<2x32xf32>
    %781 = arith.negf %780 : vector<2x32xf32>
    %782 = math.exp %781 : vector<2x32xf32>
    %cst_275 = arith.constant 1.000000e+00 : f32
    %783 = vector.broadcast %cst_275 : f32 to vector<2x32xf32>
    %784 = arith.addf %783, %782 : vector<2x32xf32>
    %785 = arith.divf %783, %784 : vector<2x32xf32>
    %786 = vector.extract_strided_slice %779 {offsets = [0, 32], sizes = [2, 32], strides = [1, 1]} : vector<2x128xf32> to vector<2x32xf32>
    %787 = arith.negf %786 : vector<2x32xf32>
    %788 = math.exp %787 : vector<2x32xf32>
    %cst_276 = arith.constant 1.000000e+00 : f32
    %789 = vector.broadcast %cst_276 : f32 to vector<2x32xf32>
    %790 = arith.addf %789, %788 : vector<2x32xf32>
    %791 = arith.divf %789, %790 : vector<2x32xf32>
    %792 = vector.extract_strided_slice %779 {offsets = [0, 64], sizes = [2, 32], strides = [1, 1]} : vector<2x128xf32> to vector<2x32xf32>
    %793 = math.tanh %792 : vector<2x32xf32>
    %794 = vector.extract_strided_slice %779 {offsets = [0, 96], sizes = [2, 32], strides = [1, 1]} : vector<2x128xf32> to vector<2x32xf32>
    %795 = arith.negf %794 : vector<2x32xf32>
    %796 = math.exp %795 : vector<2x32xf32>
    %cst_277 = arith.constant 1.000000e+00 : f32
    %797 = vector.broadcast %cst_277 : f32 to vector<2x32xf32>
    %798 = arith.addf %797, %796 : vector<2x32xf32>
    %799 = arith.divf %797, %798 : vector<2x32xf32>
    %800 = arith.mulf %791, %720 : vector<2x32xf32>
    %801 = arith.mulf %785, %793 : vector<2x32xf32>
    %802 = arith.addf %800, %801 : vector<2x32xf32>
    %803 = math.tanh %802 : vector<2x32xf32>
    %804 = arith.mulf %799, %803 : vector<2x32xf32>
    %805 = vector.shape_cast %804 : vector<2x32xf32> to vector<2x1x32xf32>
    "tpu.trace_start"() <{level = 10 : i32, message = "bih,bsh->bis"}> : () -> ()
    %cst_278 = arith.constant dense<0.000000e+00> : vector<2x1x8xf32>
    %806 = tpu.matmul %805, %404, %cst_278 {dimension_numbers = #tpu.dot_dimension_numbers<[2], [2], [1], [1], [0, 0, 0, 1, 1, 1], [0], [0]>} : vector<2x1x32xf32>, vector<2x8x32xf32>, vector<2x1x8xf32> -> vector<2x1x8xf32>
    "tpu.trace_stop"() : () -> ()
    %807 = vector.shape_cast %806 : vector<2x1x8xf32> to vector<2x8xf32>
    %cst_279 = arith.constant dense<0xFF800000> : vector<2xf32>
    %808 = vector.multi_reduction <maximumf>, %807, %cst_279 [1] : vector<2x8xf32> to vector<2xf32>
    %809 = vector.shape_cast %808 : vector<2xf32> to vector<2x1xf32>
    %810 = vector.broadcast %809 : vector<2x1xf32> to vector<2x8xf32>
    %811 = arith.subf %807, %810 : vector<2x8xf32>
    %812 = math.exp %811 : vector<2x8xf32>
    %cst_280 = arith.constant dense<0.000000e+00> : vector<2xf32>
    %813 = vector.multi_reduction <add>, %812, %cst_280 [1] : vector<2x8xf32> to vector<2xf32>
    %814 = vector.shape_cast %813 : vector<2xf32> to vector<2x1xf32>
    %815 = vector.broadcast %814 : vector<2x1xf32> to vector<2x8xf32>
    %816 = arith.divf %812, %815 : vector<2x8xf32>
    %817 = vector.shape_cast %816 : vector<2x8xf32> to vector<2x1x8xf32>
    "tpu.trace_start"() <{level = 10 : i32, message = "bis,bsh->bih"}> : () -> ()
    %cst_281 = arith.constant dense<0.000000e+00> : vector<2x1x32xf32>
    %818 = tpu.matmul %817, %373, %cst_281 {dimension_numbers = #tpu.dot_dimension_numbers<[2], [1], [1], [2], [0, 0, 0, 1, 1, 2], [0], [0]>} : vector<2x1x8xf32>, vector<2x8x32xf32>, vector<2x1x32xf32> -> vector<2x1x32xf32>
    "tpu.trace_stop"() : () -> ()
    %819 = vector.shape_cast %818 : vector<2x1x32xf32> to vector<2x32xf32>
    %820 = arith.truncf %819 : vector<2x32xf32> to vector<2x32xbf16>
    %cst_282 = arith.constant dense<0.000000e+00> : vector<2x32xf32>
    %821 = tpu.matmul %820, %416, %cst_282 {dimension_numbers = #tpu.dot_dimension_numbers<[1], [0], [0], [1], [0, 0, 1, 1], [], []>} : vector<2x32xbf16>, vector<32x32xbf16>, vector<2x32xf32> -> vector<2x32xf32>
    %822 = arith.truncf %804 : vector<2x32xf32> to vector<2x32xbf16>
    %cst_283 = arith.constant dense<0.000000e+00> : vector<2x32xf32>
    %823 = tpu.matmul %822, %417, %cst_283 {dimension_numbers = #tpu.dot_dimension_numbers<[1], [0], [0], [1], [0, 0, 1, 1], [], []>} : vector<2x32xbf16>, vector<32x32xbf16>, vector<2x32xf32> -> vector<2x32xf32>
    %824 = arith.addf %821, %823 : vector<2x32xf32>
    %825 = vector.broadcast %418 : vector<1x32xf32> to vector<2x32xf32>
    %826 = arith.addf %824, %825 : vector<2x32xf32>
    %827 = math.tanh %826 : vector<2x32xf32>
    %c8 = arith.constant 8 : index
    %c0_284 = arith.constant 0 : index
    %828 = vector.load %arg34[%c8, %c0_284] : memref<14x32xf32, #tpu.memory_space<vmem>>, vector<2x32xf32>
    tpu.vector_store %arg34[%c8, %c0_284], %827 {strides = array<i32>} : memref<14x32xf32, #tpu.memory_space<vmem>>, vector<2x32xf32>,
    %829 = vector.extract_strided_slice %400 {offsets = [10, 0], sizes = [2, 128], strides = [1, 1]} : vector<14x128xf32> to vector<2x128xf32>
    %cst_285 = arith.constant dense<0.000000e+00> : vector<2x128xf32>
    %830 = tpu.matmul %774, %407, %cst_285 {dimension_numbers = #tpu.dot_dimension_numbers<[1], [0], [0], [1], [0, 0, 1, 1], [], []>} : vector<2x32xf32>, vector<32x128xf32>, vector<2x128xf32> -> vector<2x128xf32>
    %831 = arith.addf %829, %830 : vector<2x128xf32>
    %832 = vector.extract_strided_slice %831 {offsets = [0, 0], sizes = [2, 32], strides = [1, 1]} : vector<2x128xf32> to vector<2x32xf32>
    %833 = arith.negf %832 : vector<2x32xf32>
    %834 = math.exp %833 : vector<2x32xf32>
    %cst_286 = arith.constant 1.000000e+00 : f32
    %835 = vector.broadcast %cst_286 : f32 to vector<2x32xf32>
    %836 = arith.addf %835, %834 : vector<2x32xf32>
    %837 = arith.divf %835, %836 : vector<2x32xf32>
    %838 = vector.extract_strided_slice %831 {offsets = [0, 32], sizes = [2, 32], strides = [1, 1]} : vector<2x128xf32> to vector<2x32xf32>
    %839 = arith.negf %838 : vector<2x32xf32>
    %840 = math.exp %839 : vector<2x32xf32>
    %cst_287 = arith.constant 1.000000e+00 : f32
    %841 = vector.broadcast %cst_287 : f32 to vector<2x32xf32>
    %842 = arith.addf %841, %840 : vector<2x32xf32>
    %843 = arith.divf %841, %842 : vector<2x32xf32>
    %844 = vector.extract_strided_slice %831 {offsets = [0, 64], sizes = [2, 32], strides = [1, 1]} : vector<2x128xf32> to vector<2x32xf32>
    %845 = math.tanh %844 : vector<2x32xf32>
    %846 = vector.extract_strided_slice %831 {offsets = [0, 96], sizes = [2, 32], strides = [1, 1]} : vector<2x128xf32> to vector<2x32xf32>
    %847 = arith.negf %846 : vector<2x32xf32>
    %848 = math.exp %847 : vector<2x32xf32>
    %cst_288 = arith.constant 1.000000e+00 : f32
    %849 = vector.broadcast %cst_288 : f32 to vector<2x32xf32>
    %850 = arith.addf %849, %848 : vector<2x32xf32>
    %851 = arith.divf %849, %850 : vector<2x32xf32>
    %852 = arith.mulf %843, %772 : vector<2x32xf32>
    %853 = arith.mulf %837, %845 : vector<2x32xf32>
    %854 = arith.addf %852, %853 : vector<2x32xf32>
    %855 = math.tanh %854 : vector<2x32xf32>
    %856 = arith.mulf %851, %855 : vector<2x32xf32>
    %cst_289 = arith.constant dense<0.000000e+00> : vector<2x128xf32>
    %857 = tpu.matmul %856, %413, %cst_289 {dimension_numbers = #tpu.dot_dimension_numbers<[1], [0], [0], [1], [0, 0, 1, 1], [], []>} : vector<2x32xf32>, vector<32x128xf32>, vector<2x128xf32> -> vector<2x128xf32>
    %cst_290 = arith.constant dense<0.000000e+00> : vector<2x128xf32>
    %858 = tpu.matmul %804, %410, %cst_290 {dimension_numbers = #tpu.dot_dimension_numbers<[1], [0], [0], [1], [0, 0, 1, 1], [], []>} : vector<2x32xf32>, vector<32x128xf32>, vector<2x128xf32> -> vector<2x128xf32>
    %859 = arith.addf %857, %858 : vector<2x128xf32>
    %860 = vector.broadcast %415 : vector<1x128xf32> to vector<2x128xf32>
    %861 = arith.addf %859, %860 : vector<2x128xf32>
    %862 = vector.extract_strided_slice %861 {offsets = [0, 0], sizes = [2, 32], strides = [1, 1]} : vector<2x128xf32> to vector<2x32xf32>
    %863 = arith.negf %862 : vector<2x32xf32>
    %864 = math.exp %863 : vector<2x32xf32>
    %cst_291 = arith.constant 1.000000e+00 : f32
    %865 = vector.broadcast %cst_291 : f32 to vector<2x32xf32>
    %866 = arith.addf %865, %864 : vector<2x32xf32>
    %867 = arith.divf %865, %866 : vector<2x32xf32>
    %868 = vector.extract_strided_slice %861 {offsets = [0, 32], sizes = [2, 32], strides = [1, 1]} : vector<2x128xf32> to vector<2x32xf32>
    %869 = arith.negf %868 : vector<2x32xf32>
    %870 = math.exp %869 : vector<2x32xf32>
    %cst_292 = arith.constant 1.000000e+00 : f32
    %871 = vector.broadcast %cst_292 : f32 to vector<2x32xf32>
    %872 = arith.addf %871, %870 : vector<2x32xf32>
    %873 = arith.divf %871, %872 : vector<2x32xf32>
    %874 = vector.extract_strided_slice %861 {offsets = [0, 64], sizes = [2, 32], strides = [1, 1]} : vector<2x128xf32> to vector<2x32xf32>
    %875 = math.tanh %874 : vector<2x32xf32>
    %876 = vector.extract_strided_slice %861 {offsets = [0, 96], sizes = [2, 32], strides = [1, 1]} : vector<2x128xf32> to vector<2x32xf32>
    %877 = arith.negf %876 : vector<2x32xf32>
    %878 = math.exp %877 : vector<2x32xf32>
    %cst_293 = arith.constant 1.000000e+00 : f32
    %879 = vector.broadcast %cst_293 : f32 to vector<2x32xf32>
    %880 = arith.addf %879, %878 : vector<2x32xf32>
    %881 = arith.divf %879, %880 : vector<2x32xf32>
    %882 = arith.mulf %873, %802 : vector<2x32xf32>
    %883 = arith.mulf %867, %875 : vector<2x32xf32>
    %884 = arith.addf %882, %883 : vector<2x32xf32>
    %885 = math.tanh %884 : vector<2x32xf32>
    %886 = arith.mulf %881, %885 : vector<2x32xf32>
    %887 = vector.shape_cast %886 : vector<2x32xf32> to vector<2x1x32xf32>
    "tpu.trace_start"() <{level = 10 : i32, message = "bih,bsh->bis"}> : () -> ()
    %cst_294 = arith.constant dense<0.000000e+00> : vector<2x1x8xf32>
    %888 = tpu.matmul %887, %404, %cst_294 {dimension_numbers = #tpu.dot_dimension_numbers<[2], [2], [1], [1], [0, 0, 0, 1, 1, 1], [0], [0]>} : vector<2x1x32xf32>, vector<2x8x32xf32>, vector<2x1x8xf32> -> vector<2x1x8xf32>
    "tpu.trace_stop"() : () -> ()
    %889 = vector.shape_cast %888 : vector<2x1x8xf32> to vector<2x8xf32>
    %cst_295 = arith.constant dense<0xFF800000> : vector<2xf32>
    %890 = vector.multi_reduction <maximumf>, %889, %cst_295 [1] : vector<2x8xf32> to vector<2xf32>
    %891 = vector.shape_cast %890 : vector<2xf32> to vector<2x1xf32>
    %892 = vector.broadcast %891 : vector<2x1xf32> to vector<2x8xf32>
    %893 = arith.subf %889, %892 : vector<2x8xf32>
    %894 = math.exp %893 : vector<2x8xf32>
    %cst_296 = arith.constant dense<0.000000e+00> : vector<2xf32>
    %895 = vector.multi_reduction <add>, %894, %cst_296 [1] : vector<2x8xf32> to vector<2xf32>
    %896 = vector.shape_cast %895 : vector<2xf32> to vector<2x1xf32>
    %897 = vector.broadcast %896 : vector<2x1xf32> to vector<2x8xf32>
    %898 = arith.divf %894, %897 : vector<2x8xf32>
    %899 = vector.shape_cast %898 : vector<2x8xf32> to vector<2x1x8xf32>
    "tpu.trace_start"() <{level = 10 : i32, message = "bis,bsh->bih"}> : () -> ()
    %cst_297 = arith.constant dense<0.000000e+00> : vector<2x1x32xf32>
    %900 = tpu.matmul %899, %373, %cst_297 {dimension_numbers = #tpu.dot_dimension_numbers<[2], [1], [1], [2], [0, 0, 0, 1, 1, 2], [0], [0]>} : vector<2x1x8xf32>, vector<2x8x32xf32>, vector<2x1x32xf32> -> vector<2x1x32xf32>
    "tpu.trace_stop"() : () -> ()
    %901 = vector.shape_cast %900 : vector<2x1x32xf32> to vector<2x32xf32>
    %902 = arith.truncf %901 : vector<2x32xf32> to vector<2x32xbf16>
    %cst_298 = arith.constant dense<0.000000e+00> : vector<2x32xf32>
    %903 = tpu.matmul %902, %416, %cst_298 {dimension_numbers = #tpu.dot_dimension_numbers<[1], [0], [0], [1], [0, 0, 1, 1], [], []>} : vector<2x32xbf16>, vector<32x32xbf16>, vector<2x32xf32> -> vector<2x32xf32>
    %904 = arith.truncf %886 : vector<2x32xf32> to vector<2x32xbf16>
    %cst_299 = arith.constant dense<0.000000e+00> : vector<2x32xf32>
    %905 = tpu.matmul %904, %417, %cst_299 {dimension_numbers = #tpu.dot_dimension_numbers<[1], [0], [0], [1], [0, 0, 1, 1], [], []>} : vector<2x32xbf16>, vector<32x32xbf16>, vector<2x32xf32> -> vector<2x32xf32>
    %906 = arith.addf %903, %905 : vector<2x32xf32>
    %907 = vector.broadcast %418 : vector<1x32xf32> to vector<2x32xf32>
    %908 = arith.addf %906, %907 : vector<2x32xf32>
    %909 = math.tanh %908 : vector<2x32xf32>
    %c10 = arith.constant 10 : index
    %c0_300 = arith.constant 0 : index
    %910 = vector.load %arg34[%c10, %c0_300] : memref<14x32xf32, #tpu.memory_space<vmem>>, vector<2x32xf32>
    tpu.vector_store %arg34[%c10, %c0_300], %909 {strides = array<i32>} : memref<14x32xf32, #tpu.memory_space<vmem>>, vector<2x32xf32>,
    %911 = vector.extract_strided_slice %400 {offsets = [12, 0], sizes = [2, 128], strides = [1, 1]} : vector<14x128xf32> to vector<2x128xf32>
    %cst_301 = arith.constant dense<0.000000e+00> : vector<2x128xf32>
    %912 = tpu.matmul %856, %407, %cst_301 {dimension_numbers = #tpu.dot_dimension_numbers<[1], [0], [0], [1], [0, 0, 1, 1], [], []>} : vector<2x32xf32>, vector<32x128xf32>, vector<2x128xf32> -> vector<2x128xf32>
    %913 = arith.addf %911, %912 : vector<2x128xf32>
    %914 = vector.extract_strided_slice %913 {offsets = [0, 0], sizes = [2, 32], strides = [1, 1]} : vector<2x128xf32> to vector<2x32xf32>
    %915 = arith.negf %914 : vector<2x32xf32>
    %916 = math.exp %915 : vector<2x32xf32>
    %cst_302 = arith.constant 1.000000e+00 : f32
    %917 = vector.broadcast %cst_302 : f32 to vector<2x32xf32>
    %918 = arith.addf %917, %916 : vector<2x32xf32>
    %919 = arith.divf %917, %918 : vector<2x32xf32>
    %920 = vector.extract_strided_slice %913 {offsets = [0, 32], sizes = [2, 32], strides = [1, 1]} : vector<2x128xf32> to vector<2x32xf32>
    %921 = arith.negf %920 : vector<2x32xf32>
    %922 = math.exp %921 : vector<2x32xf32>
    %cst_303 = arith.constant 1.000000e+00 : f32
    %923 = vector.broadcast %cst_303 : f32 to vector<2x32xf32>
    %924 = arith.addf %923, %922 : vector<2x32xf32>
    %925 = arith.divf %923, %924 : vector<2x32xf32>
    %926 = vector.extract_strided_slice %913 {offsets = [0, 64], sizes = [2, 32], strides = [1, 1]} : vector<2x128xf32> to vector<2x32xf32>
    %927 = math.tanh %926 : vector<2x32xf32>
    %928 = vector.extract_strided_slice %913 {offsets = [0, 96], sizes = [2, 32], strides = [1, 1]} : vector<2x128xf32> to vector<2x32xf32>
    %929 = arith.negf %928 : vector<2x32xf32>
    %930 = math.exp %929 : vector<2x32xf32>
    %cst_304 = arith.constant 1.000000e+00 : f32
    %931 = vector.broadcast %cst_304 : f32 to vector<2x32xf32>
    %932 = arith.addf %931, %930 : vector<2x32xf32>
    %933 = arith.divf %931, %932 : vector<2x32xf32>
    %934 = arith.mulf %925, %854 : vector<2x32xf32>
    %935 = arith.mulf %919, %927 : vector<2x32xf32>
    %936 = arith.addf %934, %935 : vector<2x32xf32>
    %937 = math.tanh %936 : vector<2x32xf32>
    %938 = arith.mulf %933, %937 : vector<2x32xf32>
    %cst_305 = arith.constant dense<0.000000e+00> : vector<2x128xf32>
    %939 = tpu.matmul %938, %413, %cst_305 {dimension_numbers = #tpu.dot_dimension_numbers<[1], [0], [0], [1], [0, 0, 1, 1], [], []>} : vector<2x32xf32>, vector<32x128xf32>, vector<2x128xf32> -> vector<2x128xf32>
    %cst_306 = arith.constant dense<0.000000e+00> : vector<2x128xf32>
    %940 = tpu.matmul %886, %410, %cst_306 {dimension_numbers = #tpu.dot_dimension_numbers<[1], [0], [0], [1], [0, 0, 1, 1], [], []>} : vector<2x32xf32>, vector<32x128xf32>, vector<2x128xf32> -> vector<2x128xf32>
    %941 = arith.addf %939, %940 : vector<2x128xf32>
    %942 = vector.broadcast %415 : vector<1x128xf32> to vector<2x128xf32>
    %943 = arith.addf %941, %942 : vector<2x128xf32>
    %944 = vector.extract_strided_slice %943 {offsets = [0, 0], sizes = [2, 32], strides = [1, 1]} : vector<2x128xf32> to vector<2x32xf32>
    %945 = arith.negf %944 : vector<2x32xf32>
    %946 = math.exp %945 : vector<2x32xf32>
    %cst_307 = arith.constant 1.000000e+00 : f32
    %947 = vector.broadcast %cst_307 : f32 to vector<2x32xf32>
    %948 = arith.addf %947, %946 : vector<2x32xf32>
    %949 = arith.divf %947, %948 : vector<2x32xf32>
    %950 = vector.extract_strided_slice %943 {offsets = [0, 32], sizes = [2, 32], strides = [1, 1]} : vector<2x128xf32> to vector<2x32xf32>
    %951 = arith.negf %950 : vector<2x32xf32>
    %952 = math.exp %951 : vector<2x32xf32>
    %cst_308 = arith.constant 1.000000e+00 : f32
    %953 = vector.broadcast %cst_308 : f32 to vector<2x32xf32>
    %954 = arith.addf %953, %952 : vector<2x32xf32>
    %955 = arith.divf %953, %954 : vector<2x32xf32>
    %956 = vector.extract_strided_slice %943 {offsets = [0, 64], sizes = [2, 32], strides = [1, 1]} : vector<2x128xf32> to vector<2x32xf32>
    %957 = math.tanh %956 : vector<2x32xf32>
    %958 = vector.extract_strided_slice %943 {offsets = [0, 96], sizes = [2, 32], strides = [1, 1]} : vector<2x128xf32> to vector<2x32xf32>
    %959 = arith.negf %958 : vector<2x32xf32>
    %960 = math.exp %959 : vector<2x32xf32>
    %cst_309 = arith.constant 1.000000e+00 : f32
    %961 = vector.broadcast %cst_309 : f32 to vector<2x32xf32>
    %962 = arith.addf %961, %960 : vector<2x32xf32>
    %963 = arith.divf %961, %962 : vector<2x32xf32>
    %964 = arith.mulf %955, %884 : vector<2x32xf32>
    %965 = arith.mulf %949, %957 : vector<2x32xf32>
    %966 = arith.addf %964, %965 : vector<2x32xf32>
    %967 = math.tanh %966 : vector<2x32xf32>
    %968 = arith.mulf %963, %967 : vector<2x32xf32>
    %969 = vector.shape_cast %968 : vector<2x32xf32> to vector<2x1x32xf32>
    "tpu.trace_start"() <{level = 10 : i32, message = "bih,bsh->bis"}> : () -> ()
    %cst_310 = arith.constant dense<0.000000e+00> : vector<2x1x8xf32>
    %970 = tpu.matmul %969, %404, %cst_310 {dimension_numbers = #tpu.dot_dimension_numbers<[2], [2], [1], [1], [0, 0, 0, 1, 1, 1], [0], [0]>} : vector<2x1x32xf32>, vector<2x8x32xf32>, vector<2x1x8xf32> -> vector<2x1x8xf32>
    "tpu.trace_stop"() : () -> ()
    %971 = vector.shape_cast %970 : vector<2x1x8xf32> to vector<2x8xf32>
    %cst_311 = arith.constant dense<0xFF800000> : vector<2xf32>
    %972 = vector.multi_reduction <maximumf>, %971, %cst_311 [1] : vector<2x8xf32> to vector<2xf32>
    %973 = vector.shape_cast %972 : vector<2xf32> to vector<2x1xf32>
    %974 = vector.broadcast %973 : vector<2x1xf32> to vector<2x8xf32>
    %975 = arith.subf %971, %974 : vector<2x8xf32>
    %976 = math.exp %975 : vector<2x8xf32>
    %cst_312 = arith.constant dense<0.000000e+00> : vector<2xf32>
    %977 = vector.multi_reduction <add>, %976, %cst_312 [1] : vector<2x8xf32> to vector<2xf32>
    %978 = vector.shape_cast %977 : vector<2xf32> to vector<2x1xf32>
    %979 = vector.broadcast %978 : vector<2x1xf32> to vector<2x8xf32>
    %980 = arith.divf %976, %979 : vector<2x8xf32>
    %981 = vector.shape_cast %980 : vector<2x8xf32> to vector<2x1x8xf32>
    "tpu.trace_start"() <{level = 10 : i32, message = "bis,bsh->bih"}> : () -> ()
    %cst_313 = arith.constant dense<0.000000e+00> : vector<2x1x32xf32>
    %982 = tpu.matmul %981, %373, %cst_313 {dimension_numbers = #tpu.dot_dimension_numbers<[2], [1], [1], [2], [0, 0, 0, 1, 1, 2], [0], [0]>} : vector<2x1x8xf32>, vector<2x8x32xf32>, vector<2x1x32xf32> -> vector<2x1x32xf32>
    "tpu.trace_stop"() : () -> ()
    %983 = vector.shape_cast %982 : vector<2x1x32xf32> to vector<2x32xf32>
    %984 = arith.truncf %983 : vector<2x32xf32> to vector<2x32xbf16>
    %cst_314 = arith.constant dense<0.000000e+00> : vector<2x32xf32>
    %985 = tpu.matmul %984, %416, %cst_314 {dimension_numbers = #tpu.dot_dimension_numbers<[1], [0], [0], [1], [0, 0, 1, 1], [], []>} : vector<2x32xbf16>, vector<32x32xbf16>, vector<2x32xf32> -> vector<2x32xf32>
    %986 = arith.truncf %968 : vector<2x32xf32> to vector<2x32xbf16>
    %cst_315 = arith.constant dense<0.000000e+00> : vector<2x32xf32>
    %987 = tpu.matmul %986, %417, %cst_315 {dimension_numbers = #tpu.dot_dimension_numbers<[1], [0], [0], [1], [0, 0, 1, 1], [], []>} : vector<2x32xbf16>, vector<32x32xbf16>, vector<2x32xf32> -> vector<2x32xf32>
    %988 = arith.addf %985, %987 : vector<2x32xf32>
    %989 = vector.broadcast %418 : vector<1x32xf32> to vector<2x32xf32>
    %990 = arith.addf %988, %989 : vector<2x32xf32>
    %991 = math.tanh %990 : vector<2x32xf32>
    %c12 = arith.constant 12 : index
    %c0_316 = arith.constant 0 : index
    %992 = vector.load %arg34[%c12, %c0_316] : memref<14x32xf32, #tpu.memory_space<vmem>>, vector<2x32xf32>
    tpu.vector_store %arg34[%c12, %c0_316], %991 {strides = array<i32>} : memref<14x32xf32, #tpu.memory_space<vmem>>, vector<2x32xf32>,
    %c0_317 = arith.constant 0 : index
    %c0_318 = arith.constant 0 : index
    %993 = vector.load %arg34[%c0_317, %c0_318] : memref<14x32xf32, #tpu.memory_space<vmem>>, vector<14x32xf32>
    %c0_319 = arith.constant 0 : index
    %c0_320 = arith.constant 0 : index
    %994 = vector.load %arg31[%c0_319, %c0_320] : memref<32x256xbf16, #tpu.memory_space<vmem>>, vector<32x256xbf16>
    %995 = arith.truncf %993 : vector<14x32xf32> to vector<14x32xbf16>
    %cst_321 = arith.constant dense<0.000000e+00> : vector<14x256xf32>
    %996 = tpu.matmul %995, %994, %cst_321 {dimension_numbers = #tpu.dot_dimension_numbers<[1], [0], [0], [1], [0, 0, 1, 1], [], []>} : vector<14x32xbf16>, vector<32x256xbf16>, vector<14x256xf32> -> vector<14x256xf32>
    %c0_322 = arith.constant 0 : index
    %c0_323 = arith.constant 0 : index
    %997 = vector.load %arg32[%c0_322, %c0_323] : memref<1x256xf32, #tpu.memory_space<vmem>>, vector<1x256xf32>
    %998 = vector.broadcast %997 : vector<1x256xf32> to vector<14x256xf32>
    %999 = arith.addf %996, %998 : vector<14x256xf32>
    %cst_324 = arith.constant dense<0xFF800000> : vector<14xf32>
    %1000 = vector.multi_reduction <maximumf>, %999, %cst_324 [1] : vector<14x256xf32> to vector<14xf32>
    %1001 = vector.shape_cast %1000 : vector<14xf32> to vector<14x1xf32>
    %1002 = vector.broadcast %1001 : vector<14x1xf32> to vector<14x256xf32>
    %1003 = arith.subf %999, %1002 : vector<14x256xf32>
    %1004 = math.exp %1003 : vector<14x256xf32>
    %cst_325 = arith.constant dense<0.000000e+00> : vector<14xf32>
    %1005 = vector.multi_reduction <add>, %1004, %cst_325 [1] : vector<14x256xf32> to vector<14xf32>
    %1006 = vector.shape_cast %1005 : vector<14xf32> to vector<14x1xf32>
    %1007 = vector.broadcast %1006 : vector<14x1xf32> to vector<14x256xf32>
    %1008 = arith.divf %1004, %1007 : vector<14x256xf32>
    %c0_326 = arith.constant 0 : index
    %c0_327 = arith.constant 0 : index
    %1009 = vector.load %arg33[%c0_326, %c0_327] : memref<14x256xf32, #tpu.memory_space<vmem>>, vector<14x256xf32>
    tpu.vector_store %arg33[%c0_326, %c0_327], %1008 {strides = array<i32>} : memref<14x256xf32, #tpu.memory_space<vmem>>, vector<14x256xf32>,
    return
  }
  func.func @transform_0(%arg0: i32) -> (i32, i32, i32) {
    %c0_i32 = arith.constant 0 : i32
    %c0_i32_0 = arith.constant 0 : i32
    %c0_i32_1 = arith.constant 0 : i32
    %c0_i32_2 = arith.constant 0 : i32
    return %c0_i32, %c0_i32_0, %c0_i32_1 : i32, i32, i32
  }
  func.func @transform_1(%arg0: i32) -> (i32, i32, i32) {
    %c0_i32 = arith.constant 0 : i32
    %c0_i32_0 = arith.constant 0 : i32
    %c0_i32_1 = arith.constant 0 : i32
    %c0_i32_2 = arith.constant 0 : i32
    return %c0_i32, %c0_i32_0, %c0_i32_1 : i32, i32, i32
  }
  func.func @transform_2(%arg0: i32) -> (i32, i32) {
    %c0_i32 = arith.constant 0 : i32
    %c0_i32_0 = arith.constant 0 : i32
    %c0_i32_1 = arith.constant 0 : i32
    return %c0_i32, %c0_i32_0 : i32, i32
  }
  func.func @transform_3(%arg0: i32) -> (i32, i32, i32) {
    %c0_i32 = arith.constant 0 : i32
    %c0_i32_0 = arith.constant 0 : i32
    %c0_i32_1 = arith.constant 0 : i32
    %c0_i32_2 = arith.constant 0 : i32
    return %c0_i32, %c0_i32_0, %c0_i32_1 : i32, i32, i32
  }
  func.func @transform_4(%arg0: i32) -> (i32, i32, i32) {
    %c0_i32 = arith.constant 0 : i32
    %c0_i32_0 = arith.constant 0 : i32
    %c0_i32_1 = arith.constant 0 : i32
    %c0_i32_2 = arith.constant 0 : i32
    return %c0_i32, %c0_i32_0, %c0_i32_1 : i32, i32, i32
  }
  func.func @transform_5(%arg0: i32) -> (i32, i32, i32) {
    %c0_i32 = arith.constant 0 : i32
    %c0_i32_0 = arith.constant 0 : i32
    %c0_i32_1 = arith.constant 0 : i32
    %c0_i32_2 = arith.constant 0 : i32
    return %c0_i32, %c0_i32_0, %c0_i32_1 : i32, i32, i32
  }
  func.func @transform_6(%arg0: i32) -> (i32, i32, i32) {
    %c0_i32 = arith.constant 0 : i32
    %c0_i32_0 = arith.constant 0 : i32
    %c0_i32_1 = arith.constant 0 : i32
    %c0_i32_2 = arith.constant 0 : i32
    return %c0_i32, %c0_i32_0, %c0_i32_1 : i32, i32, i32
  }
  func.func @transform_7(%arg0: i32) -> (i32, i32, i32) {
    %c0_i32 = arith.constant 0 : i32
    %c0_i32_0 = arith.constant 0 : i32
    %c0_i32_1 = arith.constant 0 : i32
    %c0_i32_2 = arith.constant 0 : i32
    return %c0_i32, %c0_i32_0, %c0_i32_1 : i32, i32, i32
  }
  func.func @transform_8(%arg0: i32) -> (i32, i32, i32) {
    %c0_i32 = arith.constant 0 : i32
    %c0_i32_0 = arith.constant 0 : i32
    %c0_i32_1 = arith.constant 0 : i32
    %c0_i32_2 = arith.constant 0 : i32
    return %c0_i32, %c0_i32_0, %c0_i32_1 : i32, i32, i32
  }
  func.func @transform_9(%arg0: i32) -> (i32, i32, i32) {
    %c0_i32 = arith.constant 0 : i32
    %c0_i32_0 = arith.constant 0 : i32
    %c0_i32_1 = arith.constant 0 : i32
    %c0_i32_2 = arith.constant 0 : i32
    return %c0_i32, %c0_i32_0, %c0_i32_1 : i32, i32, i32
  }
  func.func @transform_10(%arg0: i32) -> (i32, i32, i32) {
    %c0_i32 = arith.constant 0 : i32
    %c0_i32_0 = arith.constant 0 : i32
    %c0_i32_1 = arith.constant 0 : i32
    %c0_i32_2 = arith.constant 0 : i32
    return %c0_i32, %c0_i32_0, %c0_i32_1 : i32, i32, i32
  }
  func.func @transform_11(%arg0: i32) -> (i32, i32, i32) {
    %c0_i32 = arith.constant 0 : i32
    %c0_i32_0 = arith.constant 0 : i32
    %c0_i32_1 = arith.constant 0 : i32
    %c0_i32_2 = arith.constant 0 : i32
    return %c0_i32, %c0_i32_0, %c0_i32_1 : i32, i32, i32
  }
  func.func @transform_12(%arg0: i32) -> (i32, i32, i32) {
    %c0_i32 = arith.constant 0 : i32
    %c0_i32_0 = arith.constant 0 : i32
    %c0_i32_1 = arith.constant 0 : i32
    %c0_i32_2 = arith.constant 0 : i32
    return %c0_i32, %c0_i32_0, %c0_i32_1 : i32, i32, i32
  }
  func.func @transform_13(%arg0: i32) -> (i32, i32, i32) {
    %c0_i32 = arith.constant 0 : i32
    %c0_i32_0 = arith.constant 0 : i32
    %c0_i32_1 = arith.constant 0 : i32
    %c0_i32_2 = arith.constant 0 : i32
    return %c0_i32, %c0_i32_0, %c0_i32_1 : i32, i32, i32
  }
  func.func @transform_14(%arg0: i32) -> (i32, i32, i32) {
    %c0_i32 = arith.constant 0 : i32
    %c0_i32_0 = arith.constant 0 : i32
    %c0_i32_1 = arith.constant 0 : i32
    %c0_i32_2 = arith.constant 0 : i32
    return %c0_i32, %c0_i32_0, %c0_i32_1 : i32, i32, i32
  }
  func.func @transform_15(%arg0: i32) -> (i32, i32) {
    %c0_i32 = arith.constant 0 : i32
    %c0_i32_0 = arith.constant 0 : i32
    %c0_i32_1 = arith.constant 0 : i32
    return %c0_i32, %c0_i32_0 : i32, i32
  }
  func.func @transform_16(%arg0: i32) -> (i32, i32) {
    %c0_i32 = arith.constant 0 : i32
    %c0_i32_0 = arith.constant 0 : i32
    %c0_i32_1 = arith.constant 0 : i32
    return %c0_i32, %c0_i32_0 : i32, i32
  }
  func.func @transform_17(%arg0: i32) -> (i32, i32) {
    %c0_i32 = arith.constant 0 : i32
    %c0_i32_0 = arith.constant 0 : i32
    %c0_i32_1 = arith.constant 0 : i32
    return %c0_i32, %c0_i32_0 : i32, i32
  }
  func.func @transform_18(%arg0: i32) -> (i32, i32) {
    %c0_i32 = arith.constant 0 : i32
    %c0_i32_0 = arith.constant 0 : i32
    %c0_i32_1 = arith.constant 0 : i32
    return %c0_i32, %c0_i32_0 : i32, i32
  }
  func.func @transform_19(%arg0: i32) -> (i32, i32) {
    %c0_i32 = arith.constant 0 : i32
    %c0_i32_0 = arith.constant 0 : i32
    %c0_i32_1 = arith.constant 0 : i32
    return %c0_i32, %c0_i32_0 : i32, i32
  }
  func.func @transform_20(%arg0: i32) -> (i32, i32) {
    %c0_i32 = arith.constant 0 : i32
    %c0_i32_0 = arith.constant 0 : i32
    %c0_i32_1 = arith.constant 0 : i32
    return %c0_i32, %c0_i32_0 : i32, i32
  }
  func.func @transform_21(%arg0: i32) -> (i32, i32) {
    %c0_i32 = arith.constant 0 : i32
    %c0_i32_0 = arith.constant 0 : i32
    %c0_i32_1 = arith.constant 0 : i32
    return %c0_i32, %c0_i32_0 : i32, i32
  }
  func.func @transform_22(%arg0: i32) -> (i32, i32) {
    %c0_i32 = arith.constant 0 : i32
    %c0_i32_0 = arith.constant 0 : i32
    %c0_i32_1 = arith.constant 0 : i32
    return %c0_i32, %c0_i32_0 : i32, i32
  }
  func.func @transform_23(%arg0: i32) -> (i32, i32, i32) {
    %c0_i32 = arith.constant 0 : i32
    %c0_i32_0 = arith.constant 0 : i32
    %c0_i32_1 = arith.constant 0 : i32
    %c0_i32_2 = arith.constant 0 : i32
    return %c0_i32, %c0_i32_0, %c0_i32_1 : i32, i32, i32
  }
  func.func @transform_24(%arg0: i32) -> (i32, i32, i32) {
    %c0_i32 = arith.constant 0 : i32
    %c0_i32_0 = arith.constant 0 : i32
    %c0_i32_1 = arith.constant 0 : i32
    %c0_i32_2 = arith.constant 0 : i32
    return %c0_i32, %c0_i32_0, %c0_i32_1 : i32, i32, i32
  }
  func.func @transform_25(%arg0: i32) -> (i32, i32, i32) {
    %c0_i32 = arith.constant 0 : i32
    %c0_i32_0 = arith.constant 0 : i32
    %c0_i32_1 = arith.constant 0 : i32
    %c0_i32_2 = arith.constant 0 : i32
    return %c0_i32, %c0_i32_0, %c0_i32_1 : i32, i32, i32
  }
  func.func @transform_26(%arg0: i32) -> (i32, i32) {
    %c0_i32 = arith.constant 0 : i32
    %c0_i32_0 = arith.constant 0 : i32
    %c0_i32_1 = arith.constant 0 : i32
    return %c0_i32, %c0_i32_0 : i32, i32
  }
  func.func @transform_27(%arg0: i32) -> (i32, i32) {
    %c0_i32 = arith.constant 0 : i32
    %c0_i32_0 = arith.constant 0 : i32
    %c0_i32_1 = arith.constant 0 : i32
    return %c0_i32, %c0_i32_0 : i32, i32
  }
  func.func @transform_28(%arg0: i32) -> (i32, i32) {
    %c0_i32 = arith.constant 0 : i32
    %c0_i32_0 = arith.constant 0 : i32
    %c0_i32_1 = arith.constant 0 : i32
    return %c0_i32, %c0_i32_0 : i32, i32
  }
  func.func @transform_29(%arg0: i32) -> (i32, i32) {
    %c0_i32 = arith.constant 0 : i32
    %c0_i32_0 = arith.constant 0 : i32
    %c0_i32_1 = arith.constant 0 : i32
    return %c0_i32, %c0_i32_0 : i32, i32
  }
  func.func @transform_30(%arg0: i32) -> (i32, i32) {
    %c0_i32 = arith.constant 0 : i32
    %c0_i32_0 = arith.constant 0 : i32
    %c0_i32_1 = arith.constant 0 : i32
    return %c0_i32, %c0_i32_0 : i32, i32
  }
  func.func @transform_31(%arg0: i32) -> (i32, i32) {
    %c0_i32 = arith.constant 0 : i32
    %c0_i32_0 = arith.constant 0 : i32
    %c0_i32_1 = arith.constant 0 : i32
    return %c0_i32, %c0_i32_0 : i32, i32
  }
  func.func @transform_32(%arg0: i32) -> (i32, i32) {
    %c0_i32 = arith.constant 0 : i32
    %c0_i32_0 = arith.constant 0 : i32
    %c0_i32_1 = arith.constant 0 : i32
    return %c0_i32, %c0_i32_0 : i32, i32
  }
}

</mosaic_0001>

<bundles_post_ra>
// kernel: bow2seq_forward.1
= control target key start
LH: loop header
LB: loop body
LE: loop exit
PB: predicated region body
PF: predicated region fallthrough
CT: control target
= control target key end

     0   :  { %v11244_v0 = vmov 0.0   ;;  %s11245_s3 = smov 3   ;;  %vm11246_vm0 = vmmov 0   ;;  %vm163_vm1 = vcmask 261120   ;;  %s11247_s10 = smov 4   ;;  %vm211_vm2 = vcmask 64512   ;;  %s12822_s0 = inlined_call_operand.smem [shape: u32[33], index: -1, kind: input, shape index: {}] }
   0x1   :  { %10059 = vmatprep.subr.bf16.mxu0 %v11244_v0  ;;  %s11300_s6 = sld [smem:[%s12822_s0 + %s11245_s3]]   ;;  %10063 = vmatprep.mubr.msk.bf16.mxu0 %vm11246_vm0, %v11244_v0  ;;  %s11248_s14 = smov 96   ;;  %v369_v15 = vlaneseq  ;;  %v11250_v20 = vmov 0   ;;  %vm1583_vm7 = vcmask 130048   ;;  %vm1586_vm8 = vcmask 195584  }
   0x2   :  { %s1_s9 = sld [smem:[%s12822_s0]]   ;;  %10067 = vmatprep.subr.mxu1 %v11244_v0  ;;  %10069 = vmatprep.mubr.msk.f32.mxu1 %vm11246_vm0, %v11244_v0  ;;  %s11249_s15 = smov 1   ;;  %vm3806_vm9 = vcmask 1041409   ;;  %vm4567_vm10 = vcmask 58368   ;;  %vm4874_vm11 = vcmask 254976   ;;  %vm9382_vm12 = vcmask 1045504  }
   0x3   :  { %s11326_s13 = sld [smem:[%s12822_s0 + %s11247_s10]]   ;;  %v11352_v17 = vshrl.u32 %v369_v15, 7  ;;  %s11251_s19 = smov 64  }
   0x4   :  { %s9422_s18 = sld [smem:[%s12822_s0 + %s11249_s15]]   ;;  %s11252_s20 = smov 88  }
   0x5   :  { %v11355_v19 = vsub.s32 0, %v11352_v17  ;;  %s11253_s21 = smov 120   ;;  %s11254_s22 = smov 56  }
   0x6   :  { %s11255_s23 = smov 80   ;;  %s11256_s24 = smov 112  }
   0x7   :  { %v10907_v1 = vld [vmem:[%s11300_s6 + $0x8] sm:$0xff]   ;;  %v10908_v2 = vld [vmem:[%s11300_s6] sm:$0xff]   ;;  %s11257_s25 = smov 48   ;;  %s11258_s26 = smov 72  }
   0x8   :  { %10060 = vmatpush3.bf16.msra.mxu0 %v10907_v1  ;;  %v11312_v3 = vld [vmem:[%s1_s9] sm:$0xff]  ;;  %v11314_v4 = vld [vmem:[%s1_s9 + $0x8] sm:$0xff]  ;;  %s11259_s27 = smov 104   ;;  %s11260_s28 = smov 40  }
   0x9   :  { %10061 = vmatprep.subr.bf16.mxu0 %v11244_v0  ;;  %v143_v5 = vpack.c.bf16 %v11314_v4, %v11312_v3  ;;  %v9454_v6 = vld [vmem:[%s11326_s13] ss:$0 sm:$0xff]  ;;  %s11261_s29 = smov 8   ;;  %s11262_s30 = smov 16  }
   0xa   :  { %v135_v16 = vld [vmem:[%s9422_s18] sm:$0x1]  ;;  %v136_v18 = vld [vmem:[%s9422_s18 + $0x1] sm:$0x1]  ;;  %s11263_s1 = smov 5   ;;  %s12823_s5 = smov 24  }
   0xb   :  { %vm365_vm3 = vcmp.gt.f32.partialorder %v135_v16, 0.0  ;;  %vm366_vm4 = vcmp.gt.f32.partialorder %v136_v18, 0.0  ;;  %s11521_s4 = sld [smem:[%s12822_s0 + %s11263_s1]]   ;;  %s11265_s7 = smov 6  }
   0xc   :  { %10062 = vmatpush3.bf16.msra.mxu0 %v10908_v2  ;;  %v367_v21 = vsel %vm365_vm3, 1, %v11250_v20  ;;  %v368_v23 = vsel %vm366_vm4, 1, %v11250_v20  ;;  %s11542_s10 = sld [smem:[%s12822_s0 + %s11265_s7]]   ;;  %s11266_s11 = smov 9  }
   0xd   :  { %10082 = vmatprep.subr.mxu0 %v11244_v0  ;;  %v372_v22 = vrot.slane %v367_v21, %v11355_v19  ;;  %v376_v26 = vrot.slane %v368_v23, %v11355_v19  ;;  %s11554_s16 = sld [smem:[%s12822_s0 + %s11266_s11]]   ;;  %s11267_s17 = smov 11  }
   0xe   :  { %s11563_s2 = sld [smem:[%s12822_s0 + %s11267_s17]]   ;;  %s11268_s3 = smov 7  }
   0xf   :  { %10064 = vmatmul.mubr.msk.bf16.vlgmr.msra.gmra.mxu0 %vm163_vm1, %v143_v5  ;;  %vm11360_vm5 = vcmp.eq.s32.totalorder %v372_v22, 1  ;;  %vm11368_vm6 = vcmp.eq.s32.totalorder %v376_v26, 1  ;;  %s11578_s9 = sld [smem:[%s12822_s0 + %s11268_s3]]   ;;  %s11269_s17 = smov 10  }
  0x10   :  { %10084 = vmatprep.mubr.msk.f32.mxu0 %vm11246_vm0, %v11244_v0  ;;  %s11584_s15 = sld [smem:[%s12822_s0 + %s11261_s29]]   ;;  %s11270_s7 = smov 12  }
  0x11   :  { %s11600_s3 = sld [smem:[%s12822_s0 + %s11269_s17]]   ;;  %s11271_s17 = smov 13  }
  0x12   :  { %s11608_s12 = sld [smem:[%s12822_s0 + %s11270_s7]]  }
  0x13   :  { %s11622_s7 = sld [smem:[%s12822_s0 + %s11271_s17]]  }
  0xcf   :  { %v201_v7 = vpop.f32.mrf.mxu0 }
  0xd0   :  { %v11329_v8 = vadd.f32 %v9454_v6, %v201_v7 }
  0xd1   :  { %v10065_v9 = vpop.f32.mrf.mxu0 }
  0xd2   :  { %209 = vrot.lane.b32.xlu0 %v11329_v8, %s11248_s14 }
  0xd3   :  { %v204_v10 = vpop.f32.mrf.mxu0 }
  0xd4   :  { %v11333_v11 = vadd.f32 %v9454_v6, %v204_v10 }
  0xd5   :  { %v10066_v12 = vpop.f32.mrf.mxu0 }
  0xd6   :  { %287 = vrot.lane.b32.xlu0 %v11333_v11, %s11248_s14 }
 0x144   :  { %v210_v13 = vpop.permute.xlu0 %209 }
 0x145   :  { %10068 = vmatpush3.xpose.msk.msra.mxu1 %vm211_vm2, %v210_v13 }
 0x146   :  { %10072 = vmatprep.subr.mxu1 %v11244_v0 }
 0x148   :  { %10070 = vmatmul.mubr.msk.f32.vlgmr.msra.gmra.mxu1 %vm211_vm2, %v11329_v8  ;;  %v288_v14 = vpop.permute.xlu0 %287 }
 0x149   :  { %10073 = vmatpush3.xpose.msk.msra.mxu1 %vm211_vm2, %v288_v14  ;;  %10074 = vmatprep.mubr.msk.f32.mxu1 %vm11246_vm0, %v11244_v0 }
 0x14a   :  { %10077 = vmatprep.subr.mxu1 %v11244_v0 }
 0x14c   :  { %10075 = vmatmul.mubr.msk.f32.vlgmr.msra.gmra.mxu1 %vm211_vm2, %v11333_v11 }
 0x14d   :  { %10079 = vmatprep.mubr.msk.f32.mxu1 %vm11246_vm0, %v11244_v0 }
 0x208   :  { %v282_v24 = vpop.f32.mrf.mxu1 }
 0x209   :  { %v363_v27 = vmul.f32 0.35355338, %v282_v24 }
 0x20a   :  { %v10071_v28 = vpop.f32.mrf.mxu1 }
 0x20b   :  { %v379_v29 = vsel %vm11360_vm5, %v363_v27, -1e+09 }
 0x20c   :  { %v359_v30 = vpop.f32.mrf.mxu1  ;;  %v381_v31 = vsel %vm211_vm2, %v379_v29, -inf }
 0x20d   :  { %v364_v33 = vmul.f32 0.35355338, %v359_v30  ;;  %382 = vmax.xlane.f32.xlu1 %v381_v31 }
 0x20e   :  { %v10076_v34 = vpop.f32.mrf.mxu1 }
 0x20f   :  { %v380_v35 = vsel %vm11368_vm6, %v364_v33, -1e+09 }
 0x210   :  { %v384_v36 = vsel %vm211_vm2, %v380_v35, -inf }
 0x211   :  { %385 = vmax.xlane.f32.xlu1 %v384_v36 }
 0x222   :  { %403 = vrot.lane.b32.xlu1 %v11329_v8, %s11251_s19 }
 0x226   :  { %479 = vrot.lane.b32.xlu1 %v11333_v11, %s11251_s19 }
 0x22a   :  { %557 = vrot.lane.b32.xlu1 %v11329_v8, %s11252_s20 }
 0x22e   :  { %635 = vrot.lane.b32.xlu1 %v11333_v11, %s11252_s20 }
 0x296   :  { %v383_v37 = vpop.xlane.xlu1 %382 }
 0x297   :  { %v387_v38 = vsub.f32 %v379_v29, %v383_v37 }
 0x299   :  { %v389_v39 = vmul.f32 1.442695, %v387_v38 }
 0x29a   :  { %v386_v40 = vpop.xlane.xlu1 %385 }
 0x29b   :  { %10955 = vpow2.f32 %v389_v39  ;;  %v388_v41 = vsub.f32 %v380_v35, %v386_v40 }
 0x29d   :  { %v391_v42 = vmul.f32 1.442695, %v388_v41 }
 0x29e   :  { %v404_v43 = vpop.permute.xlu1 %403 }
 0x29f   :  { %10957 = vpow2.f32 %v391_v42  ;;  %10078 = vmatpush3.msra.mxu1 %v404_v43 }
 0x2a0   :  { %10087 = vmatprep.subr.mxu1 %v11244_v0 }
 0x2a2   :  { %v480_v44 = vpop.permute.xlu1 %479 }
 0x2a3   :  { %10083 = vmatpush3.msra.mxu0 %v480_v44 }
 0x2a4   :  { %10092 = vmatprep.subr.mxu0 %v11244_v0 }
 0x2a6   :  { %v558_v49 = vpop.permute.xlu1 %557 }
 0x2a8   :  { %v10956_v45 = vpop.eup %10955 }
 0x2a9   :  { %v393_v46 = vsel %vm211_vm2, %v10956_v45, 0.0 }
 0x2aa   :  { %394 = vadd.xlane.f32.xlu0 %v393_v46  ;;  %v636_v50 = vpop.permute.xlu1 %635 }
 0x2ac   :  { %v10958_v47 = vpop.eup %10957 }
 0x2ad   :  { %v396_v48 = vsel %vm211_vm2, %v10958_v47, 0.0 }
 0x2ae   :  { %397 = vadd.xlane.f32.xlu1 %v396_v48 }
 0x2bf   :  { %633 = vrot.lane.b32.xlu1 %v11333_v11, %s11253_s21 }
 0x2c0   :  { %555 = vrot.lane.b32.xlu0 %v11329_v8, %s11253_s21 }
 0x333   :  { %v395_v51 = vpop.xlane.xlu0 %394 }
 0x334   :  { %10959 = vrcp.f32 %v395_v51 }
 0x337   :  { %v398_v52 = vpop.xlane.xlu1 %397  ;;  %v556_v57 = vpop.permute.xlu0 %555 }
 0x338   :  { %10961 = vrcp.f32 %v398_v52 }
 0x33b   :  { %v634_v58 = vpop.permute.xlu1 %633 }
 0x341   :  { %v10960_v53 = vpop.eup %10959 }
 0x342   :  { %v400_v54 = vmul.f32 %v10960_v53, %v10956_v45 }
 0x344   :  { %10080 = vmatmul.mubr.msk.f32.vlgmr.msra.gmra.mxu1 %vm211_vm2, %v400_v54 }
 0x345   :  { %v10962_v55 = vpop.eup %10961  ;;  %10088 = vmatpush3.xpose.msk.msra.mxu1 %vm211_vm2, %v558_v49  ;;  %10089 = vmatprep.mubr.msk.f32.mxu1 %vm11246_vm0, %v11244_v0 }
 0x346   :  { %v402_v56 = vmul.f32 %v10962_v55, %v10958_v47  ;;  %10097 = vmatprep.subr.mxu1 %v11244_v0 }
 0x348   :  { %10085 = vmatmul.mubr.msk.f32.vlgmr.msra.gmra.mxu0 %vm211_vm2, %v402_v56  ;;  %10090 = vmatmul.mubr.msk.f32.vlgmr.msra.gmra.mxu1 %vm211_vm2, %v556_v57 }
 0x349   :  { %10093 = vmatpush3.xpose.msk.msra.mxu0 %vm211_vm2, %v636_v50  ;;  %10094 = vmatprep.mubr.msk.f32.mxu0 %vm11246_vm0, %v11244_v0 }
 0x34a   :  { %10102 = vmatprep.subr.mxu0 %v11244_v0  ;;  %10099 = vmatprep.mubr.msk.f32.mxu1 %vm11246_vm0, %v11244_v0 }
 0x34c   :  { %10095 = vmatmul.mubr.msk.f32.vlgmr.msra.gmra.mxu0 %vm211_vm2, %v634_v58 }
 0x34d   :  { %10104 = vmatprep.mubr.msk.f32.mxu0 %vm11246_vm0, %v11244_v0 }
 0x404   :  { %v11407_v59 = vpop.f32.mrf.mxu1 }
 0x406   :  { %v10081_v60 = vpop.f32.mrf.mxu1 }
 0x408   :  { %v11409_v61 = vpop.f32.mrf.mxu0  ;;  %v629_v62 = vpop.f32.mrf.mxu1 }
 0x409   :  { %v711_v63 = vmul.f32 0.35355338, %v629_v62 }
 0x40a   :  { %v10086_v1 = vpop.f32.mrf.mxu0  ;;  %v10091_v2 = vpop.f32.mrf.mxu1 }
 0x40b   :  { %v713_v5 = vsel %vm11360_vm5, %v711_v63, -1e+09 }
 0x40c   :  { %v707_v6 = vpop.f32.mrf.mxu0  ;;  %v715_v7 = vsel %vm211_vm2, %v713_v5, -inf }
 0x40d   :  { %v712_v9 = vmul.f32 0.35355338, %v707_v6  ;;  %716 = vmax.xlane.f32.xlu1 %v715_v7 }
 0x40e   :  { %v10096_v10 = vpop.f32.mrf.mxu0 }
 0x40f   :  { %v714_v12 = vsel %vm11368_vm6, %v712_v9, -1e+09 }
 0x410   :  { %v718_v13 = vsel %vm211_vm2, %v714_v12, -inf }
 0x411   :  { %719 = vmax.xlane.f32.xlu0 %v718_v13 }
 0x41e   :  { %737 = vrot.lane.b32.xlu1 %v11329_v8, %s11254_s22 }
 0x422   :  { %891 = vrot.lane.b32.xlu1 %v11329_v8, %s11255_s23 }
 0x426   :  { %969 = vrot.lane.b32.xlu1 %v11333_v11, %s11255_s23 }
 0x427   :  { %813 = vrot.lane.b32.xlu0 %v11333_v11, %s11254_s22 }
 0x42b   :  { %889 = vrot.lane.b32.xlu0 %v11329_v8, %s11256_s24 }
 0x496   :  { %v717_v14 = vpop.xlane.xlu1 %716 }
 0x497   :  { %v721_v15 = vsub.f32 %v713_v5, %v717_v14 }
 0x499   :  { %v723_v16 = vmul.f32 1.442695, %v721_v15 }
 0x49a   :  { %v738_v18 = vpop.permute.xlu1 %737  ;;  %v720_v21 = vpop.xlane.xlu0 %719 }
 0x49b   :  { %10963 = vpow2.f32 %v723_v16  ;;  %v722_v22 = vsub.f32 %v714_v12, %v720_v21  ;;  %10098 = vmatpush3.msra.mxu1 %v738_v18 }
 0x49c   :  { %10107 = vmatprep.subr.mxu1 %v11244_v0 }
 0x49d   :  { %v725_v23 = vmul.f32 1.442695, %v722_v22 }
 0x49e   :  { %v814_v24 = vpop.permute.xlu0 %813  ;;  %v892_v30 = vpop.permute.xlu1 %891 }
 0x49f   :  { %10965 = vpow2.f32 %v725_v23  ;;  %10103 = vmatpush3.msra.mxu0 %v814_v24 }
 0x4a0   :  { %10112 = vmatprep.subr.mxu0 %v11244_v0 }
 0x4a2   :  { %v970_v31 = vpop.permute.xlu1 %969  ;;  %v890_v39 = vpop.permute.xlu0 %889 }
 0x4a8   :  { %v10964_v26 = vpop.eup %10963 }
 0x4a9   :  { %v727_v27 = vsel %vm211_vm2, %v10964_v26, 0.0 }
 0x4aa   :  { %728 = vadd.xlane.f32.xlu1 %v727_v27 }
 0x4ac   :  { %v10966_v28 = vpop.eup %10965 }
 0x4ad   :  { %v730_v29 = vsel %vm211_vm2, %v10966_v28, 0.0 }
 0x4ae   :  { %731 = vadd.xlane.f32.xlu1 %v730_v29 }
 0x4bf   :  { %967 = vrot.lane.b32.xlu1 %v11333_v11, %s11256_s24 }
 0x533   :  { %v729_v33 = vpop.xlane.xlu1 %728 }
 0x534   :  { %10967 = vrcp.f32 %v729_v33 }
 0x537   :  { %v732_v34 = vpop.xlane.xlu1 %731 }
 0x538   :  { %10969 = vrcp.f32 %v732_v34 }
 0x53b   :  { %v968_v40 = vpop.permute.xlu1 %967 }
 0x541   :  { %v10968_v35 = vpop.eup %10967 }
 0x542   :  { %v734_v36 = vmul.f32 %v10968_v35, %v10964_v26 }
 0x544   :  { %10100 = vmatmul.mubr.msk.f32.vlgmr.msra.gmra.mxu1 %vm211_vm2, %v734_v36 }
 0x545   :  { %v10970_v37 = vpop.eup %10969  ;;  %10108 = vmatpush3.xpose.msk.msra.mxu1 %vm211_vm2, %v892_v30  ;;  %10109 = vmatprep.mubr.msk.f32.mxu1 %vm11246_vm0, %v11244_v0 }
 0x546   :  { %v736_v38 = vmul.f32 %v10970_v37, %v10966_v28  ;;  %10117 = vmatprep.subr.mxu1 %v11244_v0 }
 0x548   :  { %10105 = vmatmul.mubr.msk.f32.vlgmr.msra.gmra.mxu0 %vm211_vm2, %v736_v38  ;;  %10110 = vmatmul.mubr.msk.f32.vlgmr.msra.gmra.mxu1 %vm211_vm2, %v890_v39 }
 0x549   :  { %10113 = vmatpush3.xpose.msk.msra.mxu0 %vm211_vm2, %v970_v31  ;;  %10114 = vmatprep.mubr.msk.f32.mxu0 %vm11246_vm0, %v11244_v0 }
 0x54a   :  { %10122 = vmatprep.subr.mxu0 %v11244_v0  ;;  %10119 = vmatprep.mubr.msk.f32.mxu1 %vm11246_vm0, %v11244_v0 }
 0x54c   :  { %10115 = vmatmul.mubr.msk.f32.vlgmr.msra.gmra.mxu0 %vm211_vm2, %v968_v40 }
 0x54d   :  { %10124 = vmatprep.mubr.msk.f32.mxu0 %vm11246_vm0, %v11244_v0 }
 0x604   :  { %v11449_v41 = vpop.f32.mrf.mxu1 }
 0x606   :  { %v10101_v42 = vpop.f32.mrf.mxu1 }
 0x608   :  { %v11451_v43 = vpop.f32.mrf.mxu0  ;;  %v963_v44 = vpop.f32.mrf.mxu1 }
 0x609   :  { %v10877_v45 = vpack.i.bf16 %v11451_v43, %v11449_v41  ;;  %v1045_v46 = vmul.f32 0.35355338, %v963_v44 }
 0x60a   :  { %v10106_v47 = vpop.f32.mrf.mxu0  ;;  %v10111_v48 = vpop.f32.mrf.mxu1 }
 0x60b   :  { %v1047_v49 = vsel %vm11360_vm5, %v1045_v46, -1e+09 }
 0x60c   :  { %v1041_v50 = vpop.f32.mrf.mxu0  ;;  %v1049_v51 = vsel %vm211_vm2, %v1047_v49, -inf }
 0x60d   :  { %v1046_v52 = vmul.f32 0.35355338, %v1041_v50  ;;  %1050 = vmax.xlane.f32.xlu0 %v1049_v51 }
 0x60e   :  { %v10116_v53 = vpop.f32.mrf.mxu0 }
 0x60f   :  { %v1048_v54 = vsel %vm11368_vm6, %v1046_v52, -1e+09 }
 0x610   :  { %v1052_v55 = vsel %vm211_vm2, %v1048_v54, -inf }
 0x611   :  { %1053 = vmax.xlane.f32.xlu1 %v1052_v55 }
 0x622   :  { %1071 = vrot.lane.b32.xlu1 %v11329_v8, %s11257_s25 }
 0x626   :  { %1225 = vrot.lane.b32.xlu1 %v11329_v8, %s11258_s26 }
 0x62a   :  { %1303 = vrot.lane.b32.xlu1 %v11333_v11, %s11258_s26 }
 0x62e   :  { %1301 = vrot.lane.b32.xlu1 %v11333_v11, %s11259_s27 }
 0x696   :  { %v1051_v56 = vpop.xlane.xlu0 %1050 }
 0x697   :  { %v1055_v57 = vsub.f32 %v1047_v49, %v1051_v56 }
 0x699   :  { %v1057_v58 = vmul.f32 1.442695, %v1055_v57 }
 0x69a   :  { %v1054_v60 = vpop.xlane.xlu1 %1053 }
 0x69b   :  { %10971 = vpow2.f32 %v1057_v58  ;;  %v1056_v62 = vsub.f32 %v1048_v54, %v1054_v60  ;;  %v10910_v58 = vld [vmem:[%s11521_s4] sm:$0xff]  }
 0x69d   :  { %v1059_v63 = vmul.f32 1.442695, %v1056_v62 }
 0x69e   :  { %v1072_v1 = vpop.permute.xlu1 %1071 }
 0x69f   :  { %10973 = vpow2.f32 %v1059_v63  ;;  %10118 = vmatpush3.msra.mxu1 %v1072_v1 }
 0x6a0   :  { %10127 = vmatprep.subr.mxu1 %v11244_v0 }
 0x6a2   :  { %v1226_v13 = vpop.permute.xlu1 %1225 }
 0x6a6   :  { %v1304_v18 = vpop.permute.xlu1 %1303 }
 0x6a8   :  { %v10972_v2 = vpop.eup %10971 }
 0x6a9   :  { %v1061_v5 = vsel %vm211_vm2, %v10972_v2, 0.0 }
 0x6aa   :  { %1062 = vadd.xlane.f32.xlu0 %v1061_v5  ;;  %v1302_v23 = vpop.permute.xlu1 %1301 }
 0x6ac   :  { %v10974_v6 = vpop.eup %10973 }
 0x6ad   :  { %v1064_v7 = vsel %vm211_vm2, %v10974_v6, 0.0 }
 0x6ae   :  { %1065 = vadd.xlane.f32.xlu0 %v1064_v7 }
 0x6c4   :  { %1147 = vrot.lane.b32.xlu0 %v11333_v11, %s11257_s25 }
 0x6c8   :  { %1223 = vrot.lane.b32.xlu0 %v11329_v8, %s11259_s27 }
 0x733   :  { %v1063_v9 = vpop.xlane.xlu0 %1062 }
 0x734   :  { %10975 = vrcp.f32 %v1063_v9 }
 0x737   :  { %v1066_v10 = vpop.xlane.xlu0 %1065 }
 0x738   :  { %10977 = vrcp.f32 %v1066_v10 }
 0x73b   :  { %v1148_v12 = vpop.permute.xlu0 %1147 }
 0x73c   :  { %10123 = vmatpush3.msra.mxu0 %v1148_v12 }
 0x73d   :  { %10132 = vmatprep.subr.mxu0 %v11244_v0 }
 0x73f   :  { %v1224_v22 = vpop.permute.xlu0 %1223 }
 0x741   :  { %v10976_v14 = vpop.eup %10975 }
 0x742   :  { %v1068_v15 = vmul.f32 %v10976_v14, %v10972_v2 }
 0x744   :  { %10120 = vmatmul.mubr.msk.f32.vlgmr.msra.gmra.mxu1 %vm211_vm2, %v1068_v15 }
 0x745   :  { %v10978_v16 = vpop.eup %10977  ;;  %10128 = vmatpush3.xpose.msk.msra.mxu1 %vm211_vm2, %v1226_v13  ;;  %10129 = vmatprep.mubr.msk.f32.mxu1 %vm11246_vm0, %v11244_v0 }
 0x746   :  { %v1070_v21 = vmul.f32 %v10978_v16, %v10974_v6  ;;  %10137 = vmatprep.subr.mxu1 %v11244_v0 }
 0x748   :  { %10125 = vmatmul.mubr.msk.f32.vlgmr.msra.gmra.mxu0 %vm211_vm2, %v1070_v21  ;;  %10130 = vmatmul.mubr.msk.f32.vlgmr.msra.gmra.mxu1 %vm211_vm2, %v1224_v22 }
 0x749   :  { %10133 = vmatpush3.xpose.msk.msra.mxu0 %vm211_vm2, %v1304_v18  ;;  %10134 = vmatprep.mubr.msk.f32.mxu0 %vm11246_vm0, %v11244_v0 }
 0x74a   :  { %10142 = vmatprep.subr.mxu0 %v11244_v0  ;;  %10139 = vmatprep.mubr.msk.f32.mxu1 %vm11246_vm0, %v11244_v0 }
 0x74c   :  { %10135 = vmatmul.mubr.msk.f32.vlgmr.msra.gmra.mxu0 %vm211_vm2, %v1302_v23 }
 0x74d   :  { %10144 = vmatprep.mubr.msk.f32.mxu0 %vm11246_vm0, %v11244_v0 }
 0x804   :  { %v1143_v24 = vpop.f32.mrf.mxu1 }
 0x806   :  { %v10121_v26 = vpop.f32.mrf.mxu1 }
 0x808   :  { %v1219_v27 = vpop.f32.mrf.mxu0  ;;  %v1297_v28 = vpop.f32.mrf.mxu1 }
 0x809   :  { %v1379_v29 = vmul.f32 0.35355338, %v1297_v28  ;;  %v10882_v40 = vpack.i.bf16 %v1219_v27, %v1143_v24 }
 0x80a   :  { %v10126_v30 = vpop.f32.mrf.mxu0  ;;  %v10131_v31 = vpop.f32.mrf.mxu1 }
 0x80b   :  { %v1381_v33 = vsel %vm11360_vm5, %v1379_v29, -1e+09 }
 0x80c   :  { %v1375_v34 = vpop.f32.mrf.mxu0  ;;  %v1383_v35 = vsel %vm211_vm2, %v1381_v33, -inf }
 0x80d   :  { %v1380_v36 = vmul.f32 0.35355338, %v1375_v34  ;;  %1384 = vmax.xlane.f32.xlu0 %v1383_v35 }
 0x80e   :  { %v10136_v37 = vpop.f32.mrf.mxu0 }
 0x80f   :  { %v1382_v38 = vsel %vm11368_vm6, %v1380_v36, -1e+09 }
 0x810   :  { %v1386_v39 = vsel %vm211_vm2, %v1382_v38, -inf }
 0x811   :  { %1387 = vmax.xlane.f32.xlu1 %v1386_v39 }
 0x822   :  { %1405 = vrot.lane.b32.xlu1 %v11329_v8, %s11260_s28 }
 0x826   :  { %10878 = vrot.lane.b32.xlu1 %v10877_v45, %s11261_s29 }
 0x82a   :  { %10883 = vrot.lane.b32.xlu1 %v10882_v40, %s11262_s30 }
 0x896   :  { %v1385_v42 = vpop.xlane.xlu0 %1384 }
 0x897   :  { %v1389_v44 = vsub.f32 %v1381_v33, %v1385_v42 }
 0x899   :  { %v1391_v46 = vmul.f32 1.442695, %v1389_v44 }
 0x89a   :  { %v1388_v47 = vpop.xlane.xlu1 %1387 }
 0x89b   :  { %10979 = vpow2.f32 %v1391_v46  ;;  %v1390_v48 = vsub.f32 %v1382_v38, %v1388_v47 }
 0x89d   :  { %v1393_v49 = vmul.f32 1.442695, %v1390_v48 }
 0x89e   :  { %v1406_v50 = vpop.permute.xlu1 %1405 }
 0x89f   :  { %10981 = vpow2.f32 %v1393_v49  ;;  %10138 = vmatpush3.msra.mxu1 %v1406_v50  ;;  %v10912_v49 = vld [vmem:[%s11554_s16] sm:$0xff]   ;;  %v10913_v50 = vld [vmem:[%s11563_s2 + $0x38] sm:$0xff]  }
 0x8a0   :  { %10147 = vmatprep.subr.bf16.mxu1 %v11244_v0 }
 0x8a2   :  { %v10879_v5 = vpop.permute.xlu1 %10878 }
 0x8a3   :  { %v10881_v7 = vunpack.i.h.bf16 %v10879_v5  ;;  %v10880_v9 = vunpack.i.l.bf16 %v10879_v5 }
 0x8a5   :  { %v1582_v14 = vsel %vm211_vm2, %v11409_v61, %v10881_v7  ;;  %v1581_v15 = vsel %vm211_vm2, %v11407_v59, %v10880_v9  ;;  %v9482_v59 = vld [vmem:[%s11542_s10] ss:$0 sm:$0xff]  ;;  %v10918_v9 = vld [vmem:[%s11563_s2 + $0x10] sm:$0xff]  }
 0x8a6   :  { %v10884_v6 = vpop.permute.xlu1 %10883 }
 0x8a7   :  { %v10886_v10 = vunpack.i.h.bf16 %v10884_v6  ;;  %v10885_v12 = vunpack.i.l.bf16 %v10884_v6 }
 0x8a8   :  { %v10980_v8 = vpop.eup %10979 }
 0x8a9   :  { %v1395_v41 = vsel %vm211_vm2, %v10980_v8, 0.0  ;;  %v1584_v21 = vsel %vm1583_vm7, %v1581_v15, %v10885_v12  ;;  %v1585_v22 = vsel %vm1583_vm7, %v1582_v14, %v10886_v10  ;;  %v10919_v10 = vld [vmem:[%s11563_s2 + $0x8] sm:$0xff]   ;;  %v10920_v12 = vld [vmem:[%s11563_s2] sm:$0xff]  }
 0x8aa   :  { %1396 = vadd.xlane.f32.xlu0 %v1395_v41  ;;  %v10915_v41 = vld [vmem:[%s11563_s2 + $0x28] sm:$0xff]  }
 0x8ac   :  { %v10982_v43 = vpop.eup %10981 }
 0x8ad   :  { %v1398_v45 = vsel %vm211_vm2, %v10982_v43, 0.0 }
 0x8ae   :  { %1399 = vadd.xlane.f32.xlu0 %v1398_v45  ;;  %v10917_v45 = vld [vmem:[%s11563_s2 + $0x18] sm:$0xff]  }
 0x8c4   :  { %1481 = vrot.lane.b32.xlu0 %v11333_v11, %s11260_s28  ;;  %v10909_v11 = vld [vmem:[%s11521_s4 + $0x8] sm:$0xff]  }
 0x933   :  { %v1397_v51 = vpop.xlane.xlu0 %1396 }
 0x934   :  { %10983 = vrcp.f32 %v1397_v51 }
 0x937   :  { %v1400_v52 = vpop.xlane.xlu0 %1399 }
 0x938   :  { %10985 = vrcp.f32 %v1400_v52 }
 0x93b   :  { %v1482_v53 = vpop.permute.xlu0 %1481 }
 0x93c   :  { %10143 = vmatpush3.msra.mxu0 %v1482_v53 }
 0x93d   :  { %10155 = vmatprep.subr.bf16.mxu0 %v11244_v0 }
 0x941   :  { %v10984_v54 = vpop.eup %10983 }
 0x942   :  { %v1402_v55 = vmul.f32 %v10984_v54, %v10980_v8  ;;  %v10914_v8 = vld [vmem:[%s11563_s2 + $0x30] sm:$0xff]  }
 0x944   :  { %10140 = vmatmul.mubr.msk.f32.vlgmr.msra.gmra.mxu1 %vm211_vm2, %v1402_v55 }
 0x945   :  { %v10986_v56 = vpop.eup %10985  ;;  %10151 = vmatprep.mubr.msk.bf16.mxu1 %vm11246_vm0, %v11244_v0  ;;  %10148 = vmatpush3.bf16.msra.mxu1 %v10909_v11 }
 0x946   :  { %v1404_v57 = vmul.f32 %v10986_v56, %v10982_v43  ;;  %10149 = vmatprep.subr.bf16.mxu1 %v11244_v0  ;;  %v10916_v43 = vld [vmem:[%s11563_s2 + $0x20] sm:$0xff]  }
 0x948   :  { %10145 = vmatmul.mubr.msk.f32.vlgmr.msra.gmra.mxu0 %vm211_vm2, %v1404_v57 }
 0x949   :  { %10159 = vmatprep.mubr.msk.bf16.mxu0 %vm11246_vm0, %v11244_v0  ;;  %10150 = vmatpush3.bf16.msra.mxu1 %v10910_v58  ;;  %v9486_v58 = vld [vmem:[%s11578_s9] ss:$0 sm:$0xff] }
 0x94a   :  { %10163 = vmatprep.subr.bf16.mxu1 %v11244_v0 }
 0xa04   :  { %v1477_v60 = vpop.f32.mrf.mxu1 }
 0xa06   :  { %v10141_v62 = vpop.f32.mrf.mxu1 }
 0xa08   :  { %v1553_v63 = vpop.f32.mrf.mxu0 }
 0xa09   :  { %v10887_v1 = vpack.i.bf16 %v1553_v63, %v1477_v60 }
 0xa0a   :  { %v10146_v2 = vpop.f32.mrf.mxu0 }
 0xa0b   :  { %10888 = vrot.lane.b32.xlu0 %v10887_v1, %s12823_s5  ;;  %v9487_v1 = vld [vmem:[%s11584_s15] ss:$0 sm:$0xff] }
 0xa7d   :  { %v10889_v13 = vpop.permute.xlu0 %10888 }
 0xa7e   :  { %v10891_v16 = vunpack.i.h.bf16 %v10889_v13  ;;  %v10890_v18 = vunpack.i.l.bf16 %v10889_v13  ;;  %v9488_v13 = vld [vmem:[%s11600_s3] ss:$0 sm:$0xff] }
 0xa80   :  { %v1588_v23 = vsel %vm1586_vm8, %v1585_v22, %v10891_v16  ;;  %v1587_v24 = vsel %vm1586_vm8, %v1584_v21, %v10890_v18 }
 0xa81   :  { %v1593_v26 = vpack.c.bf16 %v1588_v23, %v1587_v24 }
 0xa83   :  { %10152 = vmatmul.mubr.msk.bf16.vlgmr.msra.gmra.mxu1 %vm163_vm1, %v1593_v26 }
 0xa84   :  { %10179 = vmatprep.mubr.msk.bf16.mxu1 %vm11246_vm0, %v11244_v0  ;;  %10164 = vmatpush3.bf16.msra.mxu1 %v10913_v50 }
 0xa85   :  { %10165 = vmatprep.subr.bf16.mxu1 %v11244_v0 }
 0xa88   :  { %10166 = vmatpush3.bf16.msra.mxu1 %v10914_v8 }
 0xa89   :  { %10167 = vmatprep.subr.bf16.mxu1 %v11244_v0 }
 0xa8c   :  { %10168 = vmatpush3.bf16.msra.mxu1 %v10915_v41 }
 0xa8d   :  { %10169 = vmatprep.subr.bf16.mxu1 %v11244_v0 }
 0xa90   :  { %10170 = vmatpush3.bf16.msra.mxu1 %v10916_v43 }
 0xa91   :  { %10171 = vmatprep.subr.bf16.mxu1 %v11244_v0 }
 0xa94   :  { %10172 = vmatpush3.bf16.msra.mxu1 %v10917_v45 }
 0xa95   :  { %10173 = vmatprep.subr.bf16.mxu1 %v11244_v0 }
 0xa98   :  { %10174 = vmatpush3.bf16.msra.mxu1 %v10918_v9 }
 0xa99   :  { %10175 = vmatprep.subr.bf16.mxu1 %v11244_v0 }
 0xa9c   :  { %10176 = vmatpush3.bf16.msra.mxu1 %v10919_v10 }
 0xa9d   :  { %10177 = vmatprep.subr.bf16.mxu1 %v11244_v0 }
 0xaa0   :  { %10178 = vmatpush3.bf16.msra.mxu1 %v10920_v12 }
 0xaa1   :  { %10221 = vmatprep.subr.mxu1 %v11244_v0 }
 0xb43   :  { %v1650_v61 = vpop.f32.mrf.mxu1 }
 0xb44   :  { %v1651_v27 = vadd.f32 %v9482_v59, %v1650_v61 }
 0xb45   :  { %v10153_v28 = vpop.f32.mrf.mxu1 }
 0xb46   :  { %v1657_v29 = vadd.f32 %v1651_v27, %v11312_v3 }
 0xb47   :  { %v1653_v30 = vpop.f32.mrf.mxu1 }
 0xb48   :  { %v1654_v31 = vadd.f32 %v9482_v59, %v1653_v30  ;;  %v1661_v33 = vsel %vm163_vm1, %v1657_v29, 0.0  ;;  %v9492_v59 = vld [vmem:[%s11608_s12] ss:$0 sm:$0xff] }
 0xb49   :  { %1662 = vadd.xlane.f32.xlu1 %v1661_v33  ;;  %v10154_v34 = vpop.f32.mrf.mxu1 }
 0xb4a   :  { %v1658_v35 = vadd.f32 %v1654_v31, %v11314_v4  ;;  %v10911_v4 = vld [vmem:[%s11554_s16 + $0x8] sm:$0xff]  }
 0xb4b   :  { %10156 = vmatpush3.bf16.msra.mxu0 %v10911_v4  ;;  %v10921_v4 = vld [vmem:[%s11300_s6 + $0x18] sm:$0xff]  }
 0xb4c   :  { %v1664_v36 = vsel %vm163_vm1, %v1658_v35, 0.0  ;;  %10157 = vmatprep.subr.bf16.mxu0 %v11244_v0 }
 0xb4d   :  { %1665 = vadd.xlane.f32.xlu0 %v1664_v36 }
 0xb4f   :  { %10158 = vmatpush3.bf16.msra.mxu0 %v10912_v49  ;;  %v10922_v49 = vld [vmem:[%s11300_s6 + $0x10] sm:$0xff]   ;;  %s11272_s6 = smov 14  }
 0xb50   :  { %10183 = vmatprep.subr.bf16.mxu0 %v11244_v0  ;;  %s11627_s5 = sld [smem:[%s12822_s0 + %s11272_s6]]  }
 0xbd2   :  { %v1663_v37 = vpop.xlane.xlu1 %1662 }
 0xbd3   :  { %v1668_v38 = vmul.f32 0.03125, %v1663_v37 }
 0xbd5   :  { %v1670_v39 = vsub.f32 %v1657_v29, %v1668_v38 }
 0xbd6   :  { %v1666_v40 = vpop.xlane.xlu0 %1665 }
 0xbd7   :  { %v1669_v42 = vmul.f32 0.03125, %v1666_v40  ;;  %v1672_v44 = vmul.f32 %v1670_v39, %v1670_v39 }
 0xbd9   :  { %v1671_v46 = vsub.f32 %v1658_v35, %v1669_v42  ;;  %v1674_v3 = vsel %vm163_vm1, %v1672_v44, 0.0 }
 0xbda   :  { %1675 = vadd.xlane.f32.xlu0 %v1674_v3 }
 0xbdb   :  { %v1673_v47 = vmul.f32 %v1671_v46, %v1671_v46 }
 0xbdd   :  { %v1677_v48 = vsel %vm163_vm1, %v1673_v47, 0.0 }
 0xbde   :  { %1678 = vadd.xlane.f32.xlu1 %v1677_v48 }
 0xc63   :  { %v1676_v51 = vpop.xlane.xlu0 %1675 }
 0xc64   :  { %v1680_v52 = vmul.f32 0.03125, %v1676_v51 }
 0xc66   :  { %v1682_v53 = vadd.f32 1e-05, %v1680_v52 }
 0xc67   :  { %v1679_v54 = vpop.xlane.xlu1 %1678 }
 0xc68   :  { %10987 = vrsqrt.f32 %v1682_v53  ;;  %v1681_v55 = vmul.f32 0.03125, %v1679_v54  ;;  %v9501_v54 = vld [vmem:[%s11622_s7] ss:$0 sm:$0xff] }
 0xc6a   :  { %v1683_v56 = vadd.f32 1e-05, %v1681_v55 }
 0xc6c   :  { %10989 = vrsqrt.f32 %v1683_v56 }
 0xc75   :  { %v10988_v57 = vpop.eup %10987 }
 0xc76   :  { %v1686_v11 = vmul.f32 %v10988_v57, %v1670_v39 }
 0xc78   :  { %v1694_v63 = vmul.f32 %v9486_v58, %v1686_v11  ;;  %v9502_v11 = vld [vmem:[%s11627_s5] ss:$0 sm:$0xff] }
 0xc79   :  { %v10990_v60 = vpop.eup %10989 }
 0xc7a   :  { %v1687_v62 = vmul.f32 %v10990_v60, %v1671_v46  ;;  %v1702_v5 = vadd.f32 %v9487_v1, %v1694_v63 }
 0xc7c   :  { %v1695_v2 = vmul.f32 %v9486_v58, %v1687_v62 }
 0xc7e   :  { %v1703_v6 = vadd.f32 %v9487_v1, %v1695_v2  ;;  %v9508_v1 = vld [vmem:[%s11326_s13 + $0x1] ss:$0 sm:$0xff]  ;;  %s12829_s13 = smov 24  }
 0xc80   :  { %v1708_v7 = vpack.c.bf16 %v1703_v6, %v1702_v5 }
 0xc82   :  { %10160 = vmatmul.mubr.msk.bf16.vlgmr.msra.gmra.mxu0 %vm163_vm1, %v1708_v7 }
 0xc83   :  { %10187 = vmatprep.mubr.msk.bf16.mxu0 %vm11246_vm0, %v11244_v0  ;;  %10184 = vmatpush3.bf16.msra.mxu0 %v10921_v4 }
 0xc84   :  { %10185 = vmatprep.subr.bf16.mxu0 %v11244_v0 }
 0xc87   :  { %10186 = vmatpush3.bf16.msra.mxu0 %v10922_v49 }
 0xc88   :  { %10191 = vmatprep.subr.mxu0 %v11244_v0 }
 0xd42   :  { %v1765_v14 = vpop.f32.mrf.mxu0 }
 0xd43   :  { %v1766_v16 = vadd.f32 %v9488_v13, %v1765_v14 }
 0xd44   :  { %v10161_v15 = vpop.f32.mrf.mxu0 }
 0xd45   :  { %v1772_v23 = vmax.f32 %v1766_v16, 0.0 }
 0xd46   :  { %v1768_v18 = vpop.f32.mrf.mxu0 }
 0xd47   :  { %v1769_v21 = vadd.f32 %v9488_v13, %v1768_v18 }
 0xd48   :  { %v10162_v22 = vpop.f32.mrf.mxu0 }
 0xd49   :  { %v1773_v24 = vmax.f32 %v1769_v21, 0.0 }
 0xd4b   :  { %v1790_v26 = vpack.c.bf16 %v1773_v24, %v1772_v23 }
 0xd4d   :  { %10180 = vmatmul.mubr.bf16.vlgmr.msra.gmra.mxu1 %v1790_v26 }
 0xd4e   :  { %10223 = vmatprep.mubr.msk.f32.mxu1 %vm11246_vm0, %v11244_v0 }
 0xe0d   :  { %v1880_v61 = vpop.f32.mrf.mxu1 }
 0xe0e   :  { %v1881_v27 = vadd.f32 %v9492_v59, %v1880_v61 }
 0xe0f   :  { %v10181_v28 = vpop.f32.mrf.mxu1 }
 0xe10   :  { %v1887_v29 = vadd.f32 %v1881_v27, %v1702_v5 }
 0xe11   :  { %v1883_v30 = vpop.f32.mrf.mxu1 }
 0xe12   :  { %v1884_v31 = vadd.f32 %v9492_v59, %v1883_v30  ;;  %v1891_v33 = vsel %vm163_vm1, %v1887_v29, 0.0 }
 0xe13   :  { %1892 = vadd.xlane.f32.xlu0 %v1891_v33  ;;  %v10182_v34 = vpop.f32.mrf.mxu1 }
 0xe14   :  { %v1888_v35 = vadd.f32 %v1884_v31, %v1703_v6 }
 0xe16   :  { %v1894_v36 = vsel %vm163_vm1, %v1888_v35, 0.0 }
 0xe17   :  { %1895 = vadd.xlane.f32.xlu1 %v1894_v36 }
 0xe9c   :  { %v1893_v37 = vpop.xlane.xlu0 %1892 }
 0xe9d   :  { %v1897_v38 = vmul.f32 0.03125, %v1893_v37 }
 0xe9f   :  { %v1899_v39 = vsub.f32 %v1887_v29, %v1897_v38 }
 0xea0   :  { %v1896_v40 = vpop.xlane.xlu1 %1895 }
 0xea1   :  { %v1898_v42 = vmul.f32 0.03125, %v1896_v40  ;;  %v1901_v44 = vmul.f32 %v1899_v39, %v1899_v39 }
 0xea3   :  { %v1900_v46 = vsub.f32 %v1888_v35, %v1898_v42  ;;  %v1903_v3 = vsel %vm163_vm1, %v1901_v44, 0.0 }
 0xea4   :  { %1904 = vadd.xlane.f32.xlu0 %v1903_v3 }
 0xea5   :  { %v1902_v47 = vmul.f32 %v1900_v46, %v1900_v46 }
 0xea7   :  { %v1906_v48 = vsel %vm163_vm1, %v1902_v47, 0.0 }
 0xea8   :  { %1907 = vadd.xlane.f32.xlu1 %v1906_v48 }
 0xf2d   :  { %v1905_v50 = vpop.xlane.xlu0 %1904 }
 0xf2e   :  { %v1909_v8 = vmul.f32 0.03125, %v1905_v50 }
 0xf30   :  { %v1911_v41 = vadd.f32 1e-05, %v1909_v8 }
 0xf31   :  { %v1908_v43 = vpop.xlane.xlu1 %1907 }
 0xf32   :  { %10991 = vrsqrt.f32 %v1911_v41  ;;  %v1910_v45 = vmul.f32 0.03125, %v1908_v43 }
 0xf34   :  { %v1912_v51 = vadd.f32 1e-05, %v1910_v45 }
 0xf36   :  { %10993 = vrsqrt.f32 %v1912_v51 }
 0xf3f   :  { %v10992_v52 = vpop.eup %10991 }
 0xf40   :  { %v1915_v53 = vmul.f32 %v10992_v52, %v1899_v39 }
 0xf42   :  { %v1923_v57 = vmul.f32 %v9501_v54, %v1915_v53 }
 0xf43   :  { %v10994_v55 = vpop.eup %10993 }
 0xf44   :  { %v1916_v56 = vmul.f32 %v10994_v55, %v1900_v46  ;;  %v11631_v60 = vadd.f32 %v9502_v11, %v1923_v57 }
 0xf46   :  { %v1924_v58 = vmul.f32 %v9501_v54, %v1916_v56 }
 0xf48   :  { %v11633_v62 = vadd.f32 %v9502_v11, %v1924_v58 }
 0xf4a   :  { %v1938_v63 = vpack.c.bf16 %v11633_v62, %v11631_v60 }
 0xf4c   :  { %10188 = vmatmul.mubr.msk.bf16.vlgmr.msra.gmra.mxu0 %vm163_vm1, %v1938_v63 }
 0xf4d   :  { %10193 = vmatprep.mubr.msk.f32.mxu0 %vm11246_vm0, %v11244_v0 }
0x100c   :  { %v1996_v2 = vpop.f32.mrf.mxu0 }
0x100d   :  { %v11641_v5 = vadd.f32 %v9508_v1, %v1996_v2 }
0x100e   :  { %v10189_v6 = vpop.f32.mrf.mxu0 }
0x100f   :  { %2004 = vrot.lane.b32.xlu0 %v11641_v5, %s11248_s14 }
0x1010   :  { %v1999_v7 = vpop.f32.mrf.mxu0 }
0x1011   :  { %v11645_v9 = vadd.f32 %v9508_v1, %v1999_v7 }
0x1012   :  { %v10190_v10 = vpop.f32.mrf.mxu0 }
0x1013   :  { %2081 = vrot.lane.b32.xlu1 %v11645_v9, %s11248_s14 }
0x1081   :  { %v2005_v12 = vpop.permute.xlu0 %2004 }
0x1082   :  { %10192 = vmatpush3.xpose.msk.msra.mxu0 %vm211_vm2, %v2005_v12 }
0x1083   :  { %10196 = vmatprep.subr.mxu0 %v11244_v0 }
0x1085   :  { %10194 = vmatmul.mubr.msk.f32.vlgmr.msra.gmra.mxu0 %vm211_vm2, %v11641_v5  ;;  %v2082_v13 = vpop.permute.xlu1 %2081 }
0x1086   :  { %10197 = vmatpush3.xpose.msk.msra.mxu0 %vm211_vm2, %v2082_v13  ;;  %10198 = vmatprep.mubr.msk.f32.mxu0 %vm11246_vm0, %v11244_v0 }
0x1087   :  { %10201 = vmatprep.subr.mxu0 %v11244_v0 }
0x1089   :  { %10199 = vmatmul.mubr.msk.f32.vlgmr.msra.gmra.mxu0 %vm211_vm2, %v11645_v9 }
0x108a   :  { %10203 = vmatprep.mubr.msk.f32.mxu0 %vm11246_vm0, %v11244_v0 }
0x1145   :  { %v2076_v14 = vpop.f32.mrf.mxu0 }
0x1146   :  { %v2157_v15 = vmul.f32 0.35355338, %v2076_v14 }
0x1147   :  { %v10195_v16 = vpop.f32.mrf.mxu0 }
0x1148   :  { %v2159_v18 = vsel %vm11360_vm5, %v2157_v15, -1e+09 }
0x1149   :  { %v2153_v21 = vpop.f32.mrf.mxu0  ;;  %v2161_v22 = vsel %vm211_vm2, %v2159_v18, -inf }
0x114a   :  { %v2158_v23 = vmul.f32 0.35355338, %v2153_v21  ;;  %2162 = vmax.xlane.f32.xlu1 %v2161_v22 }
0x114b   :  { %v10200_v24 = vpop.f32.mrf.mxu0 }
0x114c   :  { %v2160_v26 = vsel %vm11368_vm6, %v2158_v23, -1e+09 }
0x114d   :  { %v2164_v59 = vsel %vm211_vm2, %v2160_v26, -inf }
0x114e   :  { %2165 = vmax.xlane.f32.xlu0 %v2164_v59 }
0x115b   :  { %2259 = vrot.lane.b32.xlu1 %v11645_v9, %s11251_s19 }
0x115f   :  { %2337 = vrot.lane.b32.xlu1 %v11641_v5, %s11252_s20 }
0x11d3   :  { %v2163_v61 = vpop.xlane.xlu1 %2162 }
0x11d4   :  { %v2167_v27 = vsub.f32 %v2159_v18, %v2163_v61 }
0x11d6   :  { %v2169_v28 = vmul.f32 1.442695, %v2167_v27 }
0x11d7   :  { %v2166_v29 = vpop.xlane.xlu0 %2165  ;;  %v2260_v37 = vpop.permute.xlu1 %2259 }
0x11d8   :  { %10995 = vpow2.f32 %v2169_v28  ;;  %v2168_v30 = vsub.f32 %v2160_v26, %v2166_v29 }
0x11da   :  { %v2171_v31 = vmul.f32 1.442695, %v2168_v30 }
0x11db   :  { %v2338_v38 = vpop.permute.xlu1 %2337 }
0x11dc   :  { %10997 = vpow2.f32 %v2171_v31 }
0x11e5   :  { %v10996_v33 = vpop.eup %10995 }
0x11e6   :  { %v2173_v34 = vsel %vm211_vm2, %v10996_v33, 0.0 }
0x11e7   :  { %2174 = vadd.xlane.f32.xlu0 %v2173_v34 }
0x11e9   :  { %v10998_v35 = vpop.eup %10997 }
0x11ea   :  { %v2176_v36 = vsel %vm211_vm2, %v10998_v35, 0.0 }
0x11eb   :  { %2177 = vadd.xlane.f32.xlu1 %v2176_v36 }
0x11fc   :  { %2415 = vrot.lane.b32.xlu1 %v11645_v9, %s11252_s20  ;;  %s11273_s20 = smov 15  }
0x11fd   :  { %2183 = vrot.lane.b32.xlu0 %v11641_v5, %s11251_s19 }
0x1201   :  { %2335 = vrot.lane.b32.xlu0 %v11641_v5, %s11253_s21 }
0x1205   :  { %2413 = vrot.lane.b32.xlu0 %v11645_v9, %s11253_s21 }
0x1270   :  { %v2175_v39 = vpop.xlane.xlu0 %2174 }
0x1271   :  { %10999 = vrcp.f32 %v2175_v39 }
0x1274   :  { %v2178_v40 = vpop.xlane.xlu1 %2177  ;;  %v2184_v42 = vpop.permute.xlu0 %2183 }
0x1275   :  { %11001 = vrcp.f32 %v2178_v40  ;;  %10202 = vmatpush3.msra.mxu0 %v2184_v42 }
0x1276   :  { %10206 = vmatprep.subr.mxu0 %v11244_v0 }
0x1278   :  { %v2336_v48 = vpop.permute.xlu0 %2335  ;;  %v2416_v4 = vpop.permute.xlu1 %2415 }
0x127c   :  { %v2414_v49 = vpop.permute.xlu0 %2413 }
0x127e   :  { %v11000_v44 = vpop.eup %10999 }
0x127f   :  { %v2180_v46 = vmul.f32 %v11000_v44, %v10996_v33 }
0x1281   :  { %10204 = vmatmul.mubr.msk.f32.vlgmr.msra.gmra.mxu0 %vm211_vm2, %v2180_v46 }
0x1282   :  { %v11002_v3 = vpop.eup %11001  ;;  %10207 = vmatpush3.msra.mxu0 %v2260_v37  ;;  %10208 = vmatprep.mubr.msk.f32.mxu0 %vm11246_vm0, %v11244_v0 }
0x1283   :  { %10211 = vmatprep.subr.mxu0 %v11244_v0  ;;  %v2182_v47 = vmul.f32 %v11002_v3, %v10998_v35 }
0x1285   :  { %10209 = vmatmul.mubr.msk.f32.vlgmr.msra.gmra.mxu0 %vm211_vm2, %v2182_v47 }
0x1286   :  { %10212 = vmatpush3.xpose.msk.msra.mxu0 %vm211_vm2, %v2338_v38  ;;  %10213 = vmatprep.mubr.msk.f32.mxu0 %vm11246_vm0, %v11244_v0 }
0x1287   :  { %10216 = vmatprep.subr.mxu0 %v11244_v0 }
0x1289   :  { %10214 = vmatmul.mubr.msk.f32.vlgmr.msra.gmra.mxu0 %vm211_vm2, %v2336_v48 }
0x128a   :  { %10217 = vmatpush3.xpose.msk.msra.mxu0 %vm211_vm2, %v2416_v4  ;;  %10218 = vmatprep.mubr.msk.f32.mxu0 %vm11246_vm0, %v11244_v0 }
0x128b   :  { %10226 = vmatprep.subr.mxu0 %v11244_v0 }
0x128d   :  { %10219 = vmatmul.mubr.msk.f32.vlgmr.msra.gmra.mxu0 %vm211_vm2, %v2414_v49 }
0x128e   :  { %10228 = vmatprep.mubr.msk.f32.mxu0 %vm11246_vm0, %v11244_v0 }
0x1341   :  { %v11699_v50 = vpop.f32.mrf.mxu0 }
0x1343   :  { %v10205_v8 = vpop.f32.mrf.mxu0 }
0x1345   :  { %v11701_v41 = vpop.f32.mrf.mxu0 }
0x1347   :  { %v10210_v43 = vpop.f32.mrf.mxu0 }
0x1349   :  { %v2409_v45 = vpop.f32.mrf.mxu0 }
0x134a   :  { %v2491_v51 = vmul.f32 0.35355338, %v2409_v45 }
0x134b   :  { %v10215_v52 = vpop.f32.mrf.mxu0 }
0x134c   :  { %v2493_v53 = vsel %vm11360_vm5, %v2491_v51, -1e+09 }
0x134d   :  { %v2487_v54 = vpop.f32.mrf.mxu0  ;;  %v2495_v55 = vsel %vm211_vm2, %v2493_v53, -inf }
0x134e   :  { %v2492_v56 = vmul.f32 0.35355338, %v2487_v54  ;;  %2496 = vmax.xlane.f32.xlu1 %v2495_v55 }
0x134f   :  { %v10220_v57 = vpop.f32.mrf.mxu0 }
0x1350   :  { %v2494_v11 = vsel %vm11368_vm6, %v2492_v56, -1e+09 }
0x1351   :  { %v2498_v58 = vsel %vm211_vm2, %v2494_v11, -inf }
0x1352   :  { %2499 = vmax.xlane.f32.xlu0 %v2498_v58 }
0x135f   :  { %2593 = vrot.lane.b32.xlu1 %v11645_v9, %s11254_s22 }
0x1363   :  { %2671 = vrot.lane.b32.xlu1 %v11641_v5, %s11255_s23 }
0x1368   :  { %2517 = vrot.lane.b32.xlu0 %v11641_v5, %s11254_s22  ;;  %s11926_s22 = sld [smem:[%s12822_s0 + %s12829_s13]]  }
0x13d7   :  { %v2497_v63 = vpop.xlane.xlu1 %2496 }
0x13d8   :  { %v2501_v1 = vsub.f32 %v2493_v53, %v2497_v63 }
0x13da   :  { %v2503_v2 = vmul.f32 1.442695, %v2501_v1 }
0x13db   :  { %v2594_v6 = vpop.permute.xlu1 %2593  ;;  %v2500_v7 = vpop.xlane.xlu0 %2499 }
0x13dc   :  { %11003 = vpow2.f32 %v2503_v2  ;;  %v2502_v10 = vsub.f32 %v2494_v11, %v2500_v7  ;;  %10227 = vmatpush3.msra.mxu0 %v2594_v6 }
0x13dd   :  { %10236 = vmatprep.subr.mxu0 %v11244_v0 }
0x13de   :  { %v2505_v12 = vmul.f32 1.442695, %v2502_v10 }
0x13df   :  { %v2518_v13 = vpop.permute.xlu0 %2517  ;;  %v2672_v21 = vpop.permute.xlu1 %2671 }
0x13e0   :  { %11005 = vpow2.f32 %v2505_v12  ;;  %10222 = vmatpush3.msra.mxu1 %v2518_v13 }
0x13e1   :  { %10231 = vmatprep.subr.mxu1 %v11244_v0 }
0x13e9   :  { %v11004_v14 = vpop.eup %11003 }
0x13ea   :  { %v2507_v15 = vsel %vm211_vm2, %v11004_v14, 0.0 }
0x13eb   :  { %2508 = vadd.xlane.f32.xlu0 %v2507_v15 }
0x13ed   :  { %v11006_v16 = vpop.eup %11005 }
0x13ee   :  { %v2510_v18 = vsel %vm211_vm2, %v11006_v16, 0.0 }
0x13ef   :  { %2511 = vadd.xlane.f32.xlu1 %v2510_v18 }
0x1400   :  { %2669 = vrot.lane.b32.xlu1 %v11641_v5, %s11256_s24 }
0x1401   :  { %2749 = vrot.lane.b32.xlu0 %v11645_v9, %s11255_s23  ;;  %s9436_s23 = sld [smem:[%s12822_s0 + %s11273_s20]]  }
0x1405   :  { %2747 = vrot.lane.b32.xlu0 %v11645_v9, %s11256_s24  ;;  %s11274_s24 = smov 26  }
0x1474   :  { %v2509_v22 = vpop.xlane.xlu0 %2508 }
0x1475   :  { %11007 = vrcp.f32 %v2509_v22 }
0x1478   :  { %v2512_v23 = vpop.xlane.xlu1 %2511  ;;  %v2750_v61 = vpop.permute.xlu0 %2749 }
0x1479   :  { %11009 = vrcp.f32 %v2512_v23 }
0x147c   :  { %v2670_v28 = vpop.permute.xlu1 %2669  ;;  %v2748_v29 = vpop.permute.xlu0 %2747 }
0x1482   :  { %v11008_v24 = vpop.eup %11007 }
0x1483   :  { %v2514_v26 = vmul.f32 %v11008_v24, %v11004_v14 }
0x1485   :  { %10224 = vmatmul.mubr.msk.f32.vlgmr.msra.gmra.mxu1 %vm211_vm2, %v2514_v26 }
0x1486   :  { %v11010_v59 = vpop.eup %11009  ;;  %10232 = vmatpush3.xpose.msk.msra.mxu1 %vm211_vm2, %v2672_v21  ;;  %10233 = vmatprep.mubr.msk.f32.mxu1 %vm11246_vm0, %v11244_v0 }
0x1487   :  { %v2516_v27 = vmul.f32 %v11010_v59, %v11006_v16  ;;  %10241 = vmatprep.subr.mxu1 %v11244_v0 }
0x1489   :  { %10229 = vmatmul.mubr.msk.f32.vlgmr.msra.gmra.mxu0 %vm211_vm2, %v2516_v27  ;;  %10234 = vmatmul.mubr.msk.f32.vlgmr.msra.gmra.mxu1 %vm211_vm2, %v2670_v28 }
0x148a   :  { %10237 = vmatpush3.xpose.msk.msra.mxu0 %vm211_vm2, %v2750_v61  ;;  %10238 = vmatprep.mubr.msk.f32.mxu0 %vm11246_vm0, %v11244_v0 }
0x148b   :  { %10246 = vmatprep.subr.mxu0 %v11244_v0  ;;  %10243 = vmatprep.mubr.msk.f32.mxu1 %vm11246_vm0, %v11244_v0 }
0x148d   :  { %10239 = vmatmul.mubr.msk.f32.vlgmr.msra.gmra.mxu0 %vm211_vm2, %v2748_v29 }
0x148e   :  { %10248 = vmatprep.mubr.msk.f32.mxu0 %vm11246_vm0, %v11244_v0 }
0x1545   :  { %v11741_v30 = vpop.f32.mrf.mxu1 }
0x1547   :  { %v10225_v31 = vpop.f32.mrf.mxu1 }
0x1549   :  { %v11743_v33 = vpop.f32.mrf.mxu0  ;;  %v2743_v34 = vpop.f32.mrf.mxu1 }
0x154a   :  { %v10892_v35 = vpack.i.bf16 %v11743_v33, %v11741_v30  ;;  %v2825_v36 = vmul.f32 0.35355338, %v2743_v34 }
0x154b   :  { %v10230_v37 = vpop.f32.mrf.mxu0  ;;  %v10235_v38 = vpop.f32.mrf.mxu1 }
0x154c   :  { %v2827_v39 = vsel %vm11360_vm5, %v2825_v36, -1e+09 }
0x154d   :  { %v2821_v40 = vpop.f32.mrf.mxu0  ;;  %v2829_v42 = vsel %vm211_vm2, %v2827_v39, -inf }
0x154e   :  { %v2826_v44 = vmul.f32 0.35355338, %v2821_v40  ;;  %2830 = vmax.xlane.f32.xlu1 %v2829_v42 }
0x154f   :  { %v10240_v46 = vpop.f32.mrf.mxu0 }
0x1550   :  { %v2828_v3 = vsel %vm11368_vm6, %v2826_v44, -1e+09 }
0x1551   :  { %v2832_v47 = vsel %vm211_vm2, %v2828_v3, -inf }
0x1552   :  { %2833 = vmax.xlane.f32.xlu0 %v2832_v47 }
0x155f   :  { %2927 = vrot.lane.b32.xlu1 %v11645_v9, %s11257_s25 }
0x1563   :  { %3005 = vrot.lane.b32.xlu1 %v11641_v5, %s11258_s26 }
0x1568   :  { %2851 = vrot.lane.b32.xlu0 %v11641_v5, %s11257_s25 }
0x15d7   :  { %v2831_v48 = vpop.xlane.xlu1 %2830 }
0x15d8   :  { %v2835_v4 = vsub.f32 %v2827_v39, %v2831_v48  ;;  %v10924_v48 = vld [vmem:[%s11521_s4 + $0x10] sm:$0xff]  }
0x15da   :  { %v2837_v49 = vmul.f32 1.442695, %v2835_v4 }
0x15db   :  { %v2928_v8 = vpop.permute.xlu1 %2927  ;;  %v2834_v43 = vpop.xlane.xlu0 %2833 }
0x15dc   :  { %11011 = vpow2.f32 %v2837_v49  ;;  %v2836_v45 = vsub.f32 %v2828_v3, %v2834_v43  ;;  %10247 = vmatpush3.msra.mxu0 %v2928_v8 }
0x15dd   :  { %10256 = vmatprep.subr.mxu0 %v11244_v0 }
0x15de   :  { %v2839_v51 = vmul.f32 1.442695, %v2836_v45 }
0x15df   :  { %v2852_v52 = vpop.permute.xlu0 %2851  ;;  %v3006_v57 = vpop.permute.xlu1 %3005 }
0x15e0   :  { %11013 = vpow2.f32 %v2839_v51  ;;  %10242 = vmatpush3.msra.mxu1 %v2852_v52 }
0x15e1   :  { %10251 = vmatprep.subr.mxu1 %v11244_v0 }
0x15e9   :  { %v11012_v53 = vpop.eup %11011 }
0x15ea   :  { %v2841_v54 = vsel %vm211_vm2, %v11012_v53, 0.0 }
0x15eb   :  { %2842 = vadd.xlane.f32.xlu0 %v2841_v54 }
0x15ed   :  { %v11014_v55 = vpop.eup %11013 }
0x15ee   :  { %v2844_v56 = vsel %vm211_vm2, %v11014_v55, 0.0 }
0x15ef   :  { %2845 = vadd.xlane.f32.xlu1 %v2844_v56 }
0x1600   :  { %3003 = vrot.lane.b32.xlu1 %v11641_v5, %s11259_s27 }
0x1601   :  { %3083 = vrot.lane.b32.xlu0 %v11645_v9, %s11258_s26  ;;  %s11280_s26 = smov 20  }
0x1605   :  { %3081 = vrot.lane.b32.xlu0 %v11645_v9, %s11259_s27  ;;  %s9447_s27 = sld [smem:[%s12822_s0 + %s11274_s24]]  }
0x1674   :  { %v2843_v11 = vpop.xlane.xlu0 %2842 }
0x1675   :  { %11015 = vrcp.f32 %v2843_v11 }
0x1678   :  { %v2846_v58 = vpop.xlane.xlu1 %2845  ;;  %v3084_v6 = vpop.permute.xlu0 %3083 }
0x1679   :  { %11017 = vrcp.f32 %v2846_v58 }
0x167c   :  { %v3004_v10 = vpop.permute.xlu1 %3003  ;;  %v3082_v12 = vpop.permute.xlu0 %3081 }
0x1682   :  { %v11016_v63 = vpop.eup %11015 }
0x1683   :  { %v2848_v1 = vmul.f32 %v11016_v63, %v11012_v53 }
0x1685   :  { %10244 = vmatmul.mubr.msk.f32.vlgmr.msra.gmra.mxu1 %vm211_vm2, %v2848_v1 }
0x1686   :  { %v11018_v2 = vpop.eup %11017  ;;  %10252 = vmatpush3.xpose.msk.msra.mxu1 %vm211_vm2, %v3006_v57  ;;  %10253 = vmatprep.mubr.msk.f32.mxu1 %vm11246_vm0, %v11244_v0 }
0x1687   :  { %v2850_v7 = vmul.f32 %v11018_v2, %v11014_v55  ;;  %10261 = vmatprep.subr.mxu1 %v11244_v0 }
0x1689   :  { %10249 = vmatmul.mubr.msk.f32.vlgmr.msra.gmra.mxu0 %vm211_vm2, %v2850_v7  ;;  %10254 = vmatmul.mubr.msk.f32.vlgmr.msra.gmra.mxu1 %vm211_vm2, %v3004_v10 }
0x168a   :  { %10257 = vmatpush3.xpose.msk.msra.mxu0 %vm211_vm2, %v3084_v6  ;;  %10258 = vmatprep.mubr.msk.f32.mxu0 %vm11246_vm0, %v11244_v0 }
0x168b   :  { %10266 = vmatprep.subr.mxu0 %v11244_v0  ;;  %10263 = vmatprep.mubr.msk.f32.mxu1 %vm11246_vm0, %v11244_v0 }
0x168d   :  { %10259 = vmatmul.mubr.msk.f32.vlgmr.msra.gmra.mxu0 %vm211_vm2, %v3082_v12 }
0x168e   :  { %10268 = vmatprep.mubr.msk.f32.mxu0 %vm11246_vm0, %v11244_v0 }
0x1745   :  { %v2923_v13 = vpop.f32.mrf.mxu1 }
0x1747   :  { %v10245_v14 = vpop.f32.mrf.mxu1 }
0x1749   :  { %v2999_v15 = vpop.f32.mrf.mxu0  ;;  %v3077_v16 = vpop.f32.mrf.mxu1 }
0x174a   :  { %v10897_v18 = vpack.i.bf16 %v2999_v15, %v2923_v13  ;;  %v3159_v21 = vmul.f32 0.35355338, %v3077_v16 }
0x174b   :  { %v10250_v22 = vpop.f32.mrf.mxu0  ;;  %v10255_v23 = vpop.f32.mrf.mxu1 }
0x174c   :  { %v3161_v24 = vsel %vm11360_vm5, %v3159_v21, -1e+09 }
0x174d   :  { %v3155_v26 = vpop.f32.mrf.mxu0  ;;  %v3163_v59 = vsel %vm211_vm2, %v3161_v24, -inf }
0x174e   :  { %v3160_v61 = vmul.f32 0.35355338, %v3155_v26  ;;  %3164 = vmax.xlane.f32.xlu1 %v3163_v59 }
0x174f   :  { %v10260_v27 = vpop.f32.mrf.mxu0 }
0x1750   :  { %v3162_v28 = vsel %vm11368_vm6, %v3160_v61, -1e+09 }
0x1751   :  { %v3166_v29 = vsel %vm211_vm2, %v3162_v28, -inf }
0x1752   :  { %3167 = vmax.xlane.f32.xlu0 %v3166_v29 }
0x17d7   :  { %v3165_v31 = vpop.xlane.xlu1 %3164 }
0x17d8   :  { %v3169_v34 = vsub.f32 %v3161_v24, %v3165_v31 }
0x17da   :  { %v3171_v36 = vmul.f32 1.442695, %v3169_v34 }
0x17db   :  { %v3168_v37 = vpop.xlane.xlu0 %3167 }
0x17dc   :  { %11019 = vpow2.f32 %v3171_v36  ;;  %v3170_v38 = vsub.f32 %v3162_v28, %v3168_v37  ;;  %v10925_v36 = vld [vmem:[%s11554_s16 + $0x18] sm:$0xff]   ;;  %v10926_v37 = vld [vmem:[%s11554_s16 + $0x10] sm:$0xff]  }
0x17de   :  { %v3173_v25 = vmul.f32 1.442695, %v3170_v38  ;;  %v10927_v38 = vld [vmem:[%s11563_s2 + $0x78] sm:$0xff]  }
0x17e0   :  { %11021 = vpow2.f32 %v3173_v25  ;;  %v10928_v25 = vld [vmem:[%s11563_s2 + $0x70] sm:$0xff]  }
0x17e9   :  { %v11020_v39 = vpop.eup %11019 }
0x17ea   :  { %v3175_v40 = vsel %vm211_vm2, %v11020_v39, 0.0 }
0x17eb   :  { %3176 = vadd.xlane.f32.xlu0 %v3175_v40  ;;  %v10930_v40 = vld [vmem:[%s11563_s2 + $0x60] sm:$0xff]  }
0x17ed   :  { %v11022_v42 = vpop.eup %11021 }
0x17ee   :  { %v3178_v44 = vsel %vm211_vm2, %v11022_v42, 0.0 }
0x17ef   :  { %3179 = vadd.xlane.f32.xlu1 %v3178_v44 }
0x1800   :  { %3261 = vrot.lane.b32.xlu1 %v11645_v9, %s11260_s28 }
0x1801   :  { %3185 = vrot.lane.b32.xlu0 %v11641_v5, %s11260_s28  ;;  %s11275_s28 = smov 17  }
0x1804   :  { %10893 = vrot.lane.b32.xlu1 %v10892_v35, %s11261_s29  ;;  %v10923_v35 = vld [vmem:[%s11521_s4 + $0x18] sm:$0xff]   ;;  %s9441_s29 = sld [smem:[%s12822_s0 + %s11280_s26]]   ;;  %s11281_s4 = smov 32  }
0x1805   :  { %10898 = vrot.lane.b32.xlu0 %v10897_v18, %s11262_s30 }
0x1874   :  { %v3177_v32 = vpop.xlane.xlu0 %3176 }
0x1875   :  { %11023 = vrcp.f32 %v3177_v32 }
0x1878   :  { %v3180_v46 = vpop.xlane.xlu1 %3179  ;;  %v3186_v3 = vpop.permute.xlu0 %3185 }
0x1879   :  { %11025 = vrcp.f32 %v3180_v46  ;;  %10262 = vmatpush3.msra.mxu1 %v3186_v3 }
0x187a   :  { %10271 = vmatprep.subr.bf16.mxu1 %v11244_v0 }
0x187c   :  { %v3262_v9 = vpop.permute.xlu1 %3261  ;;  %v10899_v54 = vpop.permute.xlu0 %10898 }
0x187d   :  { %10267 = vmatpush3.msra.mxu0 %v3262_v9  ;;  %v10901_v57 = vunpack.i.h.bf16 %v10899_v54  ;;  %v10900_v11 = vunpack.i.l.bf16 %v10899_v54  ;;  %v10934_v54 = vld [vmem:[%s11563_s2 + $0x40] sm:$0xff]  }
0x187e   :  { %10279 = vmatprep.subr.bf16.mxu0 %v11244_v0 }
0x1880   :  { %v10894_v51 = vpop.permute.xlu1 %10893 }
0x1881   :  { %v10896_v52 = vunpack.i.h.bf16 %v10894_v51  ;;  %v10895_v53 = vunpack.i.l.bf16 %v10894_v51 }
0x1882   :  { %v11024_v5 = vpop.eup %11023 }
0x1883   :  { %v3182_v47 = vmul.f32 %v11024_v5, %v11020_v39  ;;  %v3362_v55 = vsel %vm211_vm2, %v11701_v41, %v10896_v52  ;;  %v3361_v56 = vsel %vm211_vm2, %v11699_v50, %v10895_v53  ;;  %v9541_v50 = vld [vmem:[%s11542_s10 + $0x1] ss:$0 sm:$0xff]  ;;  %v10929_v39 = vld [vmem:[%s11563_s2 + $0x68] sm:$0xff]   ;;  %v10932_v52 = vld [vmem:[%s11563_s2 + $0x50] sm:$0xff]   ;;  %s11276_s10 = smov 19  }
0x1884   :  { %v3363_v2 = vsel %vm1583_vm7, %v3361_v56, %v10900_v11  ;;  %v3364_v6 = vsel %vm1583_vm7, %v3362_v55, %v10901_v57  ;;  %v10933_v53 = vld [vmem:[%s11563_s2 + $0x48] sm:$0xff]   ;;  %v9554_v55 = vld [vmem:[%s11600_s3 + $0x1] ss:$0 sm:$0xff] }
0x1885   :  { %10264 = vmatmul.mubr.msk.f32.vlgmr.msra.gmra.mxu1 %vm211_vm2, %v3182_v47 }
0x1886   :  { %v11026_v30 = vpop.eup %11025  ;;  %10275 = vmatprep.mubr.msk.bf16.mxu1 %vm11246_vm0, %v11244_v0  ;;  %10272 = vmatpush3.bf16.msra.mxu1 %v10923_v35 }
0x1887   :  { %v3184_v33 = vmul.f32 %v11026_v30, %v11022_v42  ;;  %10273 = vmatprep.subr.bf16.mxu1 %v11244_v0  ;;  %v10931_v42 = vld [vmem:[%s11563_s2 + $0x58] sm:$0xff]  }
0x1889   :  { %10269 = vmatmul.mubr.msk.f32.vlgmr.msra.gmra.mxu0 %vm211_vm2, %v3184_v33  ;;  %v9547_v33 = vld [vmem:[%s11578_s9 + $0x1] ss:$0 sm:$0xff]  ;;  %s9440_s9 = sld [smem:[%s12822_s0 + %s11276_s10]]  }
0x188a   :  { %10283 = vmatprep.mubr.msk.bf16.mxu0 %vm11246_vm0, %v11244_v0  ;;  %10274 = vmatpush3.bf16.msra.mxu1 %v10924_v48 }
0x188b   :  { %10287 = vmatprep.subr.bf16.mxu1 %v11244_v0  ;;  %10280 = vmatpush3.bf16.msra.mxu0 %v10925_v36 }
0x188c   :  { %10281 = vmatprep.subr.bf16.mxu0 %v11244_v0 }
0x188f   :  { %10282 = vmatpush3.bf16.msra.mxu0 %v10926_v37 }
0x1890   :  { %10307 = vmatprep.subr.bf16.mxu0 %v11244_v0 }
0x1945   :  { %v3257_v4 = vpop.f32.mrf.mxu1 }
0x1947   :  { %v10265_v49 = vpop.f32.mrf.mxu1 }
0x1948   :  { %v9548_v49 = vld [vmem:[%s11584_s15 + $0x1] ss:$0 sm:$0xff] }
0x1949   :  { %v3333_v8 = vpop.f32.mrf.mxu0 }
0x194a   :  { %v10902_v43 = vpack.i.bf16 %v3333_v8, %v3257_v4 }
0x194b   :  { %v10270_v45 = vpop.f32.mrf.mxu0 }
0x194c   :  { %10903 = vrot.lane.b32.xlu1 %v10902_v43, %s12829_s13  ;;  %s11279_s13 = smov 18  }
0x194d   :  { %s9439_s25 = sld [smem:[%s12822_s0 + %s11279_s13]]   ;;  %s11288_s13 = smov 29  }
0x19be   :  { %v10904_v58 = vpop.permute.xlu1 %10903 }
0x19bf   :  { %v10906_v63 = vunpack.i.h.bf16 %v10904_v58  ;;  %v10905_v1 = vunpack.i.l.bf16 %v10904_v58 }
0x19c1   :  { %v3366_v7 = vsel %vm1586_vm8, %v3364_v6, %v10906_v63  ;;  %v3365_v10 = vsel %vm1586_vm8, %v3363_v2, %v10905_v1 }
0x19c2   :  { %v3372_v12 = vpack.c.bf16 %v3366_v7, %v3365_v10  ;;  %v9575_v10 = vld [vmem:[%s11608_s12 + $0x1] ss:$0 sm:$0xff]  ;;  %s9437_s12 = sld [smem:[%s12822_s0 + %s11262_s30]]   ;;  %s11277_s30 = smov 21  }
0x19c3   :  { %s9442_s1 = sld [smem:[%s12822_s0 + %s11277_s30]]  }
0x19c4   :  { %10276 = vmatmul.mubr.msk.bf16.vlgmr.msra.gmra.mxu1 %vm163_vm1, %v3372_v12 }
0x19c5   :  { %10303 = vmatprep.mubr.msk.bf16.mxu1 %vm11246_vm0, %v11244_v0  ;;  %10288 = vmatpush3.bf16.msra.mxu1 %v10927_v38 }
0x19c6   :  { %10289 = vmatprep.subr.bf16.mxu1 %v11244_v0 }
0x19c9   :  { %10290 = vmatpush3.bf16.msra.mxu1 %v10928_v25 }
0x19ca   :  { %10291 = vmatprep.subr.bf16.mxu1 %v11244_v0 }
0x19cd   :  { %10292 = vmatpush3.bf16.msra.mxu1 %v10929_v39 }
0x19ce   :  { %10293 = vmatprep.subr.bf16.mxu1 %v11244_v0 }
0x19d1   :  { %10294 = vmatpush3.bf16.msra.mxu1 %v10930_v40 }
0x19d2   :  { %10295 = vmatprep.subr.bf16.mxu1 %v11244_v0 }
0x19d5   :  { %10296 = vmatpush3.bf16.msra.mxu1 %v10931_v42 }
0x19d6   :  { %10297 = vmatprep.subr.bf16.mxu1 %v11244_v0 }
0x19d9   :  { %10298 = vmatpush3.bf16.msra.mxu1 %v10932_v52 }
0x19da   :  { %10299 = vmatprep.subr.bf16.mxu1 %v11244_v0 }
0x19dd   :  { %10300 = vmatpush3.bf16.msra.mxu1 %v10933_v53 }
0x19de   :  { %10301 = vmatprep.subr.bf16.mxu1 %v11244_v0 }
0x19e1   :  { %10302 = vmatpush3.bf16.msra.mxu1 %v10934_v54 }
0x19e2   :  { %10339 = vmatprep.subr.bf16.mxu1 %v11244_v0 }
0x1a84   :  { %v3430_v41 = vpop.f32.mrf.mxu1 }
0x1a85   :  { %v3431_v13 = vadd.f32 %v9541_v50, %v3430_v41 }
0x1a86   :  { %v10277_v14 = vpop.f32.mrf.mxu1 }
0x1a87   :  { %v3437_v15 = vadd.f32 %v3431_v13, %v11631_v60 }
0x1a88   :  { %v3433_v16 = vpop.f32.mrf.mxu1 }
0x1a89   :  { %v3434_v18 = vadd.f32 %v9541_v50, %v3433_v16  ;;  %v3443_v21 = vsel %vm163_vm1, %v3437_v15, 0.0 }
0x1a8a   :  { %3444 = vadd.xlane.f32.xlu0 %v3443_v21  ;;  %v10278_v22 = vpop.f32.mrf.mxu1 }
0x1a8b   :  { %v3438_v23 = vadd.f32 %v3434_v18, %v11633_v62 }
0x1a8d   :  { %v3446_v24 = vsel %vm163_vm1, %v3438_v23, 0.0 }
0x1a8e   :  { %3447 = vadd.xlane.f32.xlu1 %v3446_v24 }
0x1b13   :  { %v3445_v26 = vpop.xlane.xlu0 %3444 }
0x1b14   :  { %v3449_v59 = vmul.f32 0.03125, %v3445_v26 }
0x1b16   :  { %v3451_v61 = vsub.f32 %v3437_v15, %v3449_v59 }
0x1b17   :  { %v3448_v27 = vpop.xlane.xlu1 %3447 }
0x1b18   :  { %v3450_v28 = vmul.f32 0.03125, %v3448_v27  ;;  %v3453_v60 = vmul.f32 %v3451_v61, %v3451_v61 }
0x1b1a   :  { %v3452_v29 = vsub.f32 %v3438_v23, %v3450_v28  ;;  %v3455_v31 = vsel %vm163_vm1, %v3453_v60, 0.0 }
0x1b1b   :  { %3456 = vadd.xlane.f32.xlu0 %v3455_v31 }
0x1b1c   :  { %v3454_v34 = vmul.f32 %v3452_v29, %v3452_v29 }
0x1b1e   :  { %v3458_v62 = vsel %vm163_vm1, %v3454_v34, 0.0  ;;  %v10935_v34 = vld [vmem:[%s9436_s23 + $0x8] sm:$0xff]  }
0x1b1f   :  { %3459 = vadd.xlane.f32.xlu0 %v3458_v62  ;;  %v10936_v62 = vld [vmem:[%s9436_s23] sm:$0xff]  }
0x1ba4   :  { %v3457_v44 = vpop.xlane.xlu0 %3456 }
0x1ba5   :  { %v3461_v32 = vmul.f32 0.03125, %v3457_v44 }
0x1ba7   :  { %v3463_v46 = vadd.f32 1e-05, %v3461_v32  ;;  %v9586_v32 = vld [vmem:[%s11622_s7 + $0x1] ss:$0 sm:$0xff]  ;;  %s11278_s7 = smov 2  }
0x1ba8   :  { %v3460_v3 = vpop.xlane.xlu0 %3459  ;;  %s9423_s11 = sld [smem:[%s12822_s0 + %s11278_s7]]  }
0x1ba9   :  { %11027 = vrsqrt.f32 %v3463_v46  ;;  %v3462_v9 = vmul.f32 0.03125, %v3460_v3 }
0x1bab   :  { %v3464_v5 = vadd.f32 1e-05, %v3462_v9 }
0x1bad   :  { %11029 = vrsqrt.f32 %v3464_v5  ;;  %v9587_v5 = vld [vmem:[%s11627_s5 + $0x1] ss:$0 sm:$0xff]  ;;  %s9438_s5 = sld [smem:[%s12822_s0 + %s11275_s28]]  }
0x1bb6   :  { %v11028_v47 = vpop.eup %11027 }
0x1bb7   :  { %v3467_v30 = vmul.f32 %v11028_v47, %v3451_v61 }
0x1bb9   :  { %v3475_v4 = vmul.f32 %v9547_v33, %v3467_v30 }
0x1bba   :  { %v11030_v35 = vpop.eup %11029 }
0x1bbb   :  { %v3468_v48 = vmul.f32 %v11030_v35, %v3452_v29  ;;  %v3483_v43 = vadd.f32 %v9548_v49, %v3475_v4  ;;  %v10938_v4 = vld [vmem:[%s9447_s27] sm:$0xff]  }
0x1bbd   :  { %v3476_v8 = vmul.f32 %v9547_v33, %v3468_v48  ;;  %v10937_v48 = vld [vmem:[%s9447_s27 + $0x8] sm:$0xff]  }
0x1bbf   :  { %v3484_v45 = vadd.f32 %v9548_v49, %v3476_v8  ;;  %v10939_v49 = vld [vmem:[%s9438_s5 + $0x8] sm:$0xff]   ;;  %v10940_v8 = vld [vmem:[%s9438_s5] sm:$0xff]   ;;  %s11282_s5 = smov 22  }
0x1bc0   :  { %s9443_s2 = sld [smem:[%s12822_s0 + %s11282_s5]]  }
0x1bc1   :  { %v3490_v51 = vpack.c.bf16 %v3484_v45, %v3483_v43 }
0x1bc3   :  { %10284 = vmatmul.mubr.msk.bf16.vlgmr.msra.gmra.mxu0 %vm163_vm1, %v3490_v51 }
0x1bc4   :  { %10311 = vmatprep.mubr.msk.bf16.mxu0 %vm11246_vm0, %v11244_v0  ;;  %10308 = vmatpush3.bf16.msra.mxu0 %v10935_v34 }
0x1bc5   :  { %10309 = vmatprep.subr.bf16.mxu0 %v11244_v0 }
0x1bc8   :  { %10310 = vmatpush3.bf16.msra.mxu0 %v10936_v62 }
0x1bc9   :  { %10315 = vmatprep.subr.bf16.mxu0 %v11244_v0 }
0x1c83   :  { %v3548_v56 = vpop.f32.mrf.mxu0 }
0x1c84   :  { %v3549_v11 = vadd.f32 %v9554_v55, %v3548_v56 }
0x1c85   :  { %v10285_v57 = vpop.f32.mrf.mxu0 }
0x1c86   :  { %v3555_v2 = vmax.f32 %v3549_v11, 0.0 }
0x1c87   :  { %v3551_v58 = vpop.f32.mrf.mxu0 }
0x1c88   :  { %v3552_v63 = vadd.f32 %v9554_v55, %v3551_v58 }
0x1c89   :  { %v10286_v1 = vpop.f32.mrf.mxu0 }
0x1c8a   :  { %v3556_v6 = vmax.f32 %v3552_v63, 0.0 }
0x1c8c   :  { %v3574_v7 = vpack.c.bf16 %v3556_v6, %v3555_v2  ;;  %v10941_v6 = vld [vmem:[%s9440_s9 + $0x8] sm:$0xff]  }
0x1c8e   :  { %10304 = vmatmul.mubr.bf16.vlgmr.msra.gmra.mxu1 %v3574_v7 }
0x1c8f   :  { %10343 = vmatprep.mubr.msk.bf16.mxu1 %vm11246_vm0, %v11244_v0  ;;  %10340 = vmatpush3.bf16.msra.mxu1 %v10937_v48 }
0x1c90   :  { %10341 = vmatprep.subr.bf16.mxu1 %v11244_v0 }
0x1c93   :  { %10342 = vmatpush3.bf16.msra.mxu1 %v10938_v4 }
0x1c94   :  { %10358 = vmatprep.subr.mxu1 %v11244_v0 }
0x1d4e   :  { %v3665_v12 = vpop.f32.mrf.mxu1 }
0x1d4f   :  { %v3666_v50 = vadd.f32 %v9575_v10, %v3665_v12  ;;  %v10943_v12 = vld [vmem:[%s9442_s1 + $0x8] sm:$0xff]  }
0x1d50   :  { %v10305_v41 = vpop.f32.mrf.mxu1 }
0x1d51   :  { %v3672_v13 = vadd.f32 %v3666_v50, %v3483_v43  ;;  %v9588_v43 = vld [vmem:[%s9437_s12] ss:$0 sm:$0xff]  ;;  %s11284_s12 = smov 25  }
0x1d52   :  { %v3668_v14 = vpop.f32.mrf.mxu1  ;;  %v10944_v50 = vld [vmem:[%s9442_s1] sm:$0xff]   ;;  %s12038_s18 = sld [smem:[%s12822_s0 + %s11284_s12]]   ;;  %s11286_s1 = smov 28  }
0x1d53   :  { %v3669_v15 = vadd.f32 %v9575_v10, %v3668_v14  ;;  %v3678_v16 = vsel %vm163_vm1, %v3672_v13, 0.0  ;;  %v10942_v10 = vld [vmem:[%s9440_s9] sm:$0xff]   ;;  %s12081_s8 = sld [smem:[%s12822_s0 + %s11286_s1]]  }
0x1d54   :  { %3679 = vadd.xlane.f32.xlu1 %v3678_v16  ;;  %v10306_v18 = vpop.f32.mrf.mxu1  ;;  %v3929_v41 = vld [vmem:[%s9423_s11] sm:$0xff]  ;;  %s9453_s9 = sld [smem:[%s12822_s0 + %s11281_s4]]  }
0x1d55   :  { %v3673_v21 = vadd.f32 %v3669_v15, %v3484_v45  ;;  %v9737_v15 = vld [vmem:[%s11926_s22 + $0x8] sm:$0xff]  }
0x1d56   :  { %v11933_v16 = vunpack.c.h.bf16 %v9737_v15  ;;  %v11935_v18 = vunpack.c.l.bf16 %v9737_v15 }
0x1d57   :  { %v3681_v22 = vsel %vm163_vm1, %v3673_v21, 0.0 }
0x1d58   :  { %3682 = vadd.xlane.f32.xlu0 %v3681_v22 }
0x1ddd   :  { %v3680_v23 = vpop.xlane.xlu1 %3679 }
0x1dde   :  { %v3684_v24 = vmul.f32 0.03125, %v3680_v23 }
0x1de0   :  { %v3686_v26 = vsub.f32 %v3672_v13, %v3684_v24  ;;  %v3930_v13 = vld [vmem:[%s9423_s11 + $0x8] sm:$0x3f]  ;;  %s11287_s11 = smov 27  }
0x1de1   :  { %v3683_v59 = vpop.xlane.xlu0 %3682  ;;  %v3935_v14 = vpack.c.bf16 %v3930_v13, %v3929_v41 }
0x1de2   :  { %v3685_v61 = vmul.f32 0.03125, %v3683_v59  ;;  %v3688_v27 = vmul.f32 %v3686_v26, %v3686_v26 }
0x1de4   :  { %v3687_v28 = vsub.f32 %v3673_v21, %v3685_v61  ;;  %v3690_v60 = vsel %vm163_vm1, %v3688_v27, 0.0  ;;  %v9714_v21 = vld [vmem:[%s11926_s22] sm:$0xff]  }
0x1de5   :  { %3691 = vadd.xlane.f32.xlu1 %v3690_v60  ;;  %v11939_v22 = vunpack.c.h.bf16 %v9714_v21  ;;  %v11943_v23 = vunpack.c.l.bf16 %v9714_v21  ;;  %v9592_v61 = vld [vmem:[%s9439_s25] ss:$0 sm:$0xff]  ;;  %s12160_s25 = sld [smem:[%s12822_s0 + %s11288_s13]]  }
0x1de6   :  { %v3689_v29 = vmul.f32 %v3687_v28, %v3687_v28 }
0x1de8   :  { %v3693_v31 = vsel %vm163_vm1, %v3689_v29, 0.0 }
0x1de9   :  { %3694 = vadd.xlane.f32.xlu0 %v3693_v31  ;;  %v9739_v31 = vld [vmem:[%s11926_s22 + $0x18] sm:$0xff]  }
0x1dea   :  { %v11961_v34 = vunpack.c.h.bf16 %v9739_v31  ;;  %v11963_v62 = vunpack.c.l.bf16 %v9739_v31 }
0x1e6e   :  { %v3692_v36 = vpop.xlane.xlu1 %3691 }
0x1e6f   :  { %v3696_v37 = vmul.f32 0.03125, %v3692_v36  ;;  %v9738_v36 = vld [vmem:[%s11926_s22 + $0x10] sm:$0xff]   ;;  %s12128_s22 = sld [smem:[%s12822_s0 + %s11287_s11]]  }
0x1e71   :  { %v3698_v38 = vadd.f32 1e-05, %v3696_v37 }
0x1e72   :  { %v3695_v25 = vpop.xlane.xlu0 %3694 }
0x1e73   :  { %11031 = vrsqrt.f32 %v3698_v38  ;;  %v3697_v39 = vmul.f32 0.03125, %v3695_v25  ;;  %v11967_v38 = vunpack.c.h.bf16 %v9738_v36 }
0x1e75   :  { %v3699_v40 = vadd.f32 1e-05, %v3697_v39  ;;  %v9596_v39 = vld [vmem:[%s9441_s29] ss:$0 sm:$0xff]  ;;  %s11290_s29 = smov 31  }
0x1e76   :  { %s9452_s16 = sld [smem:[%s12822_s0 + %s11290_s29]]  }
0x1e77   :  { %11033 = vrsqrt.f32 %v3699_v40  ;;  %v11971_v40 = vunpack.c.l.bf16 %v9738_v36 }
0x1e80   :  { %v11032_v42 = vpop.eup %11031 }
0x1e81   :  { %v3702_v44 = vmul.f32 %v11032_v42, %v3686_v26 }
0x1e83   :  { %v3710_v9 = vmul.f32 %v9586_v32, %v3702_v44 }
0x1e84   :  { %v11034_v46 = vpop.eup %11033 }
0x1e85   :  { %v3703_v3 = vmul.f32 %v11034_v46, %v3687_v28  ;;  %v3718_v30 = vadd.f32 %v9587_v5, %v3710_v9 }
0x1e87   :  { %v3711_v47 = vmul.f32 %v9586_v32, %v3703_v3 }
0x1e89   :  { %v3719_v33 = vadd.f32 %v9587_v5, %v3711_v47 }
0x1e8b   :  { %v3724_v35 = vpack.c.bf16 %v3719_v33, %v3718_v30  ;;  %v9600_v30 = vld [vmem:[%s9443_s2] ss:$0 sm:$0xff] }
0x1e8d   :  { %10312 = vmatmul.mubr.msk.bf16.vlgmr.msra.gmra.mxu0 %vm163_vm1, %v3724_v35 }
0x1e8e   :  { %10319 = vmatprep.mubr.msk.bf16.mxu0 %vm11246_vm0, %v11244_v0  ;;  %10316 = vmatpush3.bf16.msra.mxu0 %v10939_v49 }
0x1e8f   :  { %10317 = vmatprep.subr.bf16.mxu0 %v11244_v0 }
0x1e92   :  { %10318 = vmatpush3.bf16.msra.mxu0 %v10940_v8 }
0x1e93   :  { %10323 = vmatprep.subr.bf16.mxu0 %v11244_v0 }
0x1f4d   :  { %v3781_v45 = vpop.f32.mrf.mxu0 }
0x1f4e   :  { %v11893_v52 = vadd.f32 %v9588_v43, %v3781_v45 }
0x1f4f   :  { %v10313_v51 = vpop.f32.mrf.mxu0 }
0x1f50   :  { %v3792_v57 = vpack.c.bf16 %v11893_v52, %v11893_v52 }
0x1f51   :  { %v3784_v53 = vpop.f32.mrf.mxu0 }
0x1f52   :  { %v11895_v54 = vadd.f32 %v9588_v43, %v3784_v53  ;;  %v3803_v63 = vunpack.c.l.b16 %v3792_v57 }
0x1f53   :  { %v10314_v55 = vpop.f32.mrf.mxu0 }
0x1f54   :  { %v4003_v56 = vpack.c.bf16 %v11895_v54, %v11893_v52  ;;  %v3793_v11 = vpack.c.bf16 %v11895_v54, %v11895_v54 }
0x1f56   :  { %10344 = vmatmul.mubr.msk.bf16.vlgmr.msra.gmra.mxu1 %vm163_vm1, %v4003_v56  ;;  %v3804_v58 = vunpack.c.l.b16 %v3793_v11 }
0x1f57   :  { %10366 = vmatprep.mubr.msk.f32.mxu1 %vm11246_vm0, %v11244_v0  ;;  %10359 = vmatpush3.msra.mxu1 %v11961_v34 }
0x1f58   :  { %v3805_v1 = vrot.slane %v3804_v58, 7  ;;  %10360 = vmatprep.subr.mxu1 %v11244_v0 }
0x1f59   :  { %10361 = vmatpush3.msra.mxu1 %v11963_v62 }
0x1f5a   :  { %v3807_v2 = vsel %vm3806_vm9, %v3805_v1, %v3803_v63  ;;  %10362 = vmatprep.subr.mxu1 %v11244_v0 }
0x1f5b   :  { %v3808_v7 = vpack.c.b16 %v3807_v2, %v3807_v2  ;;  %10363 = vmatpush3.msra.mxu1 %v11967_v38 }
0x1f5c   :  { %10364 = vmatprep.subr.mxu1 %v11244_v0 }
0x1f5d   :  { %10320 = vmatmul.mubr.msk.bf16.vlgmr.msra.gmra.mxu0 %vm163_vm1, %v3808_v7  ;;  %10365 = vmatpush3.msra.mxu1 %v11971_v40 }
0x1f5e   :  { %10324 = vmatpush3.bf16.msra.mxu0 %v10941_v6  ;;  %10327 = vmatprep.mubr.msk.bf16.mxu0 %vm11246_vm0, %v11244_v0 }
0x1f5f   :  { %10325 = vmatprep.subr.bf16.mxu0 %v11244_v0  ;;  %10380 = vmatprep.subr.mxu1 %v11244_v0 }
0x1f62   :  { %10326 = vmatpush3.bf16.msra.mxu0 %v10942_v10 }
0x1f63   :  { %10331 = vmatprep.subr.bf16.mxu0 %v11244_v0 }
0x1f65   :  { %10328 = vmatmul.mubr.msk.bf16.vlgmr.msra.gmra.mxu0 %vm163_vm1, %v3808_v7 }
0x1f66   :  { %10335 = vmatprep.mubr.msk.bf16.mxu0 %vm11246_vm0, %v11244_v0  ;;  %10332 = vmatpush3.bf16.msra.mxu0 %v10943_v12 }
0x1f67   :  { %10333 = vmatprep.subr.bf16.mxu0 %v11244_v0 }
0x1f6a   :  { %10334 = vmatpush3.bf16.msra.mxu0 %v10944_v50 }
0x1f6b   :  { %10347 = vmatprep.subr.mxu0 %v11244_v0 }
0x1f6d   :  { %10336 = vmatmul.mubr.msk.bf16.vlgmr.msra.gmra.mxu0 %vm163_vm1, %v3935_v14 }
0x1f6e   :  { %10355 = vmatprep.mubr.msk.f32.mxu0 %vm11246_vm0, %v11244_v0  ;;  %10348 = vmatpush3.msra.mxu0 %v11933_v16 }
0x1f6f   :  { %10349 = vmatprep.subr.mxu0 %v11244_v0 }
0x1f70   :  { %10350 = vmatpush3.msra.mxu0 %v11935_v18 }
0x1f71   :  { %10351 = vmatprep.subr.mxu0 %v11244_v0 }
0x1f72   :  { %10352 = vmatpush3.msra.mxu0 %v11939_v22 }
0x1f73   :  { %10353 = vmatprep.subr.mxu0 %v11244_v0 }
0x1f74   :  { %10354 = vmatpush3.msra.mxu0 %v11943_v23 }
0x1f75   :  { %10369 = vmatprep.subr.mxu0 %v11244_v0 }
0x2016   :  { %v11953_v24 = vpop.f32.mrf.mxu1 }
0x2018   :  { %v10345_v26 = vpop.f32.mrf.mxu1 }
0x201a   :  { %v11955_v59 = vpop.f32.mrf.mxu1 }
0x201c   :  { %v10346_v27 = vpop.f32.mrf.mxu1 }
0x201d   :  { %v3858_v28 = vpop.f32.mrf.mxu0 }
0x201e   :  { %v3859_v60 = vadd.f32 %v9592_v61, %v3858_v28 }
0x201f   :  { %v10321_v29 = vpop.f32.mrf.mxu0 }
0x2020   :  { %11035 = vtanh.f32 %v3859_v60  ;;  %v12041_v60 = vld [vmem:[%s12038_s18] ss:$0 sm:$0xff] }
0x2021   :  { %v3861_v37 = vpop.f32.mrf.mxu0 }
0x2023   :  { %v10322_v25 = vpop.f32.mrf.mxu0 }
0x2025   :  { %v3922_v42 = vpop.f32.mrf.mxu0 }
0x2026   :  { %v3923_v44 = vadd.f32 %v9596_v39, %v3922_v42 }
0x2027   :  { %v10329_v32 = vpop.f32.mrf.mxu0 }
0x2028   :  { %11037 = vtanh.f32 %v3923_v44 }
0x2029   :  { %v3925_v46 = vpop.f32.mrf.mxu0 }
0x202b   :  { %v10330_v3 = vpop.f32.mrf.mxu0 }
0x202d   :  { %v11978_v9 = vpop.eup %11035  ;;  %v3992_v47 = vpop.f32.mrf.mxu0 }
0x202e   :  { %4177 = vrot.lane.b32.xlu0 %v11978_v9, %s11281_s4  ;;  %v11997_v43 = vadd.f32 %v9600_v30, %v3992_v47 }
0x202f   :  { %v10337_v33 = vpop.f32.mrf.mxu0 }
0x2031   :  { %v3995_v35 = vpop.f32.mrf.mxu0 }
0x2032   :  { %v11989_v48 = vadd.f32 %v9600_v30, %v3995_v35  ;;  %v11285_v35 = vmov 1966171168  }
0x2033   :  { %v10338_v4 = vpop.f32.mrf.mxu0 }
0x2034   :  { %v4379_v4 = vunpack.c.l.s4 %v11285_v35 }
0x2035   :  { %v11038_v5 = vpop.eup %11037 }
0x2036   :  { %4197 = vrot.lane.b32.xlu0 %v11038_v5, %s11248_s14  ;;  %10356 = vmatmul.mubr.msk.f32.vlgmr.msra.gmra.mxu0 %vm163_vm1, %v11038_v5  ;;  %s11283_s14 = smov 23  }
0x2037   :  { %10377 = vmatprep.mubr.msk.f32.mxu0 %vm11246_vm0, %v11244_v0  ;;  %s9444_s3 = sld [smem:[%s12822_s0 + %s11283_s14]]  }
0x203d   :  { %v9740_v50 = vld [vmem:[%s9444_s3 + $0x8] sm:$0xff]   ;;  %v9730_v41 = vld [vmem:[%s9444_s3] sm:$0xff]  }
0x203e   :  { %v12008_v13 = vunpack.c.h.bf16 %v9740_v50  ;;  %v12010_v14 = vunpack.c.l.bf16 %v9740_v50  ;;  %v12013_v21 = vunpack.c.h.bf16 %v9730_v41  ;;  %v12018_v26 = vunpack.c.l.bf16 %v9730_v41 }
0x2040   :  { %10370 = vmatpush3.msra.mxu0 %v12008_v13 }
0x2041   :  { %10371 = vmatprep.subr.mxu0 %v11244_v0 }
0x2042   :  { %10372 = vmatpush3.msra.mxu0 %v12010_v14 }
0x2043   :  { %10373 = vmatprep.subr.mxu0 %v11244_v0 }
0x2044   :  { %10374 = vmatpush3.msra.mxu0 %v12013_v21 }
0x2045   :  { %10375 = vmatprep.subr.mxu0 %v11244_v0 }
0x2046   :  { %10376 = vmatpush3.msra.mxu0 %v12018_v26 }
0x2047   :  { %10385 = vmatprep.subr.mxu0 %v11244_v0 }
0x20a0   :  { %v4178_v49 = vpop.permute.xlu0 %4177 }
0x20a8   :  { %v4198_v8 = vpop.permute.xlu0 %4197 }
0x20a9   :  { %10367 = vmatmul.mubr.msk.f32.vlgmr.msra.gmra.mxu1 %vm163_vm1, %v4198_v8 }
0x20aa   :  { %10381 = vmatpush3.xpose.msk.msra.mxu1 %vm163_vm1, %v11953_v24  ;;  %10382 = vmatprep.mubr.msk.f32.mxu1 %vm11246_vm0, %v11244_v0 }
0x20ab   :  { %10390 = vmatprep.subr.mxu1 %v11244_v0 }
0x20f6   :  { %v4164_v45 = vpop.f32.mrf.mxu0 }
0x20f7   :  { %v4168_v51 = vadd.f32 %v4164_v45, %v11997_v43 }
0x20f8   :  { %v10357_v53 = vpop.f32.mrf.mxu0 }
0x20f9   :  { %11039 = vtanh.f32 %v4168_v51  ;;  %v9612_v56 = vmul.f32 -1.442695, %v4168_v51 }
0x20fb   :  { %11041 = vpow2.f32 %v9612_v56 }
0x2106   :  { %v11040_v55 = vpop.eup %11039 }
0x2107   :  { %4182 = vrot.lane.b32.xlu1 %v11040_v55, %s11251_s19 }
0x2108   :  { %v11042_v57 = vpop.eup %11041 }
0x2109   :  { %v4172_v11 = vadd.f32 1.0, %v11042_v57 }
0x210b   :  { %11043 = vrcp.f32 %v4172_v11 }
0x2118   :  { %v11044_v1 = vpop.eup %11043 }
0x2119   :  { %v4180_v7 = vmul.f32 %v11044_v1, %v4178_v49  ;;  %v4380_v49 = vunpack.c.0.s8 %v4379_v4 }
0x211b   :  { %v12052_v8 = vsub.s32 %v4380_v49, %v11352_v17  ;;  %v12092_v49 = vld [vmem:[%s12081_s8] sm:$0xff]  }
0x2169   :  { %v4267_v58 = vpop.f32.mrf.mxu1 }
0x216b   :  { %v10368_v63 = vpop.f32.mrf.mxu1 }
0x2179   :  { %v4183_v2 = vpop.permute.xlu1 %4182 }
0x217a   :  { %v4185_v6 = vmul.f32 %v11044_v1, %v4183_v2 }
0x217c   :  { %4187 = vrot.lane.b32.xlu1 %v4185_v6, %s11281_s4 }
0x21ee   :  { %v4188_v10 = vpop.permute.xlu1 %4187 }
0x21ef   :  { %v12002_v12 = vadd.f32 %v4188_v10, %v4180_v7 }
0x21f1   :  { %11045 = vtanh.f32 %v12002_v12 }
0x21fe   :  { %v11046_v15 = vpop.eup %11045 }
0x21ff   :  { %4193 = vrot.lane.b32.xlu1 %v11046_v15, %s11251_s19 }
0x2271   :  { %v4194_v61 = vpop.permute.xlu1 %4193 }
0x2272   :  { %v4196_v27 = vmul.f32 %v11044_v1, %v4194_v61 }
0x2274   :  { %4272 = vrot.lane.b32.xlu1 %v4196_v27, %s11281_s4 }
0x22e6   :  { %v12026_v28 = vpop.permute.xlu1 %4272 }
0x22e7   :  { %10378 = vmatmul.mubr.msk.f32.vlgmr.msra.gmra.mxu0 %vm163_vm1, %v12026_v28 }
0x22e8   :  { %10386 = vmatpush3.xpose.msk.msra.mxu0 %vm163_vm1, %v11955_v59  ;;  %10387 = vmatprep.mubr.msk.f32.mxu0 %vm11246_vm0, %v11244_v0 }
0x22e9   :  { %10395 = vmatprep.subr.mxu0 %v11244_v0 }
0x23a7   :  { %v4342_v29 = vpop.f32.mrf.mxu0 }
0x23a8   :  { %v4343_v31 = vadd.f32 %v4342_v29, %v4267_v58 }
0x23a9   :  { %v10379_v36 = vpop.f32.mrf.mxu0 }
0x23aa   :  { %v4352_v37 = vadd.f32 %v12041_v60, %v4343_v31 }
0x23ac   :  { %11047 = vtanh.f32 %v4352_v37  ;;  %v9616_v39 = vmul.f32 -1.442695, %v4352_v37 }
0x23ae   :  { %11049 = vpow2.f32 %v9616_v39 }
0x23b9   :  { %v11048_v25 = vpop.eup %11047 }
0x23ba   :  { %4362 = vrot.lane.b32.xlu0 %v11048_v25, %s11251_s19 }
0x23bb   :  { %v11050_v42 = vpop.eup %11049 }
0x23bc   :  { %v4356_v44 = vadd.f32 1.0, %v11050_v42 }
0x23be   :  { %11051 = vrcp.f32 %v4356_v44 }
0x23cb   :  { %v11052_v32 = vpop.eup %11051 }
0x23cc   :  { %v4360_v5 = vmul.f32 %v11052_v32, %v11978_v9 }
0x242c   :  { %v4363_v46 = vpop.permute.xlu0 %4362 }
0x242d   :  { %v4365_v3 = vmul.f32 %v11052_v32, %v4363_v46 }
0x242f   :  { %4367 = vrot.lane.b32.xlu1 %v4365_v3, %s11281_s4 }
0x24a1   :  { %v4368_v47 = vpop.permute.xlu1 %4367 }
0x24a2   :  { %v12047_v30 = vadd.f32 %v4368_v47, %v4360_v5  ;;  %v12087_v47 = vld [vmem:[%s12081_s8 + $0x8] sm:$0xff]  }
0x24a4   :  { %11053 = vtanh.f32 %v12047_v30 }
0x24b1   :  { %v11054_v33 = vpop.eup %11053 }
0x24b2   :  { %4373 = vrot.lane.b32.xlu0 %v11054_v33, %s11251_s19 }
0x2524   :  { %v4374_v45 = vpop.permute.xlu0 %4373 }
0x2525   :  { %v12054_v51 = vmul.f32 %v11052_v32, %v4374_v45 }
0x2527   :  { %v4384_v9 = vrot.slane %v12054_v51, %v12052_v8  ;;  %v4745_v32 = vpack.c.bf16 %v12054_v51, %v12054_v51 }
0x2529   :  { %v4385_v53 = vcombine.high %v4384_v9, %v4384_v9  ;;  %v4392_v55 = vrot.slane %v4384_v9, %v12052_v8  ;;  %v12136_v9 = vld [vmem:[%s12128_s22] sm:$0xff]  }
0x252b   :  { %v4399_v56 = vrot.slane %v4385_v53, %v12052_v8  ;;  %v4403_v57 = vrot.slane %v4392_v55, %v11355_v19 }
0x252d   :  { %4404 = vrot.lane.b32.xlu0 %v4403_v57, %s11281_s4  ;;  %v4484_v11 = vrot.slane %v4399_v56, %v11355_v19 }
0x252f   :  { %4485 = vrot.lane.b32.xlu1 %v4484_v11, %s11281_s4 }
0x259f   :  { %v4405_v58 = vpop.permute.xlu0 %4404 }
0x25a0   :  { %10383 = vmatmul.mubr.msk.f32.vlgmr.msra.gmra.mxu1 %vm163_vm1, %v4405_v58 }
0x25a1   :  { %10391 = vmatpush3.msra.mxu1 %v11893_v52  ;;  %v4486_v63 = vpop.permute.xlu1 %4485  ;;  %10392 = vmatprep.mubr.msk.f32.mxu1 %vm11246_vm0, %v11244_v0 }
0x25a2   :  { %10388 = vmatmul.mubr.msk.f32.vlgmr.msra.gmra.mxu0 %vm163_vm1, %v4486_v63  ;;  %10400 = vmatprep.subr.bf16.mxu1 %v11244_v0 }
0x25a3   :  { %10396 = vmatpush3.msra.mxu0 %v11895_v54  ;;  %10397 = vmatprep.mubr.msk.f32.mxu0 %vm11246_vm0, %v11244_v0 }
0x25a4   :  { %10408 = vmatprep.subr.bf16.mxu0 %v11244_v0 }
0x2660   :  { %v4477_v1 = vpop.f32.mrf.mxu1 }
0x2662   :  { %v10384_v2 = vpop.f32.mrf.mxu1  ;;  %v4558_v6 = vpop.f32.mrf.mxu0 }
0x2663   :  { %v4564_v7 = vrot.slane %v4558_v6, 7 }
0x2664   :  { %v10389_v10 = vpop.f32.mrf.mxu0 }
0x2665   :  { %v4565_v50 = vsel %vm3806_vm9, %v4564_v7, %v4477_v1 }
0x2666   :  { %v4568_v41 = vsel %vm4567_vm10, %v4565_v50, -inf }
0x2667   :  { %4569 = vmax.xlane.f32.xlu1 %v4568_v41 }
0x26f0   :  { %v4570_v15 = vpop.xlane.xlu1 %4569 }
0x26f1   :  { %v4572_v61 = vrot.slane %v4570_v15, 1  ;;  %v4575_v27 = vsub.f32 %v4477_v1, %v4570_v15 }
0x26f3   :  { %v4576_v29 = vsub.f32 %v4558_v6, %v4572_v61  ;;  %v4577_v31 = vmul.f32 1.442695, %v4575_v27 }
0x26f5   :  { %v4579_v36 = vmul.f32 1.442695, %v4576_v29 }
0x26f7   :  { %11055 = vpow2.f32 %v4579_v36 }
0x26f8   :  { %11057 = vpow2.f32 %v4577_v31 }
0x2704   :  { %v11056_v37 = vpop.eup %11055 }
0x2705   :  { %v4583_v25 = vrot.slane %v11056_v37, 7  ;;  %v11058_v39 = vpop.eup %11057 }
0x2707   :  { %v4584_v42 = vsel %vm3806_vm9, %v4583_v25, %v11058_v39 }
0x2708   :  { %v4586_v44 = vsel %vm4567_vm10, %v4584_v42, 0.0 }
0x2709   :  { %4587 = vadd.xlane.f32.xlu0 %v4586_v44 }
0x271f   :  { %4747 = vrot.lane.b32.xlu0 %v4745_v32, %s11281_s4 }
0x2792   :  { %v4588_v46 = vpop.xlane.xlu0 %4587 }
0x2793   :  { %v4590_v3 = vrot.slane %v4588_v46, 1  ;;  %11059 = vrcp.f32 %v4588_v46  ;;  %v12163_v46 = vld [vmem:[%s12160_s25] ss:$0 sm:$0xff] }
0x2795   :  { %11061 = vrcp.f32 %v4590_v3 }
0x2796   :  { %v4748_v45 = vpop.permute.xlu0 %4747 }
0x27a0   :  { %v11060_v5 = vpop.eup %11059 }
0x27a1   :  { %v4594_v33 = vmul.f32 %v11060_v5, %v11058_v39 }
0x27a2   :  { %v11062_v35 = vpop.eup %11061 }
0x27a3   :  { %10393 = vmatmul.mubr.msk.f32.vlgmr.msra.gmra.mxu1 %vm211_vm2, %v4594_v33  ;;  %v4596_v4 = vmul.f32 %v11062_v35, %v11056_v37 }
0x27a4   :  { %10401 = vmatpush3.bf16.msra.mxu1 %v12087_v47  ;;  %10404 = vmatprep.mubr.msk.bf16.mxu1 %vm11246_vm0, %v11244_v0 }
0x27a5   :  { %10398 = vmatmul.mubr.msk.f32.vlgmr.msra.gmra.mxu0 %vm211_vm2, %v4596_v4  ;;  %10402 = vmatprep.subr.bf16.mxu1 %v11244_v0 }
0x27a6   :  { %10412 = vmatprep.mubr.msk.bf16.mxu0 %vm11246_vm0, %v11244_v0 }
0x27a8   :  { %10403 = vmatpush3.bf16.msra.mxu1 %v12092_v49 }
0x27a9   :  { %10416 = vmatprep.subr.mxu1 %v11244_v0 }
0x27ab   :  { %10405 = vmatmul.mubr.msk.bf16.vlgmr.msra.gmra.mxu1 %vm163_vm1, %v4748_v45 }
0x27ac   :  { %10417 = vmatpush3.msra.mxu1 %v11933_v16  ;;  %10424 = vmatprep.mubr.msk.f32.mxu1 %vm11246_vm0, %v11244_v0 }
0x27ad   :  { %10418 = vmatprep.subr.mxu1 %v11244_v0 }
0x27ae   :  { %10419 = vmatpush3.msra.mxu1 %v11935_v18 }
0x27af   :  { %10420 = vmatprep.subr.mxu1 %v11244_v0 }
0x27b0   :  { %10421 = vmatpush3.msra.mxu1 %v11939_v22 }
0x27b1   :  { %10422 = vmatprep.subr.mxu1 %v11244_v0 }
0x27b2   :  { %10423 = vmatpush3.msra.mxu1 %v11943_v23 }
0x27b3   :  { %10425 = vmatmul.mubr.msk.f32.vlgmr.msra.gmra.mxu1 %vm163_vm1, %v12026_v28  ;;  %10438 = vmatprep.subr.mxu1 %v11244_v0  ;;  %v12131_v28 = vld [vmem:[%s12128_s22 + $0x8] sm:$0xff]  }
0x27b4   :  { %10439 = vmatpush3.msra.mxu1 %v12008_v13  ;;  %10446 = vmatprep.mubr.msk.f32.mxu1 %vm11246_vm0, %v11244_v0 }
0x27b5   :  { %10440 = vmatprep.subr.mxu1 %v11244_v0  ;;  %10409 = vmatpush3.bf16.msra.mxu0 %v12131_v28 }
0x27b6   :  { %10441 = vmatpush3.msra.mxu1 %v12010_v14  ;;  %10410 = vmatprep.subr.bf16.mxu0 %v11244_v0 }
0x27b7   :  { %10442 = vmatprep.subr.mxu1 %v11244_v0 }
0x27b8   :  { %10443 = vmatpush3.msra.mxu1 %v12013_v21 }
0x27b9   :  { %10444 = vmatprep.subr.mxu1 %v11244_v0  ;;  %10411 = vmatpush3.bf16.msra.mxu0 %v12136_v9 }
0x27ba   :  { %10445 = vmatpush3.msra.mxu1 %v12018_v26  ;;  %10427 = vmatprep.subr.mxu0 %v11244_v0 }
0x27bb   :  { %10459 = vmatprep.subr.mxu1 %v11244_v0 }
0x2863   :  { %v4666_v53 = vpop.f32.mrf.mxu1 }
0x2864   :  { %v4743_v57 = vpack.c.bf16 %v4666_v53, %v4666_v53 }
0x2865   :  { %v10394_v55 = vpop.f32.mrf.mxu1  ;;  %v4739_v56 = vpop.f32.mrf.mxu0 }
0x2866   :  { %v4744_v11 = vpack.c.bf16 %v4739_v56, %v4739_v56  ;;  %v4806_v1 = vunpack.c.l.b16 %v4743_v57 }
0x2867   :  { %v10399_v58 = vpop.f32.mrf.mxu0 }
0x2868   :  { %v4807_v63 = vunpack.c.l.b16 %v4744_v11 }
0x286a   :  { %v4808_v2 = vrot.slane %v4807_v63, 7 }
0x286b   :  { %v4798_v6 = vpop.f32.mrf.mxu1 }
0x286c   :  { %v4809_v7 = vsel %vm3806_vm9, %v4808_v2, %v4806_v1 }
0x286d   :  { %v4810_v10 = vpack.c.b16 %v4809_v7, %v4809_v7  ;;  %v10406_v50 = vpop.f32.mrf.mxu1 }
0x286f   :  { %v4801_v41 = vpop.f32.mrf.mxu1  ;;  %10413 = vmatmul.mubr.msk.bf16.vlgmr.msra.gmra.mxu0 %vm163_vm1, %v4810_v10 }
0x2870   :  { %10428 = vmatpush3.msra.mxu0 %v11961_v34  ;;  %10435 = vmatprep.mubr.msk.f32.mxu0 %vm11246_vm0, %v11244_v0 }
0x2871   :  { %v10407_v15 = vpop.f32.mrf.mxu1  ;;  %10429 = vmatprep.subr.mxu0 %v11244_v0 }
0x2872   :  { %10430 = vmatpush3.msra.mxu0 %v11963_v62 }
0x2873   :  { %v4942_v61 = vpop.f32.mrf.mxu1  ;;  %10431 = vmatprep.subr.mxu0 %v11244_v0 }
0x2874   :  { %v4947_v27 = vrot.slane %v4942_v61, 6  ;;  %10432 = vmatpush3.msra.mxu0 %v11967_v38 }
0x2875   :  { %v10426_v29 = vpop.f32.mrf.mxu1  ;;  %10433 = vmatprep.subr.mxu0 %v11244_v0 }
0x2876   :  { %v4949_v31 = vadd.f32 %v4947_v27, %v11997_v43  ;;  %10434 = vmatpush3.msra.mxu0 %v11971_v40 }
0x2877   :  { %10449 = vmatprep.subr.mxu0 %v11244_v0 }
0x2878   :  { %11063 = vtanh.f32 %v4949_v31  ;;  %v9631_v37 = vmul.f32 -1.442695, %v4949_v31 }
0x287a   :  { %11065 = vpow2.f32 %v9631_v37 }
0x2885   :  { %v11064_v36 = vpop.eup %11063 }
0x2886   :  { %4962 = vrot.lane.b32.xlu1 %v11064_v36, %s11251_s19 }
0x2887   :  { %v11066_v25 = vpop.eup %11065 }
0x2888   :  { %v4953_v39 = vadd.f32 1.0, %v11066_v25 }
0x288a   :  { %11067 = vrcp.f32 %v4953_v39 }
0x2897   :  { %v11068_v42 = vpop.eup %11067 }
0x28f8   :  { %v4963_v44 = vpop.permute.xlu1 %4962 }
0x28f9   :  { %v4965_v32 = vmul.f32 %v11068_v42, %v4963_v44 }
0x28fb   :  { %4967 = vrot.lane.b32.xlu1 %v4965_v32, %s11281_s4 }
0x28ff   :  { %4977 = vrot.lane.b32.xlu1 %v12054_v51, %s11281_s4  ;;  %v4958_v51 = vrot.slane %v12002_v12, 6 }
0x2901   :  { %v4960_v55 = vmul.f32 %v11068_v42, %v4958_v51 }
0x292f   :  { %v4860_v3 = vpop.f32.mrf.mxu0 }
0x2930   :  { %v4861_v5 = vadd.f32 %v4860_v3, %v4798_v6 }
0x2931   :  { %v10414_v33 = vpop.f32.mrf.mxu0 }
0x2932   :  { %v4872_v35 = vadd.f32 %v12163_v46, %v4861_v5 }
0x2933   :  { %v4863_v4 = vpop.f32.mrf.mxu0 }
0x2934   :  { %11069 = vtanh.f32 %v4872_v35 }
0x2935   :  { %v10415_v45 = vpop.f32.mrf.mxu0 }
0x2941   :  { %v11070_v53 = vpop.eup %11069 }
0x2942   :  { %4875 = vst.msk [vmem:[#allocation2] sm:$0x3] %vm4874_vm11, %v11070_v53 }
0x296d   :  { %v4968_v56 = vpop.permute.xlu1 %4967 }
0x296e   :  { %v12168_v57 = vadd.f32 %v4968_v56, %v4960_v55 }
0x2970   :  { %11071 = vtanh.f32 %v12168_v57 }
0x2971   :  { %v4978_v11 = vpop.permute.xlu1 %4977 }
0x2972   :  { %10436 = vmatmul.mubr.msk.f32.vlgmr.msra.gmra.mxu0 %vm163_vm1, %v4978_v11 }
0x2973   :  { %10450 = vmatpush3.xpose.msk.msra.mxu0 %vm163_vm1, %v11953_v24  ;;  %10451 = vmatprep.mubr.msk.f32.mxu0 %vm11246_vm0, %v11244_v0 }
0x2974   :  { %10454 = vmatprep.subr.mxu0 %v11244_v0 }
0x297d   :  { %v11072_v58 = vpop.eup %11071 }
0x297e   :  { %4973 = vrot.lane.b32.xlu0 %v11072_v58, %s11251_s19 }
0x29f0   :  { %v4974_v12 = vpop.permute.xlu0 %4973 }
0x29f1   :  { %v4976_v63 = vmul.f32 %v11068_v42, %v4974_v12 }
0x29f3   :  { %v5052_v1 = vrot.slane %v4976_v63, 2 }
0x29f5   :  { %5053 = vrot.lane.b32.xlu0 %v5052_v1, %s11281_s4 }
0x2a32   :  { %v5047_v2 = vpop.f32.mrf.mxu0 }
0x2a34   :  { %v10437_v6 = vpop.f32.mrf.mxu0 }
0x2a67   :  { %v12179_v7 = vpop.permute.xlu0 %5053 }
0x2a68   :  { %10447 = vmatmul.mubr.msk.f32.vlgmr.msra.gmra.mxu1 %vm163_vm1, %v12179_v7 }
0x2a69   :  { %10460 = vmatpush3.msra.mxu1 %v11893_v52  ;;  %10461 = vmatprep.mubr.msk.f32.mxu1 %vm11246_vm0, %v11244_v0 }
0x2a6a   :  { %10469 = vmatprep.subr.bf16.mxu1 %v11244_v0 }
0x2b28   :  { %v5123_v10 = vpop.f32.mrf.mxu1 }
0x2b29   :  { %v5124_v50 = vadd.f32 %v5123_v10, %v5047_v2 }
0x2b2a   :  { %v10448_v41 = vpop.f32.mrf.mxu1 }
0x2b2b   :  { %v5127_v15 = vadd.f32 %v12041_v60, %v5124_v50 }
0x2b2d   :  { %11073 = vtanh.f32 %v5127_v15  ;;  %v9634_v27 = vmul.f32 -1.442695, %v5127_v15 }
0x2b2f   :  { %11075 = vpow2.f32 %v9634_v27 }
0x2b3a   :  { %v11074_v61 = vpop.eup %11073 }
0x2b3b   :  { %5137 = vrot.lane.b32.xlu1 %v11074_v61, %s11251_s19 }
0x2b3c   :  { %v11076_v29 = vpop.eup %11075 }
0x2b3d   :  { %v5131_v31 = vadd.f32 1.0, %v11076_v29 }
0x2b3f   :  { %11077 = vrcp.f32 %v5131_v31 }
0x2b4c   :  { %v11078_v36 = vpop.eup %11077 }
0x2b4d   :  { %v5135_v39 = vmul.f32 %v11078_v36, %v12047_v30 }
0x2bad   :  { %v5138_v37 = vpop.permute.xlu1 %5137 }
0x2bae   :  { %v5140_v25 = vmul.f32 %v11078_v36, %v5138_v37 }
0x2bb0   :  { %5142 = vrot.lane.b32.xlu0 %v5140_v25, %s11281_s4 }
0x2c22   :  { %v5143_v42 = vpop.permute.xlu0 %5142 }
0x2c23   :  { %v12191_v44 = vadd.f32 %v5143_v42, %v5135_v39 }
0x2c25   :  { %11079 = vtanh.f32 %v12191_v44 }
0x2c32   :  { %v11080_v32 = vpop.eup %11079 }
0x2c33   :  { %5148 = vrot.lane.b32.xlu1 %v11080_v32, %s11251_s19 }
0x2ca5   :  { %v5149_v3 = vpop.permute.xlu1 %5148 }
0x2ca6   :  { %v12195_v5 = vmul.f32 %v11078_v36, %v5149_v3 }
0x2ca8   :  { %v5159_v33 = vrot.slane %v12195_v5, %v12052_v8  ;;  %v5513_v6 = vpack.c.bf16 %v12195_v5, %v12195_v5 }
0x2caa   :  { %v5160_v35 = vcombine.high %v5159_v33, %v5159_v33  ;;  %v5167_v4 = vrot.slane %v5159_v33, %v12052_v8 }
0x2cac   :  { %v5174_v45 = vrot.slane %v5160_v35, %v12052_v8  ;;  %v5178_v30 = vrot.slane %v5167_v4, %v11355_v19 }
0x2cae   :  { %5179 = vrot.lane.b32.xlu0 %v5178_v30, %s11281_s4  ;;  %v5256_v53 = vrot.slane %v5174_v45, %v11355_v19 }
0x2cb0   :  { %5257 = vrot.lane.b32.xlu1 %v5256_v53, %s11281_s4 }
0x2d20   :  { %v5180_v51 = vpop.permute.xlu0 %5179 }
0x2d21   :  { %10452 = vmatmul.mubr.msk.f32.vlgmr.msra.gmra.mxu0 %vm163_vm1, %v5180_v51 }
0x2d22   :  { %10455 = vmatpush3.xpose.msk.msra.mxu0 %vm163_vm1, %v11955_v59  ;;  %10456 = vmatprep.mubr.msk.f32.mxu0 %vm11246_vm0, %v11244_v0  ;;  %v5258_v55 = vpop.permute.xlu1 %5257 }
0x2d23   :  { %10464 = vmatprep.subr.mxu0 %v11244_v0 }
0x2d25   :  { %10457 = vmatmul.mubr.msk.f32.vlgmr.msra.gmra.mxu0 %vm163_vm1, %v5258_v55 }
0x2d26   :  { %10465 = vmatpush3.msra.mxu0 %v11895_v54  ;;  %10466 = vmatprep.mubr.msk.f32.mxu0 %vm11246_vm0, %v11244_v0 }
0x2d27   :  { %10477 = vmatprep.subr.bf16.mxu0 %v11244_v0 }
0x2de1   :  { %v5249_v56 = vpop.f32.mrf.mxu0 }
0x2de3   :  { %v10453_v11 = vpop.f32.mrf.mxu0 }
0x2de5   :  { %v5327_v58 = vpop.f32.mrf.mxu0 }
0x2de6   :  { %v5333_v12 = vrot.slane %v5327_v58, 7 }
0x2de7   :  { %v10458_v63 = vpop.f32.mrf.mxu0 }
0x2de8   :  { %v5334_v1 = vsel %vm3806_vm9, %v5333_v12, %v5249_v56 }
0x2de9   :  { %v5336_v2 = vsel %vm4567_vm10, %v5334_v1, -inf }
0x2dea   :  { %5337 = vmax.xlane.f32.xlu0 %v5336_v2 }
0x2e00   :  { %5515 = vrot.lane.b32.xlu0 %v5513_v6, %s11281_s4 }
0x2e73   :  { %v5338_v10 = vpop.xlane.xlu0 %5337 }
0x2e74   :  { %v5340_v50 = vrot.slane %v5338_v10, 1  ;;  %v5343_v41 = vsub.f32 %v5249_v56, %v5338_v10 }
0x2e76   :  { %v5344_v15 = vsub.f32 %v5327_v58, %v5340_v50  ;;  %v5345_v61 = vmul.f32 1.442695, %v5343_v41 }
0x2e77   :  { %v5516_v4 = vpop.permute.xlu0 %5515 }
0x2e78   :  { %v5347_v27 = vmul.f32 1.442695, %v5344_v15 }
0x2e7a   :  { %11081 = vpow2.f32 %v5347_v27 }
0x2e7b   :  { %11083 = vpow2.f32 %v5345_v61 }
0x2e87   :  { %v11082_v29 = vpop.eup %11081 }
0x2e88   :  { %v5351_v31 = vrot.slane %v11082_v29, 7  ;;  %v11084_v36 = vpop.eup %11083 }
0x2e8a   :  { %v5352_v37 = vsel %vm3806_vm9, %v5351_v31, %v11084_v36 }
0x2e8b   :  { %v5354_v25 = vsel %vm4567_vm10, %v5352_v37, 0.0 }
0x2e8c   :  { %5355 = vadd.xlane.f32.xlu1 %v5354_v25 }
0x2f15   :  { %v5356_v39 = vpop.xlane.xlu1 %5355 }
0x2f16   :  { %v5358_v42 = vrot.slane %v5356_v39, 1  ;;  %11085 = vrcp.f32 %v5356_v39 }
0x2f18   :  { %11087 = vrcp.f32 %v5358_v42 }
0x2f23   :  { %v11086_v32 = vpop.eup %11085 }
0x2f24   :  { %v5362_v3 = vmul.f32 %v11086_v32, %v11084_v36 }
0x2f25   :  { %v11088_v33 = vpop.eup %11087 }
0x2f26   :  { %10462 = vmatmul.mubr.msk.f32.vlgmr.msra.gmra.mxu1 %vm211_vm2, %v5362_v3  ;;  %v5364_v35 = vmul.f32 %v11088_v33, %v11082_v29 }
0x2f27   :  { %10470 = vmatpush3.bf16.msra.mxu1 %v12087_v47  ;;  %10473 = vmatprep.mubr.msk.bf16.mxu1 %vm11246_vm0, %v11244_v0 }
0x2f28   :  { %10467 = vmatmul.mubr.msk.f32.vlgmr.msra.gmra.mxu0 %vm211_vm2, %v5364_v35  ;;  %10471 = vmatprep.subr.bf16.mxu1 %v11244_v0 }
0x2f29   :  { %10478 = vmatpush3.bf16.msra.mxu0 %v12131_v28  ;;  %10481 = vmatprep.mubr.msk.bf16.mxu0 %vm11246_vm0, %v11244_v0 }
0x2f2a   :  { %10479 = vmatprep.subr.bf16.mxu0 %v11244_v0 }
0x2f2b   :  { %10472 = vmatpush3.bf16.msra.mxu1 %v12092_v49 }
0x2f2c   :  { %10485 = vmatprep.subr.mxu1 %v11244_v0 }
0x2f2d   :  { %10480 = vmatpush3.bf16.msra.mxu0 %v12136_v9 }
0x2f2e   :  { %10474 = vmatmul.mubr.msk.bf16.vlgmr.msra.gmra.mxu1 %vm163_vm1, %v5516_v4  ;;  %10496 = vmatprep.subr.mxu0 %v11244_v0 }
0x2f2f   :  { %10486 = vmatpush3.msra.mxu1 %v11933_v16  ;;  %10493 = vmatprep.mubr.msk.f32.mxu1 %vm11246_vm0, %v11244_v0 }
0x2f30   :  { %10487 = vmatprep.subr.mxu1 %v11244_v0 }
0x2f31   :  { %10488 = vmatpush3.msra.mxu1 %v11935_v18 }
0x2f32   :  { %10489 = vmatprep.subr.mxu1 %v11244_v0 }
0x2f33   :  { %10490 = vmatpush3.msra.mxu1 %v11939_v22 }
0x2f34   :  { %10491 = vmatprep.subr.mxu1 %v11244_v0 }
0x2f35   :  { %10492 = vmatpush3.msra.mxu1 %v11943_v23 }
0x2f36   :  { %10494 = vmatmul.mubr.msk.f32.vlgmr.msra.gmra.mxu1 %vm163_vm1, %v12179_v7  ;;  %10507 = vmatprep.subr.mxu1 %v11244_v0 }
0x2f37   :  { %10508 = vmatpush3.msra.mxu1 %v12008_v13  ;;  %10515 = vmatprep.mubr.msk.f32.mxu1 %vm11246_vm0, %v11244_v0 }
0x2f38   :  { %10509 = vmatprep.subr.mxu1 %v11244_v0 }
0x2f39   :  { %10510 = vmatpush3.msra.mxu1 %v12010_v14 }
0x2f3a   :  { %10511 = vmatprep.subr.mxu1 %v11244_v0 }
0x2f3b   :  { %10512 = vmatpush3.msra.mxu1 %v12013_v21 }
0x2f3c   :  { %10513 = vmatprep.subr.mxu1 %v11244_v0 }
0x2f3d   :  { %10514 = vmatpush3.msra.mxu1 %v12018_v26 }
0x2f3e   :  { %10528 = vmatprep.subr.mxu1 %v11244_v0 }
0x2fe6   :  { %v5434_v7 = vpop.f32.mrf.mxu1 }
0x2fe7   :  { %v5511_v53 = vpack.c.bf16 %v5434_v7, %v5434_v7 }
0x2fe8   :  { %v10463_v45 = vpop.f32.mrf.mxu1  ;;  %v5507_v30 = vpop.f32.mrf.mxu0 }
0x2fe9   :  { %v5512_v51 = vpack.c.bf16 %v5507_v30, %v5507_v30  ;;  %v5562_v11 = vunpack.c.l.b16 %v5511_v53  ;;  %v5695_v45 = vrot.slane %v12168_v57, 6 }
0x2fea   :  { %v10468_v55 = vpop.f32.mrf.mxu0 }
0x2feb   :  { %v5563_v56 = vunpack.c.l.b16 %v5512_v51 }
0x2fed   :  { %v5564_v58 = vrot.slane %v5563_v56, 7 }
0x2fee   :  { %v5554_v12 = vpop.f32.mrf.mxu1 }
0x2fef   :  { %v5565_v63 = vsel %vm3806_vm9, %v5564_v58, %v5562_v11 }
0x2ff0   :  { %v5566_v1 = vpack.c.b16 %v5565_v63, %v5565_v63  ;;  %v10475_v2 = vpop.f32.mrf.mxu1 }
0x2ff2   :  { %v5557_v6 = vpop.f32.mrf.mxu1  ;;  %10482 = vmatmul.mubr.msk.bf16.vlgmr.msra.gmra.mxu0 %vm163_vm1, %v5566_v1 }
0x2ff3   :  { %10497 = vmatpush3.msra.mxu0 %v11961_v34  ;;  %10504 = vmatprep.mubr.msk.f32.mxu0 %vm11246_vm0, %v11244_v0 }
0x2ff4   :  { %v10476_v10 = vpop.f32.mrf.mxu1  ;;  %10498 = vmatprep.subr.mxu0 %v11244_v0 }
0x2ff5   :  { %10499 = vmatpush3.msra.mxu0 %v11963_v62 }
0x2ff6   :  { %v5679_v50 = vpop.f32.mrf.mxu1  ;;  %10500 = vmatprep.subr.mxu0 %v11244_v0 }
0x2ff7   :  { %v5684_v41 = vrot.slane %v5679_v50, 4  ;;  %10501 = vmatpush3.msra.mxu0 %v11967_v38 }
0x2ff8   :  { %v10495_v15 = vpop.f32.mrf.mxu1  ;;  %10502 = vmatprep.subr.mxu0 %v11244_v0 }
0x2ff9   :  { %v5686_v61 = vadd.f32 %v5684_v41, %v11997_v43  ;;  %10503 = vmatpush3.msra.mxu0 %v11971_v40 }
0x2ffa   :  { %10518 = vmatprep.subr.mxu0 %v11244_v0 }
0x2ffb   :  { %11089 = vtanh.f32 %v5686_v61  ;;  %v9644_v29 = vmul.f32 -1.442695, %v5686_v61 }
0x2ffd   :  { %11091 = vpow2.f32 %v9644_v29 }
0x3008   :  { %v11090_v27 = vpop.eup %11089 }
0x3009   :  { %5699 = vrot.lane.b32.xlu1 %v11090_v27, %s11251_s19 }
0x300a   :  { %v11092_v31 = vpop.eup %11091 }
0x300b   :  { %v5690_v36 = vadd.f32 1.0, %v11092_v31 }
0x300d   :  { %11093 = vrcp.f32 %v5690_v36 }
0x301a   :  { %v11094_v37 = vpop.eup %11093 }
0x301b   :  { %v5697_v30 = vmul.f32 %v11094_v37, %v5695_v45 }
0x307b   :  { %v5700_v25 = vpop.permute.xlu1 %5699 }
0x307c   :  { %v5702_v39 = vmul.f32 %v11094_v37, %v5700_v25 }
0x307e   :  { %5704 = vrot.lane.b32.xlu0 %v5702_v39, %s11281_s4 }
0x3082   :  { %5714 = vrot.lane.b32.xlu0 %v12195_v5, %s11281_s4 }
0x30b2   :  { %v5604_v42 = vpop.f32.mrf.mxu0 }
0x30b3   :  { %v5605_v32 = vadd.f32 %v5604_v42, %v5554_v12 }
0x30b4   :  { %v10483_v3 = vpop.f32.mrf.mxu0 }
0x30b5   :  { %v5610_v33 = vadd.f32 %v12163_v46, %v5605_v32 }
0x30b6   :  { %v5607_v35 = vpop.f32.mrf.mxu0 }
0x30b7   :  { %11095 = vtanh.f32 %v5610_v33 }
0x30b8   :  { %v10484_v4 = vpop.f32.mrf.mxu0 }
0x30c4   :  { %v11096_v7 = vpop.eup %11095 }
0x30c5   :  { %5612 = vst.msk [vmem:[#allocation2 + $0x2] sm:$0x3] %vm4874_vm11, %v11096_v7 }
0x30f0   :  { %v5705_v53 = vpop.permute.xlu0 %5704 }
0x30f1   :  { %v12280_v51 = vadd.f32 %v5705_v53, %v5697_v30 }
0x30f3   :  { %11097 = vtanh.f32 %v12280_v51 }
0x30f4   :  { %v5715_v5 = vpop.permute.xlu0 %5714 }
0x30f5   :  { %10505 = vmatmul.mubr.msk.f32.vlgmr.msra.gmra.mxu0 %vm163_vm1, %v5715_v5 }
0x30f6   :  { %10519 = vmatpush3.xpose.msk.msra.mxu0 %vm163_vm1, %v11953_v24  ;;  %10520 = vmatprep.mubr.msk.f32.mxu0 %vm11246_vm0, %v11244_v0 }
0x30f7   :  { %10523 = vmatprep.subr.mxu0 %v11244_v0 }
0x3100   :  { %v11098_v55 = vpop.eup %11097 }
0x3101   :  { %5710 = vrot.lane.b32.xlu1 %v11098_v55, %s11251_s19 }
0x3173   :  { %v5711_v57 = vpop.permute.xlu1 %5710 }
0x3174   :  { %v5713_v56 = vmul.f32 %v11094_v37, %v5711_v57 }
0x3176   :  { %v5789_v11 = vrot.slane %v5713_v56, 4 }
0x3178   :  { %5790 = vrot.lane.b32.xlu1 %v5789_v11, %s11281_s4 }
0x31b5   :  { %v5784_v58 = vpop.f32.mrf.mxu0 }
0x31b7   :  { %v10506_v12 = vpop.f32.mrf.mxu0 }
0x31ea   :  { %v12291_v63 = vpop.permute.xlu1 %5790 }
0x31eb   :  { %10516 = vmatmul.mubr.msk.f32.vlgmr.msra.gmra.mxu1 %vm163_vm1, %v12291_v63 }
0x31ec   :  { %10529 = vmatpush3.msra.mxu1 %v11893_v52  ;;  %10530 = vmatprep.mubr.msk.f32.mxu1 %vm11246_vm0, %v11244_v0 }
0x31ed   :  { %10538 = vmatprep.subr.bf16.mxu1 %v11244_v0 }
0x32ab   :  { %v5860_v1 = vpop.f32.mrf.mxu1 }
0x32ac   :  { %v5861_v2 = vadd.f32 %v5860_v1, %v5784_v58 }
0x32ad   :  { %v10517_v6 = vpop.f32.mrf.mxu1 }
0x32ae   :  { %v5864_v10 = vadd.f32 %v12041_v60, %v5861_v2 }
0x32b0   :  { %11099 = vtanh.f32 %v5864_v10  ;;  %v9647_v41 = vmul.f32 -1.442695, %v5864_v10 }
0x32b2   :  { %11101 = vpow2.f32 %v9647_v41 }
0x32bd   :  { %v11100_v50 = vpop.eup %11099 }
0x32be   :  { %5874 = vrot.lane.b32.xlu0 %v11100_v50, %s11251_s19 }
0x32bf   :  { %v11102_v15 = vpop.eup %11101 }
0x32c0   :  { %v5868_v61 = vadd.f32 1.0, %v11102_v15 }
0x32c2   :  { %11103 = vrcp.f32 %v5868_v61 }
0x32cf   :  { %v11104_v27 = vpop.eup %11103 }
0x32d0   :  { %v5872_v36 = vmul.f32 %v11104_v27, %v12191_v44 }
0x3330   :  { %v5875_v29 = vpop.permute.xlu0 %5874 }
0x3331   :  { %v5877_v31 = vmul.f32 %v11104_v27, %v5875_v29 }
0x3333   :  { %5879 = vrot.lane.b32.xlu1 %v5877_v31, %s11281_s4 }
0x33a5   :  { %v5880_v37 = vpop.permute.xlu1 %5879 }
0x33a6   :  { %v12303_v25 = vadd.f32 %v5880_v37, %v5872_v36 }
0x33a8   :  { %11105 = vtanh.f32 %v12303_v25 }
0x33b5   :  { %v11106_v60 = vpop.eup %11105 }
0x33b6   :  { %5885 = vrot.lane.b32.xlu0 %v11106_v60, %s11251_s19 }
0x3428   :  { %v5886_v39 = vpop.permute.xlu0 %5885 }
0x3429   :  { %v12307_v42 = vmul.f32 %v11104_v27, %v5886_v39 }
0x342b   :  { %v5896_v32 = vrot.slane %v12307_v42, %v12052_v8  ;;  %v6250_v29 = vpack.c.bf16 %v12307_v42, %v12307_v42 }
0x342d   :  { %v5897_v3 = vcombine.high %v5896_v32, %v5896_v32  ;;  %v5904_v33 = vrot.slane %v5896_v32, %v12052_v8 }
0x342f   :  { %v5911_v35 = vrot.slane %v5897_v3, %v12052_v8  ;;  %v5915_v44 = vrot.slane %v5904_v33, %v11355_v19 }
0x3431   :  { %5916 = vrot.lane.b32.xlu1 %v5915_v44, %s11281_s4  ;;  %v5993_v4 = vrot.slane %v5911_v35, %v11355_v19 }
0x3433   :  { %5994 = vrot.lane.b32.xlu0 %v5993_v4, %s11281_s4 }
0x34a3   :  { %v5917_v7 = vpop.permute.xlu1 %5916 }
0x34a4   :  { %10521 = vmatmul.mubr.msk.f32.vlgmr.msra.gmra.mxu0 %vm163_vm1, %v5917_v7 }
0x34a5   :  { %10524 = vmatpush3.xpose.msk.msra.mxu0 %vm163_vm1, %v11955_v59  ;;  %10525 = vmatprep.mubr.msk.f32.mxu0 %vm11246_vm0, %v11244_v0  ;;  %v5995_v45 = vpop.permute.xlu0 %5994 }
0x34a6   :  { %10533 = vmatprep.subr.mxu0 %v11244_v0 }
0x34a8   :  { %10526 = vmatmul.mubr.msk.f32.vlgmr.msra.gmra.mxu0 %vm163_vm1, %v5995_v45 }
0x34a9   :  { %10534 = vmatpush3.msra.mxu0 %v11895_v54  ;;  %10535 = vmatprep.mubr.msk.f32.mxu0 %vm11246_vm0, %v11244_v0 }
0x34aa   :  { %10546 = vmatprep.subr.bf16.mxu0 %v11244_v0 }
0x3564   :  { %v5986_v30 = vpop.f32.mrf.mxu0 }
0x3566   :  { %v10522_v53 = vpop.f32.mrf.mxu0 }
0x3568   :  { %v6064_v5 = vpop.f32.mrf.mxu0 }
0x3569   :  { %v6070_v55 = vrot.slane %v6064_v5, 7 }
0x356a   :  { %v10527_v57 = vpop.f32.mrf.mxu0 }
0x356b   :  { %v6071_v56 = vsel %vm3806_vm9, %v6070_v55, %v5986_v30 }
0x356c   :  { %v6073_v11 = vsel %vm4567_vm10, %v6071_v56, -inf }
0x356d   :  { %6074 = vmax.xlane.f32.xlu1 %v6073_v11 }
0x35f6   :  { %v6075_v58 = vpop.xlane.xlu1 %6074 }
0x35f7   :  { %v6077_v12 = vrot.slane %v6075_v58, 1  ;;  %v6080_v1 = vsub.f32 %v5986_v30, %v6075_v58 }
0x35f9   :  { %v6081_v2 = vsub.f32 %v6064_v5, %v6077_v12  ;;  %v6082_v6 = vmul.f32 1.442695, %v6080_v1 }
0x35fb   :  { %v6084_v10 = vmul.f32 1.442695, %v6081_v2 }
0x35fd   :  { %11107 = vpow2.f32 %v6084_v10 }
0x35fe   :  { %11109 = vpow2.f32 %v6082_v6 }
0x360a   :  { %v11108_v50 = vpop.eup %11107 }
0x360b   :  { %v6088_v41 = vrot.slane %v11108_v50, 7  ;;  %v11110_v15 = vpop.eup %11109 }
0x360d   :  { %v6089_v61 = vsel %vm3806_vm9, %v6088_v41, %v11110_v15 }
0x360e   :  { %v6091_v27 = vsel %vm4567_vm10, %v6089_v61, 0.0 }
0x360f   :  { %6092 = vadd.xlane.f32.xlu0 %v6091_v27 }
0x3625   :  { %6252 = vrot.lane.b32.xlu0 %v6250_v29, %s11281_s4 }
0x3698   :  { %v6093_v31 = vpop.xlane.xlu0 %6092 }
0x3699   :  { %v6095_v36 = vrot.slane %v6093_v31, 1  ;;  %11111 = vrcp.f32 %v6093_v31 }
0x369b   :  { %11113 = vrcp.f32 %v6095_v36 }
0x369c   :  { %v6253_v3 = vpop.permute.xlu0 %6252 }
0x36a6   :  { %v11112_v37 = vpop.eup %11111 }
0x36a7   :  { %v6099_v60 = vmul.f32 %v11112_v37, %v11110_v15  ;;  %v6432_v37 = vrot.slane %v12280_v51, 6 }
0x36a8   :  { %v11114_v39 = vpop.eup %11113 }
0x36a9   :  { %10531 = vmatmul.mubr.msk.f32.vlgmr.msra.gmra.mxu1 %vm211_vm2, %v6099_v60  ;;  %v6101_v32 = vmul.f32 %v11114_v39, %v11108_v50 }
0x36aa   :  { %10539 = vmatpush3.bf16.msra.mxu1 %v12087_v47  ;;  %10542 = vmatprep.mubr.msk.bf16.mxu1 %vm11246_vm0, %v11244_v0 }
0x36ab   :  { %10536 = vmatmul.mubr.msk.f32.vlgmr.msra.gmra.mxu0 %vm211_vm2, %v6101_v32  ;;  %10540 = vmatprep.subr.bf16.mxu1 %v11244_v0 }
0x36ac   :  { %10547 = vmatpush3.bf16.msra.mxu0 %v12131_v28  ;;  %10550 = vmatprep.mubr.msk.bf16.mxu0 %vm11246_vm0, %v11244_v0 }
0x36ad   :  { %10548 = vmatprep.subr.bf16.mxu0 %v11244_v0 }
0x36ae   :  { %10541 = vmatpush3.bf16.msra.mxu1 %v12092_v49 }
0x36af   :  { %10554 = vmatprep.subr.mxu1 %v11244_v0 }
0x36b0   :  { %10549 = vmatpush3.bf16.msra.mxu0 %v12136_v9 }
0x36b1   :  { %10543 = vmatmul.mubr.msk.bf16.vlgmr.msra.gmra.mxu1 %vm163_vm1, %v6253_v3  ;;  %10565 = vmatprep.subr.mxu0 %v11244_v0 }
0x36b2   :  { %10555 = vmatpush3.msra.mxu1 %v11933_v16  ;;  %10562 = vmatprep.mubr.msk.f32.mxu1 %vm11246_vm0, %v11244_v0 }
0x36b3   :  { %10556 = vmatprep.subr.mxu1 %v11244_v0 }
0x36b4   :  { %10557 = vmatpush3.msra.mxu1 %v11935_v18 }
0x36b5   :  { %10558 = vmatprep.subr.mxu1 %v11244_v0 }
0x36b6   :  { %10559 = vmatpush3.msra.mxu1 %v11939_v22 }
0x36b7   :  { %10560 = vmatprep.subr.mxu1 %v11244_v0 }
0x36b8   :  { %10561 = vmatpush3.msra.mxu1 %v11943_v23 }
0x36b9   :  { %10563 = vmatmul.mubr.msk.f32.vlgmr.msra.gmra.mxu1 %vm163_vm1, %v12291_v63  ;;  %10576 = vmatprep.subr.mxu1 %v11244_v0 }
0x36ba   :  { %10577 = vmatpush3.msra.mxu1 %v12008_v13  ;;  %10584 = vmatprep.mubr.msk.f32.mxu1 %vm11246_vm0, %v11244_v0 }
0x36bb   :  { %10578 = vmatprep.subr.mxu1 %v11244_v0 }
0x36bc   :  { %10579 = vmatpush3.msra.mxu1 %v12010_v14 }
0x36bd   :  { %10580 = vmatprep.subr.mxu1 %v11244_v0 }
0x36be   :  { %10581 = vmatpush3.msra.mxu1 %v12013_v21 }
0x36bf   :  { %10582 = vmatprep.subr.mxu1 %v11244_v0 }
0x36c0   :  { %10583 = vmatpush3.msra.mxu1 %v12018_v26 }
0x36c1   :  { %10597 = vmatprep.subr.mxu1 %v11244_v0 }
0x3769   :  { %v6171_v47 = vpop.f32.mrf.mxu1 }
0x376a   :  { %v6248_v9 = vpack.c.bf16 %v6171_v47, %v6171_v47 }
0x376b   :  { %v10532_v49 = vpop.f32.mrf.mxu1  ;;  %v6244_v28 = vpop.f32.mrf.mxu0 }
0x376c   :  { %v6249_v63 = vpack.c.bf16 %v6244_v28, %v6244_v28  ;;  %v6299_v44 = vunpack.c.l.b16 %v6248_v9 }
0x376d   :  { %v10537_v33 = vpop.f32.mrf.mxu0 }
0x376e   :  { %v6300_v35 = vunpack.c.l.b16 %v6249_v63 }
0x3770   :  { %v6301_v4 = vrot.slane %v6300_v35, 7 }
0x3771   :  { %v6291_v7 = vpop.f32.mrf.mxu1 }
0x3772   :  { %v6302_v45 = vsel %vm3806_vm9, %v6301_v4, %v6299_v44  ;;  %v12412_v44 = vld [vmem:[%s12038_s18] ss:$0 sm:$0xff] }
0x3773   :  { %v6303_v30 = vpack.c.b16 %v6302_v45, %v6302_v45  ;;  %v10544_v53 = vpop.f32.mrf.mxu1 }
0x3775   :  { %v6294_v5 = vpop.f32.mrf.mxu1  ;;  %10551 = vmatmul.mubr.msk.bf16.vlgmr.msra.gmra.mxu0 %vm163_vm1, %v6303_v30 }
0x3776   :  { %10566 = vmatpush3.msra.mxu0 %v11961_v34  ;;  %10573 = vmatprep.mubr.msk.f32.mxu0 %vm11246_vm0, %v11244_v0 }
0x3777   :  { %v10545_v55 = vpop.f32.mrf.mxu1  ;;  %10567 = vmatprep.subr.mxu0 %v11244_v0 }
0x3778   :  { %10568 = vmatpush3.msra.mxu0 %v11963_v62 }
0x3779   :  { %v6416_v57 = vpop.f32.mrf.mxu1  ;;  %10569 = vmatprep.subr.mxu0 %v11244_v0 }
0x377a   :  { %v6421_v56 = vrot.slane %v6416_v57, 2  ;;  %10570 = vmatpush3.msra.mxu0 %v11967_v38 }
0x377b   :  { %v10564_v11 = vpop.f32.mrf.mxu1  ;;  %10571 = vmatprep.subr.mxu0 %v11244_v0 }
0x377c   :  { %v6423_v58 = vadd.f32 %v6421_v56, %v11997_v43  ;;  %10572 = vmatpush3.msra.mxu0 %v11971_v40 }
0x377d   :  { %10587 = vmatprep.subr.mxu0 %v11244_v0 }
0x377e   :  { %11115 = vtanh.f32 %v6423_v58  ;;  %v9657_v1 = vmul.f32 -1.442695, %v6423_v58 }
0x3780   :  { %11117 = vpow2.f32 %v9657_v1 }
0x378b   :  { %v11116_v12 = vpop.eup %11115 }
0x378c   :  { %6436 = vrot.lane.b32.xlu1 %v11116_v12, %s11251_s19 }
0x378d   :  { %v11118_v2 = vpop.eup %11117 }
0x378e   :  { %v6427_v6 = vadd.f32 1.0, %v11118_v2 }
0x3790   :  { %11119 = vrcp.f32 %v6427_v6 }
0x379d   :  { %v11120_v10 = vpop.eup %11119 }
0x379e   :  { %v6434_v60 = vmul.f32 %v11120_v10, %v6432_v37 }
0x37fe   :  { %v6437_v50 = vpop.permute.xlu1 %6436 }
0x37ff   :  { %v6439_v41 = vmul.f32 %v11120_v10, %v6437_v50 }
0x3801   :  { %6441 = vrot.lane.b32.xlu1 %v6439_v41, %s11281_s4 }
0x3805   :  { %6451 = vrot.lane.b32.xlu1 %v12307_v42, %s11281_s4 }
0x3835   :  { %v6341_v43 = vpop.f32.mrf.mxu0 }
0x3836   :  { %v6342_v15 = vadd.f32 %v6341_v43, %v6291_v7 }
0x3837   :  { %v10552_v61 = vpop.f32.mrf.mxu0 }
0x3838   :  { %v6347_v27 = vadd.f32 %v12163_v46, %v6342_v15 }
0x3839   :  { %v6344_v29 = vpop.f32.mrf.mxu0 }
0x383a   :  { %11121 = vtanh.f32 %v6347_v27 }
0x383b   :  { %v10553_v31 = vpop.f32.mrf.mxu0 }
0x3847   :  { %v11122_v36 = vpop.eup %11121 }
0x3848   :  { %6349 = vst.msk [vmem:[#allocation2 + $0x4] sm:$0x3] %vm4874_vm11, %v11122_v36 }
0x3873   :  { %v6442_v39 = vpop.permute.xlu1 %6441 }
0x3874   :  { %v12392_v32 = vadd.f32 %v6442_v39, %v6434_v60 }
0x3876   :  { %11123 = vtanh.f32 %v12392_v32 }
0x3877   :  { %v6452_v42 = vpop.permute.xlu1 %6451 }
0x3878   :  { %10574 = vmatmul.mubr.msk.f32.vlgmr.msra.gmra.mxu0 %vm163_vm1, %v6452_v42 }
0x3879   :  { %10588 = vmatpush3.xpose.msk.msra.mxu0 %vm163_vm1, %v11953_v24  ;;  %10589 = vmatprep.mubr.msk.f32.mxu0 %vm11246_vm0, %v11244_v0 }
0x387a   :  { %10592 = vmatprep.subr.mxu0 %v11244_v0 }
0x3883   :  { %v11124_v46 = vpop.eup %11123 }
0x3884   :  { %6447 = vrot.lane.b32.xlu0 %v11124_v46, %s11251_s19 }
0x38f6   :  { %v6448_v51 = vpop.permute.xlu0 %6447 }
0x38f7   :  { %v6450_v3 = vmul.f32 %v11120_v10, %v6448_v51 }
0x38f9   :  { %v6526_v47 = vrot.slane %v6450_v3, 6 }
0x38fb   :  { %6527 = vrot.lane.b32.xlu0 %v6526_v47, %s11281_s4 }
0x3938   :  { %v6521_v49 = vpop.f32.mrf.mxu0 }
0x393a   :  { %v10575_v28 = vpop.f32.mrf.mxu0 }
0x396d   :  { %v12403_v9 = vpop.permute.xlu0 %6527 }
0x396e   :  { %10585 = vmatmul.mubr.msk.f32.vlgmr.msra.gmra.mxu1 %vm163_vm1, %v12403_v9 }
0x396f   :  { %10598 = vmatpush3.msra.mxu1 %v11893_v52  ;;  %10599 = vmatprep.mubr.msk.f32.mxu1 %vm11246_vm0, %v11244_v0 }
0x3970   :  { %10607 = vmatprep.subr.bf16.mxu1 %v11244_v0 }
0x3a2e   :  { %v6597_v63 = vpop.f32.mrf.mxu1 }
0x3a2f   :  { %v6598_v33 = vadd.f32 %v6597_v63, %v6521_v49 }
0x3a30   :  { %v10586_v35 = vpop.f32.mrf.mxu1 }
0x3a31   :  { %v6601_v4 = vadd.f32 %v12412_v44, %v6598_v33 }
0x3a33   :  { %11125 = vtanh.f32 %v6601_v4  ;;  %v9660_v45 = vmul.f32 -1.442695, %v6601_v4 }
0x3a35   :  { %11127 = vpow2.f32 %v9660_v45 }
0x3a40   :  { %v11126_v7 = vpop.eup %11125 }
0x3a41   :  { %6611 = vrot.lane.b32.xlu1 %v11126_v7, %s11251_s19 }
0x3a42   :  { %v11128_v30 = vpop.eup %11127 }
0x3a43   :  { %v6605_v53 = vadd.f32 1.0, %v11128_v30 }
0x3a45   :  { %11129 = vrcp.f32 %v6605_v53 }
0x3a52   :  { %v11130_v5 = vpop.eup %11129 }
0x3a53   :  { %v6609_v56 = vmul.f32 %v11130_v5, %v12303_v25 }
0x3ab3   :  { %v6612_v55 = vpop.permute.xlu1 %6611 }
0x3ab4   :  { %v6614_v57 = vmul.f32 %v11130_v5, %v6612_v55 }
0x3ab6   :  { %6616 = vrot.lane.b32.xlu0 %v6614_v57, %s11281_s4 }
0x3b28   :  { %v6617_v11 = vpop.permute.xlu0 %6616 }
0x3b29   :  { %v12418_v58 = vadd.f32 %v6617_v11, %v6609_v56  ;;  %v12452_v56 = vld [vmem:[%s12081_s8 + $0x8] sm:$0xff]  }
0x3b2a   :  { %v12460_v11 = vld [vmem:[%s12128_s22 + $0x8] sm:$0xff]  }
0x3b2b   :  { %11131 = vtanh.f32 %v12418_v58 }
0x3b38   :  { %v11132_v12 = vpop.eup %11131 }
0x3b39   :  { %6622 = vrot.lane.b32.xlu1 %v11132_v12, %s11251_s19  ;;  %v12467_v12 = vld [vmem:[%s12081_s8] sm:$0xff]  }
0x3bab   :  { %v6623_v1 = vpop.permute.xlu1 %6622 }
0x3bac   :  { %v12422_v2 = vmul.f32 %v11130_v5, %v6623_v1 }
0x3bae   :  { %v6633_v6 = vrot.slane %v12422_v2, %v12052_v8  ;;  %v6987_v42 = vpack.c.bf16 %v12422_v2, %v12422_v2 }
0x3bb0   :  { %v6634_v10 = vcombine.high %v6633_v6, %v6633_v6  ;;  %v6641_v50 = vrot.slane %v6633_v6, %v12052_v8  ;;  %v12472_v6 = vld [vmem:[%s12128_s22] sm:$0xff]  }
0x3bb2   :  { %v6648_v41 = vrot.slane %v6634_v10, %v12052_v8  ;;  %v6652_v25 = vrot.slane %v6641_v50, %v11355_v19 }
0x3bb4   :  { %6653 = vrot.lane.b32.xlu0 %v6652_v25, %s11281_s4  ;;  %v6730_v43 = vrot.slane %v6648_v41, %v11355_v19 }
0x3bb6   :  { %6731 = vrot.lane.b32.xlu1 %v6730_v43, %s11281_s4 }
0x3c26   :  { %v6654_v15 = vpop.permute.xlu0 %6653 }
0x3c27   :  { %10590 = vmatmul.mubr.msk.f32.vlgmr.msra.gmra.mxu0 %vm163_vm1, %v6654_v15 }
0x3c28   :  { %10593 = vmatpush3.xpose.msk.msra.mxu0 %vm163_vm1, %v11955_v59  ;;  %10594 = vmatprep.mubr.msk.f32.mxu0 %vm11246_vm0, %v11244_v0  ;;  %v6732_v61 = vpop.permute.xlu1 %6731 }
0x3c29   :  { %10602 = vmatprep.subr.mxu0 %v11244_v0 }
0x3c2b   :  { %10595 = vmatmul.mubr.msk.f32.vlgmr.msra.gmra.mxu0 %vm163_vm1, %v6732_v61 }
0x3c2c   :  { %10603 = vmatpush3.msra.mxu0 %v11895_v54  ;;  %10604 = vmatprep.mubr.msk.f32.mxu0 %vm11246_vm0, %v11244_v0 }
0x3c2d   :  { %10615 = vmatprep.subr.bf16.mxu0 %v11244_v0 }
0x3ce7   :  { %v6723_v27 = vpop.f32.mrf.mxu0 }
0x3ce9   :  { %v10591_v29 = vpop.f32.mrf.mxu0 }
0x3ceb   :  { %v6801_v31 = vpop.f32.mrf.mxu0 }
0x3cec   :  { %v6807_v36 = vrot.slane %v6801_v31, 7 }
0x3ced   :  { %v10596_v37 = vpop.f32.mrf.mxu0 }
0x3cee   :  { %v6808_v60 = vsel %vm3806_vm9, %v6807_v36, %v6723_v27 }
0x3cef   :  { %v6810_v39 = vsel %vm4567_vm10, %v6808_v60, -inf }
0x3cf0   :  { %6811 = vmax.xlane.f32.xlu0 %v6810_v39 }
0x3d06   :  { %6989 = vrot.lane.b32.xlu0 %v6987_v42, %s11281_s4 }
0x3d79   :  { %v6812_v46 = vpop.xlane.xlu0 %6811 }
0x3d7a   :  { %v6814_v51 = vrot.slane %v6812_v46, 1  ;;  %v6817_v3 = vsub.f32 %v6723_v27, %v6812_v46 }
0x3d7c   :  { %v6818_v47 = vsub.f32 %v6801_v31, %v6814_v51  ;;  %v6819_v49 = vmul.f32 1.442695, %v6817_v3 }
0x3d7d   :  { %v6990_v1 = vpop.permute.xlu0 %6989 }
0x3d7e   :  { %v6821_v28 = vmul.f32 1.442695, %v6818_v47 }
0x3d80   :  { %11133 = vpow2.f32 %v6821_v28 }
0x3d81   :  { %11135 = vpow2.f32 %v6819_v49 }
0x3d8d   :  { %v11134_v63 = vpop.eup %11133 }
0x3d8e   :  { %v6825_v33 = vrot.slane %v11134_v63, 7  ;;  %v11136_v35 = vpop.eup %11135 }
0x3d90   :  { %v6826_v4 = vsel %vm3806_vm9, %v6825_v33, %v11136_v35 }
0x3d91   :  { %v6828_v7 = vsel %vm4567_vm10, %v6826_v4, 0.0 }
0x3d92   :  { %6829 = vadd.xlane.f32.xlu1 %v6828_v7 }
0x3e1b   :  { %v6830_v45 = vpop.xlane.xlu1 %6829 }
0x3e1c   :  { %v6832_v30 = vrot.slane %v6830_v45, 1  ;;  %11137 = vrcp.f32 %v6830_v45 }
0x3e1e   :  { %11139 = vrcp.f32 %v6832_v30  ;;  %v12517_v30 = vld [vmem:[%s12160_s25] ss:$0 sm:$0xff] }
0x3e29   :  { %v11138_v53 = vpop.eup %11137 }
0x3e2a   :  { %v6836_v5 = vmul.f32 %v11138_v53, %v11136_v35 }
0x3e2b   :  { %v11140_v55 = vpop.eup %11139 }
0x3e2c   :  { %10600 = vmatmul.mubr.msk.f32.vlgmr.msra.gmra.mxu1 %vm211_vm2, %v6836_v5  ;;  %v6838_v57 = vmul.f32 %v11140_v55, %v11134_v63 }
0x3e2d   :  { %10608 = vmatpush3.bf16.msra.mxu1 %v12452_v56  ;;  %10611 = vmatprep.mubr.msk.bf16.mxu1 %vm11246_vm0, %v11244_v0 }
0x3e2e   :  { %10605 = vmatmul.mubr.msk.f32.vlgmr.msra.gmra.mxu0 %vm211_vm2, %v6838_v57  ;;  %10609 = vmatprep.subr.bf16.mxu1 %v11244_v0 }
0x3e2f   :  { %10616 = vmatpush3.bf16.msra.mxu0 %v12460_v11  ;;  %10619 = vmatprep.mubr.msk.bf16.mxu0 %vm11246_vm0, %v11244_v0 }
0x3e30   :  { %10617 = vmatprep.subr.bf16.mxu0 %v11244_v0 }
0x3e31   :  { %10610 = vmatpush3.bf16.msra.mxu1 %v12467_v12 }
0x3e32   :  { %10623 = vmatprep.subr.mxu1 %v11244_v0 }
0x3e33   :  { %10618 = vmatpush3.bf16.msra.mxu0 %v12472_v6 }
0x3e34   :  { %10612 = vmatmul.mubr.msk.bf16.vlgmr.msra.gmra.mxu1 %vm163_vm1, %v6990_v1  ;;  %10634 = vmatprep.subr.mxu0 %v11244_v0  ;;  %v7166_v1 = vrot.slane %v12392_v32, 6 }
0x3e35   :  { %10624 = vmatpush3.msra.mxu1 %v11933_v16  ;;  %10631 = vmatprep.mubr.msk.f32.mxu1 %vm11246_vm0, %v11244_v0 }
0x3e36   :  { %10625 = vmatprep.subr.mxu1 %v11244_v0 }
0x3e37   :  { %10626 = vmatpush3.msra.mxu1 %v11935_v18 }
0x3e38   :  { %10627 = vmatprep.subr.mxu1 %v11244_v0 }
0x3e39   :  { %10628 = vmatpush3.msra.mxu1 %v11939_v22 }
0x3e3a   :  { %10629 = vmatprep.subr.mxu1 %v11244_v0 }
0x3e3b   :  { %10630 = vmatpush3.msra.mxu1 %v11943_v23 }
0x3e3c   :  { %10632 = vmatmul.mubr.msk.f32.vlgmr.msra.gmra.mxu1 %vm163_vm1, %v12403_v9  ;;  %10645 = vmatprep.subr.mxu1 %v11244_v0 }
0x3e3d   :  { %10646 = vmatpush3.msra.mxu1 %v12008_v13  ;;  %10653 = vmatprep.mubr.msk.f32.mxu1 %vm11246_vm0, %v11244_v0 }
0x3e3e   :  { %10647 = vmatprep.subr.mxu1 %v11244_v0 }
0x3e3f   :  { %10648 = vmatpush3.msra.mxu1 %v12010_v14 }
0x3e40   :  { %10649 = vmatprep.subr.mxu1 %v11244_v0 }
0x3e41   :  { %10650 = vmatpush3.msra.mxu1 %v12013_v21 }
0x3e42   :  { %10651 = vmatprep.subr.mxu1 %v11244_v0 }
0x3e43   :  { %10652 = vmatpush3.msra.mxu1 %v12018_v26 }
0x3e44   :  { %10666 = vmatprep.subr.mxu1 %v11244_v0 }
0x3eec   :  { %v6908_v9 = vpop.f32.mrf.mxu1 }
0x3eed   :  { %v6985_v41 = vpack.c.bf16 %v6908_v9, %v6908_v9 }
0x3eee   :  { %v10601_v10 = vpop.f32.mrf.mxu1  ;;  %v6981_v50 = vpop.f32.mrf.mxu0 }
0x3eef   :  { %v6986_v25 = vpack.c.bf16 %v6981_v50, %v6981_v50  ;;  %v7036_v61 = vunpack.c.l.b16 %v6985_v41 }
0x3ef0   :  { %v10606_v43 = vpop.f32.mrf.mxu0 }
0x3ef1   :  { %v7037_v15 = vunpack.c.l.b16 %v6986_v25 }
0x3ef3   :  { %v7038_v27 = vrot.slane %v7037_v15, 7 }
0x3ef4   :  { %v7028_v29 = vpop.f32.mrf.mxu1 }
0x3ef5   :  { %v7039_v31 = vsel %vm3806_vm9, %v7038_v27, %v7036_v61 }
0x3ef6   :  { %v7040_v36 = vpack.c.b16 %v7039_v31, %v7039_v31  ;;  %v10613_v37 = vpop.f32.mrf.mxu1 }
0x3ef8   :  { %v7031_v60 = vpop.f32.mrf.mxu1  ;;  %10620 = vmatmul.mubr.msk.bf16.vlgmr.msra.gmra.mxu0 %vm163_vm1, %v7040_v36 }
0x3ef9   :  { %10635 = vmatpush3.msra.mxu0 %v11961_v34  ;;  %10642 = vmatprep.mubr.msk.f32.mxu0 %vm11246_vm0, %v11244_v0 }
0x3efa   :  { %v10614_v39 = vpop.f32.mrf.mxu1  ;;  %10636 = vmatprep.subr.mxu0 %v11244_v0 }
0x3efb   :  { %10637 = vmatpush3.msra.mxu0 %v11963_v62 }
0x3efc   :  { %v7153_v42 = vpop.f32.mrf.mxu1  ;;  %10638 = vmatprep.subr.mxu0 %v11244_v0 }
0x3efd   :  { %v7157_v46 = vadd.f32 %v7153_v42, %v11989_v48  ;;  %10639 = vmatpush3.msra.mxu0 %v11967_v38 }
0x3efe   :  { %v10633_v51 = vpop.f32.mrf.mxu1  ;;  %10640 = vmatprep.subr.mxu0 %v11244_v0 }
0x3eff   :  { %11141 = vtanh.f32 %v7157_v46  ;;  %10641 = vmatpush3.msra.mxu0 %v11971_v40  ;;  %v9670_v47 = vmul.f32 -1.442695, %v7157_v46 }
0x3f00   :  { %10656 = vmatprep.subr.mxu0 %v11244_v0 }
0x3f01   :  { %11143 = vpow2.f32 %v9670_v47 }
0x3f0c   :  { %v11142_v3 = vpop.eup %11141 }
0x3f0d   :  { %7170 = vrot.lane.b32.xlu1 %v11142_v3, %s11251_s19 }
0x3f0e   :  { %v11144_v49 = vpop.eup %11143 }
0x3f0f   :  { %v7161_v28 = vadd.f32 1.0, %v11144_v49 }
0x3f11   :  { %11145 = vrcp.f32 %v7161_v28 }
0x3f1e   :  { %v11146_v63 = vpop.eup %11145 }
0x3f1f   :  { %v7168_v9 = vmul.f32 %v11146_v63, %v7166_v1 }
0x3f7f   :  { %v7171_v33 = vpop.permute.xlu1 %7170 }
0x3f80   :  { %v7173_v35 = vmul.f32 %v11146_v63, %v7171_v33 }
0x3f82   :  { %7175 = vrot.lane.b32.xlu0 %v7173_v35, %s11281_s4 }
0x3f86   :  { %7185 = vrot.lane.b32.xlu0 %v12422_v2, %s11281_s4 }
0x3fb8   :  { %v7078_v4 = vpop.f32.mrf.mxu0 }
0x3fb9   :  { %v7079_v7 = vadd.f32 %v7078_v4, %v7028_v29 }
0x3fba   :  { %v10621_v45 = vpop.f32.mrf.mxu0 }
0x3fbb   :  { %v7084_v53 = vadd.f32 %v12517_v30, %v7079_v7 }
0x3fbc   :  { %v7081_v5 = vpop.f32.mrf.mxu0 }
0x3fbd   :  { %11147 = vtanh.f32 %v7084_v53 }
0x3fbe   :  { %v10622_v55 = vpop.f32.mrf.mxu0 }
0x3fca   :  { %v11148_v57 = vpop.eup %11147 }
0x3fcb   :  { %7086 = vst.msk [vmem:[#allocation2 + $0x6] sm:$0x3] %vm4874_vm11, %v11148_v57 }
0x3ff4   :  { %v7176_v10 = vpop.permute.xlu0 %7175 }
0x3ff5   :  { %v12522_v50 = vadd.f32 %v7176_v10, %v7168_v9 }
0x3ff7   :  { %11149 = vtanh.f32 %v12522_v50 }
0x3ff8   :  { %v7186_v2 = vpop.permute.xlu0 %7185 }
0x3ff9   :  { %10643 = vmatmul.mubr.msk.f32.vlgmr.msra.gmra.mxu0 %vm163_vm1, %v7186_v2 }
0x3ffa   :  { %10657 = vmatpush3.xpose.msk.msra.mxu0 %vm163_vm1, %v11953_v24  ;;  %10658 = vmatprep.mubr.msk.f32.mxu0 %vm11246_vm0, %v11244_v0 }
0x3ffb   :  { %10661 = vmatprep.subr.mxu0 %v11244_v0 }
0x4004   :  { %v11150_v41 = vpop.eup %11149 }
0x4005   :  { %7181 = vrot.lane.b32.xlu1 %v11150_v41, %s11251_s19 }
0x4077   :  { %v7182_v32 = vpop.permute.xlu1 %7181 }
0x4078   :  { %v7184_v25 = vmul.f32 %v11146_v63, %v7182_v32 }
0x407a   :  { %7260 = vrot.lane.b32.xlu1 %v7184_v25, %s11281_s4 }
0x40b9   :  { %v7255_v43 = vpop.f32.mrf.mxu0 }
0x40bb   :  { %v10644_v15 = vpop.f32.mrf.mxu0 }
0x40ec   :  { %v12533_v61 = vpop.permute.xlu1 %7260 }
0x40ed   :  { %10654 = vmatmul.mubr.msk.f32.vlgmr.msra.gmra.mxu1 %vm163_vm1, %v12533_v61 }
0x40ee   :  { %10667 = vmatpush3.msra.mxu1 %v11893_v52  ;;  %10668 = vmatprep.mubr.msk.f32.mxu1 %vm11246_vm0, %v11244_v0 }
0x40ef   :  { %10676 = vmatprep.subr.bf16.mxu1 %v11244_v0 }
0x41ad   :  { %v7330_v27 = vpop.f32.mrf.mxu1 }
0x41ae   :  { %v7331_v29 = vadd.f32 %v7330_v27, %v7255_v43 }
0x41af   :  { %v10655_v31 = vpop.f32.mrf.mxu1 }
0x41b0   :  { %v7334_v36 = vadd.f32 %v12412_v44, %v7331_v29 }
0x41b2   :  { %11151 = vtanh.f32 %v7334_v36  ;;  %v9673_v60 = vmul.f32 -1.442695, %v7334_v36 }
0x41b4   :  { %11153 = vpow2.f32 %v9673_v60 }
0x41bf   :  { %v11152_v37 = vpop.eup %11151 }
0x41c0   :  { %7344 = vrot.lane.b32.xlu0 %v11152_v37, %s11251_s19 }
0x41c1   :  { %v11154_v39 = vpop.eup %11153 }
0x41c2   :  { %v7338_v42 = vadd.f32 1.0, %v11154_v39 }
0x41c4   :  { %11155 = vrcp.f32 %v7338_v42 }
0x41d1   :  { %v11156_v46 = vpop.eup %11155 }
0x41d2   :  { %v7342_v47 = vmul.f32 %v11156_v46, %v12418_v58 }
0x4232   :  { %v7345_v51 = vpop.permute.xlu0 %7344 }
0x4233   :  { %v7347_v3 = vmul.f32 %v11156_v46, %v7345_v51 }
0x4235   :  { %7349 = vrot.lane.b32.xlu1 %v7347_v3, %s11281_s4 }
0x42a7   :  { %v7350_v49 = vpop.permute.xlu1 %7349 }
0x42a8   :  { %v12545_v28 = vadd.f32 %v7350_v49, %v7342_v47 }
0x42aa   :  { %11157 = vtanh.f32 %v12545_v28 }
0x42b7   :  { %v11158_v63 = vpop.eup %11157 }
0x42b8   :  { %7355 = vrot.lane.b32.xlu0 %v11158_v63, %s11251_s19 }
0x432a   :  { %v7356_v33 = vpop.permute.xlu0 %7355 }
0x432b   :  { %v12549_v35 = vmul.f32 %v11156_v46, %v7356_v33 }
0x432d   :  { %v7366_v4 = vrot.slane %v12549_v35, %v12052_v8  ;;  %v7720_v51 = vpack.c.bf16 %v12549_v35, %v12549_v35 }
0x432f   :  { %v7367_v7 = vcombine.high %v7366_v4, %v7366_v4  ;;  %v7374_v45 = vrot.slane %v7366_v4, %v12052_v8 }
0x4331   :  { %v7381_v53 = vrot.slane %v7367_v7, %v12052_v8  ;;  %v7385_v58 = vrot.slane %v7374_v45, %v11355_v19 }
0x4333   :  { %7386 = vrot.lane.b32.xlu1 %v7385_v58, %s11281_s4  ;;  %v7463_v5 = vrot.slane %v7381_v53, %v11355_v19 }
0x4335   :  { %7464 = vrot.lane.b32.xlu0 %v7463_v5, %s11281_s4 }
0x43a5   :  { %v7387_v55 = vpop.permute.xlu1 %7386 }
0x43a6   :  { %10659 = vmatmul.mubr.msk.f32.vlgmr.msra.gmra.mxu0 %vm163_vm1, %v7387_v55 }
0x43a7   :  { %10662 = vmatpush3.xpose.msk.msra.mxu0 %vm163_vm1, %v11955_v59  ;;  %10663 = vmatprep.mubr.msk.f32.mxu0 %vm11246_vm0, %v11244_v0  ;;  %v7465_v57 = vpop.permute.xlu0 %7464 }
0x43a8   :  { %10671 = vmatprep.subr.mxu0 %v11244_v0 }
0x43aa   :  { %10664 = vmatmul.mubr.msk.f32.vlgmr.msra.gmra.mxu0 %vm163_vm1, %v7465_v57 }
0x43ab   :  { %10672 = vmatpush3.msra.mxu0 %v11895_v54  ;;  %10673 = vmatprep.mubr.msk.f32.mxu0 %vm11246_vm0, %v11244_v0 }
0x43ac   :  { %10684 = vmatprep.subr.bf16.mxu0 %v11244_v0 }
0x4466   :  { %v7456_v1 = vpop.f32.mrf.mxu0 }
0x4468   :  { %v10660_v9 = vpop.f32.mrf.mxu0 }
0x446a   :  { %v7534_v10 = vpop.f32.mrf.mxu0 }
0x446b   :  { %v7540_v2 = vrot.slane %v7534_v10, 7 }
0x446c   :  { %v10665_v41 = vpop.f32.mrf.mxu0 }
0x446d   :  { %v7541_v32 = vsel %vm3806_vm9, %v7540_v2, %v7456_v1 }
0x446e   :  { %v7543_v25 = vsel %vm4567_vm10, %v7541_v32, -inf }
0x446f   :  { %7544 = vmax.xlane.f32.xlu1 %v7543_v25 }
0x44f8   :  { %v7545_v43 = vpop.xlane.xlu1 %7544 }
0x44f9   :  { %v7547_v15 = vrot.slane %v7545_v43, 1  ;;  %v7550_v27 = vsub.f32 %v7456_v1, %v7545_v43 }
0x44fb   :  { %v7551_v29 = vsub.f32 %v7534_v10, %v7547_v15  ;;  %v7552_v31 = vmul.f32 1.442695, %v7550_v27 }
0x44fd   :  { %v7554_v36 = vmul.f32 1.442695, %v7551_v29 }
0x44ff   :  { %11159 = vpow2.f32 %v7554_v36 }
0x4500   :  { %11161 = vpow2.f32 %v7552_v31 }
0x450c   :  { %v11160_v37 = vpop.eup %11159 }
0x450d   :  { %v7558_v60 = vrot.slane %v11160_v37, 7  ;;  %v11162_v39 = vpop.eup %11161 }
0x450f   :  { %v7559_v42 = vsel %vm3806_vm9, %v7558_v60, %v11162_v39 }
0x4510   :  { %v7561_v46 = vsel %vm4567_vm10, %v7559_v42, 0.0 }
0x4511   :  { %7562 = vadd.xlane.f32.xlu0 %v7561_v46 }
0x4527   :  { %7722 = vrot.lane.b32.xlu0 %v7720_v51, %s11281_s4 }
0x459a   :  { %v7563_v3 = vpop.xlane.xlu0 %7562 }
0x459b   :  { %v7565_v47 = vrot.slane %v7563_v3, 1  ;;  %11163 = vrcp.f32 %v7563_v3 }
0x459d   :  { %11165 = vrcp.f32 %v7565_v47 }
0x459e   :  { %v7723_v7 = vpop.permute.xlu0 %7722 }
0x45a8   :  { %v11164_v49 = vpop.eup %11163 }
0x45a9   :  { %v7569_v63 = vmul.f32 %v11164_v49, %v11162_v39 }
0x45aa   :  { %v11166_v33 = vpop.eup %11165 }
0x45ab   :  { %v7571_v4 = vmul.f32 %v11166_v33, %v11160_v37  ;;  %10669 = vmatmul.mubr.msk.f32.vlgmr.msra.gmra.mxu1 %vm211_vm2, %v7569_v63 }
0x45ac   :  { %10677 = vmatpush3.bf16.msra.mxu1 %v12452_v56  ;;  %10680 = vmatprep.mubr.msk.bf16.mxu1 %vm11246_vm0, %v11244_v0 }
0x45ad   :  { %10674 = vmatmul.mubr.msk.f32.vlgmr.msra.gmra.mxu0 %vm211_vm2, %v7571_v4  ;;  %10678 = vmatprep.subr.bf16.mxu1 %v11244_v0 }
0x45ae   :  { %10685 = vmatpush3.bf16.msra.mxu0 %v12460_v11  ;;  %10688 = vmatprep.mubr.msk.bf16.mxu0 %vm11246_vm0, %v11244_v0 }
0x45af   :  { %10686 = vmatprep.subr.bf16.mxu0 %v11244_v0 }
0x45b0   :  { %10679 = vmatpush3.bf16.msra.mxu1 %v12467_v12 }
0x45b1   :  { %10692 = vmatprep.subr.mxu1 %v11244_v0 }
0x45b2   :  { %10687 = vmatpush3.bf16.msra.mxu0 %v12472_v6 }
0x45b3   :  { %10681 = vmatmul.mubr.msk.bf16.vlgmr.msra.gmra.mxu1 %vm163_vm1, %v7723_v7  ;;  %10703 = vmatprep.subr.mxu0 %v11244_v0 }
0x45b4   :  { %10693 = vmatpush3.msra.mxu1 %v11933_v16  ;;  %10700 = vmatprep.mubr.msk.f32.mxu1 %vm11246_vm0, %v11244_v0 }
0x45b5   :  { %10694 = vmatprep.subr.mxu1 %v11244_v0 }
0x45b6   :  { %10695 = vmatpush3.msra.mxu1 %v11935_v18 }
0x45b7   :  { %10696 = vmatprep.subr.mxu1 %v11244_v0 }
0x45b8   :  { %10697 = vmatpush3.msra.mxu1 %v11939_v22 }
0x45b9   :  { %10698 = vmatprep.subr.mxu1 %v11244_v0 }
0x45ba   :  { %10699 = vmatpush3.msra.mxu1 %v11943_v23 }
0x45bb   :  { %10701 = vmatmul.mubr.msk.f32.vlgmr.msra.gmra.mxu1 %vm163_vm1, %v12533_v61  ;;  %10714 = vmatprep.subr.mxu1 %v11244_v0 }
0x45bc   :  { %10715 = vmatpush3.msra.mxu1 %v12008_v13  ;;  %10722 = vmatprep.mubr.msk.f32.mxu1 %vm11246_vm0, %v11244_v0 }
0x45bd   :  { %10716 = vmatprep.subr.mxu1 %v11244_v0 }
0x45be   :  { %10717 = vmatpush3.msra.mxu1 %v12010_v14 }
0x45bf   :  { %10718 = vmatprep.subr.mxu1 %v11244_v0 }
0x45c0   :  { %10719 = vmatpush3.msra.mxu1 %v12013_v21 }
0x45c1   :  { %10720 = vmatprep.subr.mxu1 %v11244_v0 }
0x45c2   :  { %10721 = vmatpush3.msra.mxu1 %v12018_v26 }
0x45c3   :  { %10735 = vmatprep.subr.mxu1 %v11244_v0 }
0x466b   :  { %v7641_v61 = vpop.f32.mrf.mxu1 }
0x466c   :  { %v7718_v58 = vpack.c.bf16 %v7641_v61, %v7641_v61  ;;  %v7902_v61 = vrot.slane %v12522_v50, 6 }
0x466d   :  { %v10670_v45 = vpop.f32.mrf.mxu1  ;;  %v7714_v53 = vpop.f32.mrf.mxu0 }
0x466e   :  { %v7719_v5 = vpack.c.bf16 %v7714_v53, %v7714_v53  ;;  %v7769_v1 = vunpack.c.l.b16 %v7718_v58 }
0x466f   :  { %v10675_v55 = vpop.f32.mrf.mxu0 }
0x4670   :  { %v7770_v57 = vunpack.c.l.b16 %v7719_v5 }
0x4672   :  { %v7771_v9 = vrot.slane %v7770_v57, 7 }
0x4673   :  { %v7761_v10 = vpop.f32.mrf.mxu1 }
0x4674   :  { %v7772_v2 = vsel %vm3806_vm9, %v7771_v9, %v7769_v1 }
0x4675   :  { %v7773_v41 = vpack.c.b16 %v7772_v2, %v7772_v2  ;;  %v10682_v32 = vpop.f32.mrf.mxu1 }
0x4677   :  { %v7764_v25 = vpop.f32.mrf.mxu1  ;;  %10689 = vmatmul.mubr.msk.bf16.vlgmr.msra.gmra.mxu0 %vm163_vm1, %v7773_v41 }
0x4678   :  { %10704 = vmatpush3.msra.mxu0 %v11961_v34  ;;  %10711 = vmatprep.mubr.msk.f32.mxu0 %vm11246_vm0, %v11244_v0 }
0x4679   :  { %v10683_v43 = vpop.f32.mrf.mxu1  ;;  %10705 = vmatprep.subr.mxu0 %v11244_v0 }
0x467a   :  { %10706 = vmatpush3.msra.mxu0 %v11963_v62 }
0x467b   :  { %v7886_v15 = vpop.f32.mrf.mxu1  ;;  %10707 = vmatprep.subr.mxu0 %v11244_v0 }
0x467c   :  { %v7891_v27 = vrot.slane %v7886_v15, 6  ;;  %10708 = vmatpush3.msra.mxu0 %v11967_v38 }
0x467d   :  { %v10702_v29 = vpop.f32.mrf.mxu1  ;;  %10709 = vmatprep.subr.mxu0 %v11244_v0 }
0x467e   :  { %v7893_v31 = vadd.f32 %v7891_v27, %v11989_v48  ;;  %10710 = vmatpush3.msra.mxu0 %v11971_v40 }
0x467f   :  { %10725 = vmatprep.subr.mxu0 %v11244_v0 }
0x4680   :  { %11167 = vtanh.f32 %v7893_v31  ;;  %v9683_v37 = vmul.f32 -1.442695, %v7893_v31 }
0x4682   :  { %11169 = vpow2.f32 %v9683_v37 }
0x468d   :  { %v11168_v36 = vpop.eup %11167 }
0x468e   :  { %7906 = vrot.lane.b32.xlu1 %v11168_v36, %s11251_s19 }
0x468f   :  { %v11170_v60 = vpop.eup %11169 }
0x4690   :  { %v7897_v39 = vadd.f32 1.0, %v11170_v60 }
0x4692   :  { %11171 = vrcp.f32 %v7897_v39 }
0x469f   :  { %v11172_v42 = vpop.eup %11171 }
0x46a0   :  { %v7904_v45 = vmul.f32 %v11172_v42, %v7902_v61 }
0x4700   :  { %v7907_v46 = vpop.permute.xlu1 %7906 }
0x4701   :  { %v7909_v51 = vmul.f32 %v11172_v42, %v7907_v46 }
0x4703   :  { %7911 = vrot.lane.b32.xlu1 %v7909_v51, %s11281_s4 }
0x4707   :  { %7921 = vrot.lane.b32.xlu1 %v12549_v35, %s11281_s4 }
0x4737   :  { %v7811_v3 = vpop.f32.mrf.mxu0 }
0x4738   :  { %v7812_v47 = vadd.f32 %v7811_v3, %v7761_v10 }
0x4739   :  { %v10690_v49 = vpop.f32.mrf.mxu0 }
0x473a   :  { %v7817_v63 = vadd.f32 %v12517_v30, %v7812_v47 }
0x473b   :  { %v7814_v33 = vpop.f32.mrf.mxu0 }
0x473c   :  { %11173 = vtanh.f32 %v7817_v63 }
0x473d   :  { %v10691_v4 = vpop.f32.mrf.mxu0 }
0x4749   :  { %v11174_v7 = vpop.eup %11173 }
0x474a   :  { %7819 = vst.msk [vmem:[#allocation2 + $0x8] sm:$0x3] %vm4874_vm11, %v11174_v7 }
0x4775   :  { %v7912_v53 = vpop.permute.xlu1 %7911 }
0x4776   :  { %v12634_v58 = vadd.f32 %v7912_v53, %v7904_v45 }
0x4778   :  { %11175 = vtanh.f32 %v12634_v58 }
0x4779   :  { %v7922_v35 = vpop.permute.xlu1 %7921 }
0x477a   :  { %10712 = vmatmul.mubr.msk.f32.vlgmr.msra.gmra.mxu0 %vm163_vm1, %v7922_v35 }
0x477b   :  { %10726 = vmatpush3.xpose.msk.msra.mxu0 %vm163_vm1, %v11953_v24  ;;  %10727 = vmatprep.mubr.msk.f32.mxu0 %vm11246_vm0, %v11244_v0 }
0x477c   :  { %10730 = vmatprep.subr.mxu0 %v11244_v0 }
0x4785   :  { %v11176_v5 = vpop.eup %11175 }
0x4786   :  { %7917 = vrot.lane.b32.xlu0 %v11176_v5, %s11251_s19 }
0x47f8   :  { %v7918_v50 = vpop.permute.xlu0 %7917 }
0x47f9   :  { %v7920_v55 = vmul.f32 %v11172_v42, %v7918_v50 }
0x47fb   :  { %v7996_v57 = vrot.slane %v7920_v55, 2 }
0x47fd   :  { %7997 = vrot.lane.b32.xlu0 %v7996_v57, %s11281_s4 }
0x483a   :  { %v7991_v1 = vpop.f32.mrf.mxu0 }
0x483c   :  { %v10713_v9 = vpop.f32.mrf.mxu0 }
0x486f   :  { %v12645_v10 = vpop.permute.xlu0 %7997 }
0x4870   :  { %10723 = vmatmul.mubr.msk.f32.vlgmr.msra.gmra.mxu1 %vm163_vm1, %v12645_v10 }
0x4871   :  { %10736 = vmatpush3.msra.mxu1 %v11893_v52  ;;  %10737 = vmatprep.mubr.msk.f32.mxu1 %vm11246_vm0, %v11244_v0 }
0x4872   :  { %10745 = vmatprep.subr.bf16.mxu1 %v11244_v0 }
0x4930   :  { %v8067_v2 = vpop.f32.mrf.mxu1 }
0x4931   :  { %v8068_v41 = vadd.f32 %v8067_v2, %v7991_v1 }
0x4932   :  { %v10724_v32 = vpop.f32.mrf.mxu1 }
0x4933   :  { %v8071_v25 = vadd.f32 %v12412_v44, %v8068_v41 }
0x4935   :  { %11177 = vtanh.f32 %v8071_v25  ;;  %v9686_v15 = vmul.f32 -1.442695, %v8071_v25 }
0x4937   :  { %11179 = vpow2.f32 %v9686_v15 }
0x4942   :  { %v11178_v43 = vpop.eup %11177 }
0x4943   :  { %8081 = vrot.lane.b32.xlu1 %v11178_v43, %s11251_s19 }
0x4944   :  { %v11180_v27 = vpop.eup %11179 }
0x4945   :  { %v8075_v29 = vadd.f32 1.0, %v11180_v27 }
0x4947   :  { %11181 = vrcp.f32 %v8075_v29 }
0x4954   :  { %v11182_v31 = vpop.eup %11181 }
0x4955   :  { %v8079_v60 = vmul.f32 %v11182_v31, %v12545_v28 }
0x49b5   :  { %v8082_v36 = vpop.permute.xlu1 %8081 }
0x49b6   :  { %v8084_v37 = vmul.f32 %v11182_v31, %v8082_v36 }
0x49b8   :  { %8086 = vrot.lane.b32.xlu0 %v8084_v37, %s11281_s4 }
0x4a2a   :  { %v8087_v39 = vpop.permute.xlu0 %8086 }
0x4a2b   :  { %v12657_v42 = vadd.f32 %v8087_v39, %v8079_v60 }
0x4a2d   :  { %11183 = vtanh.f32 %v12657_v42 }
0x4a3a   :  { %v11184_v44 = vpop.eup %11183 }
0x4a3b   :  { %8092 = vrot.lane.b32.xlu1 %v11184_v44, %s11251_s19 }
0x4aad   :  { %v8093_v46 = vpop.permute.xlu1 %8092 }
0x4aae   :  { %v12661_v51 = vmul.f32 %v11182_v31, %v8093_v46 }
0x4ab0   :  { %v8103_v3 = vrot.slane %v12661_v51, %v12052_v8  ;;  %v8457_v57 = vpack.c.bf16 %v12661_v51, %v12661_v51 }
0x4ab2   :  { %v8104_v47 = vcombine.high %v8103_v3, %v8103_v3  ;;  %v8111_v49 = vrot.slane %v8103_v3, %v12052_v8 }
0x4ab4   :  { %v8118_v63 = vrot.slane %v8104_v47, %v12052_v8  ;;  %v8122_v28 = vrot.slane %v8111_v49, %v11355_v19 }
0x4ab6   :  { %8123 = vrot.lane.b32.xlu0 %v8122_v28, %s11281_s4  ;;  %v8200_v33 = vrot.slane %v8118_v63, %v11355_v19 }
0x4ab8   :  { %8201 = vrot.lane.b32.xlu1 %v8200_v33, %s11281_s4 }
0x4b28   :  { %v8124_v4 = vpop.permute.xlu0 %8123 }
0x4b29   :  { %10728 = vmatmul.mubr.msk.f32.vlgmr.msra.gmra.mxu0 %vm163_vm1, %v8124_v4 }
0x4b2a   :  { %10731 = vmatpush3.xpose.msk.msra.mxu0 %vm163_vm1, %v11955_v59  ;;  %10732 = vmatprep.mubr.msk.f32.mxu0 %vm11246_vm0, %v11244_v0  ;;  %v8202_v7 = vpop.permute.xlu1 %8201 }
0x4b2b   :  { %10740 = vmatprep.subr.mxu0 %v11244_v0 }
0x4b2d   :  { %10733 = vmatmul.mubr.msk.f32.vlgmr.msra.gmra.mxu0 %vm163_vm1, %v8202_v7 }
0x4b2e   :  { %10741 = vmatpush3.msra.mxu0 %v11895_v54  ;;  %10742 = vmatprep.mubr.msk.f32.mxu0 %vm11246_vm0, %v11244_v0 }
0x4b2f   :  { %10753 = vmatprep.subr.bf16.mxu0 %v11244_v0 }
0x4be9   :  { %v8193_v61 = vpop.f32.mrf.mxu0 }
0x4beb   :  { %v10729_v45 = vpop.f32.mrf.mxu0 }
0x4bed   :  { %v8271_v53 = vpop.f32.mrf.mxu0 }
0x4bee   :  { %v8277_v35 = vrot.slane %v8271_v53, 7 }
0x4bef   :  { %v10734_v5 = vpop.f32.mrf.mxu0 }
0x4bf0   :  { %v8278_v50 = vsel %vm3806_vm9, %v8277_v35, %v8193_v61 }
0x4bf1   :  { %v8280_v55 = vsel %vm4567_vm10, %v8278_v50, -inf }
0x4bf2   :  { %8281 = vmax.xlane.f32.xlu0 %v8280_v55 }
0x4c08   :  { %8459 = vrot.lane.b32.xlu0 %v8457_v57, %s11281_s4 }
0x4c7b   :  { %v8282_v1 = vpop.xlane.xlu0 %8281 }
0x4c7c   :  { %v8284_v9 = vrot.slane %v8282_v1, 1  ;;  %v8287_v2 = vsub.f32 %v8193_v61, %v8282_v1  ;;  %v8639_v1 = vrot.slane %v12634_v58, 6 }
0x4c7e   :  { %v8288_v41 = vsub.f32 %v8271_v53, %v8284_v9  ;;  %v8289_v32 = vmul.f32 1.442695, %v8287_v2 }
0x4c7f   :  { %v8460_v3 = vpop.permute.xlu0 %8459 }
0x4c80   :  { %v8291_v25 = vmul.f32 1.442695, %v8288_v41 }
0x4c82   :  { %11185 = vpow2.f32 %v8291_v25 }
0x4c83   :  { %11187 = vpow2.f32 %v8289_v32 }
0x4c8f   :  { %v11186_v43 = vpop.eup %11185 }
0x4c90   :  { %v8295_v15 = vrot.slane %v11186_v43, 7  ;;  %v11188_v27 = vpop.eup %11187 }
0x4c92   :  { %v8296_v29 = vsel %vm3806_vm9, %v8295_v15, %v11188_v27 }
0x4c93   :  { %v8298_v31 = vsel %vm4567_vm10, %v8296_v29, 0.0 }
0x4c94   :  { %8299 = vadd.xlane.f32.xlu1 %v8298_v31 }
0x4d1d   :  { %v8300_v36 = vpop.xlane.xlu1 %8299 }
0x4d1e   :  { %v8302_v37 = vrot.slane %v8300_v36, 1  ;;  %11189 = vrcp.f32 %v8300_v36 }
0x4d20   :  { %11191 = vrcp.f32 %v8302_v37  ;;  %v11239_v37 = vld [vmem:[%s12038_s18] ss:$0 sm:$0xff] }
0x4d2b   :  { %v11190_v60 = vpop.eup %11189 }
0x4d2c   :  { %v8306_v39 = vmul.f32 %v11190_v60, %v11188_v27 }
0x4d2d   :  { %v11192_v44 = vpop.eup %11191 }
0x4d2e   :  { %v8308_v46 = vmul.f32 %v11192_v44, %v11186_v43  ;;  %10738 = vmatmul.mubr.msk.f32.vlgmr.msra.gmra.mxu1 %vm211_vm2, %v8306_v39 }
0x4d2f   :  { %10746 = vmatpush3.bf16.msra.mxu1 %v12452_v56  ;;  %10749 = vmatprep.mubr.msk.bf16.mxu1 %vm11246_vm0, %v11244_v0 }
0x4d30   :  { %10743 = vmatmul.mubr.msk.f32.vlgmr.msra.gmra.mxu0 %vm211_vm2, %v8308_v46  ;;  %10747 = vmatprep.subr.bf16.mxu1 %v11244_v0 }
0x4d31   :  { %10754 = vmatpush3.bf16.msra.mxu0 %v12460_v11  ;;  %10757 = vmatprep.mubr.msk.bf16.mxu0 %vm11246_vm0, %v11244_v0 }
0x4d32   :  { %10755 = vmatprep.subr.bf16.mxu0 %v11244_v0 }
0x4d33   :  { %10748 = vmatpush3.bf16.msra.mxu1 %v12467_v12 }
0x4d34   :  { %10761 = vmatprep.subr.mxu1 %v11244_v0 }
0x4d35   :  { %10756 = vmatpush3.bf16.msra.mxu0 %v12472_v6 }
0x4d36   :  { %10750 = vmatmul.mubr.msk.bf16.vlgmr.msra.gmra.mxu1 %vm163_vm1, %v8460_v3  ;;  %10772 = vmatprep.subr.mxu0 %v11244_v0 }
0x4d37   :  { %10762 = vmatpush3.msra.mxu1 %v11933_v16  ;;  %10769 = vmatprep.mubr.msk.f32.mxu1 %vm11246_vm0, %v11244_v0 }
0x4d38   :  { %10763 = vmatprep.subr.mxu1 %v11244_v0 }
0x4d39   :  { %10764 = vmatpush3.msra.mxu1 %v11935_v18 }
0x4d3a   :  { %10765 = vmatprep.subr.mxu1 %v11244_v0 }
0x4d3b   :  { %10766 = vmatpush3.msra.mxu1 %v11939_v22 }
0x4d3c   :  { %10767 = vmatprep.subr.mxu1 %v11244_v0 }
0x4d3d   :  { %10768 = vmatpush3.msra.mxu1 %v11943_v23 }
0x4d3e   :  { %10770 = vmatmul.mubr.msk.f32.vlgmr.msra.gmra.mxu1 %vm163_vm1, %v12645_v10  ;;  %10783 = vmatprep.subr.mxu1 %v11244_v0 }
0x4d3f   :  { %10784 = vmatpush3.msra.mxu1 %v12008_v13  ;;  %10791 = vmatprep.mubr.msk.f32.mxu1 %vm11246_vm0, %v11244_v0 }
0x4d40   :  { %10785 = vmatprep.subr.mxu1 %v11244_v0 }
0x4d41   :  { %10786 = vmatpush3.msra.mxu1 %v12010_v14 }
0x4d42   :  { %10787 = vmatprep.subr.mxu1 %v11244_v0 }
0x4d43   :  { %10788 = vmatpush3.msra.mxu1 %v12013_v21 }
0x4d44   :  { %10789 = vmatprep.subr.mxu1 %v11244_v0 }
0x4d45   :  { %10790 = vmatpush3.msra.mxu1 %v12018_v26 }
0x4d46   :  { %10804 = vmatprep.subr.mxu1 %v11244_v0 }
0x4dee   :  { %v8378_v16 = vpop.f32.mrf.mxu1 }
0x4def   :  { %v8455_v23 = vpack.c.bf16 %v8378_v16, %v8378_v16 }
0x4df0   :  { %v10739_v18 = vpop.f32.mrf.mxu1  ;;  %v8451_v22 = vpop.f32.mrf.mxu0 }
0x4df1   :  { %v8456_v13 = vpack.c.bf16 %v8451_v22, %v8451_v22  ;;  %v8506_v12 = vunpack.c.l.b16 %v8455_v23 }
0x4df2   :  { %v10744_v56 = vpop.f32.mrf.mxu0 }
0x4df3   :  { %v8507_v11 = vunpack.c.l.b16 %v8456_v13 }
0x4df5   :  { %v8508_v6 = vrot.slane %v8507_v11, 7 }
0x4df6   :  { %v8498_v14 = vpop.f32.mrf.mxu1 }
0x4df7   :  { %v8509_v10 = vsel %vm3806_vm9, %v8508_v6, %v8506_v12 }
0x4df8   :  { %v8510_v47 = vpack.c.b16 %v8509_v10, %v8509_v10  ;;  %v10751_v21 = vpop.f32.mrf.mxu1 }
0x4dfa   :  { %v8501_v49 = vpop.f32.mrf.mxu1  ;;  %10758 = vmatmul.mubr.msk.bf16.vlgmr.msra.gmra.mxu0 %vm163_vm1, %v8510_v47 }
0x4dfb   :  { %10773 = vmatpush3.msra.mxu0 %v11961_v34  ;;  %10780 = vmatprep.mubr.msk.f32.mxu0 %vm11246_vm0, %v11244_v0 }
0x4dfc   :  { %v10752_v26 = vpop.f32.mrf.mxu1  ;;  %10774 = vmatprep.subr.mxu0 %v11244_v0 }
0x4dfd   :  { %10775 = vmatpush3.msra.mxu0 %v11963_v62 }
0x4dfe   :  { %v8623_v63 = vpop.f32.mrf.mxu1  ;;  %10776 = vmatprep.subr.mxu0 %v11244_v0 }
0x4dff   :  { %v8628_v28 = vrot.slane %v8623_v63, 4  ;;  %10777 = vmatpush3.msra.mxu0 %v11967_v38 }
0x4e00   :  { %v10771_v33 = vpop.f32.mrf.mxu1  ;;  %10778 = vmatprep.subr.mxu0 %v11244_v0 }
0x4e01   :  { %v8630_v4 = vadd.f32 %v8628_v28, %v11989_v48  ;;  %10779 = vmatpush3.msra.mxu0 %v11971_v40 }
0x4e02   :  { %10794 = vmatprep.subr.mxu0 %v11244_v0 }
0x4e03   :  { %11193 = vtanh.f32 %v8630_v4  ;;  %v9696_v62 = vmul.f32 -1.442695, %v8630_v4 }
0x4e05   :  { %11195 = vpow2.f32 %v9696_v62 }
0x4e10   :  { %v11194_v34 = vpop.eup %11193 }
0x4e11   :  { %8643 = vrot.lane.b32.xlu1 %v11194_v34, %s11251_s19 }
0x4e12   :  { %v11196_v7 = vpop.eup %11195 }
0x4e13   :  { %v8634_v61 = vadd.f32 1.0, %v11196_v7 }
0x4e15   :  { %11197 = vrcp.f32 %v8634_v61 }
0x4e22   :  { %v11198_v45 = vpop.eup %11197 }
0x4e23   :  { %v8641_v9 = vmul.f32 %v11198_v45, %v8639_v1 }
0x4e83   :  { %v8644_v38 = vpop.permute.xlu1 %8643 }
0x4e84   :  { %v8646_v53 = vmul.f32 %v11198_v45, %v8644_v38 }
0x4e86   :  { %8648 = vrot.lane.b32.xlu0 %v8646_v53, %s11281_s4 }
0x4e8a   :  { %8658 = vrot.lane.b32.xlu0 %v12661_v51, %s11281_s4 }
0x4eba   :  { %v8548_v40 = vpop.f32.mrf.mxu0 }
0x4ebb   :  { %v8549_v48 = vadd.f32 %v8548_v40, %v8498_v14 }
0x4ebc   :  { %v10759_v35 = vpop.f32.mrf.mxu0 }
0x4ebd   :  { %v8554_v5 = vadd.f32 %v12517_v30, %v8549_v48 }
0x4ebe   :  { %v8551_v50 = vpop.f32.mrf.mxu0 }
0x4ebf   :  { %11199 = vtanh.f32 %v8554_v5 }
0x4ec0   :  { %v10760_v55 = vpop.f32.mrf.mxu0 }
0x4ecc   :  { %v11200_v57 = vpop.eup %11199 }
0x4ecd   :  { %8556 = vst.msk [vmem:[#allocation2 + $0xa] sm:$0x3] %vm4874_vm11, %v11200_v57 }
0x4ef8   :  { %v8649_v2 = vpop.permute.xlu0 %8648 }
0x4ef9   :  { %v8651_v41 = vadd.f32 %v8649_v2, %v8641_v9 }
0x4efb   :  { %11201 = vtanh.f32 %v8651_v41 }
0x4efc   :  { %v8659_v32 = vpop.permute.xlu0 %8658 }
0x4efd   :  { %10781 = vmatmul.mubr.msk.f32.vlgmr.msra.gmra.mxu0 %vm163_vm1, %v8659_v32  ;;  %v11240_v32 = vld [vmem:[%s12081_s8 + $0x8] sm:$0xff]  }
0x4efe   :  { %10795 = vmatpush3.xpose.msk.msra.mxu0 %vm163_vm1, %v11953_v24  ;;  %10796 = vmatprep.mubr.msk.f32.mxu0 %vm11246_vm0, %v11244_v0 }
0x4eff   :  { %10799 = vmatprep.subr.mxu0 %v11244_v0 }
0x4f08   :  { %v11202_v51 = vpop.eup %11201 }
0x4f09   :  { %8654 = vrot.lane.b32.xlu1 %v11202_v51, %s11251_s19  ;;  %v11241_v51 = vld [vmem:[%s12128_s22 + $0x8] sm:$0xff]  }
0x4f7b   :  { %v8655_v58 = vpop.permute.xlu1 %8654 }
0x4f7c   :  { %v8657_v25 = vmul.f32 %v11198_v45, %v8655_v58  ;;  %v11242_v58 = vld [vmem:[%s12081_s8] sm:$0xff]  }
0x4f7e   :  { %v8733_v43 = vrot.slane %v8657_v25, 4 }
0x4f80   :  { %8734 = vrot.lane.b32.xlu1 %v8733_v43, %s11281_s4  ;;  %v11243_v43 = vld [vmem:[%s12128_s22] sm:$0xff]  }
0x4fbd   :  { %v8728_v15 = vpop.f32.mrf.mxu0 }
0x4fbf   :  { %v10782_v27 = vpop.f32.mrf.mxu0 }
0x4ff2   :  { %v8735_v29 = vpop.permute.xlu1 %8734 }
0x4ff3   :  { %10792 = vmatmul.mubr.msk.f32.vlgmr.msra.gmra.mxu1 %vm163_vm1, %v8735_v29 }
0x4ff4   :  { %10805 = vmatpush3.msra.mxu1 %v11893_v52  ;;  %10806 = vmatprep.mubr.msk.f32.mxu1 %vm11246_vm0, %v11244_v0 }
0x4ff5   :  { %10814 = vmatprep.subr.bf16.mxu1 %v11244_v0 }
0x50b3   :  { %v8804_v24 = vpop.f32.mrf.mxu1 }
0x50b4   :  { %v8805_v31 = vadd.f32 %v8804_v24, %v8728_v15 }
0x50b5   :  { %v10793_v36 = vpop.f32.mrf.mxu1 }
0x50b6   :  { %v8808_v60 = vadd.f32 %v11239_v37, %v8805_v31 }
0x50b8   :  { %11203 = vtanh.f32 %v8808_v60  ;;  %v9699_v44 = vmul.f32 -1.442695, %v8808_v60 }
0x50ba   :  { %11205 = vpow2.f32 %v9699_v44 }
0x50c5   :  { %v11204_v39 = vpop.eup %11203 }
0x50c6   :  { %8818 = vrot.lane.b32.xlu0 %v11204_v39, %s11251_s19 }
0x50c7   :  { %v11206_v46 = vpop.eup %11205 }
0x50c8   :  { %v8812_v3 = vadd.f32 1.0, %v11206_v46 }
0x50ca   :  { %11207 = vrcp.f32 %v8812_v3 }
0x50d7   :  { %v11208_v52 = vpop.eup %11207 }
0x50d8   :  { %v8816_v22 = vmul.f32 %v11208_v52, %v12657_v42 }
0x5138   :  { %v8819_v16 = vpop.permute.xlu0 %8818 }
0x5139   :  { %v8821_v18 = vmul.f32 %v11208_v52, %v8819_v16 }
0x513b   :  { %8823 = vrot.lane.b32.xlu1 %v8821_v18, %s11281_s4 }
0x51ad   :  { %v8824_v23 = vpop.permute.xlu1 %8823 }
0x51ae   :  { %v8826_v13 = vadd.f32 %v8824_v23, %v8816_v22 }
0x51b0   :  { %11209 = vtanh.f32 %v8826_v13 }
0x51bd   :  { %v11210_v56 = vpop.eup %11209 }
0x51be   :  { %8829 = vrot.lane.b32.xlu0 %v11210_v56, %s11251_s19  ;;  %s11289_s19 = smov 30  }
0x51bf   :  { %s9451_s28 = sld [smem:[%s12822_s0 + %s11289_s19]]  }
0x51c5   :  { %v10951_v18 = vld [vmem:[%s9451_s28 + $0x14] ss:$8 sps:$4 sm:$0xff]   ;;  %v10954_v22 = vld [vmem:[%s9451_s28 + $0x4] ss:$8 sps:$4 sm:$0xff]   ;;  %v10952_v23 = vld [vmem:[%s9451_s28] ss:$8 sps:$4 sm:$0xff]  }
0x5230   :  { %v8830_v11 = vpop.permute.xlu0 %8829 }
0x5231   :  { %v8832_v12 = vmul.f32 %v11208_v52, %v8830_v11 }
0x5233   :  { %v8840_v6 = vrot.slane %v8832_v12, %v12052_v8  ;;  %v9194_v50 = vpack.c.bf16 %v8832_v12, %v8832_v12 }
0x5235   :  { %v8841_v14 = vcombine.high %v8840_v6, %v8840_v6  ;;  %v8848_v10 = vrot.slane %v8840_v6, %v12052_v8 }
0x5237   :  { %v8855_v47 = vrot.slane %v8841_v14, %v12052_v8  ;;  %v8859_v21 = vrot.slane %v8848_v10, %v11355_v19 }
0x5239   :  { %8860 = vrot.lane.b32.xlu1 %v8859_v21, %s11281_s4  ;;  %v8937_v42 = vrot.slane %v8855_v47, %v11355_v19  ;;  %v9294_v47 = vld [vmem:[#allocation2] sm:$0xff] }
0x523b   :  { %8938 = vrot.lane.b32.xlu0 %v8937_v42, %s11281_s4 }
0x52ab   :  { %v8861_v49 = vpop.permute.xlu1 %8860 }
0x52ac   :  { %10797 = vmatmul.mubr.msk.f32.vlgmr.msra.gmra.mxu0 %vm163_vm1, %v8861_v49  ;;  %v9301_v49 = vld [vmem:[%s9452_s16] sm:$0x3] }
0x52ad   :  { %10800 = vmatpush3.xpose.msk.msra.mxu0 %vm163_vm1, %v11955_v59  ;;  %10801 = vmatprep.mubr.msk.f32.mxu0 %vm11246_vm0, %v11244_v0  ;;  %v8939_v8 = vpop.permute.xlu0 %8938 }
0x52ae   :  { %10809 = vmatprep.subr.mxu0 %v11244_v0 }
0x52b0   :  { %10802 = vmatmul.mubr.msk.f32.vlgmr.msra.gmra.mxu0 %vm163_vm1, %v8939_v8 }
0x52b1   :  { %10810 = vmatpush3.msra.mxu0 %v11895_v54  ;;  %10811 = vmatprep.mubr.msk.f32.mxu0 %vm11246_vm0, %v11244_v0 }
0x52b2   :  { %10822 = vmatprep.subr.bf16.mxu0 %v11244_v0 }
0x536c   :  { %v8930_v26 = vpop.f32.mrf.mxu0 }
0x536e   :  { %v10798_v63 = vpop.f32.mrf.mxu0 }
0x536f   :  { %v9306_v63 = vrot.slane %v9301_v49, %v11355_v19 }
0x5370   :  { %v9008_v28 = vpop.f32.mrf.mxu0 }
0x5371   :  { %v9014_v33 = vrot.slane %v9008_v28, 7 }
0x5372   :  { %v10803_v59 = vpop.f32.mrf.mxu0 }
0x5373   :  { %v9015_v4 = vsel %vm3806_vm9, %v9014_v33, %v8930_v26 }
0x5374   :  { %v9017_v34 = vsel %vm4567_vm10, %v9015_v4, -inf }
0x5375   :  { %9018 = vmax.xlane.f32.xlu1 %v9017_v34 }
0x53fe   :  { %v9019_v62 = vpop.xlane.xlu1 %9018 }
0x53ff   :  { %v9021_v7 = vrot.slane %v9019_v62, 1  ;;  %v9024_v61 = vsub.f32 %v8930_v26, %v9019_v62 }
0x5401   :  { %v9025_v45 = vsub.f32 %v9008_v28, %v9021_v7  ;;  %v9026_v54 = vmul.f32 1.442695, %v9024_v61 }
0x5403   :  { %v9028_v38 = vmul.f32 1.442695, %v9025_v45 }
0x5405   :  { %11211 = vpow2.f32 %v9028_v38 }
0x5406   :  { %11213 = vpow2.f32 %v9026_v54 }
0x5412   :  { %v11212_v53 = vpop.eup %11211 }
0x5413   :  { %v9032_v40 = vrot.slane %v11212_v53, 7  ;;  %v11214_v48 = vpop.eup %11213 }
0x5415   :  { %v9033_v35 = vsel %vm3806_vm9, %v9032_v40, %v11214_v48 }
0x5416   :  { %v9035_v5 = vsel %vm4567_vm10, %v9033_v35, 0.0 }
0x5417   :  { %9036 = vadd.xlane.f32.xlu0 %v9035_v5 }
0x542d   :  { %9196 = vrot.lane.b32.xlu0 %v9194_v50, %s11281_s4 }
0x54a0   :  { %v9037_v55 = vpop.xlane.xlu0 %9036 }
0x54a1   :  { %v9039_v57 = vrot.slane %v9037_v55, 1  ;;  %11215 = vrcp.f32 %v9037_v55 }
0x54a3   :  { %11217 = vrcp.f32 %v9039_v57 }
0x54a4   :  { %v9197_v25 = vpop.permute.xlu0 %9196 }
0x54ae   :  { %v11216_v1 = vpop.eup %11215 }
0x54af   :  { %v9043_v9 = vmul.f32 %v11216_v1, %v11214_v48 }
0x54b0   :  { %v11218_v2 = vpop.eup %11217 }
0x54b1   :  { %v9045_v41 = vmul.f32 %v11218_v2, %v11212_v53  ;;  %10807 = vmatmul.mubr.msk.f32.vlgmr.msra.gmra.mxu1 %vm211_vm2, %v9043_v9 }
0x54b2   :  { %10815 = vmatpush3.bf16.msra.mxu1 %v11240_v32  ;;  %10818 = vmatprep.mubr.msk.bf16.mxu1 %vm11246_vm0, %v11244_v0 }
0x54b3   :  { %10812 = vmatmul.mubr.msk.f32.vlgmr.msra.gmra.mxu0 %vm211_vm2, %v9045_v41  ;;  %10816 = vmatprep.subr.bf16.mxu1 %v11244_v0 }
0x54b4   :  { %10823 = vmatpush3.bf16.msra.mxu0 %v11241_v51  ;;  %10826 = vmatprep.mubr.msk.bf16.mxu0 %vm11246_vm0, %v11244_v0 }
0x54b5   :  { %10824 = vmatprep.subr.bf16.mxu0 %v11244_v0 }
0x54b6   :  { %10817 = vmatpush3.bf16.msra.mxu1 %v11242_v58 }
0x54b7   :  { %9348 = vmatprep.subr.bf16.mxu1 %v10951_v18 }
0x54b8   :  { %10825 = vmatpush3.bf16.msra.mxu0 %v11243_v43 }
0x54b9   :  { %10819 = vmatmul.mubr.msk.bf16.vlgmr.msra.gmra.mxu1 %vm163_vm1, %v9197_v25 }
0x54ba   :  { %9368 = vmatprep.mubr.bf16.mxu1 %v11250_v20  ;;  %v10949_v20 = vld [vmem:[%s9451_s28 + $0x10] ss:$8 sps:$4 sm:$0xff]  }
0x54bb   :  { %9349 = vmatpush1.bf16.msra.mxu1 %v10949_v20 }
0x54bc   :  { %9350 = vmatprep.subr.bf16.mxu1 %v10954_v22 }
0x54bf   :  { %9351 = vmatpush1.bf16.msra.mxu1 %v10952_v23 }
0x5571   :  { %v9115_v15 = vpop.f32.mrf.mxu1 }
0x5572   :  { %v9192_v24 = vpack.c.bf16 %v9115_v15, %v9115_v15 }
0x5573   :  { %v10808_v27 = vpop.f32.mrf.mxu1  ;;  %v9188_v29 = vpop.f32.mrf.mxu0 }
0x5574   :  { %v9193_v31 = vpack.c.bf16 %v9188_v29, %v9188_v29  ;;  %v9243_v60 = vunpack.c.l.b16 %v9192_v24 }
0x5575   :  { %v10813_v36 = vpop.f32.mrf.mxu0 }
0x5576   :  { %v9244_v37 = vunpack.c.l.b16 %v9193_v31 }
0x5578   :  { %v9245_v39 = vrot.slane %v9244_v37, 7 }
0x5579   :  { %v9235_v44 = vpop.f32.mrf.mxu1 }
0x557a   :  { %v9246_v0 = vsel %vm3806_vm9, %v9245_v39, %v9243_v60 }
0x557b   :  { %v9247_v46 = vpack.c.b16 %v9246_v0, %v9246_v0  ;;  %v10820_v3 = vpop.f32.mrf.mxu1 }
0x557d   :  { %v9238_v52 = vpop.f32.mrf.mxu1  ;;  %10827 = vmatmul.mubr.msk.bf16.vlgmr.msra.gmra.mxu0 %vm163_vm1, %v9247_v46 }
0x557f   :  { %v10821_v16 = vpop.f32.mrf.mxu1 }
0x563d   :  { %v9285_v13 = vpop.f32.mrf.mxu0 }
0x563e   :  { %v9286_v56 = vadd.f32 %v9285_v13, %v9235_v44 }
0x563f   :  { %v10828_v11 = vpop.f32.mrf.mxu0 }
0x5640   :  { %v9291_v12 = vadd.f32 %v12517_v30, %v9286_v56  ;;  %v9309_v30 = vsub.s32 1, %v11352_v17 }
0x5641   :  { %v9288_v6 = vpop.f32.mrf.mxu0 }
0x5642   :  { %11219 = vtanh.f32 %v9291_v12  ;;  %v9310_v33 = vrot.slane %v9301_v49, %v9309_v30 }
0x5643   :  { %v10829_v14 = vpop.f32.mrf.mxu0 }
0x564f   :  { %v11220_v10 = vpop.eup %11219 }
0x5650   :  { %9293 = vst.msk [vmem:[#allocation2 + $0xc] sm:$0x3] %vm4874_vm11, %v11220_v10 }
0x5657   :  { %v9295_v21 = vld [vmem:[#allocation2 + $0x8] sm:$0x3f] }
0x5658   :  { %v9300_v42 = vpack.c.bf16 %v9295_v21, %v9294_v47 }
0x565a   :  { %9712 = vmatmul.mubr.msk.bf16.vlgmr.msra.gmra.mxu1 %vm163_vm1, %v9300_v42 }
0x571a   :  { %v9370_v8 = vpop.f32.mrf.mxu1 }
0x571b   :  { %v9371_v54 = vadd.f32 %v9370_v8, %v9306_v63 }
0x571c   :  { %v9372_v26 = vpop.f32.mrf.mxu1 }
0x571d   :  { %v9373_v61 = vadd.f32 %v9372_v26, %v9310_v33 }
0x571e   :  { %v9374_v28 = vpop.f32.mrf.mxu1 }
0x571f   :  { %v9375_v59 = vadd.f32 %v9374_v28, %v9306_v63  ;;  %v9379_v38 = vmax.f32 %v9371_v54, %v9373_v61 }
0x5720   :  { %v9376_v4 = vpop.f32.mrf.mxu1 }
0x5721   :  { %v9377_v34 = vadd.f32 %v9376_v4, %v9310_v33  ;;  %v9383_v62 = vsel %vm9382_vm12, %v9375_v59, -inf }
0x5723   :  { %v9384_v7 = vsel %vm9382_vm12, %v9377_v34, -inf }
0x5724   :  { %v9385_v45 = vmax.f32 %v9383_v62, %v9384_v7 }
0x5726   :  { %9386 = vmax.xlane.f32.xlu1 %v9385_v45 }
0x572a   :  { %9380 = vmax.xlane.f32.xlu1 %v9379_v38 }
0x57af   :  { %v9387_v17 = vpop.xlane.xlu1 %9386 }
0x57b0   :  { %v9390_v53 = vsub.f32 %v9375_v59, %v9387_v17  ;;  %v9391_v40 = vsub.f32 %v9377_v34, %v9387_v17 }
0x57b2   :  { %v9396_v19 = vmul.f32 1.442695, %v9390_v53  ;;  %v9398_v48 = vmul.f32 1.442695, %v9391_v40 }
0x57b3   :  { %v9381_v35 = vpop.xlane.xlu1 %9380 }
0x57b4   :  { %v9388_v5 = vsub.f32 %v9371_v54, %v9381_v35  ;;  %v9389_v50 = vsub.f32 %v9373_v61, %v9381_v35  ;;  %11221 = vpow2.f32 %v9396_v19 }
0x57b5   :  { %11223 = vpow2.f32 %v9398_v48 }
0x57b6   :  { %v9392_v55 = vmul.f32 1.442695, %v9388_v5  ;;  %v9394_v57 = vmul.f32 1.442695, %v9389_v50 }
0x57b8   :  { %11225 = vpow2.f32 %v9392_v55 }
0x57b9   :  { %11227 = vpow2.f32 %v9394_v57 }
0x57c1   :  { %v11222_v1 = vpop.eup %11221 }
0x57c2   :  { %v11224_v9 = vpop.eup %11223  ;;  %v9403_v51 = vsel %vm9382_vm12, %v11222_v1, 0.0 }
0x57c3   :  { %v9404_v58 = vsel %vm9382_vm12, %v11224_v9, 0.0 }
0x57c4   :  { %v9405_v25 = vadd.f32 %v9404_v58, %v9403_v51 }
0x57c5   :  { %v11226_v2 = vpop.eup %11225 }
0x57c6   :  { %v11228_v41 = vpop.eup %11227 }
0x57c7   :  { %v9400_v32 = vadd.f32 %v11228_v41, %v11226_v2 }
0x57c9   :  { %9401 = vadd.xlane.f32.xlu1 %v9400_v32 }
0x57cd   :  { %9406 = vadd.xlane.f32.xlu1 %v9405_v25 }
0x5852   :  { %v9402_v43 = vpop.xlane.xlu1 %9401 }
0x5853   :  { %11229 = vrcp.f32 %v9402_v43 }
0x5856   :  { %v9407_v15 = vpop.xlane.xlu1 %9406 }
0x5857   :  { %11231 = vrcp.f32 %v9407_v15 }
0x5860   :  { %v11230_v27 = vpop.eup %11229 }
0x5861   :  { %v9409_v29 = vmul.f32 %v11230_v27, %v11226_v2  ;;  %v9410_v24 = vmul.f32 %v11230_v27, %v11228_v41 }
0x5863   :  { %9414 = vst [vmem:[%s9453_s9] sm:$0xff] %v9409_v29  ;;  %9415 = vst [vmem:[%s9453_s9 + $0x8] sm:$0xff] %v9410_v24 }
0x5864   :  { %v11232_v31 = vpop.eup %11231 }
0x5865   :  { %v9412_v36 = vmul.f32 %v11232_v31, %v11222_v1  ;;  %v9413_v37 = vmul.f32 %v11232_v31, %v11224_v9 }
0x5867   :  { %9416 = vst [vmem:[%s9453_s9 + $0x10] sm:$0x3f] %v9412_v36  ;;  %9417 = vst [vmem:[%s9453_s9 + $0x18] sm:$0x3f] %v9413_v37 }

</bundles_post_ra>
